<compile_context>
chip_gen: v5e
topology: v5e:2x2
jax: 0.10.0
libtpu: 0.0.40
codegen_flags: <defaults>
</compile_context>

<pallas_src>
import functools

import jax
import jax.numpy as jnp
from jax.experimental import pallas as pl
from jax.experimental.pallas import tpu as pltpu


# ---------------------------------------------------------------------------
# Pallas kernels
# ---------------------------------------------------------------------------

def _conv_tap_kernel(x_ref, w_ref, b_ref, o_ref, acc_ref, *, kw_size, ow,
                     apply_lrelu, alpha):
    """Stride-1 conv as a sum over kernel taps (no im2col).

    Grid: (batch, output row, kh).  Per step: one padded input row
    x_ref (1, 1, Wp, Cin) bf16, full tap weights w_ref (KH*KW, Cin, OC) bf16
    resident in VMEM, f32 accumulator acc_ref (OW, OC).  Bias + optional
    LeakyReLU are applied on the last kh step only.
    """
    kh = pl.program_id(2)

    @pl.when(kh == 0)
    def _():
        acc_ref[...] = jnp.zeros_like(acc_ref)

    acc = acc_ref[...]
    for kw in range(kw_size):
        win = x_ref[0, 0, kw:kw + ow, :]                      # (OW, Cin) bf16
        wt = w_ref[kh * kw_size + kw]                         # (Cin, OC) bf16
        acc = acc + jnp.dot(win, wt, preferred_element_type=jnp.float32)
    acc_ref[...] = acc

    @pl.when(kh == pl.num_programs(2) - 1)
    def _():
        out = acc + b_ref[...]                                # (OW, OC) f32
        if apply_lrelu:
            out = jnp.where(out > 0, out, alpha * out)
        o_ref[0, 0] = out.astype(o_ref.dtype)


def _instnorm_lrelu_kernel(x_ref, o_ref, *, eps, alpha, inv_hw):
    # x: (1, HW, tc) bf16.  f32 stats over the whole (resident) HW axis,
    # two-pass (mean, then centered sum of squares) -> matches
    # torch.nn.InstanceNorm2d(affine=False) with biased variance.
    x = x_ref[...].astype(jnp.float32)
    mean = jnp.sum(x, axis=1, keepdims=True) * inv_hw
    d = x - mean
    var = jnp.sum(d * d, axis=1, keepdims=True) * inv_hw
    y = d * jax.lax.rsqrt(var + eps)
    y = jnp.where(y > 0, y, alpha * y)
    o_ref[...] = y.astype(o_ref.dtype)


def _final_conv_pool_kernel(x_ref, w_ref, o_ref, *, oh, ow, kh_size, kw_size,
                            inv_count):
    """Fused final conv (OC=1) + global average pool for one batch element.

    x: (1, Hp, Wp, C) bf16, w: (KH*KW, C) f32, o: (B, 128) f32 (value broadcast
    across lanes; column 0 is used by the wrapper).  Channel (lane) partial sums
    are kept in `acc`; the single cross-lane reduce happens once at the end.
    """
    b = pl.program_id(0)
    c = x_ref.shape[-1]
    acc = jnp.zeros((1, c), jnp.float32)
    for kh in range(kh_size):
        for kw in range(kw_size):
            t = kh * kw_size + kw
            win = x_ref[0, kh:kh + oh, kw:kw + ow, :].astype(jnp.float32)
            s = jnp.sum(win, axis=0)                          # (OW, C)
            s = jnp.sum(s, axis=0, keepdims=True)             # (1, C)
            acc = acc + s * w_ref[t:t + 1, :]
    val = jnp.sum(acc) * inv_count
    o_ref[pl.ds(b, 1), :] = jnp.full((1, 128), val, jnp.float32)


# ---------------------------------------------------------------------------
# Layer wrappers
# ---------------------------------------------------------------------------

def _pad_hw1(x):
    return jnp.pad(x, ((0, 0), (1, 1), (1, 1), (0, 0)))


def _space_to_depth2(x):
    B, H, W, C = x.shape
    x = x.reshape(B, H // 2, 2, W // 2, 2, C)
    x = jnp.transpose(x, (0, 1, 3, 2, 4, 5))
    return x.reshape(B, H // 2, W // 2, 4 * C)


def conv2d(x, p, *, apply_lrelu, alpha=0.2):
    """Conv2d(k=4, pad=1, stride=p['stride']) + bias (+ optional LeakyReLU).

    x: (B, H, W, C) bf16 NHWC -> (B, OH, OW, OC) bf16.
    """
    if p["stride"] == 2:
        assert x.shape[1] % 2 == 0 and x.shape[2] % 2 == 0
        # TODO(synk): fold the pad + space-to-depth re-layout into the kernel's
        # input DMA (strided copy) to remove this last 1x XLA relayout pass too.
        xp = _space_to_depth2(_pad_hw1(x))
    else:
        xp = _pad_hw1(x)
    KH, KW = p["kh"], p["kw"]
    B, Hp, Wp, Cin = xp.shape
    OC = p["w_taps"].shape[-1]
    OH = Hp - KH + 1
    OW = Wp - KW + 1

    return pl.pallas_call(
        functools.partial(_conv_tap_kernel, kw_size=KW, ow=OW,
                          apply_lrelu=apply_lrelu, alpha=alpha),
        out_shape=jax.ShapeDtypeStruct((B, OH, OW, OC), jnp.bfloat16),
        grid=(B, OH, KH),
        in_specs=[
            pl.BlockSpec((1, 1, Wp, Cin), lambda b, oh, k: (b, oh + k, 0, 0)),
            # full tap-weight tensor resident in VMEM (fetched once; index const)
            pl.BlockSpec((KH * KW, Cin, OC), lambda b, oh, k: (0, 0, 0)),
            pl.BlockSpec((1, OC), lambda b, oh, k: (0, 0)),
        ],
        out_specs=pl.BlockSpec((1, 1, OW, OC), lambda b, oh, k: (b, oh, 0, 0)),
        scratch_shapes=[pltpu.VMEM((OW, OC), jnp.float32)],
        compiler_params=pltpu.CompilerParams(
            dimension_semantics=("parallel", "parallel", "arbitrary")),
    )(xp, p["w_taps"], p["b"])


def instnorm_lrelu(x, *, eps=1e-5, alpha=0.2, tc=128):
    """x: (B, HW, C) bf16 -> instance-normalized + LeakyReLU(0.2), bf16."""
    B, HW, C = x.shape
    assert C % tc == 0, (C, tc)
    # TODO(synk): for very large feature maps (HW*tc blocks past the VMEM budget,
    # e.g. 512x512 inputs on v7x) switch to a tiled-HW two-pass variant.
    return pl.pallas_call(
        functools.partial(_instnorm_lrelu_kernel, eps=eps, alpha=alpha,
                          inv_hw=1.0 / HW),
        out_shape=jax.ShapeDtypeStruct((B, HW, C), x.dtype),
        grid=(B, C // tc),
        in_specs=[pl.BlockSpec((1, HW, tc), lambda b, c: (b, 0, c))],
        out_specs=pl.BlockSpec((1, HW, tc), lambda b, c: (b, 0, c)),
        compiler_params=pltpu.CompilerParams(
            dimension_semantics=("parallel", "parallel")),
    )(x)


def final_conv_avgpool(x, p):
    """Fused final conv (OC=1, k=4, pad=1, stride=1) + global avg pool -> (B, 1)."""
    B, H, W, C = x.shape
    xp = _pad_hw1(x)
    KH, KW = p["kh"], p["kw"]
    Hp, Wp = H + 2, W + 2
    OH, OW = Hp - KH + 1, Wp - KW + 1
    pooled = pl.pallas_call(
        functools.partial(_final_conv_pool_kernel, oh=OH, ow=OW, kh_size=KH,
                          kw_size=KW, inv_count=1.0 / (OH * OW)),
        out_shape=jax.ShapeDtypeStruct((B, 128), jnp.float32),
        grid=(B,),
        in_specs=[
            pl.BlockSpec((1, Hp, Wp, C), lambda b: (b, 0, 0, 0)),
            pl.BlockSpec((KH * KW, C), lambda b: (0, 0)),
        ],
        out_specs=pl.BlockSpec((B, 128), lambda b: (0, 0)),
        compiler_params=pltpu.CompilerParams(dimension_semantics=("arbitrary",)),
    )(xp, p["w_final"])
    # avg_pool(conv(x) + b) == avg_pool(conv(x)) + b for the scalar OC=1 bias.
    return pooled[:, :1] + p["b"]


# ---------------------------------------------------------------------------
# Parameters & forward
# ---------------------------------------------------------------------------

def init_params(key, input_nc):
    cfgs = [(input_nc, 64, 2), (64, 128, 2), (128, 256, 2), (256, 512, 1), (512, 1, 1)]
    params = []
    for i, (cin, cout, s) in enumerate(cfgs):
        kw_, kb_ = jax.random.split(jax.random.fold_in(key, i))
        fan_in = cin * 4 * 4
        w = jax.random.normal(kw_, (cout, cin, 4, 4), jnp.float32) / jnp.sqrt(float(fan_in))
        b = jax.random.normal(kb_, (cout,), jnp.float32) * 0.01
        params.append((w, b, s))
    return params


def prepare_params(params):
    """One-time weight prep into tap-major layouts (bf16 for MXU layers).

    Stride-2 4x4 convs are folded (via space-to-depth of the padded input) into
    stride-1 2x2 convs over 4*C channels; the matching weight re-layout (channel
    packing order (di, dj, c)) is done here, once.
    """
    prepared = []
    for (w, b, s) in params:
        OC, C, KH, KW = w.shape
        w_r = jnp.transpose(w, (2, 3, 1, 0))                      # (KH, KW, C, OC)
        entry = dict(stride=s, b=b.astype(jnp.float32).reshape(1, OC))
        if OC == 1:
            # final layer: consumed by the fused conv + avg-pool kernel
            entry.update(kh=KH, kw=KW,
                         w_final=w_r.reshape(KH * KW, C).astype(jnp.float32))
        elif s == 2:
            # stride-2 4x4 -> stride-1 2x2 over 4C channels: kh = 2*i + di, kw = 2*j + dj
            w_t = w_r.reshape(2, 2, 2, 2, C, OC)                  # (i, di, j, dj, C, OC)
            w_t = jnp.transpose(w_t, (0, 2, 1, 3, 4, 5))          # (i, j, di, dj, C, OC)
            entry.update(kh=2, kw=2,
                         w_taps=w_t.reshape(4, 4 * C, OC).astype(jnp.bfloat16))
        else:
            entry.update(kh=KH, kw=KW,
                         w_taps=w_r.reshape(KH * KW, C, OC).astype(jnp.bfloat16))
        prepared.append(entry)
    return prepared


def discriminator_forward(x_nchw, prepared):
    x = jnp.transpose(x_nchw, (0, 2, 3, 1)).astype(jnp.bfloat16)   # NCHW -> NHWC bf16

    # Block 1: conv + LeakyReLU (fused in the conv epilogue)
    x = conv2d(x, prepared[0], apply_lrelu=True)

    # Blocks 2-4: conv -> InstanceNorm -> LeakyReLU
    for p in prepared[1:4]:
        x = conv2d(x, p, apply_lrelu=False)
        B_, OH, OW, OC = x.shape
        x = instnorm_lrelu(x.reshape(B_, OH * OW, OC)).reshape(B_, OH, OW, OC)

    # Block 5: fused final conv (OC=1) + global average pool -> (B, 1)
    return final_conv_avgpool(x, prepared[4])


# ---------------------------------------------------------------------------
# Pure-JAX reference (correctness check only)
# ---------------------------------------------------------------------------

def ref_forward(x_nchw, params):
    def conv(x, w, b, s, p):
        y = jax.lax.conv_general_dilated(
            x, w, (s, s), ((p, p), (p, p)),
            dimension_numbers=("NCHW", "OIHW", "NCHW"))
        return y + b[None, :, None, None]

    def lrelu(x):
        return jnp.where(x > 0, x, 0.2 * x)

    def inorm(x):
        m = jnp.mean(x, axis=(2, 3), keepdims=True)
        v = jnp.mean((x - m) ** 2, axis=(2, 3), keepdims=True)
        return (x - m) / jnp.sqrt(v + 1e-5)

    w, b, s = params[0]
    x = lrelu(conv(x_nchw, w, b, s, 1))
    for (w, b, s) in params[1:4]:
        x = lrelu(inorm(conv(x, w, b, s, 1)))
    w, b, s = params[4]
    x = conv(x, w, b, s, 1)
    return jnp.mean(x, axis=(2, 3)).reshape(x.shape[0], -1)


if __name__ == "__main__":
    key = jax.random.PRNGKey(0)
    kx, kp = jax.random.split(key)

    B, C_in, H, W = 2, 4, 32, 32      # 32x32 so the final 4x4 convs have valid outputs
    x = jax.random.normal(kx, (B, C_in, H, W), jnp.float32)
    params = init_params(kp, C_in)
    prepared = prepare_params(params)

    fwd = jax.jit(lambda xx: discriminator_forward(xx, prepared))
    out = jax.block_until_ready(fwd(x))

    ref = jax.block_until_ready(ref_forward(x, params))
    assert out.shape == (B, 1), out.shape
    # bf16 activations end-to-end (f32 accumulation / stats) vs the pure-f32
    # reference -> slightly relaxed tolerance.
    assert jnp.allclose(out, ref, rtol=7.5e-2, atol=7.5e-2), (out, ref)

    print("KERNEL_OK")
</pallas_src>

<mosaic_0001>
module attributes {stable_mosaic.version = 11 : i64} {
  func.func @_conv_tap_kernel(%arg0: i32, %arg1: i32, %arg2: i32, %arg3: memref<1x1x17x16xbf16, #tpu.memory_space<vmem>>, %arg4: memref<4x16x64xbf16, #tpu.memory_space<vmem>>, %arg5: memref<1x64xf32, #tpu.memory_space<vmem>>, %arg6: memref<1x1x16x64xbf16, #tpu.memory_space<vmem>>, %arg7: memref<16x64xf32, #tpu.memory_space<vmem>>) attributes {dimension_semantics = [#tpu.dimension_semantics<parallel>, #tpu.dimension_semantics<parallel>, #tpu.dimension_semantics<arbitrary>], iteration_bounds = array<i64: 2, 16, 2>, scalar_prefetch = 0 : i64, scratch_operands = 1 : i64, tpu.core_type = #tpu.core_type<tc>, window_params = [{transform_indices = @transform_0, window_bounds = array<i64: 1, 1, 17, 16>}, {pipeline_mode = #tpu.pipeline_mode<synchronous>, transform_indices = @transform_1, window_bounds = array<i64: 4, 16, 64>}, {pipeline_mode = #tpu.pipeline_mode<synchronous>, transform_indices = @transform_2, window_bounds = array<i64: 1, 64>}, {transform_indices = @transform_3, window_bounds = array<i64: 1, 1, 16, 64>}]} {
    %c0_i32 = arith.constant 0 : i32
    %0 = arith.cmpi eq, %arg2, %c0_i32 : i32
    %1 = arith.extui %0 : i1 to i32
    %c0_i32_0 = arith.constant 0 : i32
    %2 = arith.cmpi ne, %1, %c0_i32_0 : i32
    scf.if %2 {
      %cst_20 = arith.constant 0.000000e+00 : f32
      %26 = vector.broadcast %cst_20 : f32 to vector<16x64xf32>
      %c0_21 = arith.constant 0 : index
      %c0_22 = arith.constant 0 : index
      %27 = vector.load %arg7[%c0_21, %c0_22] : memref<16x64xf32, #tpu.memory_space<vmem>>, vector<16x64xf32>
      tpu.vector_store %arg7[%c0_21, %c0_22], %26 {strides = array<i32>} : memref<16x64xf32, #tpu.memory_space<vmem>>, vector<16x64xf32>,
    } else {
    }
    %c0 = arith.constant 0 : index
    %c0_1 = arith.constant 0 : index
    %3 = vector.load %arg7[%c0, %c0_1] : memref<16x64xf32, #tpu.memory_space<vmem>>, vector<16x64xf32>
    %c0_2 = arith.constant 0 : index
    %c0_3 = arith.constant 0 : index
    %c0_4 = arith.constant 0 : index
    %c0_5 = arith.constant 0 : index
    %4 = vector.load %arg3[%c0_2, %c0_3, %c0_4, %c0_5] : memref<1x1x17x16xbf16, #tpu.memory_space<vmem>>, vector<1x1x16x16xbf16>
    %5 = vector.shape_cast %4 : vector<1x1x16x16xbf16> to vector<16x16xbf16>
    %c2_i32 = arith.constant 2 : i32
    %6 = arith.muli %arg2, %c2_i32 : i32
    %c0_i32_6 = arith.constant 0 : i32
    %7 = arith.addi %6, %c0_i32_6 : i32
    %8 = arith.index_cast %7 : i32 to index
    %c0_7 = arith.constant 0 : index
    %c0_8 = arith.constant 0 : index
    %9 = vector.load %arg4[%8, %c0_7, %c0_8] : memref<4x16x64xbf16, #tpu.memory_space<vmem>>, vector<1x16x64xbf16>
    %10 = vector.shape_cast %9 : vector<1x16x64xbf16> to vector<16x64xbf16>
    %cst = arith.constant dense<0.000000e+00> : vector<16x64xf32>
    %11 = tpu.matmul %5, %10, %cst {dimension_numbers = #tpu.dot_dimension_numbers<[1], [0], [0], [1], [0, 0, 1, 1], [], []>} : vector<16x16xbf16>, vector<16x64xbf16>, vector<16x64xf32> -> vector<16x64xf32>
    %12 = arith.addf %3, %11 : vector<16x64xf32>
    %c0_9 = arith.constant 0 : index
    %c0_10 = arith.constant 0 : index
    %c1 = arith.constant 1 : index
    %c0_11 = arith.constant 0 : index
    %13 = vector.load %arg3[%c0_9, %c0_10, %c1, %c0_11] : memref<1x1x17x16xbf16, #tpu.memory_space<vmem>>, vector<1x1x16x16xbf16>
    %14 = vector.shape_cast %13 : vector<1x1x16x16xbf16> to vector<16x16xbf16>
    %c2_i32_12 = arith.constant 2 : i32
    %15 = arith.muli %arg2, %c2_i32_12 : i32
    %c1_i32 = arith.constant 1 : i32
    %16 = arith.addi %15, %c1_i32 : i32
    %17 = arith.index_cast %16 : i32 to index
    %c0_13 = arith.constant 0 : index
    %c0_14 = arith.constant 0 : index
    %18 = vector.load %arg4[%17, %c0_13, %c0_14] : memref<4x16x64xbf16, #tpu.memory_space<vmem>>, vector<1x16x64xbf16>
    %19 = vector.shape_cast %18 : vector<1x16x64xbf16> to vector<16x64xbf16>
    %cst_15 = arith.constant dense<0.000000e+00> : vector<16x64xf32>
    %20 = tpu.matmul %14, %19, %cst_15 {dimension_numbers = #tpu.dot_dimension_numbers<[1], [0], [0], [1], [0, 0, 1, 1], [], []>} : vector<16x16xbf16>, vector<16x64xbf16>, vector<16x64xf32> -> vector<16x64xf32>
    %21 = arith.addf %12, %20 : vector<16x64xf32>
    %c0_16 = arith.constant 0 : index
    %c0_17 = arith.constant 0 : index
    %22 = vector.load %arg7[%c0_16, %c0_17] : memref<16x64xf32, #tpu.memory_space<vmem>>, vector<16x64xf32>
    tpu.vector_store %arg7[%c0_16, %c0_17], %21 {strides = array<i32>} : memref<16x64xf32, #tpu.memory_space<vmem>>, vector<16x64xf32>,
    %c1_i32_18 = arith.constant 1 : i32
    %23 = arith.cmpi eq, %arg2, %c1_i32_18 : i32
    %24 = arith.extui %23 : i1 to i32
    %c0_i32_19 = arith.constant 0 : i32
    %25 = arith.cmpi ne, %24, %c0_i32_19 : i32
    scf.if %25 {
      %c0_20 = arith.constant 0 : index
      %c0_21 = arith.constant 0 : index
      %26 = vector.load %arg5[%c0_20, %c0_21] : memref<1x64xf32, #tpu.memory_space<vmem>>, vector<1x64xf32>
      %27 = vector.broadcast %26 : vector<1x64xf32> to vector<16x64xf32>
      %28 = arith.addf %21, %27 : vector<16x64xf32>
      %cst_22 = arith.constant 0.000000e+00 : f32
      %29 = vector.broadcast %cst_22 : f32 to vector<16x64xf32>
      %30 = arith.cmpf ogt, %28, %29 : vector<16x64xf32>
      %cst_23 = arith.constant 2.000000e-01 : f32
      %31 = vector.broadcast %cst_23 : f32 to vector<16x64xf32>
      %32 = arith.mulf %31, %28 : vector<16x64xf32>
      %33 = arith.select %30, %28, %32 : vector<16x64xi1>, vector<16x64xf32>
      %34 = arith.truncf %33 : vector<16x64xf32> to vector<16x64xbf16>
      %c0_24 = arith.constant 0 : index
      %c0_25 = arith.constant 0 : index
      %c0_26 = arith.constant 0 : index
      %c0_27 = arith.constant 0 : index
      %35 = vector.load %arg6[%c0_24, %c0_25, %c0_26, %c0_27] : memref<1x1x16x64xbf16, #tpu.memory_space<vmem>>, vector<1x1x16x64xbf16>
      %36 = vector.shape_cast %35 : vector<1x1x16x64xbf16> to vector<16x64xbf16>
      %37 = vector.shape_cast %34 : vector<16x64xbf16> to vector<1x1x16x64xbf16>
      tpu.vector_store %arg6[%c0_24, %c0_25, %c0_26, %c0_27], %37 {strides = array<i32>} : memref<1x1x16x64xbf16, #tpu.memory_space<vmem>>, vector<1x1x16x64xbf16>,
    } else {
    }
    return
  }
  func.func @transform_0(%arg0: i32, %arg1: i32, %arg2: i32) -> (i32, i32, i32, i32) {
    %0 = arith.addi %arg1, %arg2 : i32
    %c0_i32 = arith.constant 0 : i32
    %c0_i32_0 = arith.constant 0 : i32
    %c0_i32_1 = arith.constant 0 : i32
    return %arg0, %0, %c0_i32, %c0_i32_0 : i32, i32, i32, i32
  }
  func.func @transform_1(%arg0: i32, %arg1: i32, %arg2: i32) -> (i32, i32, i32) {
    %c0_i32 = arith.constant 0 : i32
    %c0_i32_0 = arith.constant 0 : i32
    %c0_i32_1 = arith.constant 0 : i32
    %c0_i32_2 = arith.constant 0 : i32
    return %c0_i32, %c0_i32_0, %c0_i32_1 : i32, i32, i32
  }
  func.func @transform_2(%arg0: i32, %arg1: i32, %arg2: i32) -> (i32, i32) {
    %c0_i32 = arith.constant 0 : i32
    %c0_i32_0 = arith.constant 0 : i32
    %c0_i32_1 = arith.constant 0 : i32
    return %c0_i32, %c0_i32_0 : i32, i32
  }
  func.func @transform_3(%arg0: i32, %arg1: i32, %arg2: i32) -> (i32, i32, i32, i32) {
    %c0_i32 = arith.constant 0 : i32
    %c0_i32_0 = arith.constant 0 : i32
    %c0_i32_1 = arith.constant 0 : i32
    return %arg0, %arg1, %c0_i32, %c0_i32_0 : i32, i32, i32, i32
  }
}

module attributes {stable_mosaic.version = 11 : i64} {
  func.func @_conv_tap_kernel(%arg0: i32, %arg1: i32, %arg2: i32, %arg3: memref<1x1x9x256xbf16, #tpu.memory_space<vmem>>, %arg4: memref<4x256x128xbf16, #tpu.memory_space<vmem>>, %arg5: memref<1x128xf32, #tpu.memory_space<vmem>>, %arg6: memref<1x1x8x128xbf16, #tpu.memory_space<vmem>>, %arg7: memref<8x128xf32, #tpu.memory_space<vmem>>) attributes {dimension_semantics = [#tpu.dimension_semantics<parallel>, #tpu.dimension_semantics<parallel>, #tpu.dimension_semantics<arbitrary>], iteration_bounds = array<i64: 2, 8, 2>, scalar_prefetch = 0 : i64, scratch_operands = 1 : i64, tpu.core_type = #tpu.core_type<tc>, window_params = [{transform_indices = @transform_0, window_bounds = array<i64: 1, 1, 9, 256>}, {pipeline_mode = #tpu.pipeline_mode<synchronous>, transform_indices = @transform_1, window_bounds = array<i64: 4, 256, 128>}, {pipeline_mode = #tpu.pipeline_mode<synchronous>, transform_indices = @transform_2, window_bounds = array<i64: 1, 128>}, {transform_indices = @transform_3, window_bounds = array<i64: 1, 1, 8, 128>}]} {
    %c0_i32 = arith.constant 0 : i32
    %0 = arith.cmpi eq, %arg2, %c0_i32 : i32
    %1 = arith.extui %0 : i1 to i32
    %c0_i32_0 = arith.constant 0 : i32
    %2 = arith.cmpi ne, %1, %c0_i32_0 : i32
    scf.if %2 {
      %cst_20 = arith.constant 0.000000e+00 : f32
      %26 = vector.broadcast %cst_20 : f32 to vector<8x128xf32>
      %c0_21 = arith.constant 0 : index
      %c0_22 = arith.constant 0 : index
      %27 = vector.load %arg7[%c0_21, %c0_22] : memref<8x128xf32, #tpu.memory_space<vmem>>, vector<8x128xf32>
      tpu.vector_store %arg7[%c0_21, %c0_22], %26 {strides = array<i32>} : memref<8x128xf32, #tpu.memory_space<vmem>>, vector<8x128xf32>,
    } else {
    }
    %c0 = arith.constant 0 : index
    %c0_1 = arith.constant 0 : index
    %3 = vector.load %arg7[%c0, %c0_1] : memref<8x128xf32, #tpu.memory_space<vmem>>, vector<8x128xf32>
    %c0_2 = arith.constant 0 : index
    %c0_3 = arith.constant 0 : index
    %c0_4 = arith.constant 0 : index
    %c0_5 = arith.constant 0 : index
    %4 = vector.load %arg3[%c0_2, %c0_3, %c0_4, %c0_5] : memref<1x1x9x256xbf16, #tpu.memory_space<vmem>>, vector<1x1x8x256xbf16>
    %5 = vector.shape_cast %4 : vector<1x1x8x256xbf16> to vector<8x256xbf16>
    %c2_i32 = arith.constant 2 : i32
    %6 = arith.muli %arg2, %c2_i32 : i32
    %c0_i32_6 = arith.constant 0 : i32
    %7 = arith.addi %6, %c0_i32_6 : i32
    %8 = arith.index_cast %7 : i32 to index
    %c0_7 = arith.constant 0 : index
    %c0_8 = arith.constant 0 : index
    %9 = vector.load %arg4[%8, %c0_7, %c0_8] : memref<4x256x128xbf16, #tpu.memory_space<vmem>>, vector<1x256x128xbf16>
    %10 = vector.shape_cast %9 : vector<1x256x128xbf16> to vector<256x128xbf16>
    %cst = arith.constant dense<0.000000e+00> : vector<8x128xf32>
    %11 = tpu.matmul %5, %10, %cst {dimension_numbers = #tpu.dot_dimension_numbers<[1], [0], [0], [1], [0, 0, 1, 1], [], []>} : vector<8x256xbf16>, vector<256x128xbf16>, vector<8x128xf32> -> vector<8x128xf32>
    %12 = arith.addf %3, %11 : vector<8x128xf32>
    %c0_9 = arith.constant 0 : index
    %c0_10 = arith.constant 0 : index
    %c1 = arith.constant 1 : index
    %c0_11 = arith.constant 0 : index
    %13 = vector.load %arg3[%c0_9, %c0_10, %c1, %c0_11] : memref<1x1x9x256xbf16, #tpu.memory_space<vmem>>, vector<1x1x8x256xbf16>
    %14 = vector.shape_cast %13 : vector<1x1x8x256xbf16> to vector<8x256xbf16>
    %c2_i32_12 = arith.constant 2 : i32
    %15 = arith.muli %arg2, %c2_i32_12 : i32
    %c1_i32 = arith.constant 1 : i32
    %16 = arith.addi %15, %c1_i32 : i32
    %17 = arith.index_cast %16 : i32 to index
    %c0_13 = arith.constant 0 : index
    %c0_14 = arith.constant 0 : index
    %18 = vector.load %arg4[%17, %c0_13, %c0_14] : memref<4x256x128xbf16, #tpu.memory_space<vmem>>, vector<1x256x128xbf16>
    %19 = vector.shape_cast %18 : vector<1x256x128xbf16> to vector<256x128xbf16>
    %cst_15 = arith.constant dense<0.000000e+00> : vector<8x128xf32>
    %20 = tpu.matmul %14, %19, %cst_15 {dimension_numbers = #tpu.dot_dimension_numbers<[1], [0], [0], [1], [0, 0, 1, 1], [], []>} : vector<8x256xbf16>, vector<256x128xbf16>, vector<8x128xf32> -> vector<8x128xf32>
    %21 = arith.addf %12, %20 : vector<8x128xf32>
    %c0_16 = arith.constant 0 : index
    %c0_17 = arith.constant 0 : index
    %22 = vector.load %arg7[%c0_16, %c0_17] : memref<8x128xf32, #tpu.memory_space<vmem>>, vector<8x128xf32>
    tpu.vector_store %arg7[%c0_16, %c0_17], %21 {strides = array<i32>} : memref<8x128xf32, #tpu.memory_space<vmem>>, vector<8x128xf32>,
    %c1_i32_18 = arith.constant 1 : i32
    %23 = arith.cmpi eq, %arg2, %c1_i32_18 : i32
    %24 = arith.extui %23 : i1 to i32
    %c0_i32_19 = arith.constant 0 : i32
    %25 = arith.cmpi ne, %24, %c0_i32_19 : i32
    scf.if %25 {
      %c0_20 = arith.constant 0 : index
      %c0_21 = arith.constant 0 : index
      %26 = vector.load %arg5[%c0_20, %c0_21] : memref<1x128xf32, #tpu.memory_space<vmem>>, vector<1x128xf32>
      %27 = vector.broadcast %26 : vector<1x128xf32> to vector<8x128xf32>
      %28 = arith.addf %21, %27 : vector<8x128xf32>
      %29 = arith.truncf %28 : vector<8x128xf32> to vector<8x128xbf16>
      %c0_22 = arith.constant 0 : index
      %c0_23 = arith.constant 0 : index
      %c0_24 = arith.constant 0 : index
      %c0_25 = arith.constant 0 : index
      %30 = vector.load %arg6[%c0_22, %c0_23, %c0_24, %c0_25] : memref<1x1x8x128xbf16, #tpu.memory_space<vmem>>, vector<1x1x8x128xbf16>
      %31 = vector.shape_cast %30 : vector<1x1x8x128xbf16> to vector<8x128xbf16>
      %32 = vector.shape_cast %29 : vector<8x128xbf16> to vector<1x1x8x128xbf16>
      tpu.vector_store %arg6[%c0_22, %c0_23, %c0_24, %c0_25], %32 {strides = array<i32>} : memref<1x1x8x128xbf16, #tpu.memory_space<vmem>>, vector<1x1x8x128xbf16>,
    } else {
    }
    return
  }
  func.func @transform_0(%arg0: i32, %arg1: i32, %arg2: i32) -> (i32, i32, i32, i32) {
    %0 = arith.addi %arg1, %arg2 : i32
    %c0_i32 = arith.constant 0 : i32
    %c0_i32_0 = arith.constant 0 : i32
    %c0_i32_1 = arith.constant 0 : i32
    return %arg0, %0, %c0_i32, %c0_i32_0 : i32, i32, i32, i32
  }
  func.func @transform_1(%arg0: i32, %arg1: i32, %arg2: i32) -> (i32, i32, i32) {
    %c0_i32 = arith.constant 0 : i32
    %c0_i32_0 = arith.constant 0 : i32
    %c0_i32_1 = arith.constant 0 : i32
    %c0_i32_2 = arith.constant 0 : i32
    return %c0_i32, %c0_i32_0, %c0_i32_1 : i32, i32, i32
  }
  func.func @transform_2(%arg0: i32, %arg1: i32, %arg2: i32) -> (i32, i32) {
    %c0_i32 = arith.constant 0 : i32
    %c0_i32_0 = arith.constant 0 : i32
    %c0_i32_1 = arith.constant 0 : i32
    return %c0_i32, %c0_i32_0 : i32, i32
  }
  func.func @transform_3(%arg0: i32, %arg1: i32, %arg2: i32) -> (i32, i32, i32, i32) {
    %c0_i32 = arith.constant 0 : i32
    %c0_i32_0 = arith.constant 0 : i32
    %c0_i32_1 = arith.constant 0 : i32
    return %arg0, %arg1, %c0_i32, %c0_i32_0 : i32, i32, i32, i32
  }
}

module attributes {stable_mosaic.version = 11 : i64} {
  func.func @_instnorm_lrelu_kernel(%arg0: i32, %arg1: i32, %arg2: memref<1x64x128xbf16, #tpu.memory_space<vmem>>, %arg3: memref<1x64x128xbf16, #tpu.memory_space<vmem>>) attributes {dimension_semantics = [#tpu.dimension_semantics<parallel>, #tpu.dimension_semantics<parallel>], iteration_bounds = array<i64: 2, 1>, scalar_prefetch = 0 : i64, scratch_operands = 0 : i64, tpu.core_type = #tpu.core_type<tc>, window_params = [{transform_indices = @transform_0, window_bounds = array<i64: 1, 64, 128>}, {transform_indices = @transform_1, window_bounds = array<i64: 1, 64, 128>}]} {
    %c0 = arith.constant 0 : index
    %c0_0 = arith.constant 0 : index
    %c0_1 = arith.constant 0 : index
    %0 = vector.load %arg2[%c0, %c0_0, %c0_1] : memref<1x64x128xbf16, #tpu.memory_space<vmem>>, vector<1x64x128xbf16>
    %1 = arith.extf %0 : vector<1x64x128xbf16> to vector<1x64x128xf32>
    %cst = arith.constant dense<0.000000e+00> : vector<1x128xf32>
    %2 = vector.multi_reduction <add>, %1, %cst [1] : vector<1x64x128xf32> to vector<1x128xf32>
    %3 = vector.shape_cast %2 : vector<1x128xf32> to vector<1x1x128xf32>
    %cst_2 = arith.constant 1.562500e-02 : f32
    %4 = vector.broadcast %cst_2 : f32 to vector<1x1x128xf32>
    %5 = arith.mulf %3, %4 : vector<1x1x128xf32>
    %6 = vector.broadcast %5 : vector<1x1x128xf32> to vector<1x64x128xf32>
    %7 = arith.subf %1, %6 : vector<1x64x128xf32>
    %8 = arith.mulf %7, %7 : vector<1x64x128xf32>
    %cst_3 = arith.constant dense<0.000000e+00> : vector<1x128xf32>
    %9 = vector.multi_reduction <add>, %8, %cst_3 [1] : vector<1x64x128xf32> to vector<1x128xf32>
    %10 = vector.shape_cast %9 : vector<1x128xf32> to vector<1x1x128xf32>
    %cst_4 = arith.constant 1.562500e-02 : f32
    %11 = vector.broadcast %cst_4 : f32 to vector<1x1x128xf32>
    %12 = arith.mulf %10, %11 : vector<1x1x128xf32>
    %cst_5 = arith.constant 9.99999974E-6 : f32
    %13 = vector.broadcast %cst_5 : f32 to vector<1x1x128xf32>
    %14 = arith.addf %12, %13 : vector<1x1x128xf32>
    %15 = math.rsqrt %14 : vector<1x1x128xf32>
    %16 = vector.broadcast %15 : vector<1x1x128xf32> to vector<1x64x128xf32>
    %17 = arith.mulf %7, %16 : vector<1x64x128xf32>
    %cst_6 = arith.constant 0.000000e+00 : f32
    %18 = vector.broadcast %cst_6 : f32 to vector<1x64x128xf32>
    %19 = arith.cmpf ogt, %17, %18 : vector<1x64x128xf32>
    %cst_7 = arith.constant 2.000000e-01 : f32
    %20 = vector.broadcast %cst_7 : f32 to vector<1x64x128xf32>
    %21 = arith.mulf %20, %17 : vector<1x64x128xf32>
    %22 = arith.select %19, %17, %21 : vector<1x64x128xi1>, vector<1x64x128xf32>
    %23 = arith.truncf %22 : vector<1x64x128xf32> to vector<1x64x128xbf16>
    %c0_8 = arith.constant 0 : index
    %c0_9 = arith.constant 0 : index
    %c0_10 = arith.constant 0 : index
    %24 = vector.load %arg3[%c0_8, %c0_9, %c0_10] : memref<1x64x128xbf16, #tpu.memory_space<vmem>>, vector<1x64x128xbf16>
    tpu.vector_store %arg3[%c0_8, %c0_9, %c0_10], %23 {strides = array<i32>} : memref<1x64x128xbf16, #tpu.memory_space<vmem>>, vector<1x64x128xbf16>,
    return
  }
  func.func @transform_0(%arg0: i32, %arg1: i32) -> (i32, i32, i32) {
    %c0_i32 = arith.constant 0 : i32
    %c0_i32_0 = arith.constant 0 : i32
    return %arg0, %c0_i32, %arg1 : i32, i32, i32
  }
  func.func @transform_1(%arg0: i32, %arg1: i32) -> (i32, i32, i32) {
    %c0_i32 = arith.constant 0 : i32
    %c0_i32_0 = arith.constant 0 : i32
    return %arg0, %c0_i32, %arg1 : i32, i32, i32
  }
}

module attributes {stable_mosaic.version = 11 : i64} {
  func.func @_conv_tap_kernel(%arg0: i32, %arg1: i32, %arg2: i32, %arg3: memref<1x1x5x512xbf16, #tpu.memory_space<vmem>>, %arg4: memref<4x512x256xbf16, #tpu.memory_space<vmem>>, %arg5: memref<1x256xf32, #tpu.memory_space<vmem>>, %arg6: memref<1x1x4x256xbf16, #tpu.memory_space<vmem>>, %arg7: memref<4x256xf32, #tpu.memory_space<vmem>>) attributes {dimension_semantics = [#tpu.dimension_semantics<parallel>, #tpu.dimension_semantics<parallel>, #tpu.dimension_semantics<arbitrary>], iteration_bounds = array<i64: 2, 4, 2>, scalar_prefetch = 0 : i64, scratch_operands = 1 : i64, tpu.core_type = #tpu.core_type<tc>, window_params = [{transform_indices = @transform_0, window_bounds = array<i64: 1, 1, 5, 512>}, {pipeline_mode = #tpu.pipeline_mode<synchronous>, transform_indices = @transform_1, window_bounds = array<i64: 4, 512, 256>}, {pipeline_mode = #tpu.pipeline_mode<synchronous>, transform_indices = @transform_2, window_bounds = array<i64: 1, 256>}, {transform_indices = @transform_3, window_bounds = array<i64: 1, 1, 4, 256>}]} {
    %c0_i32 = arith.constant 0 : i32
    %0 = arith.cmpi eq, %arg2, %c0_i32 : i32
    %1 = arith.extui %0 : i1 to i32
    %c0_i32_0 = arith.constant 0 : i32
    %2 = arith.cmpi ne, %1, %c0_i32_0 : i32
    scf.if %2 {
      %cst_20 = arith.constant 0.000000e+00 : f32
      %26 = vector.broadcast %cst_20 : f32 to vector<4x256xf32>
      %c0_21 = arith.constant 0 : index
      %c0_22 = arith.constant 0 : index
      %27 = vector.load %arg7[%c0_21, %c0_22] : memref<4x256xf32, #tpu.memory_space<vmem>>, vector<4x256xf32>
      tpu.vector_store %arg7[%c0_21, %c0_22], %26 {strides = array<i32>} : memref<4x256xf32, #tpu.memory_space<vmem>>, vector<4x256xf32>,
    } else {
    }
    %c0 = arith.constant 0 : index
    %c0_1 = arith.constant 0 : index
    %3 = vector.load %arg7[%c0, %c0_1] : memref<4x256xf32, #tpu.memory_space<vmem>>, vector<4x256xf32>
    %c0_2 = arith.constant 0 : index
    %c0_3 = arith.constant 0 : index
    %c0_4 = arith.constant 0 : index
    %c0_5 = arith.constant 0 : index
    %4 = vector.load %arg3[%c0_2, %c0_3, %c0_4, %c0_5] : memref<1x1x5x512xbf16, #tpu.memory_space<vmem>>, vector<1x1x4x512xbf16>
    %5 = vector.shape_cast %4 : vector<1x1x4x512xbf16> to vector<4x512xbf16>
    %c2_i32 = arith.constant 2 : i32
    %6 = arith.muli %arg2, %c2_i32 : i32
    %c0_i32_6 = arith.constant 0 : i32
    %7 = arith.addi %6, %c0_i32_6 : i32
    %8 = arith.index_cast %7 : i32 to index
    %c0_7 = arith.constant 0 : index
    %c0_8 = arith.constant 0 : index
    %9 = vector.load %arg4[%8, %c0_7, %c0_8] : memref<4x512x256xbf16, #tpu.memory_space<vmem>>, vector<1x512x256xbf16>
    %10 = vector.shape_cast %9 : vector<1x512x256xbf16> to vector<512x256xbf16>
    %cst = arith.constant dense<0.000000e+00> : vector<4x256xf32>
    %11 = tpu.matmul %5, %10, %cst {dimension_numbers = #tpu.dot_dimension_numbers<[1], [0], [0], [1], [0, 0, 1, 1], [], []>} : vector<4x512xbf16>, vector<512x256xbf16>, vector<4x256xf32> -> vector<4x256xf32>
    %12 = arith.addf %3, %11 : vector<4x256xf32>
    %c0_9 = arith.constant 0 : index
    %c0_10 = arith.constant 0 : index
    %c1 = arith.constant 1 : index
    %c0_11 = arith.constant 0 : index
    %13 = vector.load %arg3[%c0_9, %c0_10, %c1, %c0_11] : memref<1x1x5x512xbf16, #tpu.memory_space<vmem>>, vector<1x1x4x512xbf16>
    %14 = vector.shape_cast %13 : vector<1x1x4x512xbf16> to vector<4x512xbf16>
    %c2_i32_12 = arith.constant 2 : i32
    %15 = arith.muli %arg2, %c2_i32_12 : i32
    %c1_i32 = arith.constant 1 : i32
    %16 = arith.addi %15, %c1_i32 : i32
    %17 = arith.index_cast %16 : i32 to index
    %c0_13 = arith.constant 0 : index
    %c0_14 = arith.constant 0 : index
    %18 = vector.load %arg4[%17, %c0_13, %c0_14] : memref<4x512x256xbf16, #tpu.memory_space<vmem>>, vector<1x512x256xbf16>
    %19 = vector.shape_cast %18 : vector<1x512x256xbf16> to vector<512x256xbf16>
    %cst_15 = arith.constant dense<0.000000e+00> : vector<4x256xf32>
    %20 = tpu.matmul %14, %19, %cst_15 {dimension_numbers = #tpu.dot_dimension_numbers<[1], [0], [0], [1], [0, 0, 1, 1], [], []>} : vector<4x512xbf16>, vector<512x256xbf16>, vector<4x256xf32> -> vector<4x256xf32>
    %21 = arith.addf %12, %20 : vector<4x256xf32>
    %c0_16 = arith.constant 0 : index
    %c0_17 = arith.constant 0 : index
    %22 = vector.load %arg7[%c0_16, %c0_17] : memref<4x256xf32, #tpu.memory_space<vmem>>, vector<4x256xf32>
    tpu.vector_store %arg7[%c0_16, %c0_17], %21 {strides = array<i32>} : memref<4x256xf32, #tpu.memory_space<vmem>>, vector<4x256xf32>,
    %c1_i32_18 = arith.constant 1 : i32
    %23 = arith.cmpi eq, %arg2, %c1_i32_18 : i32
    %24 = arith.extui %23 : i1 to i32
    %c0_i32_19 = arith.constant 0 : i32
    %25 = arith.cmpi ne, %24, %c0_i32_19 : i32
    scf.if %25 {
      %c0_20 = arith.constant 0 : index
      %c0_21 = arith.constant 0 : index
      %26 = vector.load %arg5[%c0_20, %c0_21] : memref<1x256xf32, #tpu.memory_space<vmem>>, vector<1x256xf32>
      %27 = vector.broadcast %26 : vector<1x256xf32> to vector<4x256xf32>
      %28 = arith.addf %21, %27 : vector<4x256xf32>
      %29 = arith.truncf %28 : vector<4x256xf32> to vector<4x256xbf16>
      %c0_22 = arith.constant 0 : index
      %c0_23 = arith.constant 0 : index
      %c0_24 = arith.constant 0 : index
      %c0_25 = arith.constant 0 : index
      %30 = vector.load %arg6[%c0_22, %c0_23, %c0_24, %c0_25] : memref<1x1x4x256xbf16, #tpu.memory_space<vmem>>, vector<1x1x4x256xbf16>
      %31 = vector.shape_cast %30 : vector<1x1x4x256xbf16> to vector<4x256xbf16>
      %32 = vector.shape_cast %29 : vector<4x256xbf16> to vector<1x1x4x256xbf16>
      tpu.vector_store %arg6[%c0_22, %c0_23, %c0_24, %c0_25], %32 {strides = array<i32>} : memref<1x1x4x256xbf16, #tpu.memory_space<vmem>>, vector<1x1x4x256xbf16>,
    } else {
    }
    return
  }
  func.func @transform_0(%arg0: i32, %arg1: i32, %arg2: i32) -> (i32, i32, i32, i32) {
    %0 = arith.addi %arg1, %arg2 : i32
    %c0_i32 = arith.constant 0 : i32
    %c0_i32_0 = arith.constant 0 : i32
    %c0_i32_1 = arith.constant 0 : i32
    return %arg0, %0, %c0_i32, %c0_i32_0 : i32, i32, i32, i32
  }
  func.func @transform_1(%arg0: i32, %arg1: i32, %arg2: i32) -> (i32, i32, i32) {
    %c0_i32 = arith.constant 0 : i32
    %c0_i32_0 = arith.constant 0 : i32
    %c0_i32_1 = arith.constant 0 : i32
    %c0_i32_2 = arith.constant 0 : i32
    return %c0_i32, %c0_i32_0, %c0_i32_1 : i32, i32, i32
  }
  func.func @transform_2(%arg0: i32, %arg1: i32, %arg2: i32) -> (i32, i32) {
    %c0_i32 = arith.constant 0 : i32
    %c0_i32_0 = arith.constant 0 : i32
    %c0_i32_1 = arith.constant 0 : i32
    return %c0_i32, %c0_i32_0 : i32, i32
  }
  func.func @transform_3(%arg0: i32, %arg1: i32, %arg2: i32) -> (i32, i32, i32, i32) {
    %c0_i32 = arith.constant 0 : i32
    %c0_i32_0 = arith.constant 0 : i32
    %c0_i32_1 = arith.constant 0 : i32
    return %arg0, %arg1, %c0_i32, %c0_i32_0 : i32, i32, i32, i32
  }
}

module attributes {stable_mosaic.version = 11 : i64} {
  func.func @_instnorm_lrelu_kernel(%arg0: i32, %arg1: i32, %arg2: memref<1x16x128xbf16, #tpu.memory_space<vmem>>, %arg3: memref<1x16x128xbf16, #tpu.memory_space<vmem>>) attributes {dimension_semantics = [#tpu.dimension_semantics<parallel>, #tpu.dimension_semantics<parallel>], iteration_bounds = array<i64: 2, 2>, scalar_prefetch = 0 : i64, scratch_operands = 0 : i64, tpu.core_type = #tpu.core_type<tc>, window_params = [{transform_indices = @transform_0, window_bounds = array<i64: 1, 16, 128>}, {transform_indices = @transform_1, window_bounds = array<i64: 1, 16, 128>}]} {
    %c0 = arith.constant 0 : index
    %c0_0 = arith.constant 0 : index
    %c0_1 = arith.constant 0 : index
    %0 = vector.load %arg2[%c0, %c0_0, %c0_1] : memref<1x16x128xbf16, #tpu.memory_space<vmem>>, vector<1x16x128xbf16>
    %1 = arith.extf %0 : vector<1x16x128xbf16> to vector<1x16x128xf32>
    %cst = arith.constant dense<0.000000e+00> : vector<1x128xf32>
    %2 = vector.multi_reduction <add>, %1, %cst [1] : vector<1x16x128xf32> to vector<1x128xf32>
    %3 = vector.shape_cast %2 : vector<1x128xf32> to vector<1x1x128xf32>
    %cst_2 = arith.constant 6.250000e-02 : f32
    %4 = vector.broadcast %cst_2 : f32 to vector<1x1x128xf32>
    %5 = arith.mulf %3, %4 : vector<1x1x128xf32>
    %6 = vector.broadcast %5 : vector<1x1x128xf32> to vector<1x16x128xf32>
    %7 = arith.subf %1, %6 : vector<1x16x128xf32>
    %8 = arith.mulf %7, %7 : vector<1x16x128xf32>
    %cst_3 = arith.constant dense<0.000000e+00> : vector<1x128xf32>
    %9 = vector.multi_reduction <add>, %8, %cst_3 [1] : vector<1x16x128xf32> to vector<1x128xf32>
    %10 = vector.shape_cast %9 : vector<1x128xf32> to vector<1x1x128xf32>
    %cst_4 = arith.constant 6.250000e-02 : f32
    %11 = vector.broadcast %cst_4 : f32 to vector<1x1x128xf32>
    %12 = arith.mulf %10, %11 : vector<1x1x128xf32>
    %cst_5 = arith.constant 9.99999974E-6 : f32
    %13 = vector.broadcast %cst_5 : f32 to vector<1x1x128xf32>
    %14 = arith.addf %12, %13 : vector<1x1x128xf32>
    %15 = math.rsqrt %14 : vector<1x1x128xf32>
    %16 = vector.broadcast %15 : vector<1x1x128xf32> to vector<1x16x128xf32>
    %17 = arith.mulf %7, %16 : vector<1x16x128xf32>
    %cst_6 = arith.constant 0.000000e+00 : f32
    %18 = vector.broadcast %cst_6 : f32 to vector<1x16x128xf32>
    %19 = arith.cmpf ogt, %17, %18 : vector<1x16x128xf32>
    %cst_7 = arith.constant 2.000000e-01 : f32
    %20 = vector.broadcast %cst_7 : f32 to vector<1x16x128xf32>
    %21 = arith.mulf %20, %17 : vector<1x16x128xf32>
    %22 = arith.select %19, %17, %21 : vector<1x16x128xi1>, vector<1x16x128xf32>
    %23 = arith.truncf %22 : vector<1x16x128xf32> to vector<1x16x128xbf16>
    %c0_8 = arith.constant 0 : index
    %c0_9 = arith.constant 0 : index
    %c0_10 = arith.constant 0 : index
    %24 = vector.load %arg3[%c0_8, %c0_9, %c0_10] : memref<1x16x128xbf16, #tpu.memory_space<vmem>>, vector<1x16x128xbf16>
    tpu.vector_store %arg3[%c0_8, %c0_9, %c0_10], %23 {strides = array<i32>} : memref<1x16x128xbf16, #tpu.memory_space<vmem>>, vector<1x16x128xbf16>,
    return
  }
  func.func @transform_0(%arg0: i32, %arg1: i32) -> (i32, i32, i32) {
    %c0_i32 = arith.constant 0 : i32
    %c0_i32_0 = arith.constant 0 : i32
    return %arg0, %c0_i32, %arg1 : i32, i32, i32
  }
  func.func @transform_1(%arg0: i32, %arg1: i32) -> (i32, i32, i32) {
    %c0_i32 = arith.constant 0 : i32
    %c0_i32_0 = arith.constant 0 : i32
    return %arg0, %c0_i32, %arg1 : i32, i32, i32
  }
}

module attributes {stable_mosaic.version = 11 : i64} {
  func.func @_conv_tap_kernel(%arg0: i32, %arg1: i32, %arg2: i32, %arg3: memref<1x1x6x256xbf16, #tpu.memory_space<vmem>>, %arg4: memref<16x256x512xbf16, #tpu.memory_space<vmem>>, %arg5: memref<1x512xf32, #tpu.memory_space<vmem>>, %arg6: memref<1x1x3x512xbf16, #tpu.memory_space<vmem>>, %arg7: memref<3x512xf32, #tpu.memory_space<vmem>>) attributes {dimension_semantics = [#tpu.dimension_semantics<parallel>, #tpu.dimension_semantics<parallel>, #tpu.dimension_semantics<arbitrary>], iteration_bounds = array<i64: 2, 3, 4>, scalar_prefetch = 0 : i64, scratch_operands = 1 : i64, tpu.core_type = #tpu.core_type<tc>, window_params = [{transform_indices = @transform_0, window_bounds = array<i64: 1, 1, 6, 256>}, {pipeline_mode = #tpu.pipeline_mode<synchronous>, transform_indices = @transform_1, window_bounds = array<i64: 16, 256, 512>}, {pipeline_mode = #tpu.pipeline_mode<synchronous>, transform_indices = @transform_2, window_bounds = array<i64: 1, 512>}, {transform_indices = @transform_3, window_bounds = array<i64: 1, 1, 3, 512>}]} {
    %c0_i32 = arith.constant 0 : i32
    %0 = arith.cmpi eq, %arg2, %c0_i32 : i32
    %1 = arith.extui %0 : i1 to i32
    %c0_i32_0 = arith.constant 0 : i32
    %2 = arith.cmpi ne, %1, %c0_i32_0 : i32
    scf.if %2 {
      %cst_34 = arith.constant 0.000000e+00 : f32
      %44 = vector.broadcast %cst_34 : f32 to vector<3x512xf32>
      %c0_35 = arith.constant 0 : index
      %c0_36 = arith.constant 0 : index
      %45 = vector.load %arg7[%c0_35, %c0_36] : memref<3x512xf32, #tpu.memory_space<vmem>>, vector<3x512xf32>
      tpu.vector_store %arg7[%c0_35, %c0_36], %44 {strides = array<i32>} : memref<3x512xf32, #tpu.memory_space<vmem>>, vector<3x512xf32>,
    } else {
    }
    %c0 = arith.constant 0 : index
    %c0_1 = arith.constant 0 : index
    %3 = vector.load %arg7[%c0, %c0_1] : memref<3x512xf32, #tpu.memory_space<vmem>>, vector<3x512xf32>
    %c0_2 = arith.constant 0 : index
    %c0_3 = arith.constant 0 : index
    %c0_4 = arith.constant 0 : index
    %c0_5 = arith.constant 0 : index
    %4 = vector.load %arg3[%c0_2, %c0_3, %c0_4, %c0_5] : memref<1x1x6x256xbf16, #tpu.memory_space<vmem>>, vector<1x1x3x256xbf16>
    %5 = vector.shape_cast %4 : vector<1x1x3x256xbf16> to vector<3x256xbf16>
    %c4_i32 = arith.constant 4 : i32
    %6 = arith.muli %arg2, %c4_i32 : i32
    %c0_i32_6 = arith.constant 0 : i32
    %7 = arith.addi %6, %c0_i32_6 : i32
    %8 = arith.index_cast %7 : i32 to index
    %c0_7 = arith.constant 0 : index
    %c0_8 = arith.constant 0 : index
    %9 = vector.load %arg4[%8, %c0_7, %c0_8] : memref<16x256x512xbf16, #tpu.memory_space<vmem>>, vector<1x256x512xbf16>
    %10 = vector.shape_cast %9 : vector<1x256x512xbf16> to vector<256x512xbf16>
    %cst = arith.constant dense<0.000000e+00> : vector<3x512xf32>
    %11 = tpu.matmul %5, %10, %cst {dimension_numbers = #tpu.dot_dimension_numbers<[1], [0], [0], [1], [0, 0, 1, 1], [], []>} : vector<3x256xbf16>, vector<256x512xbf16>, vector<3x512xf32> -> vector<3x512xf32>
    %12 = arith.addf %3, %11 : vector<3x512xf32>
    %c0_9 = arith.constant 0 : index
    %c0_10 = arith.constant 0 : index
    %c1 = arith.constant 1 : index
    %c0_11 = arith.constant 0 : index
    %13 = vector.load %arg3[%c0_9, %c0_10, %c1, %c0_11] : memref<1x1x6x256xbf16, #tpu.memory_space<vmem>>, vector<1x1x3x256xbf16>
    %14 = vector.shape_cast %13 : vector<1x1x3x256xbf16> to vector<3x256xbf16>
    %c4_i32_12 = arith.constant 4 : i32
    %15 = arith.muli %arg2, %c4_i32_12 : i32
    %c1_i32 = arith.constant 1 : i32
    %16 = arith.addi %15, %c1_i32 : i32
    %17 = arith.index_cast %16 : i32 to index
    %c0_13 = arith.constant 0 : index
    %c0_14 = arith.constant 0 : index
    %18 = vector.load %arg4[%17, %c0_13, %c0_14] : memref<16x256x512xbf16, #tpu.memory_space<vmem>>, vector<1x256x512xbf16>
    %19 = vector.shape_cast %18 : vector<1x256x512xbf16> to vector<256x512xbf16>
    %cst_15 = arith.constant dense<0.000000e+00> : vector<3x512xf32>
    %20 = tpu.matmul %14, %19, %cst_15 {dimension_numbers = #tpu.dot_dimension_numbers<[1], [0], [0], [1], [0, 0, 1, 1], [], []>} : vector<3x256xbf16>, vector<256x512xbf16>, vector<3x512xf32> -> vector<3x512xf32>
    %21 = arith.addf %12, %20 : vector<3x512xf32>
    %c0_16 = arith.constant 0 : index
    %c0_17 = arith.constant 0 : index
    %c2 = arith.constant 2 : index
    %c0_18 = arith.constant 0 : index
    %22 = vector.load %arg3[%c0_16, %c0_17, %c2, %c0_18] : memref<1x1x6x256xbf16, #tpu.memory_space<vmem>>, vector<1x1x3x256xbf16>
    %23 = vector.shape_cast %22 : vector<1x1x3x256xbf16> to vector<3x256xbf16>
    %c4_i32_19 = arith.constant 4 : i32
    %24 = arith.muli %arg2, %c4_i32_19 : i32
    %c2_i32 = arith.constant 2 : i32
    %25 = arith.addi %24, %c2_i32 : i32
    %26 = arith.index_cast %25 : i32 to index
    %c0_20 = arith.constant 0 : index
    %c0_21 = arith.constant 0 : index
    %27 = vector.load %arg4[%26, %c0_20, %c0_21] : memref<16x256x512xbf16, #tpu.memory_space<vmem>>, vector<1x256x512xbf16>
    %28 = vector.shape_cast %27 : vector<1x256x512xbf16> to vector<256x512xbf16>
    %cst_22 = arith.constant dense<0.000000e+00> : vector<3x512xf32>
    %29 = tpu.matmul %23, %28, %cst_22 {dimension_numbers = #tpu.dot_dimension_numbers<[1], [0], [0], [1], [0, 0, 1, 1], [], []>} : vector<3x256xbf16>, vector<256x512xbf16>, vector<3x512xf32> -> vector<3x512xf32>
    %30 = arith.addf %21, %29 : vector<3x512xf32>
    %c0_23 = arith.constant 0 : index
    %c0_24 = arith.constant 0 : index
    %c3 = arith.constant 3 : index
    %c0_25 = arith.constant 0 : index
    %31 = vector.load %arg3[%c0_23, %c0_24, %c3, %c0_25] : memref<1x1x6x256xbf16, #tpu.memory_space<vmem>>, vector<1x1x3x256xbf16>
    %32 = vector.shape_cast %31 : vector<1x1x3x256xbf16> to vector<3x256xbf16>
    %c4_i32_26 = arith.constant 4 : i32
    %33 = arith.muli %arg2, %c4_i32_26 : i32
    %c3_i32 = arith.constant 3 : i32
    %34 = arith.addi %33, %c3_i32 : i32
    %35 = arith.index_cast %34 : i32 to index
    %c0_27 = arith.constant 0 : index
    %c0_28 = arith.constant 0 : index
    %36 = vector.load %arg4[%35, %c0_27, %c0_28] : memref<16x256x512xbf16, #tpu.memory_space<vmem>>, vector<1x256x512xbf16>
    %37 = vector.shape_cast %36 : vector<1x256x512xbf16> to vector<256x512xbf16>
    %cst_29 = arith.constant dense<0.000000e+00> : vector<3x512xf32>
    %38 = tpu.matmul %32, %37, %cst_29 {dimension_numbers = #tpu.dot_dimension_numbers<[1], [0], [0], [1], [0, 0, 1, 1], [], []>} : vector<3x256xbf16>, vector<256x512xbf16>, vector<3x512xf32> -> vector<3x512xf32>
    %39 = arith.addf %30, %38 : vector<3x512xf32>
    %c0_30 = arith.constant 0 : index
    %c0_31 = arith.constant 0 : index
    %40 = vector.load %arg7[%c0_30, %c0_31] : memref<3x512xf32, #tpu.memory_space<vmem>>, vector<3x512xf32>
    tpu.vector_store %arg7[%c0_30, %c0_31], %39 {strides = array<i32>} : memref<3x512xf32, #tpu.memory_space<vmem>>, vector<3x512xf32>,
    %c3_i32_32 = arith.constant 3 : i32
    %41 = arith.cmpi eq, %arg2, %c3_i32_32 : i32
    %42 = arith.extui %41 : i1 to i32
    %c0_i32_33 = arith.constant 0 : i32
    %43 = arith.cmpi ne, %42, %c0_i32_33 : i32
    scf.if %43 {
      %c0_34 = arith.constant 0 : index
      %c0_35 = arith.constant 0 : index
      %44 = vector.load %arg5[%c0_34, %c0_35] : memref<1x512xf32, #tpu.memory_space<vmem>>, vector<1x512xf32>
      %45 = vector.broadcast %44 : vector<1x512xf32> to vector<3x512xf32>
      %46 = arith.addf %39, %45 : vector<3x512xf32>
      %47 = arith.truncf %46 : vector<3x512xf32> to vector<3x512xbf16>
      %c0_36 = arith.constant 0 : index
      %c0_37 = arith.constant 0 : index
      %c0_38 = arith.constant 0 : index
      %c0_39 = arith.constant 0 : index
      %48 = vector.load %arg6[%c0_36, %c0_37, %c0_38, %c0_39] : memref<1x1x3x512xbf16, #tpu.memory_space<vmem>>, vector<1x1x3x512xbf16>
      %49 = vector.shape_cast %48 : vector<1x1x3x512xbf16> to vector<3x512xbf16>
      %50 = vector.shape_cast %47 : vector<3x512xbf16> to vector<1x1x3x512xbf16>
      tpu.vector_store %arg6[%c0_36, %c0_37, %c0_38, %c0_39], %50 {strides = array<i32>} : memref<1x1x3x512xbf16, #tpu.memory_space<vmem>>, vector<1x1x3x512xbf16>,
    } else {
    }
    return
  }
  func.func @transform_0(%arg0: i32, %arg1: i32, %arg2: i32) -> (i32, i32, i32, i32) {
    %0 = arith.addi %arg1, %arg2 : i32
    %c0_i32 = arith.constant 0 : i32
    %c0_i32_0 = arith.constant 0 : i32
    %c0_i32_1 = arith.constant 0 : i32
    return %arg0, %0, %c0_i32, %c0_i32_0 : i32, i32, i32, i32
  }
  func.func @transform_1(%arg0: i32, %arg1: i32, %arg2: i32) -> (i32, i32, i32) {
    %c0_i32 = arith.constant 0 : i32
    %c0_i32_0 = arith.constant 0 : i32
    %c0_i32_1 = arith.constant 0 : i32
    %c0_i32_2 = arith.constant 0 : i32
    return %c0_i32, %c0_i32_0, %c0_i32_1 : i32, i32, i32
  }
  func.func @transform_2(%arg0: i32, %arg1: i32, %arg2: i32) -> (i32, i32) {
    %c0_i32 = arith.constant 0 : i32
    %c0_i32_0 = arith.constant 0 : i32
    %c0_i32_1 = arith.constant 0 : i32
    return %c0_i32, %c0_i32_0 : i32, i32
  }
  func.func @transform_3(%arg0: i32, %arg1: i32, %arg2: i32) -> (i32, i32, i32, i32) {
    %c0_i32 = arith.constant 0 : i32
    %c0_i32_0 = arith.constant 0 : i32
    %c0_i32_1 = arith.constant 0 : i32
    return %arg0, %arg1, %c0_i32, %c0_i32_0 : i32, i32, i32, i32
  }
}

module attributes {stable_mosaic.version = 11 : i64} {
  func.func @_instnorm_lrelu_kernel(%arg0: i32, %arg1: i32, %arg2: memref<1x9x128xbf16, #tpu.memory_space<vmem>>, %arg3: memref<1x9x128xbf16, #tpu.memory_space<vmem>>) attributes {dimension_semantics = [#tpu.dimension_semantics<parallel>, #tpu.dimension_semantics<parallel>], iteration_bounds = array<i64: 2, 4>, scalar_prefetch = 0 : i64, scratch_operands = 0 : i64, tpu.core_type = #tpu.core_type<tc>, window_params = [{transform_indices = @transform_0, window_bounds = array<i64: 1, 9, 128>}, {transform_indices = @transform_1, window_bounds = array<i64: 1, 9, 128>}]} {
    %c0 = arith.constant 0 : index
    %c0_0 = arith.constant 0 : index
    %c0_1 = arith.constant 0 : index
    %0 = vector.load %arg2[%c0, %c0_0, %c0_1] : memref<1x9x128xbf16, #tpu.memory_space<vmem>>, vector<1x9x128xbf16>
    %1 = arith.extf %0 : vector<1x9x128xbf16> to vector<1x9x128xf32>
    %cst = arith.constant dense<0.000000e+00> : vector<1x128xf32>
    %2 = vector.multi_reduction <add>, %1, %cst [1] : vector<1x9x128xf32> to vector<1x128xf32>
    %3 = vector.shape_cast %2 : vector<1x128xf32> to vector<1x1x128xf32>
    %cst_2 = arith.constant 0.111111112 : f32
    %4 = vector.broadcast %cst_2 : f32 to vector<1x1x128xf32>
    %5 = arith.mulf %3, %4 : vector<1x1x128xf32>
    %6 = vector.broadcast %5 : vector<1x1x128xf32> to vector<1x9x128xf32>
    %7 = arith.subf %1, %6 : vector<1x9x128xf32>
    %8 = arith.mulf %7, %7 : vector<1x9x128xf32>
    %cst_3 = arith.constant dense<0.000000e+00> : vector<1x128xf32>
    %9 = vector.multi_reduction <add>, %8, %cst_3 [1] : vector<1x9x128xf32> to vector<1x128xf32>
    %10 = vector.shape_cast %9 : vector<1x128xf32> to vector<1x1x128xf32>
    %cst_4 = arith.constant 0.111111112 : f32
    %11 = vector.broadcast %cst_4 : f32 to vector<1x1x128xf32>
    %12 = arith.mulf %10, %11 : vector<1x1x128xf32>
    %cst_5 = arith.constant 9.99999974E-6 : f32
    %13 = vector.broadcast %cst_5 : f32 to vector<1x1x128xf32>
    %14 = arith.addf %12, %13 : vector<1x1x128xf32>
    %15 = math.rsqrt %14 : vector<1x1x128xf32>
    %16 = vector.broadcast %15 : vector<1x1x128xf32> to vector<1x9x128xf32>
    %17 = arith.mulf %7, %16 : vector<1x9x128xf32>
    %cst_6 = arith.constant 0.000000e+00 : f32
    %18 = vector.broadcast %cst_6 : f32 to vector<1x9x128xf32>
    %19 = arith.cmpf ogt, %17, %18 : vector<1x9x128xf32>
    %cst_7 = arith.constant 2.000000e-01 : f32
    %20 = vector.broadcast %cst_7 : f32 to vector<1x9x128xf32>
    %21 = arith.mulf %20, %17 : vector<1x9x128xf32>
    %22 = arith.select %19, %17, %21 : vector<1x9x128xi1>, vector<1x9x128xf32>
    %23 = arith.truncf %22 : vector<1x9x128xf32> to vector<1x9x128xbf16>
    %c0_8 = arith.constant 0 : index
    %c0_9 = arith.constant 0 : index
    %c0_10 = arith.constant 0 : index
    %24 = vector.load %arg3[%c0_8, %c0_9, %c0_10] : memref<1x9x128xbf16, #tpu.memory_space<vmem>>, vector<1x9x128xbf16>
    tpu.vector_store %arg3[%c0_8, %c0_9, %c0_10], %23 {strides = array<i32>} : memref<1x9x128xbf16, #tpu.memory_space<vmem>>, vector<1x9x128xbf16>,
    return
  }
  func.func @transform_0(%arg0: i32, %arg1: i32) -> (i32, i32, i32) {
    %c0_i32 = arith.constant 0 : i32
    %c0_i32_0 = arith.constant 0 : i32
    return %arg0, %c0_i32, %arg1 : i32, i32, i32
  }
  func.func @transform_1(%arg0: i32, %arg1: i32) -> (i32, i32, i32) {
    %c0_i32 = arith.constant 0 : i32
    %c0_i32_0 = arith.constant 0 : i32
    return %arg0, %c0_i32, %arg1 : i32, i32, i32
  }
}

module attributes {stable_mosaic.version = 11 : i64} {
  func.func @_final_conv_pool_kernel(%arg0: i32, %arg1: memref<1x5x5x512xbf16, #tpu.memory_space<vmem>>, %arg2: memref<16x512xf32, #tpu.memory_space<vmem>>, %arg3: memref<2x128xf32, #tpu.memory_space<vmem>>) attributes {dimension_semantics = [#tpu.dimension_semantics<arbitrary>], iteration_bounds = array<i64: 2>, scalar_prefetch = 0 : i64, scratch_operands = 0 : i64, tpu.core_type = #tpu.core_type<tc>, window_params = [{transform_indices = @transform_0, window_bounds = array<i64: 1, 5, 5, 512>}, {pipeline_mode = #tpu.pipeline_mode<synchronous>, transform_indices = @transform_1, window_bounds = array<i64: 16, 512>}, {pipeline_mode = #tpu.pipeline_mode<synchronous>, transform_indices = @transform_2, window_bounds = array<i64: 2, 128>}]} {
    %cst = arith.constant 0.000000e+00 : f32
    %0 = vector.broadcast %cst : f32 to vector<1x512xf32>
    %c0 = arith.constant 0 : index
    %c0_0 = arith.constant 0 : index
    %c0_1 = arith.constant 0 : index
    %c0_2 = arith.constant 0 : index
    %1 = vector.load %arg1[%c0, %c0_0, %c0_1, %c0_2] : memref<1x5x5x512xbf16, #tpu.memory_space<vmem>>, vector<1x2x2x512xbf16>
    %2 = vector.shape_cast %1 : vector<1x2x2x512xbf16> to vector<2x2x512xbf16>
    %3 = arith.extf %2 : vector<2x2x512xbf16> to vector<2x2x512xf32>
    %cst_3 = arith.constant dense<0.000000e+00> : vector<2x512xf32>
    %4 = vector.multi_reduction <add>, %3, %cst_3 [0] : vector<2x2x512xf32> to vector<2x512xf32>
    %cst_4 = arith.constant dense<0.000000e+00> : vector<512xf32>
    %5 = vector.multi_reduction <add>, %4, %cst_4 [0] : vector<2x512xf32> to vector<512xf32>
    %6 = vector.shape_cast %5 : vector<512xf32> to vector<1x512xf32>
    %c0_5 = arith.constant 0 : index
    %c0_6 = arith.constant 0 : index
    %7 = vector.load %arg2[%c0_5, %c0_6] : memref<16x512xf32, #tpu.memory_space<vmem>>, vector<1x512xf32>
    %8 = arith.mulf %6, %7 : vector<1x512xf32>
    %9 = arith.addf %0, %8 : vector<1x512xf32>
    %c0_7 = arith.constant 0 : index
    %c0_8 = arith.constant 0 : index
    %c1 = arith.constant 1 : index
    %c0_9 = arith.constant 0 : index
    %10 = vector.load %arg1[%c0_7, %c0_8, %c1, %c0_9] : memref<1x5x5x512xbf16, #tpu.memory_space<vmem>>, vector<1x2x2x512xbf16>
    %11 = vector.shape_cast %10 : vector<1x2x2x512xbf16> to vector<2x2x512xbf16>
    %12 = arith.extf %11 : vector<2x2x512xbf16> to vector<2x2x512xf32>
    %cst_10 = arith.constant dense<0.000000e+00> : vector<2x512xf32>
    %13 = vector.multi_reduction <add>, %12, %cst_10 [0] : vector<2x2x512xf32> to vector<2x512xf32>
    %cst_11 = arith.constant dense<0.000000e+00> : vector<512xf32>
    %14 = vector.multi_reduction <add>, %13, %cst_11 [0] : vector<2x512xf32> to vector<512xf32>
    %15 = vector.shape_cast %14 : vector<512xf32> to vector<1x512xf32>
    %c1_12 = arith.constant 1 : index
    %c0_13 = arith.constant 0 : index
    %16 = vector.load %arg2[%c1_12, %c0_13] : memref<16x512xf32, #tpu.memory_space<vmem>>, vector<1x512xf32>
    %17 = arith.mulf %15, %16 : vector<1x512xf32>
    %18 = arith.addf %9, %17 : vector<1x512xf32>
    %c0_14 = arith.constant 0 : index
    %c0_15 = arith.constant 0 : index
    %c2 = arith.constant 2 : index
    %c0_16 = arith.constant 0 : index
    %19 = vector.load %arg1[%c0_14, %c0_15, %c2, %c0_16] : memref<1x5x5x512xbf16, #tpu.memory_space<vmem>>, vector<1x2x2x512xbf16>
    %20 = vector.shape_cast %19 : vector<1x2x2x512xbf16> to vector<2x2x512xbf16>
    %21 = arith.extf %20 : vector<2x2x512xbf16> to vector<2x2x512xf32>
    %cst_17 = arith.constant dense<0.000000e+00> : vector<2x512xf32>
    %22 = vector.multi_reduction <add>, %21, %cst_17 [0] : vector<2x2x512xf32> to vector<2x512xf32>
    %cst_18 = arith.constant dense<0.000000e+00> : vector<512xf32>
    %23 = vector.multi_reduction <add>, %22, %cst_18 [0] : vector<2x512xf32> to vector<512xf32>
    %24 = vector.shape_cast %23 : vector<512xf32> to vector<1x512xf32>
    %c2_19 = arith.constant 2 : index
    %c0_20 = arith.constant 0 : index
    %25 = vector.load %arg2[%c2_19, %c0_20] : memref<16x512xf32, #tpu.memory_space<vmem>>, vector<1x512xf32>
    %26 = arith.mulf %24, %25 : vector<1x512xf32>
    %27 = arith.addf %18, %26 : vector<1x512xf32>
    %c0_21 = arith.constant 0 : index
    %c0_22 = arith.constant 0 : index
    %c3 = arith.constant 3 : index
    %c0_23 = arith.constant 0 : index
    %28 = vector.load %arg1[%c0_21, %c0_22, %c3, %c0_23] : memref<1x5x5x512xbf16, #tpu.memory_space<vmem>>, vector<1x2x2x512xbf16>
    %29 = vector.shape_cast %28 : vector<1x2x2x512xbf16> to vector<2x2x512xbf16>
    %30 = arith.extf %29 : vector<2x2x512xbf16> to vector<2x2x512xf32>
    %cst_24 = arith.constant dense<0.000000e+00> : vector<2x512xf32>
    %31 = vector.multi_reduction <add>, %30, %cst_24 [0] : vector<2x2x512xf32> to vector<2x512xf32>
    %cst_25 = arith.constant dense<0.000000e+00> : vector<512xf32>
    %32 = vector.multi_reduction <add>, %31, %cst_25 [0] : vector<2x512xf32> to vector<512xf32>
    %33 = vector.shape_cast %32 : vector<512xf32> to vector<1x512xf32>
    %c3_26 = arith.constant 3 : index
    %c0_27 = arith.constant 0 : index
    %34 = vector.load %arg2[%c3_26, %c0_27] : memref<16x512xf32, #tpu.memory_space<vmem>>, vector<1x512xf32>
    %35 = arith.mulf %33, %34 : vector<1x512xf32>
    %36 = arith.addf %27, %35 : vector<1x512xf32>
    %c0_28 = arith.constant 0 : index
    %c1_29 = arith.constant 1 : index
    %c0_30 = arith.constant 0 : index
    %c0_31 = arith.constant 0 : index
    %37 = vector.load %arg1[%c0_28, %c1_29, %c0_30, %c0_31] : memref<1x5x5x512xbf16, #tpu.memory_space<vmem>>, vector<1x2x2x512xbf16>
    %38 = vector.shape_cast %37 : vector<1x2x2x512xbf16> to vector<2x2x512xbf16>
    %39 = arith.extf %38 : vector<2x2x512xbf16> to vector<2x2x512xf32>
    %cst_32 = arith.constant dense<0.000000e+00> : vector<2x512xf32>
    %40 = vector.multi_reduction <add>, %39, %cst_32 [0] : vector<2x2x512xf32> to vector<2x512xf32>
    %cst_33 = arith.constant dense<0.000000e+00> : vector<512xf32>
    %41 = vector.multi_reduction <add>, %40, %cst_33 [0] : vector<2x512xf32> to vector<512xf32>
    %42 = vector.shape_cast %41 : vector<512xf32> to vector<1x512xf32>
    %c4 = arith.constant 4 : index
    %c0_34 = arith.constant 0 : index
    %43 = vector.load %arg2[%c4, %c0_34] : memref<16x512xf32, #tpu.memory_space<vmem>>, vector<1x512xf32>
    %44 = arith.mulf %42, %43 : vector<1x512xf32>
    %45 = arith.addf %36, %44 : vector<1x512xf32>
    %c0_35 = arith.constant 0 : index
    %c1_36 = arith.constant 1 : index
    %c1_37 = arith.constant 1 : index
    %c0_38 = arith.constant 0 : index
    %46 = vector.load %arg1[%c0_35, %c1_36, %c1_37, %c0_38] : memref<1x5x5x512xbf16, #tpu.memory_space<vmem>>, vector<1x2x2x512xbf16>
    %47 = vector.shape_cast %46 : vector<1x2x2x512xbf16> to vector<2x2x512xbf16>
    %48 = arith.extf %47 : vector<2x2x512xbf16> to vector<2x2x512xf32>
    %cst_39 = arith.constant dense<0.000000e+00> : vector<2x512xf32>
    %49 = vector.multi_reduction <add>, %48, %cst_39 [0] : vector<2x2x512xf32> to vector<2x512xf32>
    %cst_40 = arith.constant dense<0.000000e+00> : vector<512xf32>
    %50 = vector.multi_reduction <add>, %49, %cst_40 [0] : vector<2x512xf32> to vector<512xf32>
    %51 = vector.shape_cast %50 : vector<512xf32> to vector<1x512xf32>
    %c5 = arith.constant 5 : index
    %c0_41 = arith.constant 0 : index
    %52 = vector.load %arg2[%c5, %c0_41] : memref<16x512xf32, #tpu.memory_space<vmem>>, vector<1x512xf32>
    %53 = arith.mulf %51, %52 : vector<1x512xf32>
    %54 = arith.addf %45, %53 : vector<1x512xf32>
    %c0_42 = arith.constant 0 : index
    %c1_43 = arith.constant 1 : index
    %c2_44 = arith.constant 2 : index
    %c0_45 = arith.constant 0 : index
    %55 = vector.load %arg1[%c0_42, %c1_43, %c2_44, %c0_45] : memref<1x5x5x512xbf16, #tpu.memory_space<vmem>>, vector<1x2x2x512xbf16>
    %56 = vector.shape_cast %55 : vector<1x2x2x512xbf16> to vector<2x2x512xbf16>
    %57 = arith.extf %56 : vector<2x2x512xbf16> to vector<2x2x512xf32>
    %cst_46 = arith.constant dense<0.000000e+00> : vector<2x512xf32>
    %58 = vector.multi_reduction <add>, %57, %cst_46 [0] : vector<2x2x512xf32> to vector<2x512xf32>
    %cst_47 = arith.constant dense<0.000000e+00> : vector<512xf32>
    %59 = vector.multi_reduction <add>, %58, %cst_47 [0] : vector<2x512xf32> to vector<512xf32>
    %60 = vector.shape_cast %59 : vector<512xf32> to vector<1x512xf32>
    %c6 = arith.constant 6 : index
    %c0_48 = arith.constant 0 : index
    %61 = vector.load %arg2[%c6, %c0_48] : memref<16x512xf32, #tpu.memory_space<vmem>>, vector<1x512xf32>
    %62 = arith.mulf %60, %61 : vector<1x512xf32>
    %63 = arith.addf %54, %62 : vector<1x512xf32>
    %c0_49 = arith.constant 0 : index
    %c1_50 = arith.constant 1 : index
    %c3_51 = arith.constant 3 : index
    %c0_52 = arith.constant 0 : index
    %64 = vector.load %arg1[%c0_49, %c1_50, %c3_51, %c0_52] : memref<1x5x5x512xbf16, #tpu.memory_space<vmem>>, vector<1x2x2x512xbf16>
    %65 = vector.shape_cast %64 : vector<1x2x2x512xbf16> to vector<2x2x512xbf16>
    %66 = arith.extf %65 : vector<2x2x512xbf16> to vector<2x2x512xf32>
    %cst_53 = arith.constant dense<0.000000e+00> : vector<2x512xf32>
    %67 = vector.multi_reduction <add>, %66, %cst_53 [0] : vector<2x2x512xf32> to vector<2x512xf32>
    %cst_54 = arith.constant dense<0.000000e+00> : vector<512xf32>
    %68 = vector.multi_reduction <add>, %67, %cst_54 [0] : vector<2x512xf32> to vector<512xf32>
    %69 = vector.shape_cast %68 : vector<512xf32> to vector<1x512xf32>
    %c7 = arith.constant 7 : index
    %c0_55 = arith.constant 0 : index
    %70 = vector.load %arg2[%c7, %c0_55] : memref<16x512xf32, #tpu.memory_space<vmem>>, vector<1x512xf32>
    %71 = arith.mulf %69, %70 : vector<1x512xf32>
    %72 = arith.addf %63, %71 : vector<1x512xf32>
    %c0_56 = arith.constant 0 : index
    %c2_57 = arith.constant 2 : index
    %c0_58 = arith.constant 0 : index
    %c0_59 = arith.constant 0 : index
    %73 = vector.load %arg1[%c0_56, %c2_57, %c0_58, %c0_59] : memref<1x5x5x512xbf16, #tpu.memory_space<vmem>>, vector<1x2x2x512xbf16>
    %74 = vector.shape_cast %73 : vector<1x2x2x512xbf16> to vector<2x2x512xbf16>
    %75 = arith.extf %74 : vector<2x2x512xbf16> to vector<2x2x512xf32>
    %cst_60 = arith.constant dense<0.000000e+00> : vector<2x512xf32>
    %76 = vector.multi_reduction <add>, %75, %cst_60 [0] : vector<2x2x512xf32> to vector<2x512xf32>
    %cst_61 = arith.constant dense<0.000000e+00> : vector<512xf32>
    %77 = vector.multi_reduction <add>, %76, %cst_61 [0] : vector<2x512xf32> to vector<512xf32>
    %78 = vector.shape_cast %77 : vector<512xf32> to vector<1x512xf32>
    %c8 = arith.constant 8 : index
    %c0_62 = arith.constant 0 : index
    %79 = vector.load %arg2[%c8, %c0_62] : memref<16x512xf32, #tpu.memory_space<vmem>>, vector<1x512xf32>
    %80 = arith.mulf %78, %79 : vector<1x512xf32>
    %81 = arith.addf %72, %80 : vector<1x512xf32>
    %c0_63 = arith.constant 0 : index
    %c2_64 = arith.constant 2 : index
    %c1_65 = arith.constant 1 : index
    %c0_66 = arith.constant 0 : index
    %82 = vector.load %arg1[%c0_63, %c2_64, %c1_65, %c0_66] : memref<1x5x5x512xbf16, #tpu.memory_space<vmem>>, vector<1x2x2x512xbf16>
    %83 = vector.shape_cast %82 : vector<1x2x2x512xbf16> to vector<2x2x512xbf16>
    %84 = arith.extf %83 : vector<2x2x512xbf16> to vector<2x2x512xf32>
    %cst_67 = arith.constant dense<0.000000e+00> : vector<2x512xf32>
    %85 = vector.multi_reduction <add>, %84, %cst_67 [0] : vector<2x2x512xf32> to vector<2x512xf32>
    %cst_68 = arith.constant dense<0.000000e+00> : vector<512xf32>
    %86 = vector.multi_reduction <add>, %85, %cst_68 [0] : vector<2x512xf32> to vector<512xf32>
    %87 = vector.shape_cast %86 : vector<512xf32> to vector<1x512xf32>
    %c9 = arith.constant 9 : index
    %c0_69 = arith.constant 0 : index
    %88 = vector.load %arg2[%c9, %c0_69] : memref<16x512xf32, #tpu.memory_space<vmem>>, vector<1x512xf32>
    %89 = arith.mulf %87, %88 : vector<1x512xf32>
    %90 = arith.addf %81, %89 : vector<1x512xf32>
    %c0_70 = arith.constant 0 : index
    %c2_71 = arith.constant 2 : index
    %c2_72 = arith.constant 2 : index
    %c0_73 = arith.constant 0 : index
    %91 = vector.load %arg1[%c0_70, %c2_71, %c2_72, %c0_73] : memref<1x5x5x512xbf16, #tpu.memory_space<vmem>>, vector<1x2x2x512xbf16>
    %92 = vector.shape_cast %91 : vector<1x2x2x512xbf16> to vector<2x2x512xbf16>
    %93 = arith.extf %92 : vector<2x2x512xbf16> to vector<2x2x512xf32>
    %cst_74 = arith.constant dense<0.000000e+00> : vector<2x512xf32>
    %94 = vector.multi_reduction <add>, %93, %cst_74 [0] : vector<2x2x512xf32> to vector<2x512xf32>
    %cst_75 = arith.constant dense<0.000000e+00> : vector<512xf32>
    %95 = vector.multi_reduction <add>, %94, %cst_75 [0] : vector<2x512xf32> to vector<512xf32>
    %96 = vector.shape_cast %95 : vector<512xf32> to vector<1x512xf32>
    %c10 = arith.constant 10 : index
    %c0_76 = arith.constant 0 : index
    %97 = vector.load %arg2[%c10, %c0_76] : memref<16x512xf32, #tpu.memory_space<vmem>>, vector<1x512xf32>
    %98 = arith.mulf %96, %97 : vector<1x512xf32>
    %99 = arith.addf %90, %98 : vector<1x512xf32>
    %c0_77 = arith.constant 0 : index
    %c2_78 = arith.constant 2 : index
    %c3_79 = arith.constant 3 : index
    %c0_80 = arith.constant 0 : index
    %100 = vector.load %arg1[%c0_77, %c2_78, %c3_79, %c0_80] : memref<1x5x5x512xbf16, #tpu.memory_space<vmem>>, vector<1x2x2x512xbf16>
    %101 = vector.shape_cast %100 : vector<1x2x2x512xbf16> to vector<2x2x512xbf16>
    %102 = arith.extf %101 : vector<2x2x512xbf16> to vector<2x2x512xf32>
    %cst_81 = arith.constant dense<0.000000e+00> : vector<2x512xf32>
    %103 = vector.multi_reduction <add>, %102, %cst_81 [0] : vector<2x2x512xf32> to vector<2x512xf32>
    %cst_82 = arith.constant dense<0.000000e+00> : vector<512xf32>
    %104 = vector.multi_reduction <add>, %103, %cst_82 [0] : vector<2x512xf32> to vector<512xf32>
    %105 = vector.shape_cast %104 : vector<512xf32> to vector<1x512xf32>
    %c11 = arith.constant 11 : index
    %c0_83 = arith.constant 0 : index
    %106 = vector.load %arg2[%c11, %c0_83] : memref<16x512xf32, #tpu.memory_space<vmem>>, vector<1x512xf32>
    %107 = arith.mulf %105, %106 : vector<1x512xf32>
    %108 = arith.addf %99, %107 : vector<1x512xf32>
    %c0_84 = arith.constant 0 : index
    %c3_85 = arith.constant 3 : index
    %c0_86 = arith.constant 0 : index
    %c0_87 = arith.constant 0 : index
    %109 = vector.load %arg1[%c0_84, %c3_85, %c0_86, %c0_87] : memref<1x5x5x512xbf16, #tpu.memory_space<vmem>>, vector<1x2x2x512xbf16>
    %110 = vector.shape_cast %109 : vector<1x2x2x512xbf16> to vector<2x2x512xbf16>
    %111 = arith.extf %110 : vector<2x2x512xbf16> to vector<2x2x512xf32>
    %cst_88 = arith.constant dense<0.000000e+00> : vector<2x512xf32>
    %112 = vector.multi_reduction <add>, %111, %cst_88 [0] : vector<2x2x512xf32> to vector<2x512xf32>
    %cst_89 = arith.constant dense<0.000000e+00> : vector<512xf32>
    %113 = vector.multi_reduction <add>, %112, %cst_89 [0] : vector<2x512xf32> to vector<512xf32>
    %114 = vector.shape_cast %113 : vector<512xf32> to vector<1x512xf32>
    %c12 = arith.constant 12 : index
    %c0_90 = arith.constant 0 : index
    %115 = vector.load %arg2[%c12, %c0_90] : memref<16x512xf32, #tpu.memory_space<vmem>>, vector<1x512xf32>
    %116 = arith.mulf %114, %115 : vector<1x512xf32>
    %117 = arith.addf %108, %116 : vector<1x512xf32>
    %c0_91 = arith.constant 0 : index
    %c3_92 = arith.constant 3 : index
    %c1_93 = arith.constant 1 : index
    %c0_94 = arith.constant 0 : index
    %118 = vector.load %arg1[%c0_91, %c3_92, %c1_93, %c0_94] : memref<1x5x5x512xbf16, #tpu.memory_space<vmem>>, vector<1x2x2x512xbf16>
    %119 = vector.shape_cast %118 : vector<1x2x2x512xbf16> to vector<2x2x512xbf16>
    %120 = arith.extf %119 : vector<2x2x512xbf16> to vector<2x2x512xf32>
    %cst_95 = arith.constant dense<0.000000e+00> : vector<2x512xf32>
    %121 = vector.multi_reduction <add>, %120, %cst_95 [0] : vector<2x2x512xf32> to vector<2x512xf32>
    %cst_96 = arith.constant dense<0.000000e+00> : vector<512xf32>
    %122 = vector.multi_reduction <add>, %121, %cst_96 [0] : vector<2x512xf32> to vector<512xf32>
    %123 = vector.shape_cast %122 : vector<512xf32> to vector<1x512xf32>
    %c13 = arith.constant 13 : index
    %c0_97 = arith.constant 0 : index
    %124 = vector.load %arg2[%c13, %c0_97] : memref<16x512xf32, #tpu.memory_space<vmem>>, vector<1x512xf32>
    %125 = arith.mulf %123, %124 : vector<1x512xf32>
    %126 = arith.addf %117, %125 : vector<1x512xf32>
    %c0_98 = arith.constant 0 : index
    %c3_99 = arith.constant 3 : index
    %c2_100 = arith.constant 2 : index
    %c0_101 = arith.constant 0 : index
    %127 = vector.load %arg1[%c0_98, %c3_99, %c2_100, %c0_101] : memref<1x5x5x512xbf16, #tpu.memory_space<vmem>>, vector<1x2x2x512xbf16>
    %128 = vector.shape_cast %127 : vector<1x2x2x512xbf16> to vector<2x2x512xbf16>
    %129 = arith.extf %128 : vector<2x2x512xbf16> to vector<2x2x512xf32>
    %cst_102 = arith.constant dense<0.000000e+00> : vector<2x512xf32>
    %130 = vector.multi_reduction <add>, %129, %cst_102 [0] : vector<2x2x512xf32> to vector<2x512xf32>
    %cst_103 = arith.constant dense<0.000000e+00> : vector<512xf32>
    %131 = vector.multi_reduction <add>, %130, %cst_103 [0] : vector<2x512xf32> to vector<512xf32>
    %132 = vector.shape_cast %131 : vector<512xf32> to vector<1x512xf32>
    %c14 = arith.constant 14 : index
    %c0_104 = arith.constant 0 : index
    %133 = vector.load %arg2[%c14, %c0_104] : memref<16x512xf32, #tpu.memory_space<vmem>>, vector<1x512xf32>
    %134 = arith.mulf %132, %133 : vector<1x512xf32>
    %135 = arith.addf %126, %134 : vector<1x512xf32>
    %c0_105 = arith.constant 0 : index
    %c3_106 = arith.constant 3 : index
    %c3_107 = arith.constant 3 : index
    %c0_108 = arith.constant 0 : index
    %136 = vector.load %arg1[%c0_105, %c3_106, %c3_107, %c0_108] : memref<1x5x5x512xbf16, #tpu.memory_space<vmem>>, vector<1x2x2x512xbf16>
    %137 = vector.shape_cast %136 : vector<1x2x2x512xbf16> to vector<2x2x512xbf16>
    %138 = arith.extf %137 : vector<2x2x512xbf16> to vector<2x2x512xf32>
    %cst_109 = arith.constant dense<0.000000e+00> : vector<2x512xf32>
    %139 = vector.multi_reduction <add>, %138, %cst_109 [0] : vector<2x2x512xf32> to vector<2x512xf32>
    %cst_110 = arith.constant dense<0.000000e+00> : vector<512xf32>
    %140 = vector.multi_reduction <add>, %139, %cst_110 [0] : vector<2x512xf32> to vector<512xf32>
    %141 = vector.shape_cast %140 : vector<512xf32> to vector<1x512xf32>
    %c15 = arith.constant 15 : index
    %c0_111 = arith.constant 0 : index
    %142 = vector.load %arg2[%c15, %c0_111] : memref<16x512xf32, #tpu.memory_space<vmem>>, vector<1x512xf32>
    %143 = arith.mulf %141, %142 : vector<1x512xf32>
    %144 = arith.addf %135, %143 : vector<1x512xf32>
    %145 = vector.shape_cast %144 : vector<1x512xf32> to vector<1x1x512xf32>
    %cst_112 = arith.constant dense<0.000000e+00> : vector<1xf32>
    %146 = vector.multi_reduction <add>, %145, %cst_112 [1, 2] : vector<1x1x512xf32> to vector<1xf32>
    %147 = vector.shape_cast %146 : vector<1xf32> to vector<1x1x1xf32>
    %148 = vector.extract %147[0, 0, 0] : f32 from vector<1x1x1xf32>
    %cst_113 = arith.constant 2.500000e-01 : f32
    %149 = arith.mulf %148, %cst_113 : f32
    %150 = vector.broadcast %149 : f32 to vector<1x128xf32>
    %151 = arith.index_cast %arg0 : i32 to index
    %c0_114 = arith.constant 0 : index
    %152 = vector.load %arg3[%151, %c0_114] : memref<2x128xf32, #tpu.memory_space<vmem>>, vector<1x128xf32>
    tpu.vector_store %arg3[%151, %c0_114], %150 {strides = array<i32>} : memref<2x128xf32, #tpu.memory_space<vmem>>, vector<1x128xf32>,
    return
  }
  func.func @transform_0(%arg0: i32) -> (i32, i32, i32, i32) {
    %c0_i32 = arith.constant 0 : i32
    %c0_i32_0 = arith.constant 0 : i32
    %c0_i32_1 = arith.constant 0 : i32
    %c0_i32_2 = arith.constant 0 : i32
    return %arg0, %c0_i32, %c0_i32_0, %c0_i32_1 : i32, i32, i32, i32
  }
  func.func @transform_1(%arg0: i32) -> (i32, i32) {
    %c0_i32 = arith.constant 0 : i32
    %c0_i32_0 = arith.constant 0 : i32
    %c0_i32_1 = arith.constant 0 : i32
    return %c0_i32, %c0_i32_0 : i32, i32
  }
  func.func @transform_2(%arg0: i32) -> (i32, i32) {
    %c0_i32 = arith.constant 0 : i32
    %c0_i32_0 = arith.constant 0 : i32
    %c0_i32_1 = arith.constant 0 : i32
    return %c0_i32, %c0_i32_0 : i32, i32
  }
}

</mosaic_0001>

<bundles_post_ra>
// kernel: _lambda_.8
= control target key start
LH: loop header
LB: loop body
LE: loop exit
PB: predicated region body
PF: predicated region fallthrough
CT: control target
= control target key end

     0   :  { %8 = vsyncpa [#allocation4], 0  ;;  %s909_s0 = inlined_call_operand.vmem [shape: bf16[2,17,17,16], index: 0, kind: input, shape index: {}]   ;;  %s910_s1 = inlined_call_operand.hbm [shape: bf16[4,16,64], index: 1, kind: input, shape index: {}]   ;;  %s911_s2 = inlined_call_operand.hbm [shape: f32[1,64], index: 2, kind: input, shape index: {}]   ;;  %s912_s3 = inlined_call_operand.vmem [shape: bf16[2,16,16,64], index: 3, kind: output, shape index: {}]  }
   0x1   :  { %9 = vsyncpa [#allocation6], 0  ;;  %s792_s12 = smov 0   ;;  %s794_s13 = smov 0  }
   0x2   :  { %s796_s14 = smov 0   ;;  %s798_s15 = smov 0  }
   0x3   :  { %s800_s16 = smov 0   ;;  %s802_s17 = smov 0  }
   0x4   :  { %s804_s18 = smov 0  }
   0x5 LB: > { %s511_s19 = sadd.s32 4294967295, %s765_s18   ;;  %s27_s20 = sadd.s32 1, %s753_s15  ;;  %s765_s18 = sphi %s804_s18, %s15_s18   ;;  %s761_s17 = sphi %s802_s17, %s920_s17   ;;  %s757_s16 = sphi %s800_s16, %s919_s16   ;;  %s753_s15 = sphi %s798_s15, %s918_s15   ;;  %s749_s14 = sphi %s796_s14, %s917_s14   ;;  %s745_s13 = sphi %s794_s13, %s916_s13   ;;  %s741_s12 = sphi %s792_s12, %s915_s12  }
   0x6   : > { %p28_p0 = scmp.ge.s32.totalorder %s27_s20, 2  ;;  %s30_s21 = sadd.s32 1, %s757_s16 }
   0x7   : > { %s34_s22 = sadd.s32 1, %s761_s17  ;;  %p513_p1 = scmp.ge.s32.totalorder %s765_s18, 1 }
   0x8   : > { %s922_s20 = smov (%p28_p0, %s27_s20), 0  ;;  %s924_s21 = smov (!%p28_p0, %s30_s21), %s757_s16 }
   0x9   : > { %p139_p2 = scmp.lt.s32.totalorder %s765_s18, 65  ;;  %p32_p3 = scmp.ge.s32.totalorder %s924_s21, 16 }
   0xa   : > { %p836_p4 = scmp.eq.s32.totalorder %s511_s19, 0  ;;  %s150_s27 = sshll.u32 %s910_s1, 4  ;;  %s151_s27 = int_to_ptr.hbm [resolvable:$true] %s150_s27 }
   0xb   : > { %p840_p5 = pnand %p513_p1, %p139_p2  ;;  %s926_s21 = smov (%p32_p3, %s924_s21), 0 }
   0xc   : > { %s928_s22 = smov (!%p32_p3, %s34_s22), %s761_s17  ;;  %s767_s28 = smov [#allocation3]  }
   0xd   : > { %p570_p6 = pneg %p840_p5  ;;  %p36_p7 = scmp.ge.s32.totalorder %s928_s22, 2 }
   0xe   : > { %s152_s29 = sshll.u32 %s767_s28, 4  ;;  %s768_s30 = smov 64   ;;  %s153_s29 = int_to_ptr.vmem [resolvable:$true] %s152_s29 }
   0xf   : > { %p571_p8 = pnand %p836_p4, %p570_p6  ;;  %s930_s22 = smov (%p36_p7, %s928_s22), 0 }
  0x10   : > { %s769_s4 = smov 4   ;;  %s165_s7 = sshll.u32 %s911_s2, 4  ;;  %s166_s7 = int_to_ptr.hbm [resolvable:$true] %s165_s7 }
  0x11   : > { %573 = dma.hbm_to_vmem [thread:$0]  (!%p571_p8), %s151_s27, 512, %s153_s29, [#allocation4], %s768_s30, %s768_s30, %s769_s4  }
  0x12   : > { %s770_s8 = smov [#allocation5]   ;;  %194 = sbr.rel (%p840_p5) target bundleno = 196 (0xc4), region = 32 }
  0x13   : > { %s167_s9 = sshll.u32 %s770_s8, 4  ;;  %s168_s9 = int_to_ptr.vmem [resolvable:$true] %s167_s9 }
  0x14   : > { %576 = dma.hbm_to_vmem [thread:$0]  (!%p571_p8), %s166_s7, 16, %s168_s9, [#allocation6]  }
  0x17   : > { %732 = dma.done.wait (%p836_p4), [#allocation4], 512  }
  0x18   : > { %734 = vsyncadd (%p836_p4), [#allocation4], 4294966784 }
  0x19   : > { %736 = dma.done.wait (%p836_p4), [#allocation6], 16  }
  0x1a   : > { %738 = vsyncadd (%p836_p4), [#allocation6], 4294967280  ;;  %s233_s10 = sadd.s32 %s741_s12, %s745_s13  ;;  %p234_p9 = scmp.lt.s32.totalorder %s749_s14, 1 }
  0x1b   : > { %p236_p10 = scmp.lt.s32.totalorder %s233_s10, 16  ;;  %p246_p11 = scmp.lt.s32.totalorder %s745_s13, 15 }
  0x1c   : > { %s932_s14 = smov (!%p234_p9, %s749_s14), 1  ;;  %p524_p12 = scmp.ne.s32.totalorder %s741_s12, 0 }
  0x1d   : > { %s934_s10 = smov (!%p236_p10, %s233_s10), 16  ;;  %s561_s11 = smul.u32 51, %s932_s14 }
  0x1e   : > { %s560_s19 = smul.u32 3, %s934_s10  ;;  %s522_s24 = sshll.u32 %s932_s14, 5 }
  0x1f   : > { %s936_s13 = smov (!%p246_p11, %s745_s13), 15  ;;  %257 = sbr.rel (%p524_p12) target bundleno = 39 (0x27), region = 44 }
  0x20   : > { %s240_s25 = sadd.s32 %s561_s11, %s560_s19  ;;  %s521_s23 = sshll.u32 %s936_s13, 1 }
  0x21   : > { %s520_s26 = sshll.u32 %s240_s25, 2  ;;  %s250_s30 = sadd.s32 %s522_s24, %s521_s23 }
  0x22   : > { %s242_s29 = scalar_lea.vmem %s909_s0, %s520_s26  ;;  %s523_s4 = sshll.u32 %s250_s30, 2 }
  0x23   : > { %s881_s7 = scalar_lea.vmem %s912_s3, %s523_s4 }
  0x24   : > { %vm258_vm0 = vcmask 523264   ;;  %v771_v0 = vmov 0.0  }
  0x25   : > { %259 = vst.msk [vmem:[#allocation2] sm:$0xff] %vm258_vm0, %v771_v0 }
  0x26   : > { %260 = vst.msk [vmem:[#allocation2 + $0x8] sm:$0xff] %vm258_vm0, %v771_v0 }
  0x27 PF: > { %s555_s13 = sshll.u32 %s741_s12, 4  ;;  %v557_v1 = vld [vmem:[%s242_s29] sm:$0xff]  ;;  %v304_v2 = vld [vmem:[%s242_s29 + $0x8] sm:$0x1]  ;;  %vm282_vm1 = vcmask 130048   ;;  %vm357_vm3 = vcmask 523264  }
  0x28   : > { %v316_v3 = vunpack.c.l.b16 %v304_v2  ;;  %s268_s14 = scalar_lea.vmem [#allocation3], %s555_s13  ;;  %v321_v6 = vshrl.u32 %v557_v1, 16  ;;  %v323_v7 = vshll.u32 %v557_v1, 16  ;;  %v553_v8 = vld [vmem:[%s242_s29] sm:$0xff]  ;;  %vm319_vm2 = vsmask.f32 7424 }
  0x29   : > { %v556_v4 = vld [vmem:[%s268_s14] sm:$0xff]  ;;  %v559_v5 = vld [vmem:[%s268_s14 + $0x8] sm:$0xff]  ;;  %p550_p13 = scmp.ne.s32.totalorder %s741_s12, 1 }
  0x2a   : > { %v318_v9 = vpack.c.b16 %v316_v3, %v316_v3  ;;  %293 = vmatpush.bf16.msra.mxu0 %v556_v4  ;;  %348 = vmatpush.bf16.msra.mxu1 %v559_v5  ;;  %v325_v10 = vrot.slane %v323_v7, 1 }
  0x2c   : > { %v328_v11 = vshll.u32 %v318_v9, 16  ;;  %v326_v12 = vor.u32 %v325_v10, %v321_v6  ;;  %v261_v15 = vld [vmem:[#allocation2] sm:$0xff] }
  0x2d   : > { %536 = vmatmul.msk.bf16.vlgmr.msra.gmra.mxu0 %vm282_vm1, %v553_v8  ;;  %v262_v20 = vld [vmem:[#allocation2 + $0x8] sm:$0xff] }
  0x2e   : > { %v330_v13 = vrot.slane %v328_v11, 1 }
  0x30   : > { %v331_v14 = vsel %vm319_vm2, %v326_v12, %v330_v13 }
  0x31   : > { %549 = vmatmul.msk.bf16.vlgmr.msra.gmra.mxu1 %vm282_vm1, %v331_v14 }
  0xaa   : > { %v295_v16 = vpop.f32.mrf.mxu0 }
  0xab   : > { %v300_v17 = vadd.f32 %v295_v16, %v261_v15 }
  0xae   : > { %v350_v18 = vpop.f32.mrf.mxu1 }
  0xaf   : > { %v355_v19 = vadd.f32 %v350_v18, %v300_v17 }
  0xb1   : > { %358 = vst.msk [vmem:[#allocation2] sm:$0xff] %vm357_vm3, %v355_v19 }
  0xb2   : > { %v297_v21 = vpop.f32.mrf.mxu0 }
  0xb3   : > { %v301_v22 = vadd.f32 %v297_v21, %v262_v20 }
  0xb5   : > { %363 = sbr.rel (%p550_p13) target bundleno = 196 (0xc4), region = 48 }
  0xb6   : > { %v352_v23 = vpop.f32.mrf.mxu1 }
  0xb7   : > { %v356_v24 = vadd.f32 %v352_v23, %v301_v22 }
  0xb9   : > { %359 = vst.msk [vmem:[#allocation2 + $0x8] sm:$0xff] %vm357_vm3, %v356_v24 }
  0xba   : > { %v642_v25 = vld [vmem:[#allocation5] ss:$0 sm:$0xff]  ;;  %vm378_vm6 = vcmask 519168  }
  0xbb   : > { %v368_v26 = vadd.f32 %v642_v25, %v355_v19  ;;  %v369_v27 = vadd.f32 %v642_v25, %v356_v24 }
  0xbd   : > { %vm370_vm4 = vcmp.gt.f32.partialorder %v368_v26, 0.0  ;;  %v372_v28 = vmul.f32 0.2, %v368_v26  ;;  %vm371_vm5 = vcmp.gt.f32.partialorder %v369_v27, 0.0  ;;  %v373_v29 = vmul.f32 0.2, %v369_v27 }
  0xbf   : > { %v374_v30 = vsel %vm370_vm4, %v368_v26, %v372_v28  ;;  %v375_v31 = vsel %vm371_vm5, %v369_v27, %v373_v29 }
  0xc0   : > { %v376_v32 = vpack.c.bf16 %v374_v30, %v374_v30  ;;  %v377_v33 = vpack.c.bf16 %v375_v31, %v375_v31 }
  0xc2   : > { %379 = vst.msk [vmem:[%s881_s7] sm:$0xf] %vm378_vm6, %v376_v32 }
  0xc3   : > { %380 = vst.msk [vmem:[%s881_s7 + $0x4] sm:$0xf] %vm378_vm6, %v377_v33 }
  0xc4 PF: > { %s15_s18 = sadd.s32 1, %s765_s18   ;;  %s915_s12 = smov %s753_s15 }
  0xc5   : > { %p12_p0 = scmp.ge.s32.totalorder %s15_s18, 66   ;;  %s916_s13 = smov %s757_s16 }
  0xc6   : > { %s917_s14 = smov %s761_s17  ;;  %s918_s15 = smov %s922_s20 }
  0xc7   : > { %s919_s16 = smov %s926_s21  ;;  %s920_s17 = smov %s930_s22 }
  0xc8   :  { %14 = sbr.rel (!%p12_p0) target bundleno = 5 (0x5), region = 81 }
  0xcd   :  { %410 = vsyncpa [#allocation4], 1 }
  0xce   :  { %412 = vsyncpa [#allocation4 + $0x1], 1 }
  0xcf   :  { %413 = vsyncpa [#allocation6], 1 }

// kernel: _lambda_.9
= control target key start
LH: loop header
LB: loop body
LE: loop exit
PB: predicated region body
PF: predicated region fallthrough
CT: control target
= control target key end

     0   :  { %8 = vsyncpa [#allocation4], 0  ;;  %s1360_s0 = inlined_call_operand.vmem [shape: bf16[2,9,9,256], index: 0, kind: input, shape index: {}]   ;;  %s1361_s1 = inlined_call_operand.hbm [shape: bf16[4,256,128], index: 1, kind: input, shape index: {}]   ;;  %s1362_s2 = inlined_call_operand.hbm [shape: f32[1,128], index: 2, kind: input, shape index: {}]   ;;  %s1363_s3 = inlined_call_operand.vmem [shape: bf16[2,8,8,128], index: 3, kind: output, shape index: {}]  }
   0x1   :  { %9 = vsyncpa [#allocation6], 0  ;;  %s1203_s12 = smov 0   ;;  %s1205_s13 = smov 0  }
   0x2   :  { %s1207_s14 = smov 0   ;;  %s1209_s15 = smov 0  }
   0x3   :  { %s1211_s16 = smov 0   ;;  %s1213_s17 = smov 0  }
   0x4   :  { %s1215_s18 = smov 0  }
   0x5 LB: > { %s745_s19 = sadd.s32 4294967295, %s1176_s18   ;;  %s27_s20 = sadd.s32 1, %s1164_s15  ;;  %s1176_s18 = sphi %s1215_s18, %s15_s18   ;;  %s1172_s17 = sphi %s1213_s17, %s1371_s17   ;;  %s1168_s16 = sphi %s1211_s16, %s1370_s16   ;;  %s1164_s15 = sphi %s1209_s15, %s1369_s15   ;;  %s1160_s14 = sphi %s1207_s14, %s1368_s14   ;;  %s1156_s13 = sphi %s1205_s13, %s1367_s13   ;;  %s1152_s12 = sphi %s1203_s12, %s1366_s12  }
   0x6   : > { %p28_p0 = scmp.ge.s32.totalorder %s27_s20, 2  ;;  %s30_s21 = sadd.s32 1, %s1168_s16 }
   0x7   : > { %s34_s22 = sadd.s32 1, %s1172_s17  ;;  %p747_p1 = scmp.ge.s32.totalorder %s1176_s18, 1 }
   0x8   : > { %s1373_s20 = smov (%p28_p0, %s27_s20), 0  ;;  %s1375_s21 = smov (!%p28_p0, %s30_s21), %s1168_s16 }
   0x9   : > { %p139_p2 = scmp.lt.s32.totalorder %s1176_s18, 33  ;;  %p32_p3 = scmp.ge.s32.totalorder %s1375_s21, 8 }
   0xa   : > { %p1247_p4 = scmp.eq.s32.totalorder %s745_s19, 0  ;;  %s150_s27 = sshll.u32 %s1361_s1, 4  ;;  %s151_s27 = int_to_ptr.hbm [resolvable:$true] %s150_s27 }
   0xb   : > { %p1251_p5 = pnand %p747_p1, %p139_p2  ;;  %s1377_s21 = smov (%p32_p3, %s1375_s21), 0 }
   0xc   : > { %s1379_s22 = smov (!%p32_p3, %s34_s22), %s1172_s17  ;;  %s1178_s28 = smov [#allocation3]  }
   0xd   : > { %p981_p6 = pneg %p1251_p5  ;;  %p36_p7 = scmp.ge.s32.totalorder %s1379_s22, 2 }
   0xe   : > { %s152_s29 = sshll.u32 %s1178_s28, 4  ;;  %s1179_s30 = smov 64   ;;  %s153_s29 = int_to_ptr.vmem [resolvable:$true] %s152_s29 }
   0xf   : > { %p982_p8 = pnand %p1247_p4, %p981_p6  ;;  %s1381_s22 = smov (%p36_p7, %s1379_s22), 0 }
  0x10   : > { %s1180_s4 = smov 4   ;;  %s165_s7 = sshll.u32 %s1362_s2, 4  ;;  %s166_s7 = int_to_ptr.hbm [resolvable:$true] %s165_s7 }
  0x11   : > { %984 = dma.hbm_to_vmem [thread:$0]  (!%p982_p8), %s151_s27, 8192, %s153_s29, [#allocation4], %s1179_s30, %s1179_s30, %s1180_s4  }
  0x12   : > { %s1181_s8 = smov [#allocation5]   ;;  %194 = sbr.rel (%p1251_p5) target bundleno = 224 (0xe0), region = 32 }
  0x13   : > { %s167_s9 = sshll.u32 %s1181_s8, 4  ;;  %s168_s9 = int_to_ptr.vmem [resolvable:$true] %s167_s9 }
  0x14   : > { %987 = dma.hbm_to_vmem [thread:$0]  (!%p982_p8), %s166_s7, 16, %s168_s9, [#allocation6]  }
  0x17   : > { %1143 = dma.done.wait (%p1247_p4), [#allocation4], 8192  }
  0x18   : > { %1145 = vsyncadd (%p1247_p4), [#allocation4], 4294959104 }
  0x19   : > { %1147 = dma.done.wait (%p1247_p4), [#allocation6], 16  }
  0x1a   : > { %1149 = vsyncadd (%p1247_p4), [#allocation6], 4294967280  ;;  %s232_s10 = sadd.s32 %s1152_s12, %s1156_s13  ;;  %p233_p9 = scmp.lt.s32.totalorder %s1160_s14, 1 }
  0x1b   : > { %p235_p10 = scmp.lt.s32.totalorder %s232_s10, 8  ;;  %p245_p11 = scmp.lt.s32.totalorder %s1156_s13, 7 }
  0x1c   : > { %s1383_s14 = smov (!%p233_p9, %s1160_s14), 1  ;;  %p758_p12 = scmp.ne.s32.totalorder %s1152_s12, 0 }
  0x1d   : > { %s1385_s10 = smov (!%p235_p10, %s232_s10), 8  ;;  %s972_s11 = smul.u32 36, %s1383_s14 }
  0x1e   : > { %s754_s19 = sshll.u32 %s1385_s10, 2  ;;  %s756_s28 = sshll.u32 %s1383_s14, 3 }
  0x1f   : > { %s239_s24 = sadd.s32 %s972_s11, %s754_s19  ;;  %s1387_s13 = smov (!%p245_p11, %s1156_s13), 7 }
  0x20   : > { %s755_s25 = sshll.u32 %s239_s24, 2  ;;  %s248_s29 = sadd.s32 %s756_s28, %s1387_s13 }
  0x21   : > { %s1288_s23 = scalar_lea.vmem %s1360_s0, %s755_s25  ;;  %s757_s30 = sshll.u32 %s248_s29, 2 }
  0x22   : > { %s1294_s6 = scalar_lea.vmem %s1363_s3, %s757_s30  ;;  %254 = sbr.rel (%p758_p12) target bundleno = 41 (0x29), region = 44 }
  0x27   : > { %v1182_v0 = vmov 0.0  }
  0x28   : > { %255 = vst [vmem:[#allocation2] sm:$0xff] %v1182_v0 }
  0x29 PF: > { %s936_s7 = sshll.u32 %s1152_s12, 8  ;;  %v862_v17 = vld [vmem:[%s1288_s23] sm:$0xf]  ;;  %v954_v18 = vld [vmem:[%s1288_s23 + $0x4] sm:$0x10]  ;;  %p932_p13 = scmp.ne.s32.totalorder %s1152_s12, 1 }
  0x2a   : > { %s1298_s8 = scalar_lea.vmem [#allocation3], %s936_s7  ;;  %v953_v21 = vld [vmem:[%s1288_s23 + $0x4] sm:$0xf]  ;;  %v864_v24 = vld [vmem:[%s1288_s23 + $0x8] sm:$0x10]  ;;  %v863_v27 = vor.u32 %v954_v18, %v862_v17 }
  0x2b   : > { %v944_v1 = vld [vmem:[%s1298_s8 + $0x38] sm:$0xff]  ;;  %v943_v5 = vld [vmem:[%s1298_s8 + $0x30] sm:$0xff]  ;;  %v942_v9 = vld [vmem:[%s1298_s8 + $0x28] sm:$0xff]  ;;  %v867_v28 = vor.u32 %v953_v21, %v864_v24 }
  0x2c   : > { %v952_v2 = vld [vmem:[%s1298_s8 + $0x78] sm:$0xff]  ;;  %397 = vmatpush.bf16.msra.mxu0 %v944_v1  ;;  %v951_v6 = vld [vmem:[%s1298_s8 + $0x70] sm:$0xff]  ;;  %v950_v10 = vld [vmem:[%s1298_s8 + $0x68] sm:$0xff]  ;;  %v473_v34 = vshll.u32 %v863_v27, 16  ;;  %v471_v42 = vshrl.u32 %v863_v27, 16 }
  0x2d   : > { %v963_v3 = vld [vmem:[%s1298_s8 + $0xb8] sm:$0xff]  ;;  %410 = vmatpush.bf16.msra.mxu1 %v952_v2  ;;  %v962_v7 = vld [vmem:[%s1298_s8 + $0xb0] sm:$0xff]  ;;  %v961_v11 = vld [vmem:[%s1298_s8 + $0xa8] sm:$0xff]  ;;  %v480_v35 = vshll.u32 %v867_v28, 16  ;;  %v478_v44 = vshrl.u32 %v867_v28, 16 }
  0x2e   : > { %v971_v4 = vld [vmem:[%s1298_s8 + $0xf8] sm:$0xff]  ;;  %582 = vmatpush.bf16.msra.mxu2 %v963_v3  ;;  %v970_v8 = vld [vmem:[%s1298_s8 + $0xf0] sm:$0xff]  ;;  %v969_v12 = vld [vmem:[%s1298_s8 + $0xe8] sm:$0xff]  ;;  %v475_v43 = vrot.slane %v473_v34, 1 }
  0x2f   : > { %595 = vmatpush.bf16.msra.mxu3 %v971_v4  ;;  %v941_v13 = vld [vmem:[%s1298_s8 + $0x20] sm:$0xff]  ;;  %v940_v19 = vld [vmem:[%s1298_s8 + $0x18] sm:$0xff]  ;;  %v939_v25 = vld [vmem:[%s1298_s8 + $0x10] sm:$0xff]  ;;  %v482_v45 = vrot.slane %v480_v35, 1 }
  0x30   : > { %398 = vmatpush.bf16.msra.mxu0 %v943_v5  ;;  %v949_v14 = vld [vmem:[%s1298_s8 + $0x60] sm:$0xff]  ;;  %v948_v20 = vld [vmem:[%s1298_s8 + $0x58] sm:$0xff]  ;;  %v947_v26 = vld [vmem:[%s1298_s8 + $0x50] sm:$0xff]  ;;  %v476_v50 = vor.u32 %v475_v43, %v471_v42 }
  0x31   : > { %411 = vmatpush.bf16.msra.mxu1 %v951_v6  ;;  %v960_v15 = vld [vmem:[%s1298_s8 + $0xa0] sm:$0xff]  ;;  %v959_v22 = vld [vmem:[%s1298_s8 + $0x98] sm:$0xff]  ;;  %v958_v29 = vld [vmem:[%s1298_s8 + $0x90] sm:$0xff]  ;;  %v483_v51 = vor.u32 %v482_v45, %v478_v44 }
  0x32   : > { %583 = vmatpush.bf16.msra.mxu2 %v962_v7  ;;  %v968_v16 = vld [vmem:[%s1298_s8 + $0xe0] sm:$0xff]  ;;  %v967_v23 = vld [vmem:[%s1298_s8 + $0xd8] sm:$0xff]  ;;  %v966_v30 = vld [vmem:[%s1298_s8 + $0xd0] sm:$0xff] }
  0x33   : > { %596 = vmatpush.bf16.msra.mxu3 %v970_v8  ;;  %v938_v31 = vld [vmem:[%s1298_s8 + $0x8] sm:$0xff]  ;;  %v257_v33 = vld [vmem:[%s1288_s23] sm:$0xff] }
  0x34   : > { %399 = vmatpush.bf16.msra.mxu0 %v942_v9  ;;  %v946_v32 = vld [vmem:[%s1298_s8 + $0x48] sm:$0xff]  ;;  %v295_v38 = vunpack.c.l.b16 %v257_v33  ;;  %v296_v39 = vunpack.c.h.b16 %v257_v33  ;;  %v937_v40 = vld [vmem:[%s1298_s8] sm:$0xff] }
  0x35   : > { %412 = vmatpush.bf16.msra.mxu1 %v950_v10  ;;  %v957_v36 = vld [vmem:[%s1298_s8 + $0x88] sm:$0xff]  ;;  %v945_v41 = vld [vmem:[%s1298_s8 + $0x40] sm:$0xff] }
  0x36   : > { %584 = vmatpush.bf16.msra.mxu2 %v961_v11  ;;  %v965_v37 = vld [vmem:[%s1298_s8 + $0xc8] sm:$0xff]  ;;  %v956_v46 = vld [vmem:[%s1298_s8 + $0x80] sm:$0xff]  ;;  %v297_v48 = vpack.c.b16 %v295_v38, %v295_v38  ;;  %v298_v49 = vpack.c.b16 %v296_v39, %v296_v39 }
  0x37   : > { %597 = vmatpush.bf16.msra.mxu3 %v969_v12  ;;  %v964_v47 = vld [vmem:[%s1298_s8 + $0xc0] sm:$0xff] }
  0x38   : > { %400 = vmatpush.bf16.msra.mxu0 %v941_v13  ;;  %v256_v55 = vld [vmem:[#allocation2] sm:$0xff] }
  0x39   : > { %413 = vmatpush.bf16.msra.mxu1 %v949_v14 }
  0x3a   : > { %585 = vmatpush.bf16.msra.mxu2 %v960_v15 }
  0x3b   : > { %598 = vmatpush.bf16.msra.mxu3 %v968_v16 }
  0x3c   : > { %401 = vmatpush.bf16.msra.mxu0 %v940_v19 }
  0x3d   : > { %414 = vmatpush.bf16.msra.mxu1 %v948_v20 }
  0x3e   : > { %586 = vmatpush.bf16.msra.mxu2 %v959_v22 }
  0x3f   : > { %599 = vmatpush.bf16.msra.mxu3 %v967_v23 }
  0x40   : > { %402 = vmatpush.bf16.msra.mxu0 %v939_v25 }
  0x41   : > { %415 = vmatpush.bf16.msra.mxu1 %v947_v26 }
  0x42   : > { %587 = vmatpush.bf16.msra.mxu2 %v958_v29 }
  0x43   : > { %600 = vmatpush.bf16.msra.mxu3 %v966_v30 }
  0x44   : > { %403 = vmatpush.bf16.msra.mxu0 %v938_v31 }
  0x45   : > { %416 = vmatpush.bf16.msra.mxu1 %v946_v32 }
  0x46   : > { %588 = vmatpush.bf16.msra.mxu2 %v957_v36 }
  0x47   : > { %601 = vmatpush.bf16.msra.mxu3 %v965_v37 }
  0x48   : > { %404 = vmatpush.bf16.msra.mxu0 %v937_v40 }
  0x49   : > { %417 = vmatpush.bf16.msra.mxu1 %v945_v41 }
  0x4a   : > { %589 = vmatpush.bf16.msra.mxu2 %v956_v46 }
  0x4b   : > { %602 = vmatpush.bf16.msra.mxu3 %v964_v47  ;;  %405 = vmatmul.bf16.vlgmr.msra.gmra.mxu0 %v297_v48 }
  0x4c   : > { %418 = vmatmul.bf16.vlgmr.msra.gmra.mxu1 %v298_v49 }
  0x4d   : > { %590 = vmatmul.bf16.vlgmr.msra.gmra.mxu2 %v476_v50 }
  0x4e   : > { %603 = vmatmul.bf16.vlgmr.msra.gmra.mxu3 %v483_v51 }
  0xc8   : > { %v406_v52 = vpop.f32.mrf.mxu0 }
  0xc9   : > { %v419_v53 = vpop.f32.mrf.mxu1 }
  0xca   : > { %v420_v54 = vadd.f32 %v419_v53, %v406_v52 }
  0xcc   : > { %v423_v56 = vadd.f32 %v420_v54, %v256_v55 }
  0xd0   : > { %v591_v57 = vpop.f32.mrf.mxu2  ;;  %v408_v60 = vpop.f32.mrf.mxu0 }
  0xd1   : > { %v604_v58 = vpop.f32.mrf.mxu3  ;;  %v421_v61 = vpop.f32.mrf.mxu1 }
  0xd2   : > { %v605_v59 = vadd.f32 %v604_v58, %v591_v57 }
  0xd4   : > { %v608_v62 = vadd.f32 %v605_v59, %v423_v56 }
  0xd5   : > { %613 = sbr.rel (%p932_p13) target bundleno = 224 (0xe0), region = 48 }
  0xd6   : > { %609 = vst [vmem:[#allocation2] sm:$0xff] %v608_v62 }
  0xd8   : > { %v593_v63 = vpop.f32.mrf.mxu2 }
  0xd9   : > { %v606_v0 = vpop.f32.mrf.mxu3 }
  0xda   : > { %v1053_v1 = vld [vmem:[#allocation5] ss:$0 sm:$0xff] }
  0xdb   : > { %v618_v2 = vadd.f32 %v1053_v1, %v608_v62 }
  0xdd   : > { %v619_v3 = vpack.c.bf16 %v618_v2, %v618_v2 }
  0xdf   : > { %620 = vst [vmem:[%s1294_s6] sm:$0xf] %v619_v3 }
  0xe0 PF: > { %s15_s18 = sadd.s32 1, %s1176_s18   ;;  %s1366_s12 = smov %s1164_s15 }
  0xe1   : > { %p12_p0 = scmp.ge.s32.totalorder %s15_s18, 34   ;;  %s1367_s13 = smov %s1168_s16 }
  0xe2   : > { %s1368_s14 = smov %s1172_s17  ;;  %s1369_s15 = smov %s1373_s20 }
  0xe3   : > { %s1370_s16 = smov %s1377_s21  ;;  %s1371_s17 = smov %s1381_s22 }
  0xe4   :  { %14 = sbr.rel (!%p12_p0) target bundleno = 5 (0x5), region = 81 }
  0xe9   :  { %648 = vsyncpa [#allocation4], 1 }
  0xea   :  { %650 = vsyncpa [#allocation4 + $0x1], 1 }
  0xeb   :  { %651 = vsyncpa [#allocation6], 1 }

// kernel: _lambda_.10
= control target key start
LH: loop header
LB: loop body
LE: loop exit
PB: predicated region body
PF: predicated region fallthrough
CT: control target
= control target key end

     0   :  { %s465_s6 = smov 0   ;;  %s467_s7 = smov 0   ;;  %s505_s0 = inlined_call_operand.vmem [shape: bf16[2,64,128], index: 0, kind: input, shape index: {}]   ;;  %s506_s1 = inlined_call_operand.vmem [shape: bf16[2,64,128], index: 1, kind: output, shape index: {}]  }
   0x1   :  { %s469_s8 = smov 0  }
   0x2 LB: > { %s23_s9 = sadd.s32 1, %s449_s7  ;;  %p354_p0 = scmp.ge.s32.totalorder %s453_s8, 1  ;;  %s453_s8 = sphi %s469_s8, %s11_s8   ;;  %s449_s7 = sphi %s467_s7, %s508_s7   ;;  %s445_s6 = sphi %s465_s6, %s507_s6  }
   0x3   : > { %p25_p1 = scmp.ge.s32.totalorder %s23_s9, 2  ;;  %p106_p2 = scmp.lt.s32.totalorder %s453_s8, 3 }
   0x5   : > { %s510_s9 = smov (%p25_p1, %s23_s9), 0  ;;  %p107_p3 = pnand %p354_p0, %p106_p2 }
   0x6   : > { %p132_p4 = scmp.lt.s32.totalorder (!%p107_p3), %s445_s6, 1 }
   0x7   : > { %110 = sbr.rel (%p107_p3) target bundleno = 111 (0x6f), region = 24 }
   0xc   : > { %s512_s6 = smov (!%p132_p4, %s445_s6), 1 }
   0xd   : > { %s361_s10 = sshll.u32 %s512_s6, 5 }
   0xe   : > { %s139_s13 = scalar_lea.vmem %s505_s0, %s361_s10  ;;  %s147_s16 = scalar_lea.vmem %s506_s1, %s361_s10 }
   0xf   : > { %v364_v0 = vld [vmem:[%s139_s13] sm:$0xff]   ;;  %v399_v1 = vld [vmem:[%s139_s13 + $0x8] sm:$0xff]   ;;  %v400_v5 = vld [vmem:[%s139_s13 + $0x10] sm:$0xff]  }
  0x10   : > { %v365_v2 = vunpack.c.l.bf16 %v364_v0  ;;  %v366_v3 = vunpack.c.h.bf16 %v364_v0  ;;  %v369_v4 = vunpack.c.l.bf16 %v399_v1  ;;  %v370_v6 = vunpack.c.h.bf16 %v399_v1  ;;  %v401_v10 = vld [vmem:[%s139_s13 + $0x18] sm:$0xff]  }
  0x11   : > { %v373_v8 = vunpack.c.l.bf16 %v400_v5  ;;  %v374_v11 = vunpack.c.h.bf16 %v400_v5  ;;  %v377_v13 = vunpack.c.l.bf16 %v401_v10  ;;  %v378_v15 = vunpack.c.h.bf16 %v401_v10 }
  0x12   : > { %v164_v7 = vadd.f32 %v366_v3, %v365_v2 }
  0x14   : > { %v165_v9 = vadd.f32 %v369_v4, %v164_v7 }
  0x16   : > { %v166_v12 = vadd.f32 %v370_v6, %v165_v9 }
  0x18   : > { %v167_v14 = vadd.f32 %v373_v8, %v166_v12 }
  0x1a   : > { %v168_v16 = vadd.f32 %v374_v11, %v167_v14 }
  0x1c   : > { %v169_v17 = vadd.f32 %v377_v13, %v168_v16 }
  0x1e   : > { %v170_v18 = vadd.f32 %v378_v15, %v169_v17 }
  0x20   : > { %v171_v19 = vrot.slane %v170_v18, 4 }
  0x22   : > { %v172_v20 = vadd.f32 %v171_v19, %v170_v18 }
  0x24   : > { %v173_v21 = vrot.slane %v172_v20, 2 }
  0x26   : > { %v174_v22 = vadd.f32 %v173_v21, %v172_v20 }
  0x28   : > { %v175_v23 = vrot.slane %v174_v22, 1 }
  0x2a   : > { %v176_v24 = vadd.f32 %v175_v23, %v174_v22 }
  0x2c   : > { %v177_v25 = vmul.f32 0.015625, %v176_v24 }
  0x2e   : > { %v178_v26 = vsub.f32 %v365_v2, %v177_v25  ;;  %v179_v27 = vsub.f32 %v366_v3, %v177_v25  ;;  %v180_v28 = vsub.f32 %v369_v4, %v177_v25  ;;  %v181_v29 = vsub.f32 %v370_v6, %v177_v25 }
  0x2f   : > { %v182_v30 = vsub.f32 %v373_v8, %v177_v25  ;;  %v183_v34 = vsub.f32 %v374_v11, %v177_v25  ;;  %v184_v37 = vsub.f32 %v377_v13, %v177_v25  ;;  %v185_v40 = vsub.f32 %v378_v15, %v177_v25 }
  0x30   : > { %v186_v31 = vmul.f32 %v178_v26, %v178_v26  ;;  %v187_v32 = vmul.f32 %v179_v27, %v179_v27  ;;  %v188_v33 = vmul.f32 %v180_v28, %v180_v28  ;;  %v189_v35 = vmul.f32 %v181_v29, %v181_v29 }
  0x31   : > { %v190_v38 = vmul.f32 %v182_v30, %v182_v30  ;;  %v191_v41 = vmul.f32 %v183_v34, %v183_v34  ;;  %v192_v43 = vmul.f32 %v184_v37, %v184_v37  ;;  %v193_v45 = vmul.f32 %v185_v40, %v185_v40 }
  0x32   : > { %v194_v36 = vadd.f32 %v187_v32, %v186_v31 }
  0x34   : > { %v195_v39 = vadd.f32 %v194_v36, %v188_v33 }
  0x36   : > { %v196_v42 = vadd.f32 %v195_v39, %v189_v35 }
  0x38   : > { %v197_v44 = vadd.f32 %v196_v42, %v190_v38 }
  0x3a   : > { %v198_v46 = vadd.f32 %v197_v44, %v191_v41 }
  0x3c   : > { %v199_v47 = vadd.f32 %v198_v46, %v192_v43 }
  0x3e   : > { %v200_v48 = vadd.f32 %v199_v47, %v193_v45 }
  0x40   : > { %v201_v49 = vrot.slane %v200_v48, 4 }
  0x42   : > { %v202_v50 = vadd.f32 %v201_v49, %v200_v48 }
  0x44   : > { %v203_v51 = vrot.slane %v202_v50, 2 }
  0x46   : > { %v204_v52 = vadd.f32 %v203_v51, %v202_v50 }
  0x48   : > { %v205_v53 = vrot.slane %v204_v52, 1 }
  0x4a   : > { %v206_v54 = vadd.f32 %v205_v53, %v204_v52 }
  0x4c   : > { %v207_v55 = vmul.f32 0.015625, %v206_v54 }
  0x4e   : > { %v208_v56 = vadd.f32 1e-05, %v207_v55 }
  0x50   : > { %429 = vrsqrt.f32 %v208_v56  ;;  %vm215_vm0 = vweird.f32 %v208_v56 }
  0x56   : > { %v430_v57 = vpop.eup %429 }
  0x57   : > { %v210_v58 = vmul.f32 %v430_v57, %v208_v56  ;;  %vm216_vm1 = vweird.f32 %v430_v57 }
  0x58   : > { %vm217_vm2 = vmor %vm215_vm0, %vm216_vm1 }
  0x59   : > { %v211_v59 = vmul.f32 %v430_v57, %v210_v58 }
  0x5b   : > { %v212_v60 = vmul.f32 0.5, %v211_v59 }
  0x5d   : > { %v213_v61 = vsub.f32 1.5, %v212_v60 }
  0x5f   : > { %v214_v62 = vmul.f32 %v430_v57, %v213_v61 }
  0x61   : > { %v218_v63 = vsel %vm217_vm2, %v430_v57, %v214_v62 }
  0x62   : > { %v219_v0 = vmul.f32 %v218_v63, %v178_v26  ;;  %v220_v1 = vmul.f32 %v218_v63, %v179_v27  ;;  %v221_v2 = vmul.f32 %v218_v63, %v180_v28  ;;  %v222_v3 = vmul.f32 %v218_v63, %v181_v29 }
  0x63   : > { %v223_v4 = vmul.f32 %v218_v63, %v182_v30  ;;  %v224_v5 = vmul.f32 %v218_v63, %v183_v34  ;;  %v225_v6 = vmul.f32 %v218_v63, %v184_v37  ;;  %v226_v7 = vmul.f32 %v218_v63, %v185_v40 }
  0x64   : > { %vm227_vm3 = vcmp.gt.f32.partialorder %v219_v0, 0.0  ;;  %vm228_vm4 = vcmp.gt.f32.partialorder %v220_v1, 0.0  ;;  %v235_v8 = vmul.f32 0.2, %v219_v0  ;;  %v236_v9 = vmul.f32 0.2, %v220_v1 }
  0x65   : > { %vm229_vm5 = vcmp.gt.f32.partialorder %v221_v2, 0.0  ;;  %vm230_vm6 = vcmp.gt.f32.partialorder %v222_v3, 0.0  ;;  %v237_v10 = vmul.f32 0.2, %v221_v2  ;;  %v238_v11 = vmul.f32 0.2, %v222_v3 }
  0x66   : > { %v243_v12 = vsel %vm227_vm3, %v219_v0, %v235_v8  ;;  %v244_v13 = vsel %vm228_vm4, %v220_v1, %v236_v9  ;;  %vm231_vm7 = vcmp.gt.f32.partialorder %v223_v4, 0.0  ;;  %vm232_vm8 = vcmp.gt.f32.partialorder %v224_v5, 0.0 }
  0x67   : > { %v382_v14 = vpack.c.bf16 %v244_v13, %v243_v12  ;;  %v245_v15 = vsel %vm229_vm5, %v221_v2, %v237_v10  ;;  %v246_v16 = vsel %vm230_vm6, %v222_v3, %v238_v11  ;;  %v239_v17 = vmul.f32 0.2, %v223_v4 }
  0x68   : > { %v387_v18 = vpack.c.bf16 %v246_v16, %v245_v15  ;;  %v240_v19 = vmul.f32 0.2, %v224_v5  ;;  %vm233_vm9 = vcmp.gt.f32.partialorder %v225_v6, 0.0  ;;  %vm234_vm10 = vcmp.gt.f32.partialorder %v226_v7, 0.0 }
  0x69   : > { %383 = vst [vmem:[%s147_s16] sm:$0xff] %v382_v14   ;;  %v247_v20 = vsel %vm231_vm7, %v223_v4, %v239_v17  ;;  %v241_v21 = vmul.f32 0.2, %v225_v6  ;;  %v242_v22 = vmul.f32 0.2, %v226_v7 }
  0x6a   : > { %402 = vst [vmem:[%s147_s16 + $0x8] sm:$0xff] %v387_v18   ;;  %v248_v23 = vsel %vm232_vm8, %v224_v5, %v240_v19 }
  0x6b   : > { %v392_v24 = vpack.c.bf16 %v248_v23, %v247_v20  ;;  %v249_v25 = vsel %vm233_vm9, %v225_v6, %v241_v21  ;;  %v250_v26 = vsel %vm234_vm10, %v226_v7, %v242_v22 }
  0x6c   : > { %v397_v27 = vpack.c.bf16 %v250_v26, %v249_v25 }
  0x6d   : > { %403 = vst [vmem:[%s147_s16 + $0x10] sm:$0xff] %v392_v24  }
  0x6e   : > { %404 = vst [vmem:[%s147_s16 + $0x18] sm:$0xff] %v397_v27  }
  0x6f PF: > { %s11_s8 = sadd.s32 1, %s453_s8   ;;  %s507_s6 = smov %s449_s7 }
  0x70   : > { %p8_p5 = scmp.ge.s32.totalorder %s11_s8, 4   ;;  %s508_s7 = smov %s510_s9 }
  0x72   :  { %10 = sbr.rel (!%p8_p5) target bundleno = 2 (0x2), region = 54 }

// kernel: _lambda_.12
= control target key start
LH: loop header
LB: loop body
LE: loop exit
PB: predicated region body
PF: predicated region fallthrough
CT: control target
= control target key end

     0   :  { %s499_s6 = smov 0   ;;  %s501_s7 = smov 0   ;;  %s599_s0 = inlined_call_operand.vmem [shape: bf16[2,16,256], index: 0, kind: input, shape index: {}]   ;;  %s600_s1 = inlined_call_operand.vmem [shape: bf16[2,16,256], index: 1, kind: output, shape index: {}]  }
   0x1   :  { %s503_s8 = smov 0   ;;  %s505_s9 = smov 0  }
   0x2   :  { %s507_s10 = smov 0   ;;  %s509_s11 = smov 0  }
   0x3   :  { %s511_s12 = smov 0  }
   0x4 LB: > { %s20_s13 = sadd.s32 1, %s479_s10  ;;  %s23_s14 = sadd.s32 1, %s483_s11  ;;  %s487_s12 = sphi %s511_s12, %s11_s12   ;;  %s483_s11 = sphi %s509_s11, %s607_s11   ;;  %s479_s10 = sphi %s507_s10, %s606_s10   ;;  %s475_s9 = sphi %s505_s9, %s605_s9   ;;  %s471_s8 = sphi %s503_s8, %s604_s8   ;;  %s467_s7 = sphi %s501_s7, %s603_s7   ;;  %s463_s6 = sphi %s499_s6, %s602_s6  }
   0x5   : > { %p21_p0 = scmp.ge.s32.totalorder %s20_s13, 2  ;;  %s351_s15 = sadd.s32 4294967295, %s487_s12  }
   0x6   : > { %p39_p1 = scmp.ne.s32.totalorder %s467_s7, %s463_s6  ;;  %p40_p2 = scmp.eq.s32.totalorder %s487_s12, 0 }
   0x7   : > { %s609_s13 = smov (%p21_p0, %s20_s13), 0  ;;  %s611_s14 = smov (!%p21_p0, %s23_s14), %s483_s11 }
   0x8   : > { %p25_p3 = scmp.ge.s32.totalorder %s611_s14, 2  ;;  %p71_p4 = scmp.eq.s32.totalorder %s351_s15, 3 }
   0x9   : > { %s28_s16 = ssub.s32 %s479_s10, %s609_s13  ;;  %p41_p5 = por %p40_p2, %p39_p1 }
   0xa   : > { %s613_s14 = smov (%p25_p3, %s611_s14), 0  ;;  %p547_p6 = por %p71_p4, %p39_p1 }
   0xb   : > { %s27_s18 = ssub.s32 %s483_s11, %s613_s14  ;;  %s32_s20 = sadd.s32 1, %s467_s7 }
   0xc   : > { %s29_s19 = sor.u32 %s28_s16, %s27_s18  ;;  %p354_p8 = scmp.ge.s32.totalorder %s487_s12, 4 }
   0xd   : > { %p30_p7 = scmp.eq.s32.totalorder %s29_s19, 0 }
   0xe   : > { %93 = sbr.rel (%p354_p8) target bundleno = 27 (0x1b), region = 16 }
   0xf   : > { %s555_s21 = scalar_select %p30_p7, %s467_s7, %s32_s20  }
  0x13   : > { %96 = sbr.rel (!%p41_p5) target bundleno = 27 (0x1b), region = 20  ;;  %s98_s22 = sand.u32 (%p41_p5), 1, %s467_s7  }
  0x14   : > { %s356_s23 = sshll.u32 (%p41_p5), %s483_s11, 2  ;;  %s355_s24 = sshll.u32 (%p41_p5), %s98_s22, 3 }
  0x15   : > { %s102_s25 = sadd.s32 (%p41_p5), %s479_s10, %s356_s23  ;;  %s100_s30 = scalar_lea.vmem (%p41_p5), [#allocation2], %s355_s24 }
  0x16   : > { %s357_s26 = sshll.u32 (%p41_p5), %s102_s25, 2 }
  0x17   : > { %s104_s29 = scalar_lea.vmem (%p41_p5), %s599_s0, %s357_s26 }
  0x18   : > { %v121_v0 = vld [vmem:[%s104_s29] sm:$0xf]  ;;  %v123_v1 = vld [vmem:[%s104_s29 + $0x8] sm:$0xf] }
  0x19   : > { %122 = vst [vmem:[%s100_s30] sm:$0xf] %v121_v0 }
  0x1a   : > { %124 = vst [vmem:[%s100_s30 + $0x4] sm:$0xf] %v123_v1 }
  0x1b PF: > { %p358_p9 = scmp.ge.s32.totalorder %s487_s12, 1  ;;  %p151_p10 = scmp.lt.s32.totalorder %s487_s12, 5 }
  0x1d   : > { %p152_p11 = pnand %p358_p9, %p151_p10 }
  0x1e   : > { %s158_s2 = sand.u32 (!%p152_p11), 1, %s463_s6  }
  0x1f   : > { %155 = sbr.rel (%p152_p11) target bundleno = 112 (0x70), region = 61  ;;  %s567_s3 = sshll.u32 (!%p152_p11), %s158_s2, 3 }
  0x20   : > { %s160_s4 = scalar_lea.vmem (!%p152_p11), [#allocation2], %s567_s3  ;;  %s175_s5 = scalar_lea.vmem (!%p152_p11), [#allocation3], %s567_s3 }
  0x24   : > { %v367_v2 = vld [vmem:[%s160_s4] sm:$0xff]   ;;  %s362_s6 = sshll.u32 (%p547_p6), %s475_s9, 2 }
  0x25   : > { %v368_v3 = vunpack.c.l.bf16 %v367_v2  ;;  %v369_v4 = vunpack.c.h.bf16 %v367_v2  ;;  %s231_s15 = sadd.s32 (%p547_p6), %s471_s8, %s362_s6 }
  0x26   : > { %s363_s16 = sshll.u32 (%p547_p6), %s231_s15, 2 }
  0x27   : > { %v180_v5 = vadd.f32 %v369_v4, %v368_v3  ;;  %s233_s20 = scalar_lea.vmem (%p547_p6), %s600_s1, %s363_s16 }
  0x29   : > { %v181_v6 = vrot.slane %v180_v5, 4 }
  0x2b   : > { %v182_v7 = vadd.f32 %v181_v6, %v180_v5 }
  0x2d   : > { %v183_v8 = vrot.slane %v182_v7, 2 }
  0x2f   : > { %v184_v9 = vadd.f32 %v183_v8, %v182_v7 }
  0x31   : > { %v185_v10 = vrot.slane %v184_v9, 1 }
  0x33   : > { %v186_v11 = vadd.f32 %v185_v10, %v184_v9 }
  0x35   : > { %v187_v12 = vmul.f32 0.0625, %v186_v11 }
  0x37   : > { %v188_v13 = vsub.f32 %v368_v3, %v187_v12  ;;  %v189_v14 = vsub.f32 %v369_v4, %v187_v12 }
  0x39   : > { %v190_v15 = vmul.f32 %v188_v13, %v188_v13  ;;  %v191_v16 = vmul.f32 %v189_v14, %v189_v14 }
  0x3b   : > { %v192_v17 = vadd.f32 %v191_v16, %v190_v15 }
  0x3d   : > { %v193_v18 = vrot.slane %v192_v17, 4 }
  0x3f   : > { %v194_v19 = vadd.f32 %v193_v18, %v192_v17 }
  0x41   : > { %v195_v20 = vrot.slane %v194_v19, 2 }
  0x43   : > { %v196_v21 = vadd.f32 %v195_v20, %v194_v19 }
  0x45   : > { %v197_v22 = vrot.slane %v196_v21, 1 }
  0x47   : > { %v198_v23 = vadd.f32 %v197_v22, %v196_v21 }
  0x49   : > { %v199_v24 = vmul.f32 0.0625, %v198_v23 }
  0x4b   : > { %v200_v25 = vadd.f32 1e-05, %v199_v24 }
  0x4d   : > { %431 = vrsqrt.f32 %v200_v25  ;;  %vm207_vm0 = vweird.f32 %v200_v25 }
  0x53   : > { %v432_v26 = vpop.eup %431 }
  0x54   : > { %v202_v27 = vmul.f32 %v432_v26, %v200_v25  ;;  %vm208_vm1 = vweird.f32 %v432_v26 }
  0x55   : > { %vm209_vm2 = vmor %vm207_vm0, %vm208_vm1 }
  0x56   : > { %v203_v28 = vmul.f32 %v432_v26, %v202_v27 }
  0x58   : > { %v204_v29 = vmul.f32 0.5, %v203_v28 }
  0x5a   : > { %v205_v30 = vsub.f32 1.5, %v204_v29 }
  0x5c   : > { %v206_v31 = vmul.f32 %v432_v26, %v205_v30 }
  0x5e   : > { %v210_v32 = vsel %vm209_vm2, %v432_v26, %v206_v31 }
  0x5f   : > { %v211_v33 = vmul.f32 %v210_v32, %v188_v13  ;;  %v212_v34 = vmul.f32 %v210_v32, %v189_v14 }
  0x61   : > { %vm213_vm3 = vcmp.gt.f32.partialorder %v211_v33, 0.0  ;;  %vm214_vm4 = vcmp.gt.f32.partialorder %v212_v34, 0.0  ;;  %v215_v35 = vmul.f32 0.2, %v211_v33  ;;  %v216_v36 = vmul.f32 0.2, %v212_v34 }
  0x62   : > { %229 = sbr.rel (!%p547_p6) target bundleno = 112 (0x70), region = 69 }
  0x63   : > { %v217_v37 = vsel %vm213_vm3, %v211_v33, %v215_v35  ;;  %v218_v38 = vsel %vm214_vm4, %v212_v34, %v216_v36 }
  0x64   : > { %v373_v39 = vpack.c.bf16 %v218_v38, %v217_v37 }
  0x66   : > { %374 = vst [vmem:[%s175_s5] sm:$0xff] %v373_v39  }
  0x6d   : > { %v250_v40 = vld [vmem:[%s175_s5] sm:$0xf]  ;;  %v252_v41 = vld [vmem:[%s175_s5 + $0x4] sm:$0xf] }
  0x6e   : > { %251 = vst [vmem:[%s233_s20] sm:$0xf] %v250_v40 }
  0x6f   : > { %253 = vst [vmem:[%s233_s20 + $0x8] sm:$0xf] %v252_v41 }
  0x70 PF: > { %s11_s12 = sadd.s32 1, %s487_s12   ;;  %s602_s6 = smov %s467_s7 }
  0x71   : > { %p8_p12 = scmp.ge.s32.totalorder %s11_s12, 6   ;;  %s603_s7 = smov %s555_s21 }
  0x72   : > { %s604_s8 = smov %s479_s10  ;;  %s605_s9 = smov %s483_s11 }
  0x73   : > { %s606_s10 = smov %s609_s13  ;;  %s607_s11 = smov %s613_s14 }
  0x74   :  { %10 = sbr.rel (!%p8_p12) target bundleno = 4 (0x4), region = 141 }

// kernel: _lambda_.14
= control target key start
LH: loop header
LB: loop body
LE: loop exit
PB: predicated region body
PF: predicated region fallthrough
CT: control target
= control target key end

     0   :  { %s498_s6 = smov 0   ;;  %s500_s7 = smov 0   ;;  %s601_s0 = inlined_call_operand.vmem [shape: bf16[2,9,512], index: 0, kind: input, shape index: {}]   ;;  %s602_s1 = inlined_call_operand.vmem [shape: bf16[2,9,512], index: 1, kind: output, shape index: {}]  }
   0x1   :  { %s502_s8 = smov 0   ;;  %s504_s9 = smov 0  }
   0x2   :  { %s506_s10 = smov 0   ;;  %s508_s11 = smov 0  }
   0x3   :  { %s510_s12 = smov 0  }
   0x4 LB: > { %s20_s13 = sadd.s32 1, %s478_s10  ;;  %s23_s14 = sadd.s32 1, %s482_s11  ;;  %s486_s12 = sphi %s510_s12, %s11_s12   ;;  %s482_s11 = sphi %s508_s11, %s609_s11   ;;  %s478_s10 = sphi %s506_s10, %s608_s10   ;;  %s474_s9 = sphi %s504_s9, %s607_s9   ;;  %s470_s8 = sphi %s502_s8, %s606_s8   ;;  %s466_s7 = sphi %s500_s7, %s605_s7   ;;  %s462_s6 = sphi %s498_s6, %s604_s6  }
   0x5   : > { %p21_p0 = scmp.ge.s32.totalorder %s20_s13, 4  ;;  %s359_s15 = sadd.s32 4294967295, %s486_s12  }
   0x6   : > { %p39_p1 = scmp.ne.s32.totalorder %s466_s7, %s462_s6  ;;  %p40_p2 = scmp.eq.s32.totalorder %s486_s12, 0 }
   0x7   : > { %s611_s13 = smov (%p21_p0, %s20_s13), 0  ;;  %s613_s14 = smov (!%p21_p0, %s23_s14), %s482_s11 }
   0x8   : > { %p25_p3 = scmp.ge.s32.totalorder %s613_s14, 2  ;;  %p71_p4 = scmp.eq.s32.totalorder %s359_s15, 7 }
   0x9   : > { %s28_s16 = ssub.s32 %s478_s10, %s611_s13  ;;  %p41_p5 = por %p40_p2, %p39_p1 }
   0xa   : > { %s615_s14 = smov (%p25_p3, %s613_s14), 0  ;;  %p546_p6 = por %p71_p4, %p39_p1 }
   0xb   : > { %s27_s18 = ssub.s32 %s482_s11, %s615_s14  ;;  %s32_s20 = sadd.s32 1, %s466_s7 }
   0xc   : > { %s29_s19 = sor.u32 %s28_s16, %s27_s18  ;;  %p362_p8 = scmp.ge.s32.totalorder %s486_s12, 8 }
   0xd   : > { %p30_p7 = scmp.eq.s32.totalorder %s29_s19, 0 }
   0xe   : > { %93 = sbr.rel (%p362_p8) target bundleno = 27 (0x1b), region = 16 }
   0xf   : > { %s554_s21 = scalar_select %p30_p7, %s466_s7, %s32_s20  }
  0x13   : > { %96 = sbr.rel (!%p41_p5) target bundleno = 27 (0x1b), region = 20  ;;  %s98_s22 = sand.u32 (%p41_p5), 1, %s466_s7  }
  0x14   : > { %s364_s23 = sshll.u32 (%p41_p5), %s482_s11, 3  ;;  %s363_s24 = sshll.u32 (%p41_p5), %s98_s22, 3 }
  0x15   : > { %s102_s25 = sadd.s32 (%p41_p5), %s478_s10, %s364_s23  ;;  %s100_s30 = scalar_lea.vmem (%p41_p5), [#allocation2], %s363_s24 }
  0x16   : > { %s365_s26 = sshll.u32 (%p41_p5), %s102_s25, 2 }
  0x17   : > { %s104_s29 = scalar_lea.vmem (%p41_p5), %s601_s0, %s365_s26 }
  0x18   : > { %v121_v0 = vld [vmem:[%s104_s29] sm:$0xf]  ;;  %v123_v1 = vld [vmem:[%s104_s29 + $0x10] sm:$0xf] }
  0x19   : > { %122 = vst [vmem:[%s100_s30] sm:$0xf] %v121_v0 }
  0x1a   : > { %124 = vst [vmem:[%s100_s30 + $0x4] sm:$0xf] %v123_v1 }
  0x1b PF: > { %p366_p9 = scmp.ge.s32.totalorder %s486_s12, 1  ;;  %p151_p10 = scmp.lt.s32.totalorder %s486_s12, 9 }
  0x1d   : > { %p152_p11 = pnand %p366_p9, %p151_p10 }
  0x1e   : > { %s158_s2 = sand.u32 (!%p152_p11), 1, %s462_s6  }
  0x1f   : > { %155 = sbr.rel (%p152_p11) target bundleno = 114 (0x72), region = 61  ;;  %s566_s3 = sshll.u32 (!%p152_p11), %s158_s2, 3 }
  0x20   : > { %s160_s4 = scalar_lea.vmem (!%p152_p11), [#allocation2], %s566_s3  ;;  %s175_s5 = scalar_lea.vmem (!%p152_p11), [#allocation3], %s566_s3 }
  0x24   : > { %v176_v2 = vld [vmem:[%s160_s4] sm:$0xf]  ;;  %v177_v3 = vld [vmem:[%s160_s4 + $0x4] sm:$0x1]  ;;  %vm180_vm0 = vcmask 1040384   ;;  %s370_s6 = sshll.u32 (%p546_p6), %s474_s9, 3 }
  0x25   : > { %v178_v4 = vunpack.c.l.bf16 %v176_v2  ;;  %v179_v5 = vunpack.c.l.bf16 %v177_v3  ;;  %vm226_vm4 = vsmask.f32 256  ;;  %v228_v42 = vld [vmem:[%s175_s5 + $0x4] sm:$0x1]  ;;  %s239_s15 = sadd.s32 (%p546_p6), %s470_s8, %s370_s6 }
  0x26   : > { %vm227_vm7 = vmand %vm180_vm0, %vm226_vm4  ;;  %s371_s16 = sshll.u32 (%p546_p6), %s239_s15, 2 }
  0x27   : > { %v181_v6 = vsel %vm180_vm0, %v179_v5, 0.0  ;;  %s241_s20 = scalar_lea.vmem (%p546_p6), %s602_s1, %s371_s16 }
  0x28   : > { %v182_v7 = vadd.f32 %v181_v6, %v178_v4 }
  0x2a   : > { %v183_v8 = vrot.slane %v182_v7, 4 }
  0x2c   : > { %v184_v9 = vadd.f32 %v183_v8, %v182_v7 }
  0x2e   : > { %v185_v10 = vrot.slane %v184_v9, 2 }
  0x30   : > { %v186_v11 = vadd.f32 %v185_v10, %v184_v9 }
  0x32   : > { %v187_v12 = vrot.slane %v186_v11, 1 }
  0x34   : > { %v188_v13 = vadd.f32 %v187_v12, %v186_v11 }
  0x36   : > { %v189_v14 = vmul.f32 0.11111111, %v188_v13 }
  0x38   : > { %v190_v15 = vsub.f32 %v178_v4, %v189_v14  ;;  %v191_v16 = vsub.f32 %v179_v5, %v189_v14 }
  0x3a   : > { %v192_v17 = vmul.f32 %v190_v15, %v190_v15  ;;  %v193_v18 = vmul.f32 %v191_v16, %v191_v16 }
  0x3c   : > { %v194_v19 = vsel %vm180_vm0, %v193_v18, 0.0 }
  0x3d   : > { %v195_v20 = vadd.f32 %v194_v19, %v192_v17 }
  0x3f   : > { %v196_v21 = vrot.slane %v195_v20, 4 }
  0x41   : > { %v197_v22 = vadd.f32 %v196_v21, %v195_v20 }
  0x43   : > { %v198_v23 = vrot.slane %v197_v22, 2 }
  0x45   : > { %v199_v24 = vadd.f32 %v198_v23, %v197_v22 }
  0x47   : > { %v200_v25 = vrot.slane %v199_v24, 1 }
  0x49   : > { %v201_v26 = vadd.f32 %v200_v25, %v199_v24 }
  0x4b   : > { %v202_v27 = vmul.f32 0.11111111, %v201_v26 }
  0x4d   : > { %v203_v28 = vadd.f32 1e-05, %v202_v27 }
  0x4f   : > { %430 = vrsqrt.f32 %v203_v28  ;;  %vm210_vm1 = vweird.f32 %v203_v28 }
  0x55   : > { %v431_v29 = vpop.eup %430 }
  0x56   : > { %v205_v30 = vmul.f32 %v431_v29, %v203_v28  ;;  %vm211_vm2 = vweird.f32 %v431_v29 }
  0x57   : > { %vm212_vm3 = vmor %vm210_vm1, %vm211_vm2 }
  0x58   : > { %v206_v31 = vmul.f32 %v431_v29, %v205_v30 }
  0x5a   : > { %v207_v32 = vmul.f32 0.5, %v206_v31 }
  0x5c   : > { %v208_v33 = vsub.f32 1.5, %v207_v32 }
  0x5e   : > { %v209_v34 = vmul.f32 %v431_v29, %v208_v33 }
  0x60   : > { %v213_v35 = vsel %vm212_vm3, %v431_v29, %v209_v34 }
  0x61   : > { %v214_v36 = vmul.f32 %v213_v35, %v190_v15  ;;  %v215_v37 = vmul.f32 %v213_v35, %v191_v16 }
  0x63   : > { %vm216_vm5 = vcmp.gt.f32.partialorder %v214_v36, 0.0  ;;  %v218_v38 = vmul.f32 0.2, %v214_v36  ;;  %vm217_vm6 = vcmp.gt.f32.partialorder %v215_v37, 0.0  ;;  %v219_v39 = vmul.f32 0.2, %v215_v37 }
  0x65   : > { %v220_v40 = vsel %vm216_vm5, %v214_v36, %v218_v38  ;;  %v221_v41 = vsel %vm217_vm6, %v215_v37, %v219_v39  ;;  %237 = sbr.rel (!%p546_p6) target bundleno = 114 (0x72), region = 69 }
  0x66   : > { %v222_v43 = vpack.c.bf16 %v220_v40, %v220_v40  ;;  %v223_v44 = vpack.c.bf16 %v221_v41, %v221_v41 }
  0x68   : > { %224 = vst [vmem:[%s175_s5] sm:$0xf] %v222_v43  ;;  %v229_v45 = vsel %vm227_vm7, %v223_v44, %v228_v42 }
  0x69   : > { %230 = vst [vmem:[%s175_s5 + $0x4] sm:$0x1] %v229_v45 }
  0x6f   : > { %v258_v46 = vld [vmem:[%s175_s5] sm:$0xf] }
  0x70   : > { %v260_v47 = vld [vmem:[%s175_s5 + $0x4] sm:$0xf]  ;;  %259 = vst [vmem:[%s241_s20] sm:$0xf] %v258_v46 }
  0x71   : > { %261 = vst [vmem:[%s241_s20 + $0x10] sm:$0xf] %v260_v47 }
  0x72 PF: > { %s11_s12 = sadd.s32 1, %s486_s12   ;;  %s604_s6 = smov %s466_s7 }
  0x73   : > { %p8_p12 = scmp.ge.s32.totalorder %s11_s12, 10   ;;  %s605_s7 = smov %s554_s21 }
  0x74   : > { %s606_s8 = smov %s478_s10  ;;  %s607_s9 = smov %s482_s11 }
  0x75   : > { %s608_s10 = smov %s611_s13  ;;  %s609_s11 = smov %s615_s14 }
  0x76   :  { %10 = sbr.rel (!%p8_p12) target bundleno = 4 (0x4), region = 141 }

// kernel: _lambda_.11
= control target key start
LH: loop header
LB: loop body
LE: loop exit
PB: predicated region body
PF: predicated region fallthrough
CT: control target
= control target key end

     0   :  { %8 = vsyncpa [#allocation4], 0  ;;  %s2362_s12 = smov 0   ;;  %s2364_s13 = smov 0   ;;  %s2789_s0 = inlined_call_operand.vmem [shape: bf16[2,5,5,512], index: 0, kind: input, shape index: {}]   ;;  %s2790_s1 = inlined_call_operand.hbm [shape: bf16[4,512,256], index: 1, kind: input, shape index: {}]   ;;  %s2791_s2 = inlined_call_operand.vmem [shape: f32[1,256], index: 2, kind: input, shape index: {}]   ;;  %s2792_s3 = inlined_call_operand.vmem [shape: bf16[2,4,4,256], index: 3, kind: output, shape index: {}]  }
   0x1   :  { %s2366_s14 = smov 0   ;;  %s2368_s15 = smov 0  }
   0x2   :  { %s2370_s16 = smov 0   ;;  %s2372_s17 = smov 0  }
   0x3   :  { %s2374_s18 = smov 0  }
   0x4 LB: > { %s1449_s19 = sadd.s32 4294967295, %s2336_s18   ;;  %s26_s20 = sadd.s32 1, %s2324_s15  ;;  %s2336_s18 = sphi %s2374_s18, %s14_s18   ;;  %s2332_s17 = sphi %s2372_s17, %s2800_s17   ;;  %s2328_s16 = sphi %s2370_s16, %s2799_s16   ;;  %s2324_s15 = sphi %s2368_s15, %s2798_s15   ;;  %s2320_s14 = sphi %s2366_s14, %s2797_s14   ;;  %s2316_s13 = sphi %s2364_s13, %s2796_s13   ;;  %s2312_s12 = sphi %s2362_s12, %s2795_s12  }
   0x5   : > { %p27_p0 = scmp.ge.s32.totalorder %s26_s20, 2  ;;  %s29_s21 = sadd.s32 1, %s2328_s16 }
   0x6   : > { %s33_s22 = sadd.s32 1, %s2332_s17  ;;  %p1451_p1 = scmp.ge.s32.totalorder %s2336_s18, 1 }
   0x7   : > { %s2802_s20 = smov (%p27_p0, %s26_s20), 0  ;;  %s2804_s21 = smov (!%p27_p0, %s29_s21), %s2328_s16 }
   0x8   : > { %p138_p2 = scmp.lt.s32.totalorder %s2336_s18, 17  ;;  %p31_p3 = scmp.ge.s32.totalorder %s2804_s21, 4 }
   0x9   : > { %p2406_p4 = scmp.eq.s32.totalorder %s1449_s19, 0  ;;  %s149_s27 = sshll.u32 %s2790_s1, 4  ;;  %s150_s27 = int_to_ptr.hbm [resolvable:$true] %s149_s27 }
   0xa   : > { %p2410_p5 = pnand %p1451_p1, %p138_p2  ;;  %s2806_s21 = smov (%p31_p3, %s2804_s21), 0 }
   0xb   : > { %s2808_s22 = smov (!%p31_p3, %s33_s22), %s2332_s17  ;;  %s2338_s28 = smov [#allocation3]  }
   0xc   : > { %p2182_p6 = pneg %p2410_p5  ;;  %p35_p7 = scmp.ge.s32.totalorder %s2808_s22, 2 }
   0xd   : > { %s151_s29 = sshll.u32 %s2338_s28, 4  ;;  %s2339_s30 = smov 128   ;;  %s152_s29 = int_to_ptr.vmem [resolvable:$true] %s151_s29 }
   0xe   : > { %p2183_p8 = pnand %p2406_p4, %p2182_p6  ;;  %s2810_s22 = smov (%p35_p7, %s2808_s22), 0 }
   0xf   : > { %s2340_s4 = smov 8   ;;  %184 = sbr.rel (%p2410_p5) target bundleno = 334 (0x14e), region = 32 }
  0x10   : > { %2185 = dma.hbm_to_vmem [thread:$0]  (!%p2183_p8), %s150_s27, 32768, %s152_s29, [#allocation4], %s2339_s30, %s2339_s30, %s2340_s4  }
  0x14   : > { %2307 = dma.done.wait (%p2406_p4), [#allocation4], 32768  }
  0x15   : > { %2309 = vsyncadd (%p2406_p4), [#allocation4], 4294934528  ;;  %s218_s5 = sadd.s32 %s2312_s12, %s2316_s13  ;;  %p219_p9 = scmp.lt.s32.totalorder %s2320_s14, 1 }
  0x16   : > { %p221_p10 = scmp.lt.s32.totalorder %s218_s5, 4  ;;  %p231_p11 = scmp.lt.s32.totalorder %s2316_s13, 3 }
  0x17   : > { %s2812_s14 = smov (!%p219_p9, %s2320_s14), 1  ;;  %p1461_p12 = scmp.ne.s32.totalorder %s2312_s12, 0 }
  0x18   : > { %s2814_s5 = smov (!%p221_p10, %s218_s5), 4  ;;  %s2177_s6 = smul.u32 20, %s2812_s14 }
  0x19   : > { %s1456_s7 = sshll.u32 %s2814_s5, 2  ;;  %s1459_s23 = sshll.u32 %s2812_s14, 3 }
  0x1a   : > { %s225_s8 = sadd.s32 %s2177_s6, %s1456_s7  ;;  %s2816_s13 = smov (!%p231_p11, %s2316_s13), 3 }
  0x1b   : > { %s1457_s9 = sshll.u32 %s225_s8, 2  ;;  %s1458_s24 = sshll.u32 %s2816_s13, 1 }
  0x1c   : > { %s2440_s19 = scalar_lea.vmem %s2789_s0, %s1457_s9  ;;  %s235_s25 = sadd.s32 %s1459_s23, %s1458_s24 }
  0x1d   : > { %s1460_s26 = sshll.u32 %s235_s25, 1  ;;  %241 = sbr.rel (%p1461_p12) target bundleno = 36 (0x24), region = 40 }
  0x1e   : > { %s2446_s29 = scalar_lea.vmem %s2792_s3, %s1460_s26 }
  0x22   : > { %v2341_v0 = vmov 0.0  }
  0x23   : > { %242 = vst [vmem:[#allocation2] sm:$0xff] %v2341_v0 }
  0x24 PF: > { %s2047_s30 = sshll.u32 %s2312_s12, 10  ;;  %vm755_vm0 = vcmask 1043456   ;;  %p2043_p13 = scmp.ne.s32.totalorder %s2312_s12, 1 }
  0x25   : > { %s2450_s4 = scalar_lea.vmem [#allocation3], %s2047_s30 }
  0x26   : > { %v1523_v1 = vld [vmem:[%s2450_s4 + $0x70] sm:$0xf]  ;;  %v2063_v2 = vld [vmem:[%s2450_s4 + $0x74] sm:$0xf0]  ;;  %v1515_v12 = vld [vmem:[%s2450_s4 + $0x60] sm:$0xf] }
  0x27   : > { %v1587_v3 = vld [vmem:[%s2450_s4 + $0xf0] sm:$0xf]  ;;  %v1524_v4 = vor.u32 %v2063_v2, %v1523_v1  ;;  %v2079_v5 = vld [vmem:[%s2450_s4 + $0xf4] sm:$0xf0]  ;;  %v2061_v14 = vld [vmem:[%s2450_s4 + $0x64] sm:$0xf0] }
  0x28   : > { %v1651_v6 = vld [vmem:[%s2450_s4 + $0x170] sm:$0xf]  ;;  %v2095_v7 = vld [vmem:[%s2450_s4 + $0x174] sm:$0xf0]  ;;  %v1588_v8 = vor.u32 %v2079_v5, %v1587_v3  ;;  %v1579_v15 = vld [vmem:[%s2450_s4 + $0xe0] sm:$0xf]  ;;  %v1516_v17 = vor.u32 %v2061_v14, %v1515_v12 }
  0x29   : > { %v1652_v9 = vor.u32 %v2095_v7, %v1651_v6  ;;  %v1715_v10 = vld [vmem:[%s2450_s4 + $0x1f0] sm:$0xf]  ;;  %v2111_v11 = vld [vmem:[%s2450_s4 + $0x1f4] sm:$0xf0]  ;;  %648 = vmatpush.bf16.msra.mxu0 %v1524_v4  ;;  %v2077_v16 = vld [vmem:[%s2450_s4 + $0xe4] sm:$0xf0] }
  0x2a   : > { %v1716_v13 = vor.u32 %v2111_v11, %v1715_v10  ;;  %661 = vmatpush.bf16.msra.mxu1 %v1588_v8  ;;  %v1580_v18 = vor.u32 %v2077_v16, %v1579_v15  ;;  %v1643_v19 = vld [vmem:[%s2450_s4 + $0x160] sm:$0xf]  ;;  %v2093_v20 = vld [vmem:[%s2450_s4 + $0x164] sm:$0xf0]  ;;  %v1507_v24 = vld [vmem:[%s2450_s4 + $0x50] sm:$0xf] }
  0x2b   : > { %674 = vmatpush.bf16.msra.mxu2 %v1652_v9  ;;  %v1707_v21 = vld [vmem:[%s2450_s4 + $0x1e0] sm:$0xf]  ;;  %v1644_v22 = vor.u32 %v2093_v20, %v1643_v19  ;;  %v2109_v23 = vld [vmem:[%s2450_s4 + $0x1e4] sm:$0xf0]  ;;  %v2059_v25 = vld [vmem:[%s2450_s4 + $0x54] sm:$0xf0] }
  0x2c   : > { %687 = vmatpush.bf16.msra.mxu3 %v1716_v13  ;;  %v1708_v26 = vor.u32 %v2109_v23, %v1707_v21  ;;  %v1571_v27 = vld [vmem:[%s2450_s4 + $0xd0] sm:$0xf]  ;;  %v2075_v28 = vld [vmem:[%s2450_s4 + $0xd4] sm:$0xf0]  ;;  %v1508_v30 = vor.u32 %v2059_v25, %v1507_v24  ;;  %v1499_v36 = vld [vmem:[%s2450_s4 + $0x40] sm:$0xf] }
  0x2d   : > { %v1635_v29 = vld [vmem:[%s2450_s4 + $0x150] sm:$0xf]  ;;  %649 = vmatpush.bf16.msra.mxu0 %v1516_v17  ;;  %v2091_v31 = vld [vmem:[%s2450_s4 + $0x154] sm:$0xf0]  ;;  %v1572_v34 = vor.u32 %v2075_v28, %v1571_v27  ;;  %v2057_v37 = vld [vmem:[%s2450_s4 + $0x44] sm:$0xf0] }
  0x2e   : > { %v1699_v32 = vld [vmem:[%s2450_s4 + $0x1d0] sm:$0xf]  ;;  %v2107_v33 = vld [vmem:[%s2450_s4 + $0x1d4] sm:$0xf0]  ;;  %662 = vmatpush.bf16.msra.mxu1 %v1580_v18  ;;  %v1636_v35 = vor.u32 %v2091_v31, %v1635_v29  ;;  %v1563_v38 = vld [vmem:[%s2450_s4 + $0xc0] sm:$0xf]  ;;  %v1500_v45 = vor.u32 %v2057_v37, %v1499_v36 }
  0x2f   : > { %675 = vmatpush.bf16.msra.mxu2 %v1644_v22  ;;  %v1700_v39 = vor.u32 %v2107_v33, %v1699_v32  ;;  %v2073_v40 = vld [vmem:[%s2450_s4 + $0xc4] sm:$0xf0]  ;;  %v1627_v41 = vld [vmem:[%s2450_s4 + $0x140] sm:$0xf]  ;;  %v1491_v48 = vld [vmem:[%s2450_s4 + $0x30] sm:$0xf] }
  0x30   : > { %688 = vmatpush.bf16.msra.mxu3 %v1708_v26  ;;  %v2089_v42 = vld [vmem:[%s2450_s4 + $0x144] sm:$0xf0]  ;;  %v1691_v43 = vld [vmem:[%s2450_s4 + $0x1c0] sm:$0xf]  ;;  %v1564_v46 = vor.u32 %v2073_v40, %v1563_v38  ;;  %v2055_v49 = vld [vmem:[%s2450_s4 + $0x34] sm:$0xf0] }
  0x31   : > { %v2105_v44 = vld [vmem:[%s2450_s4 + $0x1c4] sm:$0xf0]  ;;  %650 = vmatpush.bf16.msra.mxu0 %v1508_v30  ;;  %v1628_v47 = vor.u32 %v2089_v42, %v1627_v41  ;;  %v1555_v50 = vld [vmem:[%s2450_s4 + $0xb0] sm:$0xf]  ;;  %v2071_v52 = vld [vmem:[%s2450_s4 + $0xb4] sm:$0xf0]  ;;  %v1492_v57 = vor.u32 %v2055_v49, %v1491_v48 }
  0x32   : > { %663 = vmatpush.bf16.msra.mxu1 %v1572_v34  ;;  %v1692_v51 = vor.u32 %v2105_v44, %v1691_v43  ;;  %v1619_v53 = vld [vmem:[%s2450_s4 + $0x130] sm:$0xf]  ;;  %v2087_v54 = vld [vmem:[%s2450_s4 + $0x134] sm:$0xf0]  ;;  %v1556_v58 = vor.u32 %v2071_v52, %v1555_v50  ;;  %v1483_v60 = vld [vmem:[%s2450_s4 + $0x20] sm:$0xf] }
  0x33   : > { %676 = vmatpush.bf16.msra.mxu2 %v1636_v35  ;;  %v1683_v55 = vld [vmem:[%s2450_s4 + $0x1b0] sm:$0xf]  ;;  %v2103_v56 = vld [vmem:[%s2450_s4 + $0x1b4] sm:$0xf0]  ;;  %v1620_v59 = vor.u32 %v2087_v54, %v1619_v53  ;;  %v2053_v61 = vld [vmem:[%s2450_s4 + $0x24] sm:$0xf0] }
  0x34   : > { %689 = vmatpush.bf16.msra.mxu3 %v1700_v39  ;;  %v1547_v62 = vld [vmem:[%s2450_s4 + $0xa0] sm:$0xf]  ;;  %v1684_v63 = vor.u32 %v2103_v56, %v1683_v55  ;;  %v2069_v0 = vld [vmem:[%s2450_s4 + $0xa4] sm:$0xf0]  ;;  %v1484_v5 = vor.u32 %v2053_v61, %v1483_v60  ;;  %v1475_v8 = vld [vmem:[%s2450_s4 + $0x10] sm:$0xf] }
  0x35   : > { %651 = vmatpush.bf16.msra.mxu0 %v1500_v45  ;;  %v1611_v1 = vld [vmem:[%s2450_s4 + $0x120] sm:$0xf]  ;;  %v2085_v2 = vld [vmem:[%s2450_s4 + $0x124] sm:$0xf0]  ;;  %v1548_v6 = vor.u32 %v2069_v0, %v1547_v62  ;;  %v2051_v9 = vld [vmem:[%s2450_s4 + $0x14] sm:$0xf0] }
  0x36   : > { %664 = vmatpush.bf16.msra.mxu1 %v1564_v46  ;;  %v1675_v3 = vld [vmem:[%s2450_s4 + $0x1a0] sm:$0xf]  ;;  %v2101_v4 = vld [vmem:[%s2450_s4 + $0x1a4] sm:$0xf0]  ;;  %v1612_v7 = vor.u32 %v2085_v2, %v1611_v1  ;;  %v1539_v10 = vld [vmem:[%s2450_s4 + $0x90] sm:$0xf]  ;;  %v1476_v17 = vor.u32 %v2051_v9, %v1475_v8 }
  0x37   : > { %677 = vmatpush.bf16.msra.mxu2 %v1628_v47  ;;  %v1676_v11 = vor.u32 %v2101_v4, %v1675_v3  ;;  %v2067_v12 = vld [vmem:[%s2450_s4 + $0x94] sm:$0xf0]  ;;  %v1603_v13 = vld [vmem:[%s2450_s4 + $0x110] sm:$0xf]  ;;  %v1467_v18 = vld [vmem:[%s2450_s4] sm:$0xf] }
  0x38   : > { %690 = vmatpush.bf16.msra.mxu3 %v1692_v51  ;;  %v2083_v14 = vld [vmem:[%s2450_s4 + $0x114] sm:$0xf0]  ;;  %v1667_v15 = vld [vmem:[%s2450_s4 + $0x190] sm:$0xf]  ;;  %v2049_v19 = vld [vmem:[%s2450_s4 + $0x4] sm:$0xf0]  ;;  %v1540_v20 = vor.u32 %v2067_v12, %v1539_v10 }
  0x39   : > { %652 = vmatpush.bf16.msra.mxu0 %v1492_v57  ;;  %v2099_v16 = vld [vmem:[%s2450_s4 + $0x194] sm:$0xf0]  ;;  %v1604_v21 = vor.u32 %v2083_v14, %v1603_v13  ;;  %v1531_v22 = vld [vmem:[%s2450_s4 + $0x80] sm:$0xf]  ;;  %v2065_v23 = vld [vmem:[%s2450_s4 + $0x84] sm:$0xf0]  ;;  %v1468_v32 = vor.u32 %v2049_v19, %v1467_v18 }
  0x3a   : > { %665 = vmatpush.bf16.msra.mxu1 %v1556_v58  ;;  %v1595_v24 = vld [vmem:[%s2450_s4 + $0x100] sm:$0xf]  ;;  %v1668_v25 = vor.u32 %v2099_v16, %v1667_v15  ;;  %v2081_v26 = vld [vmem:[%s2450_s4 + $0x104] sm:$0xf0]  ;;  %v2062_v29 = vld [vmem:[%s2450_s4 + $0x74] sm:$0xf]  ;;  %v1532_v36 = vor.u32 %v2065_v23, %v1531_v22 }
  0x3b   : > { %678 = vmatpush.bf16.msra.mxu2 %v1620_v59  ;;  %v1659_v27 = vld [vmem:[%s2450_s4 + $0x180] sm:$0xf]  ;;  %v2097_v28 = vld [vmem:[%s2450_s4 + $0x184] sm:$0xf0]  ;;  %v1525_v30 = vld [vmem:[%s2450_s4 + $0x78] sm:$0xf0]  ;;  %v1596_v37 = vor.u32 %v2081_v26, %v1595_v24 }
  0x3c   : > { %691 = vmatpush.bf16.msra.mxu3 %v1684_v63  ;;  %v2078_v31 = vld [vmem:[%s2450_s4 + $0xf4] sm:$0xf]  ;;  %v1589_v33 = vld [vmem:[%s2450_s4 + $0xf8] sm:$0xf0]  ;;  %v1660_v40 = vor.u32 %v2097_v28, %v1659_v27  ;;  %v1528_v41 = vor.u32 %v2062_v29, %v1525_v30  ;;  %v2060_v44 = vld [vmem:[%s2450_s4 + $0x64] sm:$0xf] }
  0x3d   : > { %653 = vmatpush.bf16.msra.mxu0 %v1484_v5  ;;  %v2094_v34 = vld [vmem:[%s2450_s4 + $0x174] sm:$0xf]  ;;  %v1653_v35 = vld [vmem:[%s2450_s4 + $0x178] sm:$0xf0]  ;;  %v1592_v42 = vor.u32 %v2078_v31, %v1589_v33  ;;  %v1517_v45 = vld [vmem:[%s2450_s4 + $0x68] sm:$0xf0] }
  0x3e   : > { %666 = vmatpush.bf16.msra.mxu1 %v1548_v6  ;;  %v2110_v38 = vld [vmem:[%s2450_s4 + $0x1f4] sm:$0xf]  ;;  %v1717_v39 = vld [vmem:[%s2450_s4 + $0x1f8] sm:$0xf0]  ;;  %v1656_v43 = vor.u32 %v2094_v34, %v1653_v35  ;;  %v2076_v46 = vld [vmem:[%s2450_s4 + $0xe4] sm:$0xf]  ;;  %v1520_v54 = vor.u32 %v2060_v44, %v1517_v45 }
  0x3f   : > { %679 = vmatpush.bf16.msra.mxu2 %v1612_v7  ;;  %v1720_v47 = vor.u32 %v2110_v38, %v1717_v39  ;;  %v1581_v48 = vld [vmem:[%s2450_s4 + $0xe8] sm:$0xf0]  ;;  %v2092_v49 = vld [vmem:[%s2450_s4 + $0x164] sm:$0xf]  ;;  %v2058_v55 = vld [vmem:[%s2450_s4 + $0x54] sm:$0xf] }
  0x40   : > { %692 = vmatpush.bf16.msra.mxu3 %v1676_v11  ;;  %v1645_v50 = vld [vmem:[%s2450_s4 + $0x168] sm:$0xf0]  ;;  %v2108_v51 = vld [vmem:[%s2450_s4 + $0x1e4] sm:$0xf]  ;;  %v1584_v58 = vor.u32 %v2076_v46, %v1581_v48  ;;  %v1509_v60 = vld [vmem:[%s2450_s4 + $0x58] sm:$0xf0] }
  0x41   : > { %654 = vmatpush.bf16.msra.mxu0 %v1476_v17  ;;  %v1709_v52 = vld [vmem:[%s2450_s4 + $0x1e8] sm:$0xf0]  ;;  %v1648_v59 = vor.u32 %v2092_v49, %v1645_v50  ;;  %v2074_v61 = vld [vmem:[%s2450_s4 + $0xd4] sm:$0xf]  ;;  %v1573_v62 = vld [vmem:[%s2450_s4 + $0xd8] sm:$0xf0]  ;;  %v1512_v9 = vor.u32 %v2058_v55, %v1509_v60 }
  0x42   : > { %667 = vmatpush.bf16.msra.mxu1 %v1540_v20  ;;  %v245_v53 = vld [vmem:[%s2440_s19 + $0x8] sm:$0x33]  ;;  %v1712_v63 = vor.u32 %v2108_v51, %v1709_v52  ;;  %v2090_v0 = vld [vmem:[%s2450_s4 + $0x154] sm:$0xf]  ;;  %v1637_v1 = vld [vmem:[%s2450_s4 + $0x158] sm:$0xf0]  ;;  %v1576_v10 = vor.u32 %v2074_v61, %v1573_v62 }
  0x43   : > { %680 = vmatpush.bf16.msra.mxu2 %v1604_v21  ;;  %v318_v56 = vunpack.c.l.b16 %v245_v53  ;;  %v319_v57 = vunpack.c.h.b16 %v245_v53  ;;  %v244_v3 = vld [vmem:[%s2440_s19] sm:$0x33]  ;;  %v2106_v4 = vld [vmem:[%s2450_s4 + $0x1d4] sm:$0xf]  ;;  %v1701_v5 = vld [vmem:[%s2450_s4 + $0x1d8] sm:$0xf0]  ;;  %v1640_v11 = vor.u32 %v2090_v0, %v1637_v1 }
  0x44   : > { %693 = vmatpush.bf16.msra.mxu3 %v1668_v25  ;;  %v316_v7 = vunpack.c.l.b16 %v244_v3  ;;  %v317_v8 = vunpack.c.h.b16 %v244_v3  ;;  %v2056_v12 = vld [vmem:[%s2450_s4 + $0x44] sm:$0xf]  ;;  %v1501_v13 = vld [vmem:[%s2450_s4 + $0x48] sm:$0xf0]  ;;  %v1704_v17 = vor.u32 %v2106_v4, %v1701_v5  ;;  %v2054_v26 = vld [vmem:[%s2450_s4 + $0x34] sm:$0xf] }
  0x45   : > { %655 = vmatpush.bf16.msra.mxu0 %v1468_v32  ;;  %v2539_v2 = vpack.c.b16 %v318_v56, %v318_v56  ;;  %v2544_v6 = vpack.c.b16 %v319_v57, %v319_v57  ;;  %v2072_v14 = vld [vmem:[%s2450_s4 + $0xc4] sm:$0xf]  ;;  %v1565_v18 = vld [vmem:[%s2450_s4 + $0xc8] sm:$0xf0]  ;;  %v1504_v23 = vor.u32 %v2056_v12, %v1501_v13  ;;  %v1493_v27 = vld [vmem:[%s2450_s4 + $0x38] sm:$0xf0] }
  0x46   : > { %668 = vmatpush.bf16.msra.mxu1 %v1532_v36  ;;  %v2550_v15 = vpack.c.b16 %v316_v7, %v316_v7  ;;  %v2552_v16 = vpack.c.b16 %v317_v8, %v317_v8  ;;  %v2088_v19 = vld [vmem:[%s2450_s4 + $0x144] sm:$0xf]  ;;  %v1629_v20 = vld [vmem:[%s2450_s4 + $0x148] sm:$0xf0]  ;;  %v1568_v24 = vor.u32 %v2072_v14, %v1565_v18  ;;  %v2070_v28 = vld [vmem:[%s2450_s4 + $0xb4] sm:$0xf]  ;;  %v1496_v35 = vor.u32 %v2054_v26, %v1493_v27 }
  0x47   : > { %681 = vmatpush.bf16.msra.mxu2 %v1596_v37  ;;  %v2104_v21 = vld [vmem:[%s2450_s4 + $0x1c4] sm:$0xf]  ;;  %v1693_v22 = vld [vmem:[%s2450_s4 + $0x1c8] sm:$0xf0]  ;;  %v1632_v25 = vor.u32 %v2088_v19, %v1629_v20  ;;  %v1557_v30 = vld [vmem:[%s2450_s4 + $0xb8] sm:$0xf0] }
  0x48   : > { %694 = vmatpush.bf16.msra.mxu3 %v1660_v40  ;;  %656 = vmatmul.bf16.vlgmr.msra.gmra.mxu0 %v2550_v15  ;;  %v1696_v29 = vor.u32 %v2104_v21, %v1693_v22  ;;  %v2086_v31 = vld [vmem:[%s2450_s4 + $0x134] sm:$0xf]  ;;  %v1621_v32 = vld [vmem:[%s2450_s4 + $0x138] sm:$0xf0]  ;;  %v1560_v36 = vor.u32 %v2070_v28, %v1557_v30  ;;  %v2052_v38 = vld [vmem:[%s2450_s4 + $0x24] sm:$0xf] }
  0x49   : > { %700 = vmatpush.bf16.msrb.mxu0 %v1528_v41  ;;  %669 = vmatmul.bf16.vlgmr.msra.gmra.mxu1 %v2552_v16  ;;  %v2102_v33 = vld [vmem:[%s2450_s4 + $0x1b4] sm:$0xf]  ;;  %v1685_v34 = vld [vmem:[%s2450_s4 + $0x1b8] sm:$0xf0]  ;;  %v1624_v37 = vor.u32 %v2086_v31, %v1621_v32  ;;  %v1485_v39 = vld [vmem:[%s2450_s4 + $0x28] sm:$0xf0] }
  0x4a   : > { %713 = vmatpush.bf16.msrb.mxu1 %v1592_v42  ;;  %682 = vmatmul.bf16.vlgmr.msra.gmra.mxu2 %v2539_v2  ;;  %v2068_v40 = vld [vmem:[%s2450_s4 + $0xa4] sm:$0xf]  ;;  %v1688_v41 = vor.u32 %v2102_v33, %v1685_v34  ;;  %v1549_v42 = vld [vmem:[%s2450_s4 + $0xa8] sm:$0xf0]  ;;  %v2050_v50 = vld [vmem:[%s2450_s4 + $0x14] sm:$0xf] }
  0x4b   : > { %726 = vmatpush.bf16.msrb.mxu2 %v1656_v43  ;;  %695 = vmatmul.bf16.vlgmr.msra.gmra.mxu3 %v2544_v6  ;;  %v2084_v43 = vld [vmem:[%s2450_s4 + $0x124] sm:$0xf]  ;;  %v1613_v44 = vld [vmem:[%s2450_s4 + $0x128] sm:$0xf0]  ;;  %v1552_v48 = vor.u32 %v2068_v40, %v1549_v42  ;;  %v1477_v51 = vld [vmem:[%s2450_s4 + $0x18] sm:$0xf0] }
  0x4c   : > { %739 = vmatpush.bf16.msrb.mxu3 %v1720_v47  ;;  %v2100_v45 = vld [vmem:[%s2450_s4 + $0x1a4] sm:$0xf]  ;;  %v1677_v46 = vld [vmem:[%s2450_s4 + $0x1a8] sm:$0xf0]  ;;  %v1488_v47 = vor.u32 %v2052_v38, %v1485_v39  ;;  %v1616_v49 = vor.u32 %v2084_v43, %v1613_v44  ;;  %v2066_v52 = vld [vmem:[%s2450_s4 + $0x94] sm:$0xf] }
  0x4d   : > { %701 = vmatpush.bf16.msrb.mxu0 %v1520_v54  ;;  %v1680_v53 = vor.u32 %v2100_v45, %v1677_v46  ;;  %v1541_v54 = vld [vmem:[%s2450_s4 + $0x98] sm:$0xf0]  ;;  %v2082_v55 = vld [vmem:[%s2450_s4 + $0x114] sm:$0xf]  ;;  %v2048_v60 = vld [vmem:[%s2450_s4 + $0x4] sm:$0xf] }
  0x4e   : > { %714 = vmatpush.bf16.msrb.mxu1 %v1584_v58  ;;  %v1605_v56 = vld [vmem:[%s2450_s4 + $0x118] sm:$0xf0]  ;;  %v2098_v57 = vld [vmem:[%s2450_s4 + $0x194] sm:$0xf]  ;;  %v1469_v61 = vld [vmem:[%s2450_s4 + $0x8] sm:$0xf0]  ;;  %v1544_v62 = vor.u32 %v2066_v52, %v1541_v54 }
  0x4f   : > { %727 = vmatpush.bf16.msrb.mxu2 %v1648_v59  ;;  %v1669_v58 = vld [vmem:[%s2450_s4 + $0x198] sm:$0xf0]  ;;  %v1480_v59 = vor.u32 %v2050_v50, %v1477_v51  ;;  %v2064_v0 = vld [vmem:[%s2450_s4 + $0x84] sm:$0xf]  ;;  %v1533_v1 = vld [vmem:[%s2450_s4 + $0x88] sm:$0xf0]  ;;  %v1472_v12 = vor.u32 %v2048_v60, %v1469_v61 }
  0x50   : > { %740 = vmatpush.bf16.msrb.mxu3 %v1712_v63  ;;  %v1608_v63 = vor.u32 %v2082_v55, %v1605_v56  ;;  %v2080_v3 = vld [vmem:[%s2450_s4 + $0x104] sm:$0xf]  ;;  %v1672_v4 = vor.u32 %v2098_v57, %v1669_v58  ;;  %v1597_v5 = vld [vmem:[%s2450_s4 + $0x108] sm:$0xf0]  ;;  %v2144_v13 = vld [vmem:[%s2450_s4 + $0x2f4] sm:$0xf0]  ;;  %v1536_v18 = vor.u32 %v2064_v0, %v1533_v1 }
  0x51   : > { %702 = vmatpush.bf16.msrb.mxu0 %v1512_v9  ;;  %v2096_v7 = vld [vmem:[%s2450_s4 + $0x184] sm:$0xf]  ;;  %v1661_v8 = vld [vmem:[%s2450_s4 + $0x188] sm:$0xf0]  ;;  %v1845_v9 = vld [vmem:[%s2450_s4 + $0x270] sm:$0xf]  ;;  %v1600_v19 = vor.u32 %v2080_v3, %v1597_v5 }
  0x52   : > { %715 = vmatpush.bf16.msrb.mxu1 %v1576_v10  ;;  %v2128_v10 = vld [vmem:[%s2450_s4 + $0x274] sm:$0xf0]  ;;  %v1973_v14 = vld [vmem:[%s2450_s4 + $0x370] sm:$0xf]  ;;  %v1664_v22 = vor.u32 %v2096_v7, %v1661_v8  ;;  %v1837_v26 = vld [vmem:[%s2450_s4 + $0x260] sm:$0xf] }
  0x53   : > { %728 = vmatpush.bf16.msrb.mxu2 %v1640_v11  ;;  %v1909_v11 = vld [vmem:[%s2450_s4 + $0x2f0] sm:$0xf]  ;;  %v2176_v21 = vld [vmem:[%s2450_s4 + $0x3f4] sm:$0xf0]  ;;  %v2126_v27 = vld [vmem:[%s2450_s4 + $0x264] sm:$0xf0] }
  0x54   : > { %741 = vmatpush.bf16.msrb.mxu3 %v1704_v17  ;;  %v2160_v17 = vld [vmem:[%s2450_s4 + $0x374] sm:$0xf0]  ;;  %v2037_v20 = vld [vmem:[%s2450_s4 + $0x3f0] sm:$0xf]  ;;  %v1901_v28 = vld [vmem:[%s2450_s4 + $0x2e0] sm:$0xf] }
  0x55   : > { %703 = vmatpush.bf16.msrb.mxu0 %v1504_v23  ;;  %v1846_v23 = vor.u32 %v2128_v10, %v1845_v9  ;;  %v2142_v30 = vld [vmem:[%s2450_s4 + $0x2e4] sm:$0xf0]  ;;  %v1965_v31 = vld [vmem:[%s2450_s4 + $0x360] sm:$0xf]  ;;  %v1829_v38 = vld [vmem:[%s2450_s4 + $0x250] sm:$0xf] }
  0x56   : > { %716 = vmatpush.bf16.msrb.mxu1 %v1568_v24  ;;  %v1910_v24 = vor.u32 %v2144_v13, %v1909_v11  ;;  %v2158_v32 = vld [vmem:[%s2450_s4 + $0x364] sm:$0xf0]  ;;  %v2029_v33 = vld [vmem:[%s2450_s4 + $0x3e0] sm:$0xf]  ;;  %v2124_v39 = vld [vmem:[%s2450_s4 + $0x254] sm:$0xf0] }
  0x57   : > { %729 = vmatpush.bf16.msrb.mxu2 %v1632_v25  ;;  %v1974_v25 = vor.u32 %v2160_v17, %v1973_v14  ;;  %v2174_v34 = vld [vmem:[%s2450_s4 + $0x3e4] sm:$0xf0]  ;;  %v1893_v40 = vld [vmem:[%s2450_s4 + $0x2d0] sm:$0xf]  ;;  %v2140_v42 = vld [vmem:[%s2450_s4 + $0x2d4] sm:$0xf0] }
  0x58   : > { %742 = vmatpush.bf16.msrb.mxu3 %v1696_v29  ;;  %v2038_v29 = vor.u32 %v2176_v21, %v2037_v20  ;;  %v1957_v43 = vld [vmem:[%s2450_s4 + $0x350] sm:$0xf]  ;;  %v2156_v44 = vld [vmem:[%s2450_s4 + $0x354] sm:$0xf0]  ;;  %v1885_v50 = vld [vmem:[%s2450_s4 + $0x2c0] sm:$0xf] }
  0x59   : > { %704 = vmatpush.bf16.msrb.mxu0 %v1496_v35  ;;  %v1838_v35 = vor.u32 %v2126_v27, %v1837_v26  ;;  %v2021_v45 = vld [vmem:[%s2450_s4 + $0x3d0] sm:$0xf]  ;;  %v2172_v46 = vld [vmem:[%s2450_s4 + $0x3d4] sm:$0xf0]  ;;  %v2138_v51 = vld [vmem:[%s2450_s4 + $0x2c4] sm:$0xf0] }
  0x5a   : > { %717 = vmatpush.bf16.msrb.mxu1 %v1560_v36  ;;  %v1902_v36 = vor.u32 %v2142_v30, %v1901_v28  ;;  %v1949_v52 = vld [vmem:[%s2450_s4 + $0x340] sm:$0xf]  ;;  %v2170_v54 = vld [vmem:[%s2450_s4 + $0x3c4] sm:$0xf0]  ;;  %v1813_v56 = vld [vmem:[%s2450_s4 + $0x230] sm:$0xf]  ;;  %v1886_v58 = vor.u32 %v2138_v51, %v1885_v50 }
  0x5b   : > { %730 = vmatpush.bf16.msrb.mxu2 %v1624_v37  ;;  %v1966_v37 = vor.u32 %v2158_v32, %v1965_v31  ;;  %v2120_v57 = vld [vmem:[%s2450_s4 + $0x234] sm:$0xf0]  ;;  %v1877_v60 = vld [vmem:[%s2450_s4 + $0x2b0] sm:$0xf]  ;;  %v759_v3 = vld [vmem:[%s2440_s19] sm:$0x77] }
  0x5c   : > { %743 = vmatpush.bf16.msrb.mxu3 %v1688_v41  ;;  %v2030_v41 = vor.u32 %v2174_v34, %v2029_v33  ;;  %v2136_v61 = vld [vmem:[%s2450_s4 + $0x2b4] sm:$0xf0]  ;;  %v1941_v0 = vld [vmem:[%s2450_s4 + $0x330] sm:$0xf]  ;;  %v1814_v7 = vor.u32 %v2120_v57, %v1813_v56  ;;  %v1805_v8 = vld [vmem:[%s2450_s4 + $0x220] sm:$0xf] }
  0x5d   : > { %705 = vmatpush.bf16.msrb.mxu0 %v1488_v47  ;;  %v1894_v47 = vor.u32 %v2140_v42, %v1893_v40  ;;  %v2152_v1 = vld [vmem:[%s2450_s4 + $0x334] sm:$0xf0]  ;;  %v1878_v10 = vor.u32 %v2136_v61, %v1877_v60  ;;  %v1869_v13 = vld [vmem:[%s2450_s4 + $0x2a0] sm:$0xf]  ;;  %v2134_v14 = vld [vmem:[%s2450_s4 + $0x2a4] sm:$0xf0] }
  0x5e   : > { %718 = vmatpush.bf16.msrb.mxu1 %v1552_v48  ;;  %v1958_v48 = vor.u32 %v2156_v44, %v1957_v43  ;;  %v2168_v5 = vld [vmem:[%s2450_s4 + $0x3b4] sm:$0xf0]  ;;  %v1942_v11 = vor.u32 %v2152_v1, %v1941_v0  ;;  %v1933_v20 = vld [vmem:[%s2450_s4 + $0x320] sm:$0xf]  ;;  %v2150_v21 = vld [vmem:[%s2450_s4 + $0x324] sm:$0xf0]  ;;  %v1870_v26 = vor.u32 %v2134_v14, %v1869_v13 }
  0x5f   : > { %731 = vmatpush.bf16.msrb.mxu2 %v1616_v49  ;;  %v2122_v49 = vld [vmem:[%s2450_s4 + $0x244] sm:$0xf0]  ;;  %v1797_v27 = vld [vmem:[%s2450_s4 + $0x210] sm:$0xf]  ;;  %v2116_v28 = vld [vmem:[%s2450_s4 + $0x214] sm:$0xf0]  ;;  %v1934_v31 = vor.u32 %v2150_v21, %v1933_v20 }
  0x60   : > { %744 = vmatpush.bf16.msrb.mxu3 %v1680_v53  ;;  %v2154_v53 = vld [vmem:[%s2450_s4 + $0x344] sm:$0xf0]  ;;  %v2132_v32 = vld [vmem:[%s2450_s4 + $0x294] sm:$0xf0]  ;;  %v1925_v33 = vld [vmem:[%s2450_s4 + $0x310] sm:$0xf] }
  0x61   : > { %706 = vmatpush.bf16.msrb.mxu0 %v1480_v59  ;;  %v1950_v59 = vor.u32 %v2154_v53, %v1949_v52  ;;  %v2148_v34 = vld [vmem:[%s2450_s4 + $0x314] sm:$0xf0]  ;;  %v1789_v40 = vld [vmem:[%s2450_s4 + $0x200] sm:$0xf]  ;;  %v2114_v42 = vld [vmem:[%s2450_s4 + $0x204] sm:$0xf0] }
  0x62   : > { %719 = vmatpush.bf16.msrb.mxu1 %v1544_v62  ;;  %v760_v62 = vld [vmem:[%s2440_s19 + $0x8] sm:$0x77]  ;;  %v1853_v43 = vld [vmem:[%s2450_s4 + $0x280] sm:$0xf]  ;;  %v2127_v53 = vld [vmem:[%s2450_s4 + $0x274] sm:$0xf] }
  0x63   : > { %732 = vmatpush.bf16.msrb.mxu2 %v1608_v63  ;;  %v833_v9 = vunpack.c.l.b16 %v760_v62  ;;  %v834_v17 = vunpack.c.h.b16 %v760_v62  ;;  %v2130_v44 = vld [vmem:[%s2450_s4 + $0x284] sm:$0xf0]  ;;  %v2143_v56 = vld [vmem:[%s2450_s4 + $0x2f4] sm:$0xf]  ;;  %v1911_v57 = vld [vmem:[%s2450_s4 + $0x2f8] sm:$0xf0] }
  0x64   : > { %745 = vmatpush.bf16.msrb.mxu3 %v1672_v4  ;;  %v2005_v4 = vld [vmem:[%s2450_s4 + $0x3b0] sm:$0xf]  ;;  %v2162_v50 = vld [vmem:[%s2450_s4 + $0x384] sm:$0xf0]  ;;  %v1975_v61 = vld [vmem:[%s2450_s4 + $0x378] sm:$0xf0] }
  0x65   : > { %707 = vmatpush.bf16.msrb.mxu0 %v1472_v12  ;;  %v2118_v12 = vld [vmem:[%s2450_s4 + $0x224] sm:$0xf0]  ;;  %v2651_v30 = vpack.c.b16 %v833_v9, %v833_v9  ;;  %v2175_v62 = vld [vmem:[%s2450_s4 + $0x3f4] sm:$0xf]  ;;  %v2039_v1 = vld [vmem:[%s2450_s4 + $0x3f8] sm:$0xf0] }
  0x66   : > { %720 = vmatpush.bf16.msrb.mxu1 %v1536_v18  ;;  %v831_v18 = vunpack.c.l.b16 %v759_v3  ;;  %v2125_v14 = vld [vmem:[%s2450_s4 + $0x264] sm:$0xf]  ;;  %v1903_v20 = vld [vmem:[%s2450_s4 + $0x2e8] sm:$0xf0] }
  0x67   : > { %733 = vmatpush.bf16.msrb.mxu2 %v1600_v19  ;;  %v2006_v19 = vor.u32 %v2168_v5, %v2005_v4  ;;  %v2157_v21 = vld [vmem:[%s2450_s4 + $0x364] sm:$0xf] }
  0x68   : > { %746 = vmatpush.bf16.msrb.mxu3 %v1664_v22  ;;  %708 = vmatmul.bf16.vlgmr.msrb.gmra.mxu0 %v2550_v15  ;;  %v2022_v15 = vor.u32 %v2172_v46, %v2021_v45  ;;  %v832_v22 = vunpack.c.h.b16 %v759_v3  ;;  %v1798_v45 = vor.u32 %v2116_v28, %v1797_v27  ;;  %v1917_v46 = vld [vmem:[%s2450_s4 + $0x300] sm:$0xf] }
  0x69   : > { %1191 = vmatpush.bf16.msra.mxu0 %v1846_v23  ;;  %721 = vmatmul.bf16.vlgmr.msrb.gmra.mxu1 %v2552_v16  ;;  %v2013_v16 = vld [vmem:[%s2450_s4 + $0x3c0] sm:$0xf] }
  0x6a   : > { %1204 = vmatpush.bf16.msra.mxu1 %v1910_v24  ;;  %734 = vmatmul.bf16.vlgmr.msrb.gmra.mxu2 %v2539_v2  ;;  %v1830_v2 = vor.u32 %v2124_v39, %v1829_v38  ;;  %v2014_v63 = vor.u32 %v2170_v54, %v2013_v16  ;;  %v1997_v23 = vld [vmem:[%s2450_s4 + $0x3a0] sm:$0xf]  ;;  %v2166_v24 = vld [vmem:[%s2450_s4 + $0x3a4] sm:$0xf0]  ;;  %v1989_v38 = vld [vmem:[%s2450_s4 + $0x390] sm:$0xf] }
  0x6b   : > { %1217 = vmatpush.bf16.msra.mxu2 %v1974_v25  ;;  %747 = vmatmul.bf16.vlgmr.msrb.gmra.mxu3 %v2544_v6  ;;  %v1821_v6 = vld [vmem:[%s2450_s4 + $0x240] sm:$0xf]  ;;  %v1806_v25 = vor.u32 %v2118_v12, %v1805_v8  ;;  %v2164_v39 = vld [vmem:[%s2450_s4 + $0x394] sm:$0xf0]  ;;  %v1847_v16 = vld [vmem:[%s2450_s4 + $0x278] sm:$0xf0]  ;;  %v1914_v12 = vor.u32 %v2143_v56, %v1911_v57 }
  0x6c   : > { %1230 = vmatpush.bf16.msra.mxu3 %v2038_v29  ;;  %v1822_v55 = vor.u32 %v2122_v49, %v1821_v6  ;;  %v1861_v29 = vld [vmem:[%s2450_s4 + $0x290] sm:$0xf]  ;;  %v1926_v6 = vor.u32 %v2148_v34, %v1925_v33  ;;  %v1981_v49 = vld [vmem:[%s2450_s4 + $0x380] sm:$0xf]  ;;  %v1990_v52 = vor.u32 %v2164_v39, %v1989_v38  ;;  %v1850_v9 = vor.u32 %v2127_v53, %v1847_v16  ;;  %v1831_v33 = vld [vmem:[%s2450_s4 + $0x258] sm:$0xf0] }
  0x6d   : > { %1192 = vmatpush.bf16.msra.mxu0 %v1838_v35  ;;  %v2656_v35 = vpack.c.b16 %v834_v17, %v834_v17  ;;  %v1982_v8 = vor.u32 %v2162_v50, %v1981_v49  ;;  %v1839_v17 = vld [vmem:[%s2450_s4 + $0x268] sm:$0xf0]  ;;  %v2139_v34 = vld [vmem:[%s2450_s4 + $0x2d4] sm:$0xf]  ;;  %v1959_v38 = vld [vmem:[%s2450_s4 + $0x358] sm:$0xf0] }
  0x6e   : > { %1205 = vmatpush.bf16.msra.mxu1 %v1902_v36  ;;  %v2658_v36 = vpack.c.b16 %v831_v18, %v831_v18  ;;  %v2141_v18 = vld [vmem:[%s2450_s4 + $0x2e4] sm:$0xf]  ;;  %v1842_v28 = vor.u32 %v2125_v14, %v1839_v17  ;;  %v2171_v39 = vld [vmem:[%s2450_s4 + $0x3d4] sm:$0xf]  ;;  %v2015_v50 = vld [vmem:[%s2450_s4 + $0x3c8] sm:$0xf0] }
  0x6f   : > { %1218 = vmatpush.bf16.msra.mxu2 %v1966_v37  ;;  %v1998_v37 = vor.u32 %v2166_v24, %v1997_v23  ;;  %v861_v3 = vshrl.u32 %v2656_v35, 16  ;;  %v2173_v24 = vld [vmem:[%s2450_s4 + $0x3e4] sm:$0xf]  ;;  %v2119_v53 = vld [vmem:[%s2450_s4 + $0x234] sm:$0xf] }
  0x70   : > { %1231 = vmatpush.bf16.msra.mxu3 %v2030_v41  ;;  %v2663_v41 = vpack.c.b16 %v832_v22, %v832_v22  ;;  %v842_v51 = vshll.u32 %v2658_v36, 16  ;;  %v840_v5 = vshrl.u32 %v2658_v36, 16  ;;  %v1967_v22 = vld [vmem:[%s2450_s4 + $0x368] sm:$0xf0]  ;;  %v1895_v36 = vld [vmem:[%s2450_s4 + $0x2d8] sm:$0xf0] }
  0x71   : > { %1193 = vmatpush.bf16.msra.mxu0 %v1830_v2  ;;  %v2146_v2 = vld [vmem:[%s2450_s4 + $0x304] sm:$0xf0]  ;;  %v2169_v49 = vld [vmem:[%s2450_s4 + $0x3c4] sm:$0xf]  ;;  %v1815_v16 = vld [vmem:[%s2450_s4 + $0x238] sm:$0xf0] }
  0x72   : > { %1206 = vmatpush.bf16.msra.mxu1 %v1894_v47  ;;  %v856_v47 = vshll.u32 %v2651_v30, 16  ;;  %v849_v54 = vshll.u32 %v2663_v41, 16  ;;  %v1918_v60 = vor.u32 %v2146_v2, %v1917_v46  ;;  %v2137_v46 = vld [vmem:[%s2450_s4 + $0x2c4] sm:$0xf]  ;;  %v1879_v56 = vld [vmem:[%s2450_s4 + $0x2b8] sm:$0xf0] }
  0x73   : > { %1219 = vmatpush.bf16.msra.mxu2 %v1958_v48  ;;  %v1862_v48 = vor.u32 %v2132_v32, %v1861_v29  ;;  %v2123_v32 = vld [vmem:[%s2450_s4 + $0x254] sm:$0xf]  ;;  %v1799_v17 = vld [vmem:[%s2450_s4 + $0x218] sm:$0xf0] }
  0x74   : > { %1232 = vmatpush.bf16.msra.mxu3 %v2022_v15  ;;  %v863_v15 = vshll.u32 %v2656_v35, 16  ;;  %v858_v0 = vrot.slane %v856_v47, 1  ;;  %v1887_v47 = vld [vmem:[%s2450_s4 + $0x2c8] sm:$0xf0]  ;;  %v2151_v57 = vld [vmem:[%s2450_s4 + $0x334] sm:$0xf] }
  0x75   : > { %1194 = vmatpush.bf16.msra.mxu0 %v1822_v55  ;;  %v1790_v55 = vor.u32 %v2114_v42, %v1789_v40  ;;  %v2023_v40 = vld [vmem:[%s2450_s4 + $0x3d8] sm:$0xf0]  ;;  %v1898_v42 = vor.u32 %v2139_v34, %v1895_v36  ;;  %v2115_v14 = vld [vmem:[%s2450_s4 + $0x214] sm:$0xf]  ;;  %v2129_v34 = vld [vmem:[%s2450_s4 + $0x284] sm:$0xf] }
  0x76   : > { %1207 = vmatpush.bf16.msra.mxu1 %v1886_v58  ;;  %v2159_v58 = vld [vmem:[%s2450_s4 + $0x374] sm:$0xf]  ;;  %v865_v4 = vrot.slane %v863_v15, 1  ;;  %v2026_v2 = vor.u32 %v2171_v39, %v2023_v40  ;;  %v1855_v36 = vld [vmem:[%s2450_s4 + $0x288] sm:$0xf0] }
  0x77   : > { %1220 = vmatpush.bf16.msra.mxu2 %v1950_v59  ;;  %v1854_v59 = vor.u32 %v2130_v44, %v1853_v43  ;;  %v1978_v13 = vor.u32 %v2159_v58, %v1975_v61  ;;  %v2121_v44 = vld [vmem:[%s2450_s4 + $0x244] sm:$0xf]  ;;  %v1943_v58 = vld [vmem:[%s2450_s4 + $0x338] sm:$0xf0]  ;;  %v1818_v61 = vor.u32 %v2119_v53, %v1815_v16  ;;  %v1983_v40 = vld [vmem:[%s2450_s4 + $0x388] sm:$0xf0] }
  0x78   : > { %1233 = vmatpush.bf16.msra.mxu3 %v2014_v63  ;;  %v854_v63 = vshrl.u32 %v2651_v30, 16  ;;  %v1906_v30 = vor.u32 %v2141_v18, %v1903_v20  ;;  %v2131_v18 = vld [vmem:[%s2450_s4 + $0x294] sm:$0xf]  ;;  %v1863_v20 = vld [vmem:[%s2450_s4 + $0x298] sm:$0xf0] }
  0x79   : > { %1195 = vmatpush.bf16.msra.mxu0 %v1814_v7  ;;  %v844_v7 = vrot.slane %v842_v51, 1  ;;  %v1890_v51 = vor.u32 %v2137_v46, %v1887_v47  ;;  %v2161_v39 = vld [vmem:[%s2450_s4 + $0x384] sm:$0xf] }
  0x7a   : > { %1208 = vmatpush.bf16.msra.mxu1 %v1878_v10  ;;  %v847_v10 = vshrl.u32 %v2663_v41, 16  ;;  %v2694_v23 = vor.u32 %v858_v0, %v854_v63  ;;  %v1834_v41 = vor.u32 %v2123_v32, %v1831_v33  ;;  %v1946_v63 = vor.u32 %v2151_v57, %v1943_v58  ;;  %v2117_v0 = vld [vmem:[%s2450_s4 + $0x224] sm:$0xf]  ;;  %v1791_v33 = vld [vmem:[%s2450_s4 + $0x208] sm:$0xf0] }
  0x7b   : > { %1221 = vmatpush.bf16.msra.mxu2 %v1942_v11  ;;  %v851_v11 = vrot.slane %v849_v54, 1  ;;  %v2700_v27 = vor.u32 %v844_v7, %v840_v5  ;;  %v2135_v54 = vld [vmem:[%s2450_s4 + $0x2b4] sm:$0xf]  ;;  %v1871_v5 = vld [vmem:[%s2450_s4 + $0x2a8] sm:$0xf0] }
  0x7c   : > { %1234 = vmatpush.bf16.msra.mxu3 %v2006_v19  ;;  %v2042_v19 = vor.u32 %v2175_v62, %v2039_v1  ;;  %v1882_v62 = vor.u32 %v2135_v54, %v1879_v56  ;;  %v1807_v1 = vld [vmem:[%s2450_s4 + $0x228] sm:$0xf0]  ;;  %v2149_v7 = vld [vmem:[%s2450_s4 + $0x324] sm:$0xf] }
  0x7d   : > { %1196 = vmatpush.bf16.msra.mxu0 %v1806_v25  ;;  %v2031_v25 = vld [vmem:[%s2450_s4 + $0x3e8] sm:$0xf0]  ;;  %v2702_v29 = vor.u32 %v851_v11, %v847_v10  ;;  %v1810_v11 = vor.u32 %v2117_v0, %v1807_v1  ;;  %v2113_v32 = vld [vmem:[%s2450_s4 + $0x204] sm:$0xf] }
  0x7e   : > { %1209 = vmatpush.bf16.msra.mxu1 %v1870_v26  ;;  %v2698_v26 = vor.u32 %v865_v4, %v861_v3  ;;  %v2034_v35 = vor.u32 %v2173_v24, %v2031_v25  ;;  %v2133_v3 = vld [vmem:[%s2450_s4 + $0x2a4] sm:$0xf]  ;;  %v1999_v10 = vld [vmem:[%s2450_s4 + $0x3a8] sm:$0xf0]  ;;  %v2163_v24 = vld [vmem:[%s2450_s4 + $0x394] sm:$0xf] }
  0x7f   : > { %1222 = vmatpush.bf16.msra.mxu2 %v1934_v31  ;;  %v1970_v31 = vor.u32 %v2157_v21, %v1967_v22  ;;  %v2147_v21 = vld [vmem:[%s2450_s4 + $0x314] sm:$0xf]  ;;  %v1927_v22 = vld [vmem:[%s2450_s4 + $0x318] sm:$0xf0] }
  0x80   : > { %1235 = vmatpush.bf16.msra.mxu3 %v1998_v37  ;;  %v2155_v37 = vld [vmem:[%s2450_s4 + $0x354] sm:$0xf]  ;;  %v1991_v25 = vld [vmem:[%s2450_s4 + $0x398] sm:$0xf0] }
  0x81   : > { %1197 = vmatpush.bf16.msra.mxu0 %v1798_v45  ;;  %v1962_v43 = vor.u32 %v2155_v37, %v1959_v38  ;;  %v1823_v45 = vld [vmem:[%s2450_s4 + $0x248] sm:$0xf0]  ;;  %v2145_v37 = vld [vmem:[%s2450_s4 + $0x304] sm:$0xf] }
  0x82   : > { %1210 = vmatpush.bf16.msra.mxu1 %v1862_v48  ;;  %v2153_v48 = vld [vmem:[%s2450_s4 + $0x344] sm:$0xf]  ;;  %v1826_v15 = vor.u32 %v2121_v44, %v1823_v45  ;;  %v1919_v38 = vld [vmem:[%s2450_s4 + $0x308] sm:$0xf0]  ;;  %v1986_v44 = vor.u32 %v2161_v39, %v1983_v40 }
  0x83   : > { %1223 = vmatpush.bf16.msra.mxu2 %v1926_v6  ;;  %v1951_v6 = vld [vmem:[%s2450_s4 + $0x348] sm:$0xf0] }
  0x84   : > { %1236 = vmatpush.bf16.msra.mxu3 %v1990_v52  ;;  %v1954_v52 = vor.u32 %v2153_v48, %v1951_v6 }
  0x85   : > { %1198 = vmatpush.bf16.msra.mxu0 %v1790_v55  ;;  %v2018_v55 = vor.u32 %v2169_v49, %v2015_v50 }
  0x86   : > { %1211 = vmatpush.bf16.msra.mxu1 %v1854_v59  ;;  %v2167_v59 = vld [vmem:[%s2450_s4 + $0x3b4] sm:$0xf] }
  0x87   : > { %1224 = vmatpush.bf16.msra.mxu2 %v1918_v60  ;;  %v2007_v60 = vld [vmem:[%s2450_s4 + $0x3b8] sm:$0xf0] }
  0x88   : > { %1237 = vmatpush.bf16.msra.mxu3 %v1982_v8  ;;  %1199 = vmatmul.bf16.vlgmr.msra.gmra.mxu0 %v2700_v27  ;;  %v2010_v4 = vor.u32 %v2167_v59, %v2007_v60  ;;  %v1935_v8 = vld [vmem:[%s2450_s4 + $0x328] sm:$0xf0] }
  0x89   : > { %1243 = vmatpush.bf16.msrb.mxu0 %v1850_v9  ;;  %1212 = vmatmul.bf16.vlgmr.msra.gmra.mxu1 %v2702_v29  ;;  %v2165_v9 = vld [vmem:[%s2450_s4 + $0x3a4] sm:$0xf] }
  0x8a   : > { %1256 = vmatpush.bf16.msrb.mxu1 %v1914_v12  ;;  %1225 = vmatmul.bf16.vlgmr.msra.gmra.mxu2 %v2694_v23  ;;  %v1874_v12 = vor.u32 %v2133_v3, %v1871_v5 }
  0x8b   : > { %1269 = vmatpush.bf16.msrb.mxu2 %v1978_v13  ;;  %1238 = vmatmul.bf16.vlgmr.msra.gmra.mxu3 %v2698_v26  ;;  %v1938_v13 = vor.u32 %v2149_v7, %v1935_v8 }
  0x8c   : > { %1282 = vmatpush.bf16.msrb.mxu3 %v2042_v19  ;;  %v2002_v19 = vor.u32 %v2165_v9, %v1999_v10 }
  0x8d   : > { %1244 = vmatpush.bf16.msrb.mxu0 %v1842_v28  ;;  %v1802_v28 = vor.u32 %v2115_v14, %v1799_v17 }
  0x8e   : > { %1257 = vmatpush.bf16.msrb.mxu1 %v1906_v30  ;;  %v1866_v30 = vor.u32 %v2131_v18, %v1863_v20  ;;  %v243_v18 = vld [vmem:[#allocation2] sm:$0xff] }
  0x8f   : > { %1270 = vmatpush.bf16.msrb.mxu2 %v1970_v31  ;;  %v1930_v31 = vor.u32 %v2147_v21, %v1927_v22 }
  0x90   : > { %1283 = vmatpush.bf16.msrb.mxu3 %v2034_v35  ;;  %v1994_v35 = vor.u32 %v2163_v24, %v1991_v25 }
  0x91   : > { %1245 = vmatpush.bf16.msrb.mxu0 %v1834_v41  ;;  %v1794_v41 = vor.u32 %v2113_v32, %v1791_v33 }
  0x92   : > { %1258 = vmatpush.bf16.msrb.mxu1 %v1898_v42  ;;  %v1858_v42 = vor.u32 %v2129_v34, %v1855_v36 }
  0x93   : > { %1271 = vmatpush.bf16.msrb.mxu2 %v1962_v43  ;;  %v1922_v43 = vor.u32 %v2145_v37, %v1919_v38 }
  0x94   : > { %1284 = vmatpush.bf16.msrb.mxu3 %v2026_v2 }
  0x95   : > { %1246 = vmatpush.bf16.msrb.mxu0 %v1826_v15 }
  0x96   : > { %1259 = vmatpush.bf16.msrb.mxu1 %v1890_v51 }
  0x97   : > { %1272 = vmatpush.bf16.msrb.mxu2 %v1954_v52 }
  0x98   : > { %1285 = vmatpush.bf16.msrb.mxu3 %v2018_v55 }
  0x99   : > { %1247 = vmatpush.bf16.msrb.mxu0 %v1818_v61 }
  0x9a   : > { %1260 = vmatpush.bf16.msrb.mxu1 %v1882_v62 }
  0x9b   : > { %1273 = vmatpush.bf16.msrb.mxu2 %v1946_v63 }
  0x9c   : > { %1286 = vmatpush.bf16.msrb.mxu3 %v2010_v4 }
  0x9d   : > { %1248 = vmatpush.bf16.msrb.mxu0 %v1810_v11 }
  0x9e   : > { %1261 = vmatpush.bf16.msrb.mxu1 %v1874_v12 }
  0x9f   : > { %1274 = vmatpush.bf16.msrb.mxu2 %v1938_v13 }
  0xa0   : > { %1287 = vmatpush.bf16.msrb.mxu3 %v2002_v19 }
  0xa1   : > { %1249 = vmatpush.bf16.msrb.mxu0 %v1802_v28 }
  0xa2   : > { %1262 = vmatpush.bf16.msrb.mxu1 %v1866_v30 }
  0xa3   : > { %1275 = vmatpush.bf16.msrb.mxu2 %v1930_v31 }
  0xa4   : > { %1288 = vmatpush.bf16.msrb.mxu3 %v1994_v35 }
  0xa5   : > { %1250 = vmatpush.bf16.msrb.mxu0 %v1794_v41 }
  0xa6   : > { %1263 = vmatpush.bf16.msrb.mxu1 %v1858_v42 }
  0xa7   : > { %1276 = vmatpush.bf16.msrb.mxu2 %v1922_v43 }
  0xa8   : > { %1289 = vmatpush.bf16.msrb.mxu3 %v1986_v44  ;;  %1251 = vmatmul.bf16.vlgmr.msrb.gmra.mxu0 %v2700_v27 }
  0xa9   : > { %1264 = vmatmul.bf16.vlgmr.msrb.gmra.mxu1 %v2702_v29 }
  0xaa   : > { %1277 = vmatmul.bf16.vlgmr.msrb.gmra.mxu2 %v2694_v23 }
  0xab   : > { %1290 = vmatmul.bf16.vlgmr.msrb.gmra.mxu3 %v2698_v26 }
  0xc5   : > { %v657_v45 = vpop.f32.mrf.mxu0 }
  0xc6   : > { %v670_v46 = vpop.f32.mrf.mxu1 }
  0xc7   : > { %v671_v2 = vadd.f32 %v670_v46, %v657_v45 }
  0xcd   : > { %v683_v47 = vpop.f32.mrf.mxu2  ;;  %v659_v50 = vpop.f32.mrf.mxu0 }
  0xce   : > { %v684_v48 = vadd.f32 %v683_v47, %v671_v2  ;;  %v696_v6 = vpop.f32.mrf.mxu3  ;;  %v672_v15 = vpop.f32.mrf.mxu1 }
  0xd0   : > { %v697_v49 = vadd.f32 %v696_v6, %v684_v48 }
  0xd5   : > { %v685_v51 = vpop.f32.mrf.mxu2 }
  0xd6   : > { %v698_v52 = vpop.f32.mrf.mxu3 }
  0xe5   : > { %v709_v53 = vpop.f32.mrf.mxu0 }
  0xe6   : > { %v722_v16 = vpop.f32.mrf.mxu1 }
  0xe7   : > { %v723_v0 = vadd.f32 %v722_v16, %v709_v53 }
  0xed   : > { %v735_v27 = vpop.f32.mrf.mxu2  ;;  %v711_v29 = vpop.f32.mrf.mxu0 }
  0xee   : > { %v748_v54 = vpop.f32.mrf.mxu3  ;;  %v724_v55 = vpop.f32.mrf.mxu1  ;;  %v736_v1 = vadd.f32 %v735_v27, %v723_v0 }
  0xf0   : > { %v749_v5 = vadd.f32 %v748_v54, %v736_v1 }
  0xf2   : > { %v754_v9 = vrot.slane %v749_v5, 4 }
  0xf4   : > { %v756_v19 = vsel %vm755_vm0, %v697_v49, %v754_v9 }
  0xf5   : > { %v737_v23 = vpop.f32.mrf.mxu2  ;;  %v758_v24 = vadd.f32 %v756_v19, %v243_v18 }
  0xf6   : > { %v750_v56 = vpop.f32.mrf.mxu3 }
 0x105   : > { %v1200_v26 = vpop.f32.mrf.mxu0 }
 0x106   : > { %v1213_v57 = vpop.f32.mrf.mxu1 }
 0x107   : > { %v1214_v7 = vadd.f32 %v1213_v57, %v1200_v26 }
 0x10d   : > { %v1226_v58 = vpop.f32.mrf.mxu2  ;;  %v1202_v60 = vpop.f32.mrf.mxu0 }
 0x10e   : > { %v1239_v59 = vpop.f32.mrf.mxu3  ;;  %v1215_v61 = vpop.f32.mrf.mxu1  ;;  %v1227_v11 = vadd.f32 %v1226_v58, %v1214_v7 }
 0x110   : > { %v1240_v21 = vadd.f32 %v1239_v59, %v1227_v11 }
 0x115   : > { %v1228_v62 = vpop.f32.mrf.mxu2 }
 0x116   : > { %v1241_v63 = vpop.f32.mrf.mxu3 }
 0x125   : > { %v1252_v3 = vpop.f32.mrf.mxu0 }
 0x126   : > { %v1265_v4 = vpop.f32.mrf.mxu1 }
 0x127   : > { %v1266_v8 = vadd.f32 %v1265_v4, %v1252_v3 }
 0x12d   : > { %v1278_v10 = vpop.f32.mrf.mxu2  ;;  %v1254_v14 = vpop.f32.mrf.mxu0 }
 0x12e   : > { %v1279_v12 = vadd.f32 %v1278_v10, %v1266_v8  ;;  %v1291_v13 = vpop.f32.mrf.mxu3  ;;  %v1267_v17 = vpop.f32.mrf.mxu1 }
 0x130   : > { %v1292_v20 = vadd.f32 %v1291_v13, %v1279_v12 }
 0x132   : > { %v1297_v22 = vrot.slane %v1292_v20, 4 }
 0x133   : > { %1305 = sbr.rel (%p2043_p13) target bundleno = 334 (0x14e), region = 44 }
 0x134   : > { %v1298_v25 = vsel %vm755_vm0, %v1240_v21, %v1297_v22 }
 0x135   : > { %v1300_v28 = vadd.f32 %v1298_v25, %v758_v24  ;;  %v1280_v30 = vpop.f32.mrf.mxu2 }
 0x136   : > { %v1293_v31 = vpop.f32.mrf.mxu3 }
 0x137   : > { %1301 = vst [vmem:[#allocation2] sm:$0xff] %v1300_v28 }
 0x138   : > { %v1306_v32 = vld [vmem:[%s2791_s2] sm:$0x3]  ;;  %vm1323_vm1 = vcmask 1041408  }
 0x139   : > { %v1308_v33 = vperm.slane %v1306_v32, 0  ;;  %v1309_v34 = vperm.slane %v1306_v32, 1 }
 0x13b   : > { %v1310_v35 = vrot.slane %v1309_v34, 4 }
 0x13d   : > { %v1311_v36 = vsel %vm755_vm0, %v1308_v33, %v1310_v35 }
 0x13e   : > { %v1313_v37 = vadd.f32 %v1311_v36, %v1300_v28 }
 0x140   : > { %1315 = vst [vmem:[#allocation1] ss:$2 sm:$0xff] %v1313_v37 }
 0x147   : > { %v1316_v38 = vld.sshfl [vmem:[#allocation1] sm:$0xff pattern:$0x75316420]  ;;  %v1317_v39 = vld.sshfl [vmem:[#allocation1 + $0x8] sm:$0xff pattern:$0x75316420] }
 0x148   : > { %v1320_v40 = vpack.c.bf16 %v1317_v39, %v1316_v38 }
 0x14a   : > { %v1322_v41 = vrot.slane %v1320_v40, 2 }
 0x14c   : > { %v1326_v42 = vsel %vm1323_vm1, %v1320_v40, %v1322_v41 }
 0x14d   : > { %1328 = vst [vmem:[%s2446_s29] sm:$0xf] %v1326_v42 }
 0x14e PF: > { %s14_s18 = sadd.s32 1, %s2336_s18   ;;  %s2795_s12 = smov %s2324_s15 }
 0x14f   : > { %p11_p0 = scmp.ge.s32.totalorder %s14_s18, 18   ;;  %s2796_s13 = smov %s2328_s16 }
 0x150   : > { %s2797_s14 = smov %s2332_s17  ;;  %s2798_s15 = smov %s2802_s20 }
 0x151   : > { %s2799_s16 = smov %s2806_s21  ;;  %s2800_s17 = smov %s2810_s22 }
 0x152   :  { %13 = sbr.rel (!%p11_p0) target bundleno = 4 (0x4), region = 77 }
 0x157   :  { %1358 = vsyncpa [#allocation4], 1 }
 0x158   :  { %1360 = vsyncpa [#allocation4 + $0x1], 1 }

// kernel: _lambda_.13
= control target key start
LH: loop header
LB: loop body
LE: loop exit
PB: predicated region body
PF: predicated region fallthrough
CT: control target
= control target key end

     0   :  { %s4115_s12 = smov 0   ;;  %s4117_s13 = smov 0   ;;  %s4812_s0 = inlined_call_operand.vmem [shape: bf16[2,6,6,256], index: 0, kind: input, shape index: {}]   ;;  %s4813_s1 = inlined_call_operand.vmem [shape: bf16[16,256,512], index: 1, kind: input, shape index: {}]   ;;  %s4814_s2 = inlined_call_operand.vmem [shape: f32[1,512], index: 2, kind: input, shape index: {}]   ;;  %s4815_s3 = inlined_call_operand.vmem [shape: bf16[2,3,3,512], index: 3, kind: output, shape index: {}]  }
   0x1   :  { %s4119_s14 = smov 0   ;;  %s4121_s15 = smov 0  }
   0x2   :  { %s4123_s16 = smov 0   ;;  %s4125_s17 = smov 0  }
   0x3   :  { %s4127_s18 = smov 0  }
   0x4 LB: > { %s25_s19 = sadd.s32 1, %s4080_s15  ;;  %s28_s20 = sadd.s32 1, %s4084_s16  ;;  %s4092_s18 = sphi %s4127_s18, %s13_s18   ;;  %s4088_s17 = sphi %s4125_s17, %s4823_s17   ;;  %s4084_s16 = sphi %s4123_s16, %s4822_s16   ;;  %s4080_s15 = sphi %s4121_s15, %s4821_s15   ;;  %s4076_s14 = sphi %s4119_s14, %s4820_s14   ;;  %s4072_s13 = sphi %s4117_s13, %s4819_s13   ;;  %s4068_s12 = sphi %s4115_s12, %s4818_s12  }
   0x5   : > { %p26_p0 = scmp.ge.s32.totalorder %s25_s19, 4  ;;  %p2485_p1 = scmp.ge.s32.totalorder %s4092_s18, 1 }
   0x6   : > { %p168_p2 = scmp.lt.s32.totalorder %s4092_s18, 25  ;;  %s32_s21 = sadd.s32 1, %s4088_s17 }
   0x7   : > { %s4825_s19 = smov (%p26_p0, %s25_s19), 0  ;;  %s4827_s20 = smov (!%p26_p0, %s28_s20), %s4084_s16 }
   0x8   : > { %p169_p3 = pnand %p2485_p1, %p168_p2  ;;  %p30_p4 = scmp.ge.s32.totalorder %s4827_s20, 3 }
   0x9   : > { %s201_s22 = sadd.s32 (!%p169_p3), %s4068_s12, %s4072_s13  ;;  %p202_p6 = scmp.lt.s32.totalorder (!%p169_p3), %s4076_s14, 1 }
   0xa   : > { %s4829_s20 = smov (%p30_p4, %s4827_s20), 0  ;;  %s4831_s21 = smov (!%p30_p4, %s32_s21), %s4088_s17 }
   0xb   : > { %p34_p5 = scmp.ge.s32.totalorder %s4831_s21, 2  ;;  %172 = sbr.rel (%p169_p3) target bundleno = 453 (0x1c5), region = 32 }
   0xc   : > { %p204_p7 = scmp.lt.s32.totalorder (!%p169_p3), %s201_s22, 5  ;;  %p214_p8 = scmp.lt.s32.totalorder (!%p169_p3), %s4072_s13, 2 }
   0xd   : > { %s4833_s21 = smov (%p34_p5, %s4831_s21), 0  ;;  %p2490_p9 = scmp.ne.s32.totalorder (!%p169_p3), %s4068_s12, 0 }
  0x10   : > { %s4835_s14 = smov (!%p202_p6, %s4076_s14), 1  ;;  %s4837_s22 = smov (!%p204_p7, %s201_s22), 5 }
  0x11   : > { %s3980_s23 = smul.u32 12, %s4835_s14  ;;  %s2486_s24 = sshll.u32 %s4837_s22, 1 }
  0x12   : > { %s4839_s13 = smov (!%p214_p8, %s4072_s13), 2  ;;  %224 = sbr.rel (%p2490_p9) target bundleno = 26 (0x1a), region = 36 }
  0x13   : > { %s208_s25 = sadd.s32 %s3980_s23, %s2486_s24  ;;  %s2488_s30 = sshll.u32 %s4839_s13, 2 }
  0x14   : > { %s2487_s26 = sshll.u32 %s208_s25, 2  ;;  %s218_s4 = sadd.s32 %s3980_s23, %s2488_s30 }
  0x15   : > { %s4167_s29 = scalar_lea.vmem %s4812_s0, %s2487_s26  ;;  %s2489_s5 = sshll.u32 %s218_s4, 1 }
  0x16   : > { %s4173_s8 = scalar_lea.vmem %s4815_s3, %s2489_s5 }
  0x17   : > { %v4094_v0 = vmov 0.0  }
  0x18   : > { %225 = vst [vmem:[#allocation2] sm:$0x77] %v4094_v0 }
  0x19   : > { %226 = vst [vmem:[#allocation2 + $0x8] sm:$0x77] %v4094_v0 }
  0x1a PF: > { %s3720_s9 = sshll.u32 %s4068_s12, 11  ;;  %vm735_vm0 = vcmask 1043456   ;;  %p3716_p10 = scmp.ne.s32.totalorder %s4068_s12, 3 }
  0x1b   : > { %s4180_s13 = scalar_lea.vmem %s4813_s1, %s3720_s9 }
  0x1c   : > { %v2608_v1 = vld [vmem:[%s4180_s13 + $0xe0] sm:$0xf]  ;;  %v3751_v2 = vld [vmem:[%s4180_s13 + $0xec] sm:$0xf0]  ;;  %v3749_v6 = vld [vmem:[%s4180_s13 + $0xe4] sm:$0xf] }
  0x1d   : > { %v2736_v3 = vld [vmem:[%s4180_s13 + $0x1e0] sm:$0xf]  ;;  %v2609_v4 = vor.u32 %v3751_v2, %v2608_v1  ;;  %v3783_v5 = vld [vmem:[%s4180_s13 + $0x1ec] sm:$0xf0]  ;;  %v2610_v7 = vld [vmem:[%s4180_s13 + $0xf0] sm:$0xf0] }
  0x1e   : > { %v2737_v8 = vor.u32 %v3783_v5, %v2736_v3  ;;  %v2613_v9 = vor.u32 %v3749_v6, %v2610_v7  ;;  %v3781_v10 = vld [vmem:[%s4180_s13 + $0x1e4] sm:$0xf]  ;;  %v2738_v11 = vld [vmem:[%s4180_s13 + $0x1f0] sm:$0xf0]  ;;  %v2592_v12 = vld [vmem:[%s4180_s13 + $0xc0] sm:$0xf] }
  0x1f   : > { %625 = vmatpush.bf16.msra.mxu0 %v2609_v4  ;;  %v2741_v13 = vor.u32 %v3781_v10, %v2738_v11  ;;  %v3747_v14 = vld [vmem:[%s4180_s13 + $0xcc] sm:$0xf0]  ;;  %v2720_v15 = vld [vmem:[%s4180_s13 + $0x1c0] sm:$0xf]  ;;  %v3745_v19 = vld [vmem:[%s4180_s13 + $0xc4] sm:$0xf] }
  0x20   : > { %v3779_v16 = vld [vmem:[%s4180_s13 + $0x1cc] sm:$0xf0]  ;;  %638 = vmatpush.bf16.msra.mxu1 %v2737_v8  ;;  %651 = vmatpush.bf16.msra.mxu2 %v2613_v9  ;;  %v2593_v17 = vor.u32 %v3747_v14, %v2592_v12  ;;  %v2594_v20 = vld [vmem:[%s4180_s13 + $0xd0] sm:$0xf0]  ;;  %v3777_v21 = vld [vmem:[%s4180_s13 + $0x1c4] sm:$0xf] }
  0x21   : > { %v2721_v18 = vor.u32 %v3779_v16, %v2720_v15  ;;  %664 = vmatpush.bf16.msra.mxu3 %v2741_v13  ;;  %v2597_v22 = vor.u32 %v3745_v19, %v2594_v20  ;;  %v2722_v23 = vld [vmem:[%s4180_s13 + $0x1d0] sm:$0xf0]  ;;  %v2576_v24 = vld [vmem:[%s4180_s13 + $0xa0] sm:$0xf]  ;;  %v3743_v25 = vld [vmem:[%s4180_s13 + $0xac] sm:$0xf0] }
  0x22   : > { %v2725_v26 = vor.u32 %v3777_v21, %v2722_v23  ;;  %v2704_v27 = vld [vmem:[%s4180_s13 + $0x1a0] sm:$0xf]  ;;  %v3775_v28 = vld [vmem:[%s4180_s13 + $0x1ac] sm:$0xf0]  ;;  %v3741_v29 = vld [vmem:[%s4180_s13 + $0xa4] sm:$0xf]  ;;  %v2577_v30 = vor.u32 %v3743_v25, %v2576_v24 }
  0x23   : > { %626 = vmatpush.bf16.msra.mxu0 %v2593_v17  ;;  %v2578_v31 = vld [vmem:[%s4180_s13 + $0xb0] sm:$0xf0]  ;;  %v3773_v32 = vld [vmem:[%s4180_s13 + $0x1a4] sm:$0xf]  ;;  %v2705_v34 = vor.u32 %v3775_v28, %v2704_v27  ;;  %v2560_v36 = vld [vmem:[%s4180_s13 + $0x80] sm:$0xf] }
  0x24   : > { %v2706_v33 = vld [vmem:[%s4180_s13 + $0x1b0] sm:$0xf0]  ;;  %639 = vmatpush.bf16.msra.mxu1 %v2721_v18  ;;  %652 = vmatpush.bf16.msra.mxu2 %v2597_v22  ;;  %v2581_v35 = vor.u32 %v3741_v29, %v2578_v31  ;;  %v3739_v37 = vld [vmem:[%s4180_s13 + $0x8c] sm:$0xf0]  ;;  %v2688_v38 = vld [vmem:[%s4180_s13 + $0x180] sm:$0xf] }
  0x25   : > { %665 = vmatpush.bf16.msra.mxu3 %v2725_v26  ;;  %v2709_v39 = vor.u32 %v3773_v32, %v2706_v33  ;;  %v3771_v40 = vld [vmem:[%s4180_s13 + $0x18c] sm:$0xf0]  ;;  %v3737_v41 = vld [vmem:[%s4180_s13 + $0x84] sm:$0xf]  ;;  %v2562_v42 = vld [vmem:[%s4180_s13 + $0x90] sm:$0xf0]  ;;  %v2561_v45 = vor.u32 %v3739_v37, %v2560_v36 }
  0x26   : > { %v3769_v43 = vld [vmem:[%s4180_s13 + $0x184] sm:$0xf]  ;;  %v2690_v44 = vld [vmem:[%s4180_s13 + $0x190] sm:$0xf0]  ;;  %v2689_v46 = vor.u32 %v3771_v40, %v2688_v38  ;;  %v2565_v47 = vor.u32 %v3737_v41, %v2562_v42  ;;  %v2544_v48 = vld [vmem:[%s4180_s13 + $0x60] sm:$0xf] }
  0x27   : > { %627 = vmatpush.bf16.msra.mxu0 %v2577_v30  ;;  %v3735_v49 = vld [vmem:[%s4180_s13 + $0x6c] sm:$0xf0]  ;;  %v2672_v50 = vld [vmem:[%s4180_s13 + $0x160] sm:$0xf]  ;;  %v2693_v51 = vor.u32 %v3769_v43, %v2690_v44  ;;  %v3733_v53 = vld [vmem:[%s4180_s13 + $0x64] sm:$0xf] }
  0x28   : > { %640 = vmatpush.bf16.msra.mxu1 %v2705_v34  ;;  %653 = vmatpush.bf16.msra.mxu2 %v2581_v35  ;;  %v3767_v52 = vld [vmem:[%s4180_s13 + $0x16c] sm:$0xf0]  ;;  %v2546_v54 = vld [vmem:[%s4180_s13 + $0x70] sm:$0xf0]  ;;  %v3765_v55 = vld [vmem:[%s4180_s13 + $0x164] sm:$0xf]  ;;  %v2545_v57 = vor.u32 %v3735_v49, %v2544_v48 }
  0x29   : > { %666 = vmatpush.bf16.msra.mxu3 %v2709_v39  ;;  %v2674_v56 = vld [vmem:[%s4180_s13 + $0x170] sm:$0xf0]  ;;  %v2673_v58 = vor.u32 %v3767_v52, %v2672_v50  ;;  %v2549_v59 = vor.u32 %v3733_v53, %v2546_v54  ;;  %v2528_v60 = vld [vmem:[%s4180_s13 + $0x40] sm:$0xf]  ;;  %v3731_v61 = vld [vmem:[%s4180_s13 + $0x4c] sm:$0xf0] }
  0x2a   : > { %v2656_v62 = vld [vmem:[%s4180_s13 + $0x140] sm:$0xf]  ;;  %v2677_v63 = vor.u32 %v3765_v55, %v2674_v56  ;;  %v3763_v0 = vld [vmem:[%s4180_s13 + $0x14c] sm:$0xf0]  ;;  %v3729_v1 = vld [vmem:[%s4180_s13 + $0x44] sm:$0xf]  ;;  %v2529_v5 = vor.u32 %v3731_v61, %v2528_v60 }
  0x2b   : > { %628 = vmatpush.bf16.msra.mxu0 %v2561_v45  ;;  %v2530_v2 = vld [vmem:[%s4180_s13 + $0x50] sm:$0xf0]  ;;  %v3761_v3 = vld [vmem:[%s4180_s13 + $0x144] sm:$0xf]  ;;  %v2657_v6 = vor.u32 %v3763_v0, %v2656_v62  ;;  %v2512_v8 = vld [vmem:[%s4180_s13 + $0x20] sm:$0xf] }
  0x2c   : > { %641 = vmatpush.bf16.msra.mxu1 %v2689_v46  ;;  %654 = vmatpush.bf16.msra.mxu2 %v2565_v47  ;;  %v2658_v4 = vld [vmem:[%s4180_s13 + $0x150] sm:$0xf0]  ;;  %v2533_v7 = vor.u32 %v3729_v1, %v2530_v2  ;;  %v3727_v9 = vld [vmem:[%s4180_s13 + $0x2c] sm:$0xf0]  ;;  %v2640_v10 = vld [vmem:[%s4180_s13 + $0x120] sm:$0xf] }
  0x2d   : > { %667 = vmatpush.bf16.msra.mxu3 %v2693_v51  ;;  %v2661_v11 = vor.u32 %v3761_v3, %v2658_v4  ;;  %v3759_v12 = vld [vmem:[%s4180_s13 + $0x12c] sm:$0xf0]  ;;  %v3725_v13 = vld [vmem:[%s4180_s13 + $0x24] sm:$0xf]  ;;  %v2514_v14 = vld [vmem:[%s4180_s13 + $0x30] sm:$0xf0]  ;;  %v2513_v17 = vor.u32 %v3727_v9, %v2512_v8 }
  0x2e   : > { %v3757_v15 = vld [vmem:[%s4180_s13 + $0x124] sm:$0xf]  ;;  %v2642_v16 = vld [vmem:[%s4180_s13 + $0x130] sm:$0xf0]  ;;  %v2496_v18 = vld [vmem:[%s4180_s13] sm:$0xf]  ;;  %v2641_v20 = vor.u32 %v3759_v12, %v2640_v10  ;;  %v2517_v21 = vor.u32 %v3725_v13, %v2514_v14 }
  0x2f   : > { %629 = vmatpush.bf16.msra.mxu0 %v2545_v57  ;;  %v3723_v19 = vld [vmem:[%s4180_s13 + $0xc] sm:$0xf0]  ;;  %v2624_v22 = vld [vmem:[%s4180_s13 + $0x100] sm:$0xf]  ;;  %v3721_v24 = vld [vmem:[%s4180_s13 + $0x4] sm:$0xf]  ;;  %v2645_v25 = vor.u32 %v3757_v15, %v2642_v16 }
  0x30   : > { %642 = vmatpush.bf16.msra.mxu1 %v2673_v58  ;;  %655 = vmatpush.bf16.msra.mxu2 %v2549_v59  ;;  %v3755_v23 = vld [vmem:[%s4180_s13 + $0x10c] sm:$0xf0]  ;;  %v2498_v26 = vld [vmem:[%s4180_s13 + $0x10] sm:$0xf0]  ;;  %v3753_v27 = vld [vmem:[%s4180_s13 + $0x104] sm:$0xf]  ;;  %v2497_v32 = vor.u32 %v3723_v19, %v2496_v18 }
  0x31   : > { %668 = vmatpush.bf16.msra.mxu3 %v2677_v63  ;;  %v2626_v28 = vld [vmem:[%s4180_s13 + $0x110] sm:$0xf0]  ;;  %v2616_v29 = vld [vmem:[%s4180_s13 + $0xe8] sm:$0xf]  ;;  %v3752_v30 = vld [vmem:[%s4180_s13 + $0xf4] sm:$0xf0]  ;;  %v2625_v36 = vor.u32 %v3755_v23, %v2624_v22  ;;  %v2501_v37 = vor.u32 %v3721_v24, %v2498_v26 }
  0x32   : > { %v2744_v31 = vld [vmem:[%s4180_s13 + $0x1e8] sm:$0xf]  ;;  %v3784_v33 = vld [vmem:[%s4180_s13 + $0x1f4] sm:$0xf0]  ;;  %v3750_v34 = vld [vmem:[%s4180_s13 + $0xec] sm:$0xf]  ;;  %v2629_v40 = vor.u32 %v3753_v27, %v2626_v28  ;;  %v2617_v41 = vor.u32 %v3752_v30, %v2616_v29 }
  0x33   : > { %630 = vmatpush.bf16.msra.mxu0 %v2529_v5  ;;  %v2618_v35 = vld [vmem:[%s4180_s13 + $0xf8] sm:$0xf0]  ;;  %v3782_v38 = vld [vmem:[%s4180_s13 + $0x1ec] sm:$0xf]  ;;  %v2745_v42 = vor.u32 %v3784_v33, %v2744_v31  ;;  %v2600_v44 = vld [vmem:[%s4180_s13 + $0xc8] sm:$0xf] }
  0x34   : > { %643 = vmatpush.bf16.msra.mxu1 %v2657_v6  ;;  %656 = vmatpush.bf16.msra.mxu2 %v2533_v7  ;;  %v2746_v39 = vld [vmem:[%s4180_s13 + $0x1f8] sm:$0xf0]  ;;  %v2621_v43 = vor.u32 %v3750_v34, %v2618_v35  ;;  %v3748_v45 = vld [vmem:[%s4180_s13 + $0xd4] sm:$0xf0]  ;;  %v2728_v46 = vld [vmem:[%s4180_s13 + $0x1c8] sm:$0xf] }
  0x35   : > { %669 = vmatpush.bf16.msra.mxu3 %v2661_v11  ;;  %v2749_v47 = vor.u32 %v3782_v38, %v2746_v39  ;;  %v3780_v48 = vld [vmem:[%s4180_s13 + $0x1d4] sm:$0xf0]  ;;  %v3746_v49 = vld [vmem:[%s4180_s13 + $0xcc] sm:$0xf]  ;;  %v2602_v50 = vld [vmem:[%s4180_s13 + $0xd8] sm:$0xf0]  ;;  %v2601_v53 = vor.u32 %v3748_v45, %v2600_v44 }
  0x36   : > { %v3778_v51 = vld [vmem:[%s4180_s13 + $0x1cc] sm:$0xf]  ;;  %v2730_v52 = vld [vmem:[%s4180_s13 + $0x1d8] sm:$0xf0]  ;;  %v2729_v54 = vor.u32 %v3780_v48, %v2728_v46  ;;  %v2605_v55 = vor.u32 %v3746_v49, %v2602_v50  ;;  %v2584_v56 = vld [vmem:[%s4180_s13 + $0xa8] sm:$0xf] }
  0x37   : > { %631 = vmatpush.bf16.msra.mxu0 %v2513_v17  ;;  %v3744_v57 = vld [vmem:[%s4180_s13 + $0xb4] sm:$0xf0]  ;;  %v2712_v58 = vld [vmem:[%s4180_s13 + $0x1a8] sm:$0xf]  ;;  %v2733_v59 = vor.u32 %v3778_v51, %v2730_v52  ;;  %v3742_v61 = vld [vmem:[%s4180_s13 + $0xac] sm:$0xf] }
  0x38   : > { %644 = vmatpush.bf16.msra.mxu1 %v2641_v20  ;;  %657 = vmatpush.bf16.msra.mxu2 %v2517_v21  ;;  %v3776_v60 = vld [vmem:[%s4180_s13 + $0x1b4] sm:$0xf0]  ;;  %v2586_v62 = vld [vmem:[%s4180_s13 + $0xb8] sm:$0xf0]  ;;  %v3774_v63 = vld [vmem:[%s4180_s13 + $0x1ac] sm:$0xf]  ;;  %v2585_v1 = vor.u32 %v3744_v57, %v2584_v56 }
  0x39   : > { %670 = vmatpush.bf16.msra.mxu3 %v2645_v25  ;;  %v2714_v0 = vld [vmem:[%s4180_s13 + $0x1b8] sm:$0xf0]  ;;  %v229_v2 = vld [vmem:[%s4167_s29] sm:$0x33]  ;;  %v2713_v3 = vor.u32 %v3776_v60, %v2712_v58  ;;  %v2589_v4 = vor.u32 %v3742_v61, %v2586_v62  ;;  %v2568_v5 = vld [vmem:[%s4180_s13 + $0x88] sm:$0xf] }
  0x3a   : > { %v3740_v6 = vld [vmem:[%s4180_s13 + $0x94] sm:$0xf0]  ;;  %v2696_v7 = vld [vmem:[%s4180_s13 + $0x188] sm:$0xf]  ;;  %v299_v8 = vunpack.c.l.b16 %v229_v2  ;;  %v300_v9 = vunpack.c.h.b16 %v229_v2  ;;  %v2717_v10 = vor.u32 %v3774_v63, %v2714_v0  ;;  %v3738_v12 = vld [vmem:[%s4180_s13 + $0x8c] sm:$0xf] }
  0x3b   : > { %632 = vmatpush.bf16.msra.mxu0 %v2497_v32  ;;  %v3772_v11 = vld [vmem:[%s4180_s13 + $0x194] sm:$0xf0]  ;;  %v2570_v13 = vld [vmem:[%s4180_s13 + $0x98] sm:$0xf0]  ;;  %v3770_v14 = vld [vmem:[%s4180_s13 + $0x18c] sm:$0xf]  ;;  %v2569_v18 = vor.u32 %v3740_v6, %v2568_v5 }
  0x3c   : > { %645 = vmatpush.bf16.msra.mxu1 %v2625_v36  ;;  %658 = vmatpush.bf16.msra.mxu2 %v2501_v37  ;;  %v2698_v15 = vld [vmem:[%s4180_s13 + $0x198] sm:$0xf0]  ;;  %v4279_v16 = vpack.c.b16 %v299_v8, %v299_v8  ;;  %v4281_v17 = vpack.c.b16 %v300_v9, %v300_v9  ;;  %v2697_v19 = vor.u32 %v3772_v11, %v2696_v7  ;;  %v2552_v21 = vld [vmem:[%s4180_s13 + $0x68] sm:$0xf]  ;;  %v3736_v22 = vld [vmem:[%s4180_s13 + $0x74] sm:$0xf0] }
  0x3d   : > { %671 = vmatpush.bf16.msra.mxu3 %v2629_v40  ;;  %v2573_v20 = vor.u32 %v3738_v12, %v2570_v13  ;;  %v2680_v23 = vld [vmem:[%s4180_s13 + $0x168] sm:$0xf]  ;;  %v2701_v24 = vor.u32 %v3770_v14, %v2698_v15  ;;  %v3768_v25 = vld [vmem:[%s4180_s13 + $0x174] sm:$0xf0]  ;;  %v3734_v26 = vld [vmem:[%s4180_s13 + $0x6c] sm:$0xf]  ;;  %v2553_v30 = vor.u32 %v3736_v22, %v2552_v21 }
  0x3e   : > { %v2554_v27 = vld [vmem:[%s4180_s13 + $0x78] sm:$0xf0]  ;;  %v3766_v28 = vld [vmem:[%s4180_s13 + $0x16c] sm:$0xf]  ;;  %633 = vmatmul.bf16.vlgmr.msra.gmra.mxu0 %v4279_v16  ;;  %v2681_v31 = vor.u32 %v3768_v25, %v2680_v23  ;;  %v2536_v33 = vld [vmem:[%s4180_s13 + $0x48] sm:$0xf] }
  0x3f   : > { %677 = vmatpush.bf16.msrb.mxu0 %v2617_v41  ;;  %659 = vmatmul.bf16.vlgmr.msra.gmra.mxu2 %v4279_v16  ;;  %v2682_v29 = vld [vmem:[%s4180_s13 + $0x178] sm:$0xf0]  ;;  %v2557_v32 = vor.u32 %v3734_v26, %v2554_v27  ;;  %v3732_v34 = vld [vmem:[%s4180_s13 + $0x54] sm:$0xf0]  ;;  %v2664_v35 = vld [vmem:[%s4180_s13 + $0x148] sm:$0xf] }
  0x40   : > { %690 = vmatpush.bf16.msrb.mxu1 %v2745_v42  ;;  %703 = vmatpush.bf16.msrb.mxu2 %v2621_v43  ;;  %v2685_v36 = vor.u32 %v3766_v28, %v2682_v29  ;;  %v3764_v37 = vld [vmem:[%s4180_s13 + $0x154] sm:$0xf0]  ;;  %v3730_v38 = vld [vmem:[%s4180_s13 + $0x4c] sm:$0xf]  ;;  %v2538_v39 = vld [vmem:[%s4180_s13 + $0x58] sm:$0xf0]  ;;  %v2537_v42 = vor.u32 %v3732_v34, %v2536_v33 }
  0x41   : > { %716 = vmatpush.bf16.msrb.mxu3 %v2749_v47  ;;  %646 = vmatmul.bf16.vlgmr.msra.gmra.mxu1 %v4281_v17  ;;  %v3762_v40 = vld [vmem:[%s4180_s13 + $0x14c] sm:$0xf]  ;;  %v2666_v41 = vld [vmem:[%s4180_s13 + $0x158] sm:$0xf0]  ;;  %v2665_v43 = vor.u32 %v3764_v37, %v2664_v35  ;;  %v2541_v44 = vor.u32 %v3730_v38, %v2538_v39  ;;  %v2520_v45 = vld [vmem:[%s4180_s13 + $0x28] sm:$0xf] }
  0x42   : > { %672 = vmatmul.bf16.vlgmr.msra.gmra.mxu3 %v4281_v17  ;;  %v3728_v46 = vld [vmem:[%s4180_s13 + $0x34] sm:$0xf0]  ;;  %v2648_v47 = vld [vmem:[%s4180_s13 + $0x128] sm:$0xf]  ;;  %v2669_v48 = vor.u32 %v3762_v40, %v2666_v41  ;;  %v3726_v50 = vld [vmem:[%s4180_s13 + $0x2c] sm:$0xf] }
  0x43   : > { %678 = vmatpush.bf16.msrb.mxu0 %v2601_v53  ;;  %v3760_v49 = vld [vmem:[%s4180_s13 + $0x134] sm:$0xf0]  ;;  %v2522_v51 = vld [vmem:[%s4180_s13 + $0x38] sm:$0xf0]  ;;  %v3758_v52 = vld [vmem:[%s4180_s13 + $0x12c] sm:$0xf] }
  0x44   : > { %691 = vmatpush.bf16.msrb.mxu1 %v2729_v54  ;;  %704 = vmatpush.bf16.msrb.mxu2 %v2605_v55  ;;  %v2650_v53 = vld [vmem:[%s4180_s13 + $0x138] sm:$0xf0]  ;;  %v2521_v54 = vor.u32 %v3728_v46, %v2520_v45  ;;  %v2504_v55 = vld [vmem:[%s4180_s13 + $0x8] sm:$0xf]  ;;  %v3724_v56 = vld [vmem:[%s4180_s13 + $0x14] sm:$0xf0]  ;;  %v2649_v57 = vor.u32 %v3760_v49, %v2648_v47  ;;  %v2525_v58 = vor.u32 %v3726_v50, %v2522_v51 }
  0x45   : > { %717 = vmatpush.bf16.msrb.mxu3 %v2733_v59  ;;  %v2632_v59 = vld [vmem:[%s4180_s13 + $0x108] sm:$0xf]  ;;  %v3756_v60 = vld [vmem:[%s4180_s13 + $0x114] sm:$0xf0]  ;;  %v3722_v61 = vld [vmem:[%s4180_s13 + $0xc] sm:$0xf]  ;;  %v2653_v62 = vor.u32 %v3758_v52, %v2650_v53  ;;  %v2505_v5 = vor.u32 %v3724_v56, %v2504_v55 }
  0x46   : > { %v2506_v63 = vld [vmem:[%s4180_s13 + $0x18] sm:$0xf0]  ;;  %v3754_v0 = vld [vmem:[%s4180_s13 + $0x10c] sm:$0xf]  ;;  %v2930_v2 = vld [vmem:[%s4180_s13 + $0x2e0] sm:$0xf]  ;;  %v2633_v9 = vor.u32 %v3756_v60, %v2632_v59 }
  0x47   : > { %679 = vmatpush.bf16.msrb.mxu0 %v2585_v1  ;;  %v2634_v1 = vld [vmem:[%s4180_s13 + $0x118] sm:$0xf0]  ;;  %v3848_v6 = vld [vmem:[%s4180_s13 + $0x3ec] sm:$0xf0]  ;;  %v3814_v7 = vld [vmem:[%s4180_s13 + $0x2e4] sm:$0xf] }
  0x48   : > { %692 = vmatpush.bf16.msrb.mxu1 %v2713_v3  ;;  %705 = vmatpush.bf16.msrb.mxu2 %v2589_v4  ;;  %v3816_v3 = vld [vmem:[%s4180_s13 + $0x2ec] sm:$0xf0]  ;;  %v3058_v4 = vld [vmem:[%s4180_s13 + $0x3e0] sm:$0xf]  ;;  %v2932_v8 = vld [vmem:[%s4180_s13 + $0x2f0] sm:$0xf0]  ;;  %v2637_v13 = vor.u32 %v3754_v0, %v2634_v1 }
  0x49   : > { %718 = vmatpush.bf16.msrb.mxu3 %v2717_v10  ;;  %v2509_v10 = vor.u32 %v3722_v61, %v2506_v63  ;;  %v3846_v11 = vld [vmem:[%s4180_s13 + $0x3e4] sm:$0xf]  ;;  %v3060_v12 = vld [vmem:[%s4180_s13 + $0x3f0] sm:$0xf0]  ;;  %v2931_v14 = vor.u32 %v3816_v3, %v2930_v2  ;;  %v3059_v15 = vor.u32 %v3848_v6, %v3058_v4  ;;  %v3042_v21 = vld [vmem:[%s4180_s13 + $0x3c0] sm:$0xf] }
  0x4a   : > { %v3063_v22 = vor.u32 %v3846_v11, %v3060_v12  ;;  %v3844_v23 = vld [vmem:[%s4180_s13 + $0x3cc] sm:$0xf0]  ;;  %v2916_v25 = vld [vmem:[%s4180_s13 + $0x2d0] sm:$0xf0]  ;;  %v3842_v26 = vld [vmem:[%s4180_s13 + $0x3c4] sm:$0xf] }
  0x4b   : > { %680 = vmatpush.bf16.msrb.mxu0 %v2569_v18  ;;  %v2935_v18 = vor.u32 %v3814_v7, %v2932_v8  ;;  %v3044_v27 = vld [vmem:[%s4180_s13 + $0x3d0] sm:$0xf0]  ;;  %v3043_v29 = vor.u32 %v3844_v23, %v3042_v21  ;;  %v3026_v33 = vld [vmem:[%s4180_s13 + $0x3a0] sm:$0xf]  ;;  %v3840_v35 = vld [vmem:[%s4180_s13 + $0x3ac] sm:$0xf0] }
  0x4c   : > { %693 = vmatpush.bf16.msrb.mxu1 %v2697_v19  ;;  %706 = vmatpush.bf16.msrb.mxu2 %v2573_v20  ;;  %v2914_v19 = vld [vmem:[%s4180_s13 + $0x2c0] sm:$0xf]  ;;  %v3812_v20 = vld [vmem:[%s4180_s13 + $0x2cc] sm:$0xf0]  ;;  %v3047_v34 = vor.u32 %v3842_v26, %v3044_v27  ;;  %v2900_v37 = vld [vmem:[%s4180_s13 + $0x2b0] sm:$0xf0]  ;;  %v3027_v41 = vor.u32 %v3840_v35, %v3026_v33 }
  0x4d   : > { %719 = vmatpush.bf16.msrb.mxu3 %v2701_v24  ;;  %v3810_v24 = vld [vmem:[%s4180_s13 + $0x2c4] sm:$0xf]  ;;  %v2915_v28 = vor.u32 %v3812_v20, %v2914_v19  ;;  %v3028_v39 = vld [vmem:[%s4180_s13 + $0x3b0] sm:$0xf0]  ;;  %v3010_v45 = vld [vmem:[%s4180_s13 + $0x380] sm:$0xf] }
  0x4e   : > { %v3838_v38 = vld [vmem:[%s4180_s13 + $0x3a4] sm:$0xf]  ;;  %v3836_v47 = vld [vmem:[%s4180_s13 + $0x38c] sm:$0xf0]  ;;  %v2884_v49 = vld [vmem:[%s4180_s13 + $0x290] sm:$0xf0] }
  0x4f   : > { %681 = vmatpush.bf16.msrb.mxu0 %v2553_v30  ;;  %v2919_v30 = vor.u32 %v3810_v24, %v2916_v25  ;;  %v3031_v46 = vor.u32 %v3838_v38, %v3028_v39  ;;  %v3834_v50 = vld [vmem:[%s4180_s13 + $0x384] sm:$0xf]  ;;  %v3012_v51 = vld [vmem:[%s4180_s13 + $0x390] sm:$0xf0]  ;;  %v3011_v53 = vor.u32 %v3836_v47, %v3010_v45  ;;  %v2866_v55 = vld [vmem:[%s4180_s13 + $0x260] sm:$0xf] }
  0x50   : > { %694 = vmatpush.bf16.msrb.mxu1 %v2681_v31  ;;  %707 = vmatpush.bf16.msrb.mxu2 %v2557_v32  ;;  %v2898_v31 = vld [vmem:[%s4180_s13 + $0x2a0] sm:$0xf]  ;;  %v3808_v32 = vld [vmem:[%s4180_s13 + $0x2ac] sm:$0xf0]  ;;  %v3798_v60 = vld [vmem:[%s4180_s13 + $0x264] sm:$0xf] }
  0x51   : > { %720 = vmatpush.bf16.msrb.mxu3 %v2685_v36  ;;  %v3806_v36 = vld [vmem:[%s4180_s13 + $0x2a4] sm:$0xf]  ;;  %v2899_v40 = vor.u32 %v3808_v32, %v2898_v31  ;;  %v3800_v56 = vld [vmem:[%s4180_s13 + $0x26c] sm:$0xf0]  ;;  %v2868_v61 = vld [vmem:[%s4180_s13 + $0x270] sm:$0xf0] }
  0x52   : > { %v3832_v59 = vld [vmem:[%s4180_s13 + $0x36c] sm:$0xf0]  ;;  %v2996_v63 = vld [vmem:[%s4180_s13 + $0x370] sm:$0xf0]  ;;  %v2867_v0 = vor.u32 %v3800_v56, %v2866_v55  ;;  %v2871_v2 = vor.u32 %v3798_v60, %v2868_v61  ;;  %v2850_v3 = vld [vmem:[%s4180_s13 + $0x240] sm:$0xf] }
  0x53   : > { %682 = vmatpush.bf16.msrb.mxu0 %v2537_v42  ;;  %v2903_v42 = vor.u32 %v3806_v36, %v2900_v37  ;;  %v3796_v4 = vld [vmem:[%s4180_s13 + $0x24c] sm:$0xf0]  ;;  %v3794_v8 = vld [vmem:[%s4180_s13 + $0x244] sm:$0xf]  ;;  %v2980_v11 = vld [vmem:[%s4180_s13 + $0x350] sm:$0xf0] }
  0x54   : > { %695 = vmatpush.bf16.msrb.mxu1 %v2665_v43  ;;  %708 = vmatpush.bf16.msrb.mxu2 %v2541_v44  ;;  %v2882_v43 = vld [vmem:[%s4180_s13 + $0x280] sm:$0xf]  ;;  %v3804_v44 = vld [vmem:[%s4180_s13 + $0x28c] sm:$0xf0]  ;;  %v2851_v12 = vor.u32 %v3796_v4, %v2850_v3  ;;  %v2836_v23 = vld [vmem:[%s4180_s13 + $0x230] sm:$0xf0] }
  0x55   : > { %721 = vmatpush.bf16.msrb.mxu3 %v2669_v48  ;;  %v3802_v48 = vld [vmem:[%s4180_s13 + $0x284] sm:$0xf]  ;;  %v2883_v52 = vor.u32 %v3804_v44, %v2882_v43  ;;  %v3828_v7 = vld [vmem:[%s4180_s13 + $0x34c] sm:$0xf0]  ;;  %v2962_v19 = vld [vmem:[%s4180_s13 + $0x320] sm:$0xf] }
  0x56   : > { %v3824_v20 = vld [vmem:[%s4180_s13 + $0x32c] sm:$0xf0]  ;;  %v3822_v24 = vld [vmem:[%s4180_s13 + $0x324] sm:$0xf]  ;;  %v2964_v25 = vld [vmem:[%s4180_s13 + $0x330] sm:$0xf0] }
  0x57   : > { %683 = vmatpush.bf16.msrb.mxu0 %v2521_v54  ;;  %v2887_v54 = vor.u32 %v3802_v48, %v2884_v49  ;;  %v2818_v26 = vld [vmem:[%s4180_s13 + $0x200] sm:$0xf]  ;;  %v3788_v27 = vld [vmem:[%s4180_s13 + $0x20c] sm:$0xf0]  ;;  %v813_v31 = vshll.u32 %v4279_v16, 16  ;;  %v2963_v32 = vor.u32 %v3824_v20, %v2962_v19  ;;  %v820_v36 = vshll.u32 %v4281_v17, 16 }
  0x58   : > { %696 = vmatpush.bf16.msrb.mxu1 %v2649_v57  ;;  %709 = vmatpush.bf16.msrb.mxu2 %v2525_v58  ;;  %v2994_v57 = vld [vmem:[%s4180_s13 + $0x360] sm:$0xf]  ;;  %v3015_v58 = vor.u32 %v3834_v50, %v3012_v51  ;;  %v2820_v35 = vld [vmem:[%s4180_s13 + $0x210] sm:$0xf0]  ;;  %v2967_v37 = vor.u32 %v3822_v24, %v2964_v25  ;;  %v3818_v38 = vld [vmem:[%s4180_s13 + $0x304] sm:$0xf]  ;;  %v2819_v44 = vor.u32 %v3788_v27, %v2818_v26 }
  0x59   : > { %722 = vmatpush.bf16.msrb.mxu3 %v2653_v62  ;;  %v3830_v62 = vld [vmem:[%s4180_s13 + $0x364] sm:$0xf]  ;;  %v2995_v1 = vor.u32 %v3832_v59, %v2994_v57  ;;  %v2948_v39 = vld [vmem:[%s4180_s13 + $0x310] sm:$0xf0]  ;;  %v3849_v43 = vld [vmem:[%s4180_s13 + $0x3f4] sm:$0xf0] }
  0x5a   : > { %v2999_v6 = vor.u32 %v3830_v62, %v2996_v63  ;;  %v3815_v45 = vld [vmem:[%s4180_s13 + $0x2ec] sm:$0xf]  ;;  %v811_v47 = vshrl.u32 %v4279_v16, 16  ;;  %v815_v48 = vrot.slane %v813_v31, 1  ;;  %v2951_v55 = vor.u32 %v3818_v38, %v2948_v39  ;;  %v3813_v59 = vld [vmem:[%s4180_s13 + $0x2d4] sm:$0xf0] }
  0x5b   : > { %684 = vmatpush.bf16.msrb.mxu0 %v2505_v5  ;;  %v2978_v5 = vld [vmem:[%s4180_s13 + $0x340] sm:$0xf]  ;;  %v3847_v51 = vld [vmem:[%s4180_s13 + $0x3ec] sm:$0xf]  ;;  %v3050_v60 = vld [vmem:[%s4180_s13 + $0x3c8] sm:$0xf] }
  0x5c   : > { %697 = vmatpush.bf16.msrb.mxu1 %v2633_v9  ;;  %710 = vmatpush.bf16.msrb.mxu2 %v2509_v10  ;;  %v2852_v9 = vld [vmem:[%s4180_s13 + $0x250] sm:$0xf0]  ;;  %v3826_v10 = vld [vmem:[%s4180_s13 + $0x344] sm:$0xf]  ;;  %v4402_v62 = vor.u32 %v815_v48, %v811_v47  ;;  %v3845_v63 = vld [vmem:[%s4180_s13 + $0x3d4] sm:$0xf0] }
  0x5d   : > { %723 = vmatpush.bf16.msrb.mxu3 %v2637_v13  ;;  %v2834_v13 = vld [vmem:[%s4180_s13 + $0x220] sm:$0xf]  ;;  %v2983_v21 = vor.u32 %v3826_v10, %v2980_v11  ;;  %v3052_v3 = vld [vmem:[%s4180_s13 + $0x3d8] sm:$0xf0]  ;;  %v3841_v11 = vld [vmem:[%s4180_s13 + $0x3b4] sm:$0xf0] }
  0x5e   : > { %685 = vmatmul.bf16.vlgmr.msrb.gmra.mxu0 %v4279_v16  ;;  %v3837_v25 = vld [vmem:[%s4180_s13 + $0x394] sm:$0xf0]  ;;  %v3803_v26 = vld [vmem:[%s4180_s13 + $0x28c] sm:$0xf]  ;;  %v2892_v27 = vld [vmem:[%s4180_s13 + $0x298] sm:$0xf0] }
  0x5f   : > { %1146 = vmatpush.bf16.msra.mxu0 %v2931_v14  ;;  %711 = vmatmul.bf16.vlgmr.msrb.gmra.mxu2 %v4279_v16  ;;  %v2979_v14 = vor.u32 %v3828_v7, %v2978_v5  ;;  %v3051_v5 = vor.u32 %v3845_v63, %v3050_v60  ;;  %v2906_v7 = vld [vmem:[%s4180_s13 + $0x2a8] sm:$0xf]  ;;  %v3799_v38 = vld [vmem:[%s4180_s13 + $0x26c] sm:$0xf]  ;;  %v2876_v39 = vld [vmem:[%s4180_s13 + $0x278] sm:$0xf0] }
  0x60   : > { %1159 = vmatpush.bf16.msra.mxu1 %v3059_v15  ;;  %1172 = vmatpush.bf16.msra.mxu2 %v2935_v18  ;;  %v2855_v15 = vor.u32 %v3794_v8, %v2852_v9  ;;  %v3792_v18 = vld [vmem:[%s4180_s13 + $0x22c] sm:$0xf0]  ;;  %v3809_v8 = vld [vmem:[%s4180_s13 + $0x2b4] sm:$0xf0]  ;;  %v3034_v9 = vld [vmem:[%s4180_s13 + $0x3a8] sm:$0xf] }
  0x61   : > { %1185 = vmatpush.bf16.msra.mxu3 %v3063_v22  ;;  %698 = vmatmul.bf16.vlgmr.msrb.gmra.mxu1 %v4281_v17  ;;  %v3790_v22 = vld [vmem:[%s4180_s13 + $0x224] sm:$0xf]  ;;  %v3035_v19 = vor.u32 %v3841_v11, %v3034_v9  ;;  %v2986_v47 = vld [vmem:[%s4180_s13 + $0x348] sm:$0xf]  ;;  %v3825_v60 = vld [vmem:[%s4180_s13 + $0x334] sm:$0xf0] }
  0x62   : > { %724 = vmatmul.bf16.vlgmr.msrb.gmra.mxu3 %v4281_v17  ;;  %v2839_v33 = vor.u32 %v3790_v22, %v2836_v23  ;;  %v3805_v22 = vld [vmem:[%s4180_s13 + $0x294] sm:$0xf0]  ;;  %v3018_v23 = vld [vmem:[%s4180_s13 + $0x388] sm:$0xf]  ;;  %v2844_v63 = vld [vmem:[%s4180_s13 + $0x238] sm:$0xf0] }
  0x63   : > { %1147 = vmatpush.bf16.msra.mxu0 %v2915_v28  ;;  %v2835_v28 = vor.u32 %v3792_v18, %v2834_v13  ;;  %v2908_v13 = vld [vmem:[%s4180_s13 + $0x2b8] sm:$0xf0]  ;;  %v2907_v18 = vor.u32 %v3809_v8, %v2906_v7  ;;  %v3019_v31 = vor.u32 %v3837_v25, %v3018_v23  ;;  %v2954_v7 = vld [vmem:[%s4180_s13 + $0x308] sm:$0xf]  ;;  %v3821_v8 = vld [vmem:[%s4180_s13 + $0x314] sm:$0xf0] }
  0x64   : > { %1160 = vmatpush.bf16.msra.mxu1 %v3043_v29  ;;  %1173 = vmatpush.bf16.msra.mxu2 %v2919_v30  ;;  %v2946_v29 = vld [vmem:[%s4180_s13 + $0x300] sm:$0xf]  ;;  %v3820_v30 = vld [vmem:[%s4180_s13 + $0x30c] sm:$0xf0]  ;;  %v3787_v9 = vld [vmem:[%s4180_s13 + $0x20c] sm:$0xf]  ;;  %v2955_v23 = vor.u32 %v3821_v8, %v2954_v7 }
  0x65   : > { %1186 = vmatpush.bf16.msra.mxu3 %v3047_v34  ;;  %v3786_v34 = vld [vmem:[%s4180_s13 + $0x204] sm:$0xf]  ;;  %v2947_v49 = vor.u32 %v3820_v30, %v2946_v29  ;;  %v3020_v29 = vld [vmem:[%s4180_s13 + $0x398] sm:$0xf0]  ;;  %v3190_v7 = vld [vmem:[%s4180_s13 + $0x470] sm:$0xf0] }
  0x66   : > { %v2823_v50 = vor.u32 %v3786_v34, %v2820_v35  ;;  %v3801_v34 = vld [vmem:[%s4180_s13 + $0x274] sm:$0xf0]  ;;  %v3002_v35 = vld [vmem:[%s4180_s13 + $0x368] sm:$0xf]  ;;  %v2828_v11 = vld [vmem:[%s4180_s13 + $0x218] sm:$0xf0] }
  0x67   : > { %1148 = vmatpush.bf16.msra.mxu0 %v2899_v40  ;;  %v2938_v40 = vld [vmem:[%s4180_s13 + $0x2e8] sm:$0xf]  ;;  %v3911_v25 = vld [vmem:[%s4180_s13 + $0x5e4] sm:$0xf] }
  0x68   : > { %1161 = vmatpush.bf16.msra.mxu1 %v3027_v41  ;;  %1174 = vmatpush.bf16.msra.mxu2 %v2903_v42  ;;  %v3817_v41 = vld [vmem:[%s4180_s13 + $0x2f4] sm:$0xf0]  ;;  %v3066_v42 = vld [vmem:[%s4180_s13 + $0x3e8] sm:$0xf]  ;;  %v3895_v8 = vld [vmem:[%s4180_s13 + $0x564] sm:$0xf] }
  0x69   : > { %1187 = vmatpush.bf16.msra.mxu3 %v3031_v46  ;;  %v2940_v46 = vld [vmem:[%s4180_s13 + $0x2f8] sm:$0xf0]  ;;  %v2939_v56 = vor.u32 %v3817_v41, %v2938_v40  ;;  %v3067_v16 = vor.u32 %v3849_v43, %v3066_v42  ;;  %v3831_v40 = vld [vmem:[%s4180_s13 + $0x36c] sm:$0xf] }
  0x6a   : > { %v2943_v57 = vor.u32 %v3815_v45, %v2940_v46  ;;  %v3004_v41 = vld [vmem:[%s4180_s13 + $0x378] sm:$0xf0]  ;;  %v2858_v45 = vld [vmem:[%s4180_s13 + $0x248] sm:$0xf]  ;;  %v3797_v46 = vld [vmem:[%s4180_s13 + $0x254] sm:$0xf0] }
  0x6b   : > { %1149 = vmatpush.bf16.msra.mxu0 %v2883_v52  ;;  %v3068_v52 = vld [vmem:[%s4180_s13 + $0x3f8] sm:$0xf0]  ;;  %v3007_v48 = vor.u32 %v3831_v40, %v3004_v41 }
  0x6c   : > { %1162 = vmatpush.bf16.msra.mxu1 %v3011_v53  ;;  %1175 = vmatpush.bf16.msra.mxu2 %v2887_v54  ;;  %v818_v53 = vshrl.u32 %v4281_v17, 16  ;;  %v822_v54 = vrot.slane %v820_v36, 1  ;;  %v3071_v61 = vor.u32 %v3847_v51, %v3068_v52  ;;  %v2924_v17 = vld [vmem:[%s4180_s13 + $0x2d8] sm:$0xf0]  ;;  %v3827_v52 = vld [vmem:[%s4180_s13 + $0x34c] sm:$0xf] }
  0x6d   : > { %1188 = vmatpush.bf16.msra.mxu3 %v3015_v58  ;;  %v2922_v58 = vld [vmem:[%s4180_s13 + $0x2c8] sm:$0xf]  ;;  %v2860_v51 = vld [vmem:[%s4180_s13 + $0x258] sm:$0xf0] }
  0x6e   : > { %v2923_v4 = vor.u32 %v3813_v59, %v2922_v58  ;;  %v2970_v58 = vld [vmem:[%s4180_s13 + $0x328] sm:$0xf] }
  0x6f   : > { %1150 = vmatpush.bf16.msra.mxu0 %v2867_v0  ;;  %v3811_v0 = vld [vmem:[%s4180_s13 + $0x2cc] sm:$0xf] }
  0x70   : > { %1163 = vmatpush.bf16.msra.mxu1 %v2995_v1  ;;  %1176 = vmatpush.bf16.msra.mxu2 %v2871_v2  ;;  %v4407_v1 = vor.u32 %v822_v54, %v818_v53  ;;  %v3843_v2 = vld [vmem:[%s4180_s13 + $0x3cc] sm:$0xf]  ;;  %v2988_v53 = vld [vmem:[%s4180_s13 + $0x358] sm:$0xf0]  ;;  %v2859_v54 = vor.u32 %v3797_v46, %v2858_v45  ;;  %v3348_v45 = vld [vmem:[%s4180_s13 + $0x5a0] sm:$0xf] }
  0x71   : > { %1189 = vmatpush.bf16.msra.mxu3 %v2999_v6  ;;  %v2927_v6 = vor.u32 %v3811_v0, %v2924_v17  ;;  %v3055_v10 = vor.u32 %v3843_v2, %v3052_v3  ;;  %v2991_v59 = vor.u32 %v3827_v52, %v2988_v53  ;;  %v3823_v0 = vld [vmem:[%s4180_s13 + $0x32c] sm:$0xf]  ;;  %v2972_v17 = vld [vmem:[%s4180_s13 + $0x338] sm:$0xf0]  ;;  %v2826_v3 = vld [vmem:[%s4180_s13 + $0x208] sm:$0xf] }
  0x73   : > { %1151 = vmatpush.bf16.msra.mxu0 %v2851_v12  ;;  %v3807_v12 = vld [vmem:[%s4180_s13 + $0x2ac] sm:$0xf] }
  0x74   : > { %1164 = vmatpush.bf16.msra.mxu1 %v2979_v14  ;;  %1177 = vmatpush.bf16.msra.mxu2 %v2855_v15  ;;  %v3839_v14 = vld [vmem:[%s4180_s13 + $0x3ac] sm:$0xf]  ;;  %v3036_v15 = vld [vmem:[%s4180_s13 + $0x3b8] sm:$0xf0]  ;;  %v2911_v20 = vor.u32 %v3807_v12, %v2908_v13 }
  0x75   : > { %1190 = vmatpush.bf16.msra.mxu3 %v2983_v21  ;;  %v2890_v21 = vld [vmem:[%s4180_s13 + $0x288] sm:$0xf]  ;;  %v3039_v24 = vor.u32 %v3839_v14, %v3036_v15  ;;  %v3819_v12 = vld [vmem:[%s4180_s13 + $0x30c] sm:$0xf]  ;;  %v2956_v13 = vld [vmem:[%s4180_s13 + $0x318] sm:$0xf0] }
  0x76   : > { %v2891_v30 = vor.u32 %v3805_v22, %v2890_v21  ;;  %v3252_v14 = vld [vmem:[%s4180_s13 + $0x4e0] sm:$0xf]  ;;  %v3881_v15 = vld [vmem:[%s4180_s13 + $0x4ec] sm:$0xf0]  ;;  %v3879_v21 = vld [vmem:[%s4180_s13 + $0x4e4] sm:$0xf] }
  0x77   : > { %1152 = vmatpush.bf16.msra.mxu0 %v2835_v28  ;;  %v3835_v28 = vld [vmem:[%s4180_s13 + $0x38c] sm:$0xf]  ;;  %v3254_v22 = vld [vmem:[%s4180_s13 + $0x4f0] sm:$0xf0] }
  0x78   : > { %1165 = vmatpush.bf16.msra.mxu1 %v2963_v32  ;;  %1178 = vmatpush.bf16.msra.mxu2 %v2839_v33  ;;  %v2895_v32 = vor.u32 %v3803_v26, %v2892_v27  ;;  %v2874_v33 = vld [vmem:[%s4180_s13 + $0x268] sm:$0xf]  ;;  %v3023_v36 = vor.u32 %v3835_v28, %v3020_v29  ;;  %v3382_v26 = vld [vmem:[%s4180_s13 + $0x5f0] sm:$0xf0]  ;;  %v2959_v27 = vor.u32 %v3819_v12, %v2956_v13  ;;  %v3172_v13 = vld [vmem:[%s4180_s13 + $0x440] sm:$0xf] }
  0x79   : > { %1191 = vmatpush.bf16.msra.mxu3 %v2967_v37  ;;  %v3833_v37 = vld [vmem:[%s4180_s13 + $0x374] sm:$0xf0]  ;;  %v2875_v42 = vor.u32 %v3801_v34, %v2874_v33  ;;  %v3253_v28 = vor.u32 %v3881_v15, %v3252_v14  ;;  %v3364_v33 = vld [vmem:[%s4180_s13 + $0x5c0] sm:$0xf]  ;;  %v3385_v34 = vor.u32 %v3911_v25, %v3382_v26  ;;  %v3861_v14 = vld [vmem:[%s4180_s13 + $0x44c] sm:$0xf0] }
  0x7a   : > { %v3003_v43 = vor.u32 %v3833_v37, %v3002_v35  ;;  %v3909_v35 = vld [vmem:[%s4180_s13 + $0x5cc] sm:$0xf0]  ;;  %v3238_v37 = vld [vmem:[%s4180_s13 + $0x4d0] sm:$0xf0]  ;;  %v3300_v15 = vld [vmem:[%s4180_s13 + $0x540] sm:$0xf] }
  0x7b   : > { %1153 = vmatpush.bf16.msra.mxu0 %v2819_v44  ;;  %v2879_v44 = vor.u32 %v3799_v38, %v2876_v39  ;;  %v3907_v38 = vld [vmem:[%s4180_s13 + $0x5c4] sm:$0xf]  ;;  %v3366_v39 = vld [vmem:[%s4180_s13 + $0x5d0] sm:$0xf0]  ;;  %v3365_v41 = vor.u32 %v3909_v35, %v3364_v33  ;;  %v3156_v25 = vld [vmem:[%s4180_s13 + $0x420] sm:$0xf] }
  0x7c   : > { %1166 = vmatpush.bf16.msra.mxu1 %v2947_v49  ;;  %1179 = vmatpush.bf16.msra.mxu2 %v2823_v50  ;;  %v3829_v49 = vld [vmem:[%s4180_s13 + $0x354] sm:$0xf0]  ;;  %v3795_v50 = vld [vmem:[%s4180_s13 + $0x24c] sm:$0xf]  ;;  %v3369_v46 = vor.u32 %v3907_v38, %v3366_v39  ;;  %v3855_v33 = vld [vmem:[%s4180_s13 + $0x424] sm:$0xf] }
  0x7d   : > { %1192 = vmatpush.bf16.msra.mxu3 %v2951_v55  ;;  %v2987_v55 = vor.u32 %v3829_v49, %v2986_v47  ;;  %v3905_v47 = vld [vmem:[%s4180_s13 + $0x5ac] sm:$0xf0]  ;;  %v3222_v49 = vld [vmem:[%s4180_s13 + $0x4b0] sm:$0xf0]  ;;  %v3887_v35 = vld [vmem:[%s4180_s13 + $0x524] sm:$0xf] }
  0x7e   : > { %1154 = vmatmul.bf16.vlgmr.msra.gmra.mxu0 %v4402_v62  ;;  %v3349_v53 = vor.u32 %v3905_v47, %v3348_v45  ;;  %v3140_v38 = vld [vmem:[%s4180_s13 + $0x400] sm:$0xf]  ;;  %v3853_v39 = vld [vmem:[%s4180_s13 + $0x40c] sm:$0xf0]  ;;  %v3851_v45 = vld [vmem:[%s4180_s13 + $0x404] sm:$0xf] }
  0x7f   : > { %1198 = vmatpush.bf16.msrb.mxu0 %v2939_v56  ;;  %1180 = vmatmul.bf16.vlgmr.msra.gmra.mxu2 %v4402_v62  ;;  %v2863_v56 = vor.u32 %v3795_v50, %v2860_v51  ;;  %v3903_v50 = vld [vmem:[%s4180_s13 + $0x5a4] sm:$0xf]  ;;  %v3350_v51 = vld [vmem:[%s4180_s13 + $0x5b0] sm:$0xf0] }
  0x80   : > { %1211 = vmatpush.bf16.msrb.mxu1 %v3067_v16  ;;  %1224 = vmatpush.bf16.msrb.mxu2 %v2943_v57  ;;  %v2842_v16 = vld [vmem:[%s4180_s13 + $0x228] sm:$0xf]  ;;  %v3793_v57 = vld [vmem:[%s4180_s13 + $0x234] sm:$0xf0] }
  0x81   : > { %1237 = vmatpush.bf16.msrb.mxu3 %v3071_v61  ;;  %1167 = vmatmul.bf16.vlgmr.msra.gmra.mxu1 %v4407_v1  ;;  %v3791_v61 = vld [vmem:[%s4180_s13 + $0x22c] sm:$0xf]  ;;  %v2843_v2 = vor.u32 %v3793_v57, %v2842_v16  ;;  %v3332_v16 = vld [vmem:[%s4180_s13 + $0x580] sm:$0xf]  ;;  %v3353_v57 = vor.u32 %v3903_v50, %v3350_v51  ;;  %v3270_v50 = vld [vmem:[%s4180_s13 + $0x510] sm:$0xf0] }
  0x82   : > { %1193 = vmatmul.bf16.vlgmr.msra.gmra.mxu3 %v4407_v1  ;;  %v3260_v51 = vld [vmem:[%s4180_s13 + $0x4e8] sm:$0xf] }
  0x83   : > { %1199 = vmatpush.bf16.msrb.mxu0 %v2923_v4  ;;  %v3789_v4 = vld [vmem:[%s4180_s13 + $0x214] sm:$0xf0] }
  0x84   : > { %1212 = vmatpush.bf16.msrb.mxu1 %v3051_v5  ;;  %1225 = vmatpush.bf16.msrb.mxu2 %v2927_v6  ;;  %v2971_v5 = vor.u32 %v3825_v60, %v2970_v58  ;;  %v2847_v6 = vor.u32 %v3791_v61, %v2844_v63  ;;  %v3901_v58 = vld [vmem:[%s4180_s13 + $0x58c] sm:$0xf0]  ;;  %v3899_v60 = vld [vmem:[%s4180_s13 + $0x584] sm:$0xf] }
  0x85   : > { %1238 = vmatpush.bf16.msrb.mxu3 %v3055_v10  ;;  %v2975_v10 = vor.u32 %v3823_v0, %v2972_v17  ;;  %v3333_v63 = vor.u32 %v3901_v58, %v3332_v16  ;;  %v3188_v17 = vld [vmem:[%s4180_s13 + $0x460] sm:$0xf]  ;;  %v3262_v16 = vld [vmem:[%s4180_s13 + $0x4f8] sm:$0xf0] }
  0x87   : > { %1200 = vmatpush.bf16.msrb.mxu0 %v2907_v18  ;;  %v3380_v18 = vld [vmem:[%s4180_s13 + $0x5e0] sm:$0xf] }
  0x88   : > { %1213 = vmatpush.bf16.msrb.mxu1 %v3035_v19  ;;  %1226 = vmatpush.bf16.msrb.mxu2 %v2911_v20  ;;  %v2827_v19 = vor.u32 %v3789_v4, %v2826_v3  ;;  %v3913_v20 = vld [vmem:[%s4180_s13 + $0x5ec] sm:$0xf0]  ;;  %v3316_v3 = vld [vmem:[%s4180_s13 + $0x560] sm:$0xf] }
  0x89   : > { %1239 = vmatpush.bf16.msrb.mxu3 %v3039_v24  ;;  %v2831_v24 = vor.u32 %v3787_v9, %v2828_v11  ;;  %v3381_v29 = vor.u32 %v3913_v20, %v3380_v18  ;;  %v3318_v9 = vld [vmem:[%s4180_s13 + $0x570] sm:$0xf0]  ;;  %v3859_v20 = vld [vmem:[%s4180_s13 + $0x444] sm:$0xf] }
  0x8a   : > { %v3321_v18 = vor.u32 %v3895_v8, %v3318_v9  ;;  %v3876_v8 = vld [vmem:[%s4180_s13 + $0x4cc] sm:$0xf]  ;;  %v3246_v9 = vld [vmem:[%s4180_s13 + $0x4d8] sm:$0xf0] }
  0x8b   : > { %1201 = vmatpush.bf16.msrb.mxu0 %v2891_v30  ;;  %v3257_v30 = vor.u32 %v3879_v21, %v3254_v22  ;;  %v3174_v21 = vld [vmem:[%s4180_s13 + $0x450] sm:$0xf0]  ;;  %v3891_v22 = vld [vmem:[%s4180_s13 + $0x544] sm:$0xf] }
  0x8c   : > { %1214 = vmatpush.bf16.msrb.mxu1 %v3019_v31  ;;  %1227 = vmatpush.bf16.msrb.mxu2 %v2895_v32  ;;  %v3236_v31 = vld [vmem:[%s4180_s13 + $0x4c0] sm:$0xf]  ;;  %v3877_v32 = vld [vmem:[%s4180_s13 + $0x4cc] sm:$0xf0] }
  0x8d   : > { %1240 = vmatpush.bf16.msrb.mxu3 %v3023_v36  ;;  %v3875_v36 = vld [vmem:[%s4180_s13 + $0x4c4] sm:$0xf]  ;;  %v3237_v40 = vor.u32 %v3877_v32, %v3236_v31  ;;  %v3889_v32 = vld [vmem:[%s4180_s13 + $0x52c] sm:$0xf0] }
  0x8f   : > { %1202 = vmatpush.bf16.msrb.mxu0 %v2875_v42  ;;  %v3241_v42 = vor.u32 %v3875_v36, %v3238_v37  ;;  %v3286_v36 = vld [vmem:[%s4180_s13 + $0x530] sm:$0xf0] }
  0x90   : > { %1215 = vmatpush.bf16.msrb.mxu1 %v3003_v43  ;;  %1228 = vmatpush.bf16.msrb.mxu2 %v2879_v44  ;;  %v3220_v43 = vld [vmem:[%s4180_s13 + $0x4a0] sm:$0xf]  ;;  %v3873_v44 = vld [vmem:[%s4180_s13 + $0x4ac] sm:$0xf0]  ;;  %v3289_v47 = vor.u32 %v3887_v35, %v3286_v36  ;;  %v3868_v35 = vld [vmem:[%s4180_s13 + $0x48c] sm:$0xf] }
  0x91   : > { %1241 = vmatpush.bf16.msrb.mxu3 %v3007_v48  ;;  %v3871_v48 = vld [vmem:[%s4180_s13 + $0x4a4] sm:$0xf]  ;;  %v3221_v52 = vor.u32 %v3873_v44, %v3220_v43  ;;  %v3268_v43 = vld [vmem:[%s4180_s13 + $0x500] sm:$0xf]  ;;  %v3885_v44 = vld [vmem:[%s4180_s13 + $0x50c] sm:$0xf0] }
  0x92   : > { %v3269_v58 = vor.u32 %v3885_v44, %v3268_v43  ;;  %v3214_v36 = vld [vmem:[%s4180_s13 + $0x498] sm:$0xf0]  ;;  %v3866_v43 = vld [vmem:[%s4180_s13 + $0x474] sm:$0xf0]  ;;  %v3324_v44 = vld [vmem:[%s4180_s13 + $0x568] sm:$0xf] }
  0x93   : > { %1203 = vmatpush.bf16.msrb.mxu0 %v2859_v54  ;;  %v3225_v54 = vor.u32 %v3871_v48, %v3222_v49  ;;  %v3142_v48 = vld [vmem:[%s4180_s13 + $0x410] sm:$0xf0]  ;;  %v3883_v49 = vld [vmem:[%s4180_s13 + $0x504] sm:$0xf] }
  0x94   : > { %1216 = vmatpush.bf16.msrb.mxu1 %v2987_v55  ;;  %1229 = vmatpush.bf16.msrb.mxu2 %v2863_v56  ;;  %v3204_v55 = vld [vmem:[%s4180_s13 + $0x480] sm:$0xf]  ;;  %v3869_v56 = vld [vmem:[%s4180_s13 + $0x48c] sm:$0xf0] }
  0x95   : > { %1242 = vmatpush.bf16.msrb.mxu3 %v2991_v59  ;;  %v3206_v59 = vld [vmem:[%s4180_s13 + $0x490] sm:$0xf0]  ;;  %v3205_v61 = vor.u32 %v3869_v56, %v3204_v55  ;;  %v3914_v55 = vld [vmem:[%s4180_s13 + $0x5f4] sm:$0xf0]  ;;  %v3880_v56 = vld [vmem:[%s4180_s13 + $0x4ec] sm:$0xf] }
  0x97   : > { %1204 = vmatpush.bf16.msrb.mxu0 %v2843_v2  ;;  %v3865_v2 = vld [vmem:[%s4180_s13 + $0x46c] sm:$0xf0] }
  0x98   : > { %1217 = vmatpush.bf16.msrb.mxu1 %v2971_v5  ;;  %1230 = vmatpush.bf16.msrb.mxu2 %v2847_v6  ;;  %v3897_v5 = vld [vmem:[%s4180_s13 + $0x56c] sm:$0xf0]  ;;  %v3863_v6 = vld [vmem:[%s4180_s13 + $0x464] sm:$0xf] }
  0x99   : > { %1243 = vmatpush.bf16.msrb.mxu3 %v2975_v10  ;;  %v3189_v10 = vor.u32 %v3865_v2, %v3188_v17  ;;  %v3317_v11 = vor.u32 %v3897_v5, %v3316_v3  ;;  %v3193_v12 = vor.u32 %v3863_v6, %v3190_v7  ;;  %v3265_v2 = vor.u32 %v3880_v56, %v3262_v16  ;;  %v3878_v3 = vld [vmem:[%s4180_s13 + $0x4d4] sm:$0xf0]  ;;  %v3308_v56 = vld [vmem:[%s4180_s13 + $0x548] sm:$0xf] }
  0x9a   : > { %v3910_v5 = vld [vmem:[%s4180_s13 + $0x5d4] sm:$0xf0] }
  0x9b   : > { %1205 = vmatpush.bf16.msrb.mxu0 %v2827_v19  ;;  %v3893_v19 = vld [vmem:[%s4180_s13 + $0x54c] sm:$0xf0] }
  0x9c   : > { %1218 = vmatpush.bf16.msrb.mxu1 %v2955_v23  ;;  %1231 = vmatpush.bf16.msrb.mxu2 %v2831_v24  ;;  %v3302_v23 = vld [vmem:[%s4180_s13 + $0x550] sm:$0xf0]  ;;  %v3173_v24 = vor.u32 %v3861_v14, %v3172_v13  ;;  %v3301_v26 = vor.u32 %v3893_v19, %v3300_v15  ;;  %v3249_v15 = vor.u32 %v3876_v8, %v3246_v9  ;;  %v3874_v19 = vld [vmem:[%s4180_s13 + $0x4b4] sm:$0xf0] }
  0x9d   : > { %1244 = vmatpush.bf16.msrb.mxu3 %v2959_v27  ;;  %v3177_v27 = vor.u32 %v3859_v20, %v3174_v21  ;;  %v3305_v31 = vor.u32 %v3891_v22, %v3302_v23  ;;  %v3356_v20 = vld [vmem:[%s4180_s13 + $0x5a8] sm:$0xf]  ;;  %v3906_v22 = vld [vmem:[%s4180_s13 + $0x5b4] sm:$0xf0]  ;;  %v3872_v23 = vld [vmem:[%s4180_s13 + $0x4ac] sm:$0xf] }
  0x9e   : > { %1206 = vmatmul.bf16.vlgmr.msrb.gmra.mxu0 %v4402_v62  ;;  %v3890_v9 = vld [vmem:[%s4180_s13 + $0x534] sm:$0xf0] }
  0x9f   : > { %1660 = vmatpush.bf16.msra.mxu0 %v3253_v28  ;;  %1232 = vmatmul.bf16.vlgmr.msrb.gmra.mxu2 %v4402_v62  ;;  %v3867_v62 = vld [vmem:[%s4180_s13 + $0x484] sm:$0xf]  ;;  %v3857_v28 = vld [vmem:[%s4180_s13 + $0x42c] sm:$0xf0] }
  0xa0   : > { %1673 = vmatpush.bf16.msra.mxu1 %v3381_v29  ;;  %1686 = vmatpush.bf16.msra.mxu2 %v3257_v30  ;;  %v3209_v0 = vor.u32 %v3867_v62, %v3206_v59  ;;  %v3284_v29 = vld [vmem:[%s4180_s13 + $0x520] sm:$0xf]  ;;  %v3157_v37 = vor.u32 %v3857_v28, %v3156_v25  ;;  %v3145_v62 = vor.u32 %v3851_v45, %v3142_v48  ;;  %v3912_v59 = vld [vmem:[%s4180_s13 + $0x5ec] sm:$0xf]  ;;  %v3198_v48 = vld [vmem:[%s4180_s13 + $0x478] sm:$0xf0] }
  0xa1   : > { %1699 = vmatpush.bf16.msra.mxu3 %v3385_v34  ;;  %1219 = vmatmul.bf16.vlgmr.msrb.gmra.mxu1 %v4407_v1  ;;  %v1262_v30 = vld [vmem:[%s4167_s29] sm:$0x66]  ;;  %v3158_v34 = vld [vmem:[%s4180_s13 + $0x430] sm:$0xf0]  ;;  %v3904_v25 = vld [vmem:[%s4180_s13 + $0x5ac] sm:$0xf]  ;;  %v3357_v28 = vor.u32 %v3906_v22, %v3356_v20 }
  0xa2   : > { %1245 = vmatmul.bf16.vlgmr.msrb.gmra.mxu3 %v4407_v1  ;;  %v3334_v1 = vld [vmem:[%s4180_s13 + $0x590] sm:$0xf0]  ;;  %v3854_v20 = vld [vmem:[%s4180_s13 + $0x414] sm:$0xf0] }
  0xa3   : > { %1661 = vmatpush.bf16.msra.mxu0 %v3237_v40  ;;  %v3337_v4 = vor.u32 %v3899_v60, %v3334_v1  ;;  %v1332_v40 = vunpack.c.l.b16 %v1262_v30  ;;  %v3390_v60 = vld [vmem:[%s4180_s13 + $0x5f8] sm:$0xf0] }
  0xa4   : > { %1674 = vmatpush.bf16.msra.mxu1 %v3365_v41  ;;  %1687 = vmatpush.bf16.msra.mxu2 %v3241_v42  ;;  %v3285_v41 = vor.u32 %v3889_v32, %v3284_v29  ;;  %v3161_v42 = vor.u32 %v3855_v33, %v3158_v34  ;;  %v3393_v6 = vor.u32 %v3912_v59, %v3390_v60  ;;  %v3340_v32 = vld [vmem:[%s4180_s13 + $0x588] sm:$0xf]  ;;  %v3902_v34 = vld [vmem:[%s4180_s13 + $0x594] sm:$0xf0]  ;;  %v3182_v59 = vld [vmem:[%s4180_s13 + $0x458] sm:$0xf0] }
  0xa5   : > { %1700 = vmatpush.bf16.msra.mxu3 %v3369_v46  ;;  %v1333_v46 = vunpack.c.h.b16 %v1262_v30  ;;  %v3212_v30 = vld [vmem:[%s4180_s13 + $0x488] sm:$0xf]  ;;  %v3892_v60 = vld [vmem:[%s4180_s13 + $0x54c] sm:$0xf] }
  0xa7   : > { %1662 = vmatpush.bf16.msra.mxu0 %v3221_v52  ;;  %v3882_v52 = vld [vmem:[%s4180_s13 + $0x4f4] sm:$0xf0]  ;;  %v4542_v1 = vpack.c.b16 %v1333_v46, %v1333_v46 }
  0xa8   : > { %1675 = vmatpush.bf16.msra.mxu1 %v3349_v53  ;;  %1688 = vmatpush.bf16.msra.mxu2 %v3225_v54  ;;  %v3388_v53 = vld [vmem:[%s4180_s13 + $0x5e8] sm:$0xf]  ;;  %v3141_v54 = vor.u32 %v3853_v39, %v3140_v38  ;;  %v3342_v38 = vld [vmem:[%s4180_s13 + $0x598] sm:$0xf0]  ;;  %v3898_v46 = vld [vmem:[%s4180_s13 + $0x574] sm:$0xf0] }
  0xa9   : > { %1701 = vmatpush.bf16.msra.mxu3 %v3353_v57  ;;  %v4538_v57 = vpack.c.b16 %v1332_v40, %v1332_v40  ;;  %v3389_v17 = vor.u32 %v3914_v55, %v3388_v53  ;;  %v3341_v40 = vor.u32 %v3902_v34, %v3340_v32  ;;  %v3862_v55 = vld [vmem:[%s4180_s13 + $0x454] sm:$0xf0]  ;;  %v3702_v34 = vld [vmem:[%s4180_s13 + $0x7e0] sm:$0xf] }
  0xab   : > { %1663 = vmatpush.bf16.msra.mxu0 %v3205_v61  ;;  %v3273_v61 = vor.u32 %v3883_v49, %v3270_v50  ;;  %v4549_v7 = vrot.slane %v4538_v57, 1  ;;  %v3896_v49 = vld [vmem:[%s4180_s13 + $0x56c] sm:$0xf]  ;;  %v3326_v50 = vld [vmem:[%s4180_s13 + $0x578] sm:$0xf0] }
  0xac   : > { %1676 = vmatpush.bf16.msra.mxu1 %v3333_v63  ;;  %1689 = vmatpush.bf16.msra.mxu2 %v3209_v0  ;;  %v3261_v63 = vor.u32 %v3882_v52, %v3260_v51  ;;  %v3244_v0 = vld [vmem:[%s4180_s13 + $0x4c8] sm:$0xf]  ;;  %v3325_v52 = vor.u32 %v3898_v46, %v3324_v44  ;;  %v3329_v16 = vor.u32 %v3896_v49, %v3326_v50  ;;  %v3704_v44 = vld [vmem:[%s4180_s13 + $0x7f0] sm:$0xf0] }
  0xad   : > { %1702 = vmatpush.bf16.msra.mxu3 %v3337_v4  ;;  %v3372_v4 = vld [vmem:[%s4180_s13 + $0x5c8] sm:$0xf]  ;;  %v3245_v13 = vor.u32 %v3878_v3, %v3244_v0 }
  0xae   : > { %v3373_v14 = vor.u32 %v3910_v5, %v3372_v4  ;;  %v3164_v3 = vld [vmem:[%s4180_s13 + $0x428] sm:$0xf]  ;;  %v3858_v4 = vld [vmem:[%s4180_s13 + $0x434] sm:$0xf0] }
  0xaf   : > { %1664 = vmatpush.bf16.msra.mxu0 %v3189_v10  ;;  %v4554_v10 = vrot.slane %v4542_v1, 1  ;;  %v3292_v5 = vld [vmem:[%s4180_s13 + $0x528] sm:$0xf] }
  0xb0   : > { %1677 = vmatpush.bf16.msra.mxu1 %v3317_v11  ;;  %1690 = vmatpush.bf16.msra.mxu2 %v3193_v12  ;;  %v3908_v11 = vld [vmem:[%s4180_s13 + $0x5cc] sm:$0xf]  ;;  %v3374_v12 = vld [vmem:[%s4180_s13 + $0x5d8] sm:$0xf0]  ;;  %v3293_v22 = vor.u32 %v3890_v9, %v3292_v5  ;;  %v3544_v9 = vld [vmem:[%s4180_s13 + $0x6b0] sm:$0xf0] }
  0xb1   : > { %1703 = vmatpush.bf16.msra.mxu3 %v3321_v18  ;;  %v3228_v18 = vld [vmem:[%s4180_s13 + $0x4a8] sm:$0xf]  ;;  %v3377_v21 = vor.u32 %v3908_v11, %v3374_v12  ;;  %v3856_v11 = vld [vmem:[%s4180_s13 + $0x42c] sm:$0xf]  ;;  %v3166_v12 = vld [vmem:[%s4180_s13 + $0x438] sm:$0xf0] }
  0xb3   : > { %1665 = vmatpush.bf16.msra.mxu0 %v3173_v24  ;;  %v3230_v24 = vld [vmem:[%s4180_s13 + $0x4b8] sm:$0xf0] }
  0xb4   : > { %1678 = vmatpush.bf16.msra.mxu1 %v3301_v26  ;;  %1691 = vmatpush.bf16.msra.mxu2 %v3177_v27  ;;  %v3358_v26 = vld [vmem:[%s4180_s13 + $0x5b8] sm:$0xf0]  ;;  %v3229_v27 = vor.u32 %v3874_v19, %v3228_v18  ;;  %v3233_v29 = vor.u32 %v3872_v23, %v3230_v24  ;;  %v3165_v18 = vor.u32 %v3858_v4, %v3164_v3  ;;  %v3148_v19 = vld [vmem:[%s4180_s13 + $0x408] sm:$0xf]  ;;  %v3886_v24 = vld [vmem:[%s4180_s13 + $0x514] sm:$0xf0] }
  0xb5   : > { %1704 = vmatpush.bf16.msra.mxu3 %v3305_v31  ;;  %v3870_v31 = vld [vmem:[%s4180_s13 + $0x494] sm:$0xf0]  ;;  %v3361_v33 = vor.u32 %v3904_v25, %v3358_v26  ;;  %v3169_v23 = vor.u32 %v3856_v11, %v3166_v12  ;;  %v3852_v25 = vld [vmem:[%s4180_s13 + $0x40c] sm:$0xf]  ;;  %v3150_v26 = vld [vmem:[%s4180_s13 + $0x418] sm:$0xf0] }
  0xb6   : > { %v3213_v39 = vor.u32 %v3870_v31, %v3212_v30  ;;  %v3278_v30 = vld [vmem:[%s4180_s13 + $0x518] sm:$0xf0]  ;;  %v3574_v31 = vld [vmem:[%s4180_s13 + $0x6e0] sm:$0xf]  ;;  %v3938_v3 = vld [vmem:[%s4180_s13 + $0x6ac] sm:$0xf0] }
  0xb7   : > { %1666 = vmatpush.bf16.msra.mxu0 %v3157_v37  ;;  %v3900_v37 = vld [vmem:[%s4180_s13 + $0x58c] sm:$0xf]  ;;  %v3670_v4 = vld [vmem:[%s4180_s13 + $0x7a0] sm:$0xf]  ;;  %v3968_v11 = vld [vmem:[%s4180_s13 + $0x7a4] sm:$0xf] }
  0xb8   : > { %1679 = vmatpush.bf16.msra.mxu1 %v3285_v41  ;;  %1692 = vmatpush.bf16.msra.mxu2 %v3161_v42  ;;  %v3217_v41 = vor.u32 %v3868_v35, %v3214_v36  ;;  %v3196_v42 = vld [vmem:[%s4180_s13 + $0x468] sm:$0xf]  ;;  %v3345_v45 = vor.u32 %v3900_v37, %v3342_v38  ;;  %v3978_v35 = vld [vmem:[%s4180_s13 + $0x7ec] sm:$0xf0]  ;;  %v3149_v37 = vor.u32 %v3854_v20, %v3148_v19  ;;  %v3944_v38 = vld [vmem:[%s4180_s13 + $0x6e4] sm:$0xf] }
  0xb9   : > { %1705 = vmatpush.bf16.msra.mxu3 %v3289_v47  ;;  %v3864_v47 = vld [vmem:[%s4180_s13 + $0x46c] sm:$0xf]  ;;  %v3197_v51 = vor.u32 %v3866_v43, %v3196_v42  ;;  %v3153_v42 = vor.u32 %v3852_v25, %v3150_v26  ;;  %v3976_v43 = vld [vmem:[%s4180_s13 + $0x7e4] sm:$0xf]  ;;  %v3703_v49 = vor.u32 %v3978_v35, %v3702_v34  ;;  %v3672_v12 = vld [vmem:[%s4180_s13 + $0x7b0] sm:$0xf0] }
  0xba   : > { %v3201_v53 = vor.u32 %v3864_v47, %v3198_v48  ;;  %v3934_v19 = vld [vmem:[%s4180_s13 + $0x68c] sm:$0xf0]  ;;  %v3654_v20 = vld [vmem:[%s4180_s13 + $0x780] sm:$0xf]  ;;  %v3656_v25 = vld [vmem:[%s4180_s13 + $0x790] sm:$0xf0] }
  0xbb   : > { %1667 = vmatpush.bf16.msra.mxu0 %v3141_v54  ;;  %v3180_v54 = vld [vmem:[%s4180_s13 + $0x448] sm:$0xf]  ;;  %v634_v0 = vpop.f32.mrf.mxu0  ;;  %v3962_v34 = vld [vmem:[%s4180_s13 + $0x76c] sm:$0xf0]  ;;  %v3928_v35 = vld [vmem:[%s4180_s13 + $0x664] sm:$0xf] }
  0xbc   : > { %1680 = vmatpush.bf16.msra.mxu1 %v3269_v58  ;;  %1693 = vmatpush.bf16.msra.mxu2 %v3145_v62  ;;  %v3894_v58 = vld [vmem:[%s4180_s13 + $0x554] sm:$0xf0]  ;;  %v3860_v62 = vld [vmem:[%s4180_s13 + $0x44c] sm:$0xf] }
  0xbd   : > { %1706 = vmatpush.bf16.msra.mxu3 %v3273_v61  ;;  %v3310_v61 = vld [vmem:[%s4180_s13 + $0x558] sm:$0xf0] }
  0xbe   : > { %1668 = vmatmul.bf16.vlgmr.msra.gmra.mxu0 %v4549_v7  ;;  %v3313_v8 = vor.u32 %v3892_v60, %v3310_v61 }
  0xbf   : > { %1712 = vmatpush.bf16.msrb.mxu0 %v3261_v63  ;;  %1694 = vmatmul.bf16.vlgmr.msra.gmra.mxu2 %v4549_v7  ;;  %v3181_v63 = vor.u32 %v3862_v55, %v3180_v54  ;;  %v3707_v55 = vor.u32 %v3976_v43, %v3704_v44  ;;  %v3494_v43 = vld [vmem:[%s4180_s13 + $0x640] sm:$0xf]  ;;  %v3926_v44 = vld [vmem:[%s4180_s13 + $0x64c] sm:$0xf0] }
  0xc0   : > { %1725 = vmatpush.bf16.msrb.mxu1 %v3389_v17  ;;  %1738 = vmatpush.bf16.msrb.mxu2 %v3265_v2  ;;  %v3309_v17 = vor.u32 %v3894_v58, %v3308_v56  ;;  %v3185_v2 = vor.u32 %v3860_v62, %v3182_v59  ;;  %v3974_v56 = vld [vmem:[%s4180_s13 + $0x7cc] sm:$0xf0]  ;;  %v3560_v58 = vld [vmem:[%s4180_s13 + $0x6d0] sm:$0xf0]  ;;  %v3972_v62 = vld [vmem:[%s4180_s13 + $0x7c4] sm:$0xf] }
  0xc1   : > { %1751 = vmatpush.bf16.msrb.mxu3 %v3393_v6  ;;  %1681 = vmatmul.bf16.vlgmr.msra.gmra.mxu1 %v4554_v10  ;;  %v647_v6 = vpop.f32.mrf.mxu1  ;;  %v3688_v59 = vld [vmem:[%s4180_s13 + $0x7d0] sm:$0xf0] }
  0xc2   : > { %1707 = vmatmul.bf16.vlgmr.msra.gmra.mxu3 %v4554_v10  ;;  %v3691_v5 = vor.u32 %v3972_v62, %v3688_v59 }
  0xc3   : > { %1713 = vmatpush.bf16.msrb.mxu0 %v3245_v13  ;;  %v648_v13 = vadd.f32 %v647_v6, %v634_v0  ;;  %v3970_v6 = vld [vmem:[%s4180_s13 + $0x7ac] sm:$0xf0] }
  0xc4   : > { %1726 = vmatpush.bf16.msrb.mxu1 %v3373_v14  ;;  %1739 = vmatpush.bf16.msrb.mxu2 %v3249_v15  ;;  %v3888_v14 = vld [vmem:[%s4180_s13 + $0x52c] sm:$0xf]  ;;  %v3294_v15 = vld [vmem:[%s4180_s13 + $0x538] sm:$0xf0] }
  0xc5   : > { %1752 = vmatpush.bf16.msrb.mxu3 %v3377_v21  ;;  %v3276_v21 = vld [vmem:[%s4180_s13 + $0x508] sm:$0xf]  ;;  %v673_v32 = vpop.f32.mrf.mxu3 }
  0xc7   : > { %1714 = vmatpush.bf16.msrb.mxu0 %v3229_v27  ;;  %v660_v27 = vpop.f32.mrf.mxu2 }
  0xc8   : > { %1727 = vmatpush.bf16.msrb.mxu1 %v3357_v28  ;;  %1740 = vmatpush.bf16.msrb.mxu2 %v3233_v29  ;;  %v3297_v28 = vor.u32 %v3888_v14, %v3294_v15  ;;  %v3884_v29 = vld [vmem:[%s4180_s13 + $0x50c] sm:$0xf]  ;;  %v674_v36 = vadd.f32 %v673_v32, %v660_v27  ;;  %v3671_v14 = vor.u32 %v3970_v6, %v3670_v4  ;;  %v3480_v4 = vld [vmem:[%s4180_s13 + $0x630] sm:$0xf0] }
  0xc9   : > { %1753 = vmatpush.bf16.msrb.mxu3 %v3361_v33  ;;  %v3946_v33 = vld [vmem:[%s4180_s13 + $0x6ec] sm:$0xf0]  ;;  %v649_v46 = vpop.f32.mrf.mxu1  ;;  %v3281_v47 = vor.u32 %v3884_v29, %v3278_v30  ;;  %v3510_v29 = vld [vmem:[%s4180_s13 + $0x660] sm:$0xf]  ;;  %v3608_v6 = vld [vmem:[%s4180_s13 + $0x730] sm:$0xf0] }
  0xca   : > { %v3575_v48 = vor.u32 %v3946_v33, %v3574_v31  ;;  %v3930_v30 = vld [vmem:[%s4180_s13 + $0x66c] sm:$0xf0]  ;;  %v3638_v31 = vld [vmem:[%s4180_s13 + $0x760] sm:$0xf] }
  0xcb   : > { %1715 = vmatpush.bf16.msrb.mxu0 %v3213_v39  ;;  %v3576_v39 = vld [vmem:[%s4180_s13 + $0x6f0] sm:$0xf0] }
  0xcc   : > { %1728 = vmatpush.bf16.msrb.mxu1 %v3341_v40  ;;  %1741 = vmatpush.bf16.msrb.mxu2 %v3217_v41  ;;  %v636_v40 = vpop.f32.mrf.mxu0  ;;  %v3277_v41 = vor.u32 %v3886_v24, %v3276_v21  ;;  %v3579_v50 = vor.u32 %v3944_v38, %v3576_v39  ;;  %v3675_v21 = vor.u32 %v3968_v11, %v3672_v12  ;;  %v3964_v24 = vld [vmem:[%s4180_s13 + $0x784] sm:$0xf]  ;;  %v3640_v39 = vld [vmem:[%s4180_s13 + $0x770] sm:$0xf0] }
  0xcd   : > { %1754 = vmatpush.bf16.msrb.mxu3 %v3345_v45  ;;  %v733_v45 = vrot.slane %v674_v36, 4  ;;  %v3659_v33 = vor.u32 %v3964_v24, %v3656_v25  ;;  %v3512_v36 = vld [vmem:[%s4180_s13 + $0x670] sm:$0xf0]  ;;  %v3960_v38 = vld [vmem:[%s4180_s13 + $0x764] sm:$0xf]  ;;  %v3511_v40 = vor.u32 %v3930_v30, %v3510_v29 }
  0xce   : > { %v3710_v29 = vld [vmem:[%s4180_s13 + $0x7e8] sm:$0xf]  ;;  %v3979_v30 = vld [vmem:[%s4180_s13 + $0x7f4] sm:$0xf0] }
  0xcf   : > { %1716 = vmatpush.bf16.msrb.mxu0 %v3197_v51  ;;  %v3558_v51 = vld [vmem:[%s4180_s13 + $0x6c0] sm:$0xf]  ;;  %v4622_v54 = vsel %vm735_vm0, %v648_v13, %v733_v45  ;;  %v662_v60 = vpop.f32.mrf.mxu2 }
  0xd0   : > { %1729 = vmatpush.bf16.msrb.mxu1 %v3325_v52  ;;  %1742 = vmatpush.bf16.msrb.mxu2 %v3201_v53  ;;  %v3942_v52 = vld [vmem:[%s4180_s13 + $0x6cc] sm:$0xf0]  ;;  %v3686_v53 = vld [vmem:[%s4180_s13 + $0x7c0] sm:$0xf] }
  0xd1   : > { %1755 = vmatpush.bf16.msrb.mxu3 %v3329_v16  ;;  %v3940_v16 = vld [vmem:[%s4180_s13 + $0x6c4] sm:$0xf]  ;;  %v3559_v61 = vor.u32 %v3942_v52, %v3558_v51  ;;  %v3687_v0 = vor.u32 %v3974_v56, %v3686_v53  ;;  %v3622_v45 = vld [vmem:[%s4180_s13 + $0x740] sm:$0xf]  ;;  %v3624_v53 = vld [vmem:[%s4180_s13 + $0x750] sm:$0xf0]  ;;  %v3495_v56 = vor.u32 %v3926_v44, %v3494_v43  ;;  %v3711_v43 = vor.u32 %v3979_v30, %v3710_v29 }
  0xd2   : > { %v3956_v52 = vld [vmem:[%s4180_s13 + $0x744] sm:$0xf]  ;;  %v3929_v29 = vld [vmem:[%s4180_s13 + $0x66c] sm:$0xf]  ;;  %v3520_v30 = vld [vmem:[%s4180_s13 + $0x678] sm:$0xf0] }
  0xd3   : > { %1717 = vmatpush.bf16.msrb.mxu0 %v3181_v63  ;;  %v675_v63 = vpop.f32.mrf.mxu3 }
  0xd4   : > { %1730 = vmatpush.bf16.msrb.mxu1 %v3309_v17  ;;  %1743 = vmatpush.bf16.msrb.mxu2 %v3185_v2  ;;  %v3563_v17 = vor.u32 %v3940_v16, %v3560_v58  ;;  %v3542_v2 = vld [vmem:[%s4180_s13 + $0x6a0] sm:$0xf]  ;;  %v3922_v58 = vld [vmem:[%s4180_s13 + $0x62c] sm:$0xf0] }
  0xd5   : > { %1756 = vmatpush.bf16.msrb.mxu3 %v3313_v8  ;;  %v3936_v8 = vld [vmem:[%s4180_s13 + $0x6a4] sm:$0xf]  ;;  %v3543_v13 = vor.u32 %v3938_v3, %v3542_v2  ;;  %v3478_v16 = vld [vmem:[%s4180_s13 + $0x620] sm:$0xf]  ;;  %v3954_v63 = vld [vmem:[%s4180_s13 + $0x72c] sm:$0xf0]  ;;  %v3627_v2 = vor.u32 %v3956_v52, %v3624_v53 }
  0xd6   : > { %v3547_v15 = vor.u32 %v3936_v8, %v3544_v9  ;;  %v3920_v3 = vld [vmem:[%s4180_s13 + $0x624] sm:$0xf]  ;;  %v3462_v8 = vld [vmem:[%s4180_s13 + $0x600] sm:$0xf]  ;;  %v3918_v9 = vld [vmem:[%s4180_s13 + $0x60c] sm:$0xf0]  ;;  %v3479_v12 = vor.u32 %v3922_v58, %v3478_v16 }
  0xd7   : > { %1718 = vmatpush.bf16.msrb.mxu0 %v3165_v18  ;;  %v3526_v18 = vld [vmem:[%s4180_s13 + $0x680] sm:$0xf]  ;;  %v3568_v52 = vld [vmem:[%s4180_s13 + $0x6d8] sm:$0xf0] }
  0xd8   : > { %1731 = vmatpush.bf16.msrb.mxu1 %v3293_v22  ;;  %1744 = vmatpush.bf16.msrb.mxu2 %v3169_v23  ;;  %v3966_v22 = vld [vmem:[%s4180_s13 + $0x78c] sm:$0xf0]  ;;  %v3528_v23 = vld [vmem:[%s4180_s13 + $0x690] sm:$0xf0] }
  0xd9   : > { %1757 = vmatpush.bf16.msrb.mxu3 %v3297_v28  ;;  %v3655_v27 = vor.u32 %v3966_v22, %v3654_v20  ;;  %v3483_v20 = vor.u32 %v3920_v3, %v3480_v4  ;;  %v3464_v22 = vld [vmem:[%s4180_s13 + $0x610] sm:$0xf0]  ;;  %v3969_v3 = vld [vmem:[%s4180_s13 + $0x7ac] sm:$0xf]  ;;  %v3680_v4 = vld [vmem:[%s4180_s13 + $0x7b8] sm:$0xf0] }
  0xdb   : > { %1719 = vmatpush.bf16.msrb.mxu0 %v3149_v37  ;;  %v686_v26 = vpop.f32.mrf.mxu0 }
  0xdc   : > { %1732 = vmatpush.bf16.msrb.mxu1 %v3277_v41  ;;  %1745 = vmatpush.bf16.msrb.mxu2 %v3153_v42  ;;  %v3639_v41 = vor.u32 %v3962_v34, %v3638_v31  ;;  %v3515_v42 = vor.u32 %v3928_v35, %v3512_v36  ;;  %v3463_v31 = vor.u32 %v3918_v9, %v3462_v8  ;;  %v3534_v9 = vld [vmem:[%s4180_s13 + $0x688] sm:$0xf] }
  0xdd   : > { %1758 = vmatpush.bf16.msrb.mxu3 %v3281_v47  ;;  %v3643_v47 = vor.u32 %v3960_v38, %v3640_v39  ;;  %v3712_v38 = vld [vmem:[%s4180_s13 + $0x7f8] sm:$0xf0] }
  0xde   : > { %1720 = vmatmul.bf16.vlgmr.msrb.gmra.mxu0 %v4549_v7  ;;  %v699_v32 = vpop.f32.mrf.mxu1 }
  0xdf   : > { %2182 = vmatpush.bf16.msra.mxu0 %v3575_v48  ;;  %1746 = vmatmul.bf16.vlgmr.msrb.gmra.mxu2 %v4549_v7  ;;  %v3932_v7 = vld [vmem:[%s4180_s13 + $0x684] sm:$0xf]  ;;  %v700_v37 = vadd.f32 %v699_v32, %v686_v26  ;;  %v3958_v48 = vld [vmem:[%s4180_s13 + $0x74c] sm:$0xf0]  ;;  %v3582_v26 = vld [vmem:[%s4180_s13 + $0x6e8] sm:$0xf] }
  0xe0   : > { %2195 = vmatpush.bf16.msra.mxu1 %v3703_v49  ;;  %2208 = vmatpush.bf16.msra.mxu2 %v3579_v50  ;;  %v3531_v28 = vor.u32 %v3932_v7, %v3528_v23  ;;  %v3924_v49 = vld [vmem:[%s4180_s13 + $0x644] sm:$0xf]  ;;  %v3496_v50 = vld [vmem:[%s4180_s13 + $0x650] sm:$0xf0]  ;;  %v3623_v59 = vor.u32 %v3958_v48, %v3622_v45  ;;  %v1853_v7 = vshrl.u32 %v4542_v1, 16  ;;  %v1856_v23 = vshll.u32 %v4542_v1, 16 }
  0xe1   : > { %2221 = vmatpush.bf16.msra.mxu3 %v3707_v55  ;;  %1733 = vmatmul.bf16.vlgmr.msrb.gmra.mxu1 %v4554_v10  ;;  %v3499_v60 = vor.u32 %v3924_v49, %v3496_v50  ;;  %v3945_v32 = vld [vmem:[%s4180_s13 + $0x6ec] sm:$0xf]  ;;  %v3566_v45 = vld [vmem:[%s4180_s13 + $0x6c8] sm:$0xf]  ;;  %v3975_v50 = vld [vmem:[%s4180_s13 + $0x7d4] sm:$0xf0] }
  0xe2   : > { %1759 = vmatmul.bf16.vlgmr.msrb.gmra.mxu3 %v4554_v10  ;;  %v3527_v10 = vor.u32 %v3934_v19, %v3526_v18  ;;  %v712_v46 = vpop.f32.mrf.mxu2  ;;  %v1848_v18 = vshll.u32 %v4538_v57, 16  ;;  %v1855_v39 = vrot.slane %v1853_v7, 1 }
  0xe3   : > { %2183 = vmatpush.bf16.msra.mxu0 %v3559_v61  ;;  %v688_v62 = vpop.f32.mrf.mxu0  ;;  %v3606_v61 = vld [vmem:[%s4180_s13 + $0x720] sm:$0xf] }
  0xe4   : > { %2196 = vmatpush.bf16.msra.mxu1 %v3687_v0  ;;  %2209 = vmatpush.bf16.msra.mxu2 %v3563_v17  ;;  %v3607_v19 = vor.u32 %v3954_v63, %v3606_v61  ;;  %v1850_v1 = vrot.slane %v1848_v18, 2  ;;  %v3678_v61 = vld [vmem:[%s4180_s13 + $0x7a8] sm:$0xf]  ;;  %v3933_v18 = vld [vmem:[%s4180_s13 + $0x68c] sm:$0xf] }
  0xe5   : > { %2222 = vmatpush.bf16.msra.mxu3 %v3691_v5  ;;  %v725_v51 = vpop.f32.mrf.mxu3  ;;  %v3952_v5 = vld [vmem:[%s4180_s13 + $0x724] sm:$0xf] }
  0xe6   : > { %v726_v55 = vadd.f32 %v725_v51, %v712_v46  ;;  %v701_v17 = vpop.f32.mrf.mxu1  ;;  %v3611_v25 = vor.u32 %v3952_v5, %v3608_v6  ;;  %v3943_v46 = vld [vmem:[%s4180_s13 + $0x6d4] sm:$0xf0]  ;;  %v3941_v51 = vld [vmem:[%s4180_s13 + $0x6cc] sm:$0xf] }
  0xe7   : > { %2184 = vmatpush.bf16.msra.mxu0 %v3543_v13  ;;  %v3590_v13 = vld [vmem:[%s4180_s13 + $0x700] sm:$0xf]  ;;  %v3567_v16 = vor.u32 %v3943_v46, %v3566_v45  ;;  %v3571_v62 = vor.u32 %v3941_v51, %v3568_v52  ;;  %v3937_v17 = vld [vmem:[%s4180_s13 + $0x6ac] sm:$0xf]  ;;  %v3486_v51 = vld [vmem:[%s4180_s13 + $0x628] sm:$0xf] }
  0xe8   : > { %2197 = vmatpush.bf16.msra.mxu1 %v3671_v14  ;;  %2210 = vmatpush.bf16.msra.mxu2 %v3547_v15  ;;  %v734_v0 = vrot.slane %v726_v55, 4  ;;  %v3950_v14 = vld [vmem:[%s4180_s13 + $0x70c] sm:$0xf0]  ;;  %v1845_v15 = vshrl.u32 %v4538_v57, 16  ;;  %v3592_v57 = vld [vmem:[%s4180_s13 + $0x710] sm:$0xf0] }
  0xe9   : > { %2223 = vmatpush.bf16.msra.mxu3 %v3675_v21  ;;  %v3916_v21 = vld [vmem:[%s4180_s13 + $0x604] sm:$0xf]  ;;  %v3591_v35 = vor.u32 %v3950_v14, %v3590_v13  ;;  %v3973_v55 = vld [vmem:[%s4180_s13 + $0x7cc] sm:$0xf]  ;;  %v3662_v13 = vld [vmem:[%s4180_s13 + $0x788] sm:$0xf]  ;;  %v3683_v14 = vor.u32 %v3969_v3, %v3680_v4 }
  0xea   : > { %v4676_v11 = vsel %vm735_vm0, %v700_v37, %v734_v0  ;;  %v714_v24 = vpop.f32.mrf.mxu2  ;;  %v1847_v34 = vrot.slane %v1845_v15, 1  ;;  %v3467_v36 = vor.u32 %v3916_v21, %v3464_v22  ;;  %v3977_v37 = vld [vmem:[%s4180_s13 + $0x7ec] sm:$0xf]  ;;  %v3971_v0 = vld [vmem:[%s4180_s13 + $0x7b4] sm:$0xf0] }
  0xeb   : > { %2185 = vmatpush.bf16.msra.mxu0 %v3527_v10  ;;  %v3948_v10 = vld [vmem:[%s4180_s13 + $0x704] sm:$0xf]  ;;  %v3715_v48 = vor.u32 %v3977_v37, %v3712_v38  ;;  %v3679_v6 = vor.u32 %v3971_v0, %v3678_v61  ;;  %v3967_v15 = vld [vmem:[%s4180_s13 + $0x794] sm:$0xf0]  ;;  %v3664_v21 = vld [vmem:[%s4180_s13 + $0x798] sm:$0xf0] }
  0xec   : > { %2198 = vmatpush.bf16.msra.mxu1 %v3655_v27  ;;  %2211 = vmatpush.bf16.msra.mxu2 %v3531_v28  ;;  %v3947_v28 = vld [vmem:[%s4180_s13 + $0x6f4] sm:$0xf0]  ;;  %v4699_v49 = vor.u32 %v1850_v1, %v1847_v34  ;;  %v3502_v37 = vld [vmem:[%s4180_s13 + $0x648] sm:$0xf]  ;;  %v3921_v0 = vld [vmem:[%s4180_s13 + $0x62c] sm:$0xf] }
  0xed   : > { %2224 = vmatpush.bf16.msra.mxu3 %v3659_v33  ;;  %v727_v27 = vpop.f32.mrf.mxu3  ;;  %v3584_v33 = vld [vmem:[%s4180_s13 + $0x6f8] sm:$0xf0]  ;;  %v3927_v38 = vld [vmem:[%s4180_s13 + $0x654] sm:$0xf0]  ;;  %v227_v45 = vld [vmem:[#allocation2] sm:$0x77] }
  0xee   : > { %v3587_v44 = vor.u32 %v3945_v32, %v3584_v33  ;;  %v3961_v32 = vld [vmem:[%s4180_s13 + $0x76c] sm:$0xf]  ;;  %v3648_v33 = vld [vmem:[%s4180_s13 + $0x778] sm:$0xf0] }
  0xef   : > { %2186 = vmatpush.bf16.msra.mxu0 %v3511_v40  ;;  %v1858_v40 = vrot.slane %v1856_v23, 2  ;;  %v3663_v23 = vor.u32 %v3967_v15, %v3662_v13  ;;  %v3953_v3 = vld [vmem:[%s4180_s13 + $0x72c] sm:$0xf]  ;;  %v3616_v4 = vld [vmem:[%s4180_s13 + $0x738] sm:$0xf0] }
  0xf0   : > { %2199 = vmatpush.bf16.msra.mxu1 %v3639_v41  ;;  %2212 = vmatpush.bf16.msra.mxu2 %v3515_v42  ;;  %v3595_v41 = vor.u32 %v3948_v10, %v3592_v57  ;;  %v3583_v42 = vor.u32 %v3947_v28, %v3582_v26  ;;  %v3931_v10 = vld [vmem:[%s4180_s13 + $0x674] sm:$0xf0]  ;;  %v3646_v57 = vld [vmem:[%s4180_s13 + $0x768] sm:$0xf]  ;;  %v3619_v15 = vor.u32 %v3953_v3, %v3616_v4 }
  0xf1   : > { %2225 = vmatpush.bf16.msra.mxu3 %v3643_v47  ;;  %v3694_v47 = vld [vmem:[%s4180_s13 + $0x7c8] sm:$0xf]  ;;  %v4704_v53 = vor.u32 %v1858_v40, %v1855_v39  ;;  %v3963_v28 = vld [vmem:[%s4180_s13 + $0x774] sm:$0xf0]  ;;  %v3651_v40 = vor.u32 %v3961_v32, %v3648_v33 }
  0xf2   : > { %v3695_v58 = vor.u32 %v3975_v50, %v3694_v47  ;;  %v3647_v1 = vor.u32 %v3963_v28, %v3646_v57  ;;  %v3630_v39 = vld [vmem:[%s4180_s13 + $0x748] sm:$0xf]  ;;  %v3957_v47 = vld [vmem:[%s4180_s13 + $0x74c] sm:$0xf]  ;;  %v3503_v50 = vor.u32 %v3927_v38, %v3502_v37 }
  0xf3   : > { %2187 = vmatpush.bf16.msra.mxu0 %v3495_v56  ;;  %v3696_v56 = vld [vmem:[%s4180_s13 + $0x7d8] sm:$0xf0]  ;;  %v3598_v13 = vld [vmem:[%s4180_s13 + $0x708] sm:$0xf] }
  0xf4   : > { %2200 = vmatpush.bf16.msra.mxu1 %v3623_v59  ;;  %2213 = vmatpush.bf16.msra.mxu2 %v3499_v60  ;;  %v3550_v59 = vld [vmem:[%s4180_s13 + $0x6a8] sm:$0xf]  ;;  %v3939_v60 = vld [vmem:[%s4180_s13 + $0x6b4] sm:$0xf0]  ;;  %v3699_v63 = vor.u32 %v3973_v55, %v3696_v56 }
  0xf5   : > { %2226 = vmatpush.bf16.msra.mxu3 %v3627_v2  ;;  %v3552_v2 = vld [vmem:[%s4180_s13 + $0x6b8] sm:$0xf0]  ;;  %v3551_v5 = vor.u32 %v3939_v60, %v3550_v59  ;;  %v740_v60 = vadd.f32 %v4622_v54, %v227_v45 }
  0xf6   : > { %v3555_v8 = vor.u32 %v3937_v17, %v3552_v2  ;;  %v3488_v17 = vld [vmem:[%s4180_s13 + $0x638] sm:$0xf0] }
  0xf7   : > { %2188 = vmatpush.bf16.msra.mxu0 %v3479_v12  ;;  %v3935_v12 = vld [vmem:[%s4180_s13 + $0x694] sm:$0xf0] }
  0xf8   : > { %2201 = vmatpush.bf16.msra.mxu1 %v3607_v19  ;;  %2214 = vmatpush.bf16.msra.mxu2 %v3483_v20  ;;  %v3536_v19 = vld [vmem:[%s4180_s13 + $0x698] sm:$0xf0]  ;;  %v3965_v20 = vld [vmem:[%s4180_s13 + $0x78c] sm:$0xf]  ;;  %v3535_v22 = vor.u32 %v3935_v12, %v3534_v9  ;;  %v3470_v9 = vld [vmem:[%s4180_s13 + $0x608] sm:$0xf] }
  0xf9   : > { %2227 = vmatpush.bf16.msra.mxu3 %v3611_v25  ;;  %v3539_v24 = vor.u32 %v3933_v18, %v3536_v19  ;;  %v3518_v25 = vld [vmem:[%s4180_s13 + $0x668] sm:$0xf]  ;;  %v3667_v27 = vor.u32 %v3965_v20, %v3664_v21  ;;  %v3919_v12 = vld [vmem:[%s4180_s13 + $0x614] sm:$0xf0]  ;;  %v3917_v19 = vld [vmem:[%s4180_s13 + $0x60c] sm:$0xf] }
  0xfa   : > { %v3519_v34 = vor.u32 %v3931_v10, %v3518_v25  ;;  %v3951_v18 = vld [vmem:[%s4180_s13 + $0x714] sm:$0xf0]  ;;  %v3472_v20 = vld [vmem:[%s4180_s13 + $0x618] sm:$0xf0] }
  0xfb   : > { %2189 = vmatpush.bf16.msra.mxu0 %v3463_v31  ;;  %v1155_v7 = vpop.f32.mrf.mxu0  ;;  %v3475_v25 = vor.u32 %v3917_v19, %v3472_v20 }
  0xfc   : > { %2202 = vmatpush.bf16.msra.mxu1 %v3591_v35  ;;  %2215 = vmatpush.bf16.msra.mxu2 %v3467_v36  ;;  %v3523_v35 = vor.u32 %v3929_v29, %v3520_v30  ;;  %v228_v30 = vld [vmem:[#allocation2 + $0x8] sm:$0x77] }
  0xfd   : > { %2228 = vmatpush.bf16.msra.mxu3 %v3595_v41 }
  0xfe   : > { %2190 = vmatmul.bf16.vlgmr.msra.gmra.mxu0 %v4699_v49  ;;  %v1168_v26 = vpop.f32.mrf.mxu1 }
  0xff   : > { %2234 = vmatpush.bf16.msrb.mxu0 %v3583_v42  ;;  %2216 = vmatmul.bf16.vlgmr.msra.gmra.mxu2 %v4699_v49  ;;  %v1169_v31 = vadd.f32 %v1168_v26, %v1155_v7  ;;  %v3959_v42 = vld [vmem:[%s4180_s13 + $0x754] sm:$0xf0]  ;;  %v3600_v7 = vld [vmem:[%s4180_s13 + $0x718] sm:$0xf0] }
 0x100   : > { %2247 = vmatpush.bf16.msrb.mxu1 %v3711_v43  ;;  %2260 = vmatpush.bf16.msrb.mxu2 %v3587_v44  ;;  %v3925_v43 = vld [vmem:[%s4180_s13 + $0x64c] sm:$0xf]  ;;  %v3504_v44 = vld [vmem:[%s4180_s13 + $0x658] sm:$0xf0]  ;;  %v3631_v56 = vor.u32 %v3959_v42, %v3630_v39 }
 0x101   : > { %2273 = vmatpush.bf16.msrb.mxu3 %v3715_v48  ;;  %2203 = vmatmul.bf16.vlgmr.msra.gmra.mxu1 %v4704_v53  ;;  %v3632_v48 = vld [vmem:[%s4180_s13 + $0x758] sm:$0xf0] }
 0x102   : > { %2229 = vmatmul.bf16.vlgmr.msra.gmra.mxu3 %v4704_v53  ;;  %v1181_v36 = vpop.f32.mrf.mxu2  ;;  %v3635_v61 = vor.u32 %v3957_v47, %v3632_v48 }
 0x103   : > { %2235 = vmatpush.bf16.msrb.mxu0 %v3567_v16  ;;  %v1157_v52 = vpop.f32.mrf.mxu0  ;;  %v3507_v16 = vor.u32 %v3925_v43, %v3504_v44 }
 0x104   : > { %2248 = vmatpush.bf16.msrb.mxu1 %v3695_v58  ;;  %2261 = vmatpush.bf16.msrb.mxu2 %v3571_v62  ;;  %v3923_v58 = vld [vmem:[%s4180_s13 + $0x634] sm:$0xf0]  ;;  %v3614_v62 = vld [vmem:[%s4180_s13 + $0x728] sm:$0xf] }
 0x105   : > { %2274 = vmatpush.bf16.msrb.mxu3 %v3699_v63  ;;  %v1194_v41 = vpop.f32.mrf.mxu3  ;;  %v3955_v63 = vld [vmem:[%s4180_s13 + $0x734] sm:$0xf0] }
 0x106   : > { %v1195_v46 = vadd.f32 %v1194_v41, %v1181_v36  ;;  %v1170_v59 = vpop.f32.mrf.mxu1  ;;  %v3615_v54 = vor.u32 %v3955_v63, %v3614_v62 }
 0x107   : > { %2236 = vmatpush.bf16.msrb.mxu0 %v3551_v5 }
 0x108   : > { %2249 = vmatpush.bf16.msrb.mxu1 %v3679_v6  ;;  %2262 = vmatpush.bf16.msrb.mxu2 %v3555_v8  ;;  %v1254_v55 = vrot.slane %v1195_v46, 4  ;;  %v3487_v6 = vor.u32 %v3923_v58, %v3486_v51  ;;  %v3491_v8 = vor.u32 %v3921_v0, %v3488_v17 }
 0x109   : > { %2275 = vmatpush.bf16.msrb.mxu3 %v3683_v14 }
 0x10a   : > { %v1256_v2 = vsel %vm735_vm0, %v1169_v31, %v1254_v55  ;;  %v1183_v14 = vpop.f32.mrf.mxu2 }
 0x10b   : > { %2237 = vmatpush.bf16.msrb.mxu0 %v3535_v22  ;;  %v1260_v5 = vadd.f32 %v1256_v2, %v740_v60  ;;  %v3949_v22 = vld [vmem:[%s4180_s13 + $0x70c] sm:$0xf] }
 0x10c   : > { %2250 = vmatpush.bf16.msrb.mxu1 %v3663_v23  ;;  %2263 = vmatpush.bf16.msrb.mxu2 %v3539_v24  ;;  %v3471_v23 = vor.u32 %v3919_v12, %v3470_v9  ;;  %v3599_v24 = vor.u32 %v3951_v18, %v3598_v13  ;;  %v3603_v10 = vor.u32 %v3949_v22, %v3600_v7 }
 0x10d   : > { %2276 = vmatpush.bf16.msrb.mxu3 %v3667_v27  ;;  %v1196_v21 = vpop.f32.mrf.mxu3 }
 0x10f   : > { %2238 = vmatpush.bf16.msrb.mxu0 %v3519_v34 }
 0x110   : > { %2251 = vmatpush.bf16.msrb.mxu1 %v3647_v1  ;;  %2264 = vmatpush.bf16.msrb.mxu2 %v3523_v35  ;;  %v741_v1 = vadd.f32 %v4676_v11, %v228_v30 }
 0x111   : > { %2277 = vmatpush.bf16.msrb.mxu3 %v3651_v40 }
 0x113   : > { %2239 = vmatpush.bf16.msrb.mxu0 %v3503_v50 }
 0x114   : > { %2252 = vmatpush.bf16.msrb.mxu1 %v3631_v56  ;;  %2265 = vmatpush.bf16.msrb.mxu2 %v3507_v16 }
 0x115   : > { %2278 = vmatpush.bf16.msrb.mxu3 %v3635_v61 }
 0x117   : > { %2240 = vmatpush.bf16.msrb.mxu0 %v3487_v6 }
 0x118   : > { %2253 = vmatpush.bf16.msrb.mxu1 %v3615_v54  ;;  %2266 = vmatpush.bf16.msrb.mxu2 %v3491_v8 }
 0x119   : > { %2279 = vmatpush.bf16.msrb.mxu3 %v3619_v15 }
 0x11b   : > { %2241 = vmatpush.bf16.msrb.mxu0 %v3471_v23  ;;  %v1207_v57 = vpop.f32.mrf.mxu0 }
 0x11c   : > { %2254 = vmatpush.bf16.msrb.mxu1 %v3599_v24  ;;  %2267 = vmatpush.bf16.msrb.mxu2 %v3475_v25 }
 0x11d   : > { %2280 = vmatpush.bf16.msrb.mxu3 %v3603_v10 }
 0x11e   : > { %2242 = vmatmul.bf16.vlgmr.msrb.gmra.mxu0 %v4699_v49  ;;  %v1220_v26 = vpop.f32.mrf.mxu1 }
 0x11f   : > { %2255 = vmatmul.bf16.vlgmr.msrb.gmra.mxu1 %v4704_v53  ;;  %2268 = vmatmul.bf16.vlgmr.msrb.gmra.mxu2 %v4699_v49  ;;  %v1221_v27 = vadd.f32 %v1220_v26, %v1207_v57 }
 0x120   : > { %2281 = vmatmul.bf16.vlgmr.msrb.gmra.mxu3 %v4704_v53 }
 0x122   : > { %v1233_v28 = vpop.f32.mrf.mxu2 }
 0x123   : > { %v1209_v32 = vpop.f32.mrf.mxu0 }
 0x125   : > { %v1246_v29 = vpop.f32.mrf.mxu3 }
 0x126   : > { %v1247_v31 = vadd.f32 %v1246_v29, %v1233_v28  ;;  %v1222_v34 = vpop.f32.mrf.mxu1 }
 0x128   : > { %v1255_v33 = vrot.slane %v1247_v31, 4 }
 0x12a   : > { %v1257_v35 = vsel %vm735_vm0, %v1221_v27, %v1255_v33  ;;  %v1235_v37 = vpop.f32.mrf.mxu2 }
 0x12b   : > { %v1261_v36 = vadd.f32 %v1257_v35, %v741_v1 }
 0x12d   : > { %v1248_v38 = vpop.f32.mrf.mxu3 }
 0x13b   : > { %v1669_v49 = vpop.f32.mrf.mxu0 }
 0x13e   : > { %v1682_v39 = vpop.f32.mrf.mxu1 }
 0x13f   : > { %v1683_v53 = vadd.f32 %v1682_v39, %v1669_v49 }
 0x142   : > { %v1695_v40 = vpop.f32.mrf.mxu2 }
 0x143   : > { %v1671_v43 = vpop.f32.mrf.mxu0 }
 0x145   : > { %v1708_v41 = vpop.f32.mrf.mxu3 }
 0x146   : > { %v1709_v42 = vadd.f32 %v1708_v41, %v1695_v40  ;;  %v1684_v45 = vpop.f32.mrf.mxu1 }
 0x148   : > { %v1768_v44 = vrot.slane %v1709_v42, 4 }
 0x14a   : > { %v1770_v46 = vsel %vm735_vm0, %v1683_v53, %v1768_v44  ;;  %v1697_v48 = vpop.f32.mrf.mxu2 }
 0x14b   : > { %v1774_v47 = vadd.f32 %v1770_v46, %v1260_v5 }
 0x14d   : > { %v1710_v50 = vpop.f32.mrf.mxu3 }
 0x15b   : > { %v1721_v11 = vpop.f32.mrf.mxu0 }
 0x15e   : > { %v1734_v51 = vpop.f32.mrf.mxu1 }
 0x15f   : > { %v1735_v52 = vadd.f32 %v1734_v51, %v1721_v11 }
 0x162   : > { %v1747_v55 = vpop.f32.mrf.mxu2 }
 0x163   : > { %v1723_v58 = vpop.f32.mrf.mxu0 }
 0x165   : > { %v1760_v56 = vpop.f32.mrf.mxu3 }
 0x166   : > { %v1761_v16 = vadd.f32 %v1760_v56, %v1747_v55  ;;  %v1736_v59 = vpop.f32.mrf.mxu1 }
 0x168   : > { %v1769_v62 = vrot.slane %v1761_v16, 4 }
 0x16a   : > { %v1771_v60 = vsel %vm735_vm0, %v1735_v52, %v1769_v62  ;;  %v1749_v63 = vpop.f32.mrf.mxu2 }
 0x16b   : > { %v1775_v61 = vadd.f32 %v1771_v60, %v1261_v36 }
 0x16d   : > { %v1762_v0 = vpop.f32.mrf.mxu3 }
 0x17b   : > { %v2191_v17 = vpop.f32.mrf.mxu0 }
 0x17e   : > { %v2204_v2 = vpop.f32.mrf.mxu1 }
 0x17f   : > { %v2205_v6 = vadd.f32 %v2204_v2, %v2191_v17 }
 0x182   : > { %v2217_v3 = vpop.f32.mrf.mxu2 }
 0x183   : > { %v2193_v54 = vpop.f32.mrf.mxu0 }
 0x185   : > { %v2230_v4 = vpop.f32.mrf.mxu3 }
 0x186   : > { %v2231_v5 = vadd.f32 %v2230_v4, %v2217_v3  ;;  %v2206_v9 = vpop.f32.mrf.mxu1 }
 0x188   : > { %v2290_v8 = vrot.slane %v2231_v5, 4 }
 0x18a   : > { %v2292_v12 = vsel %vm735_vm0, %v2205_v6, %v2290_v8  ;;  %v2219_v14 = vpop.f32.mrf.mxu2 }
 0x18b   : > { %v2296_v13 = vadd.f32 %v2292_v12, %v1774_v47 }
 0x18d   : > { %2298 = vst [vmem:[#allocation2] sm:$0x77] %v2296_v13  ;;  %v2232_v15 = vpop.f32.mrf.mxu3 }
 0x19b   : > { %v2243_v18 = vpop.f32.mrf.mxu0 }
 0x19c   : > { %v2256_v19 = vpop.f32.mrf.mxu1 }
 0x19d   : > { %v2257_v24 = vadd.f32 %v2256_v19, %v2243_v18 }
 0x1a2   : > { %v2269_v20 = vpop.f32.mrf.mxu2 }
 0x1a3   : > { %v2282_v21 = vpop.f32.mrf.mxu3  ;;  %v2245_v22 = vpop.f32.mrf.mxu0 }
 0x1a4   : > { %v2283_v7 = vadd.f32 %v2282_v21, %v2269_v20  ;;  %v2258_v23 = vpop.f32.mrf.mxu1 }
 0x1a6   : > { %v2291_v25 = vrot.slane %v2283_v7, 4 }
 0x1a7   : > { %2303 = sbr.rel (%p3716_p10) target bundleno = 453 (0x1c5), region = 40 }
 0x1a8   : > { %v2293_v10 = vsel %vm735_vm0, %v2257_v24, %v2291_v25 }
 0x1a9   : > { %v2297_v57 = vadd.f32 %v2293_v10, %v1775_v61 }
 0x1aa   : > { %v2271_v26 = vpop.f32.mrf.mxu2 }
 0x1ab   : > { %2299 = vst [vmem:[#allocation2 + $0x8] sm:$0x77] %v2297_v57  ;;  %v2284_v27 = vpop.f32.mrf.mxu3 }
 0x1ac   : > { %v2304_v28 = vld [vmem:[%s4814_s2] sm:$0xf]  ;;  %vm2338_vm1 = vcmask 1041408   ;;  %vm2349_vm2 = vsmask.f32 1280  ;;  %vm2351_vm3 = vcmask 1043458  }
 0x1ad   : > { %v2306_v29 = vperm.slane %v2304_v28, 0  ;;  %v2307_v30 = vperm.slane %v2304_v28, 1  ;;  %v2308_v31 = vperm.slane %v2304_v28, 2  ;;  %v2309_v32 = vperm.slane %v2304_v28, 3  ;;  %vm4779_vm5 = vmand %vm2338_vm1, %vm2349_vm2  ;;  %v2363_v47 = vld [vmem:[%s4173_s8] sm:$0xff] }
 0x1ae   : > { %vm2352_vm4 = vsmask.f32 3328  ;;  %vm2342_vm7 = vcmask 1045508   ;;  %vm2356_vm8 = vsmask.f32 5376  ;;  %vm2359_vm11 = vcmask 1047558  }
 0x1af   : > { %v2310_v33 = vrot.slane %v2307_v30, 4  ;;  %v2311_v34 = vrot.slane %v2309_v32, 4  ;;  %vm2353_vm6 = vmand %vm2351_vm3, %vm2352_vm4  ;;  %vm2360_vm12 = vsmask.f32 7424 }
 0x1b0   : > { %vm2354_vm9 = vmor %vm2353_vm6, %vm4779_vm5 }
 0x1b1   : > { %v2312_v1 = vsel %vm735_vm0, %v2306_v29, %v2310_v33  ;;  %v2313_v35 = vsel %vm735_vm0, %v2308_v31, %v2311_v34  ;;  %vm2357_vm10 = vmand %vm2342_vm7, %vm2356_vm8 }
 0x1b2   : > { %v2316_v36 = vadd.f32 %v2312_v1, %v2296_v13  ;;  %v2317_v37 = vadd.f32 %v2313_v35, %v2297_v57  ;;  %vm2358_vm13 = vmor %vm2357_vm10, %vm2354_vm9 }
 0x1b3   : > { %vm2361_vm14 = vmand %vm2359_vm11, %vm2360_vm12 }
 0x1b4   : > { %2320 = vst [vmem:[#allocation1] ss:$2 sm:$0xff] %v2316_v36  ;;  %vm2362_vm15 = vmor %vm2361_vm14, %vm2358_vm13 }
 0x1b5   : > { %2322 = vst [vmem:[#allocation1 + $0x10] ss:$2 sm:$0xff] %v2317_v37 }
 0x1bb   : > { %v2323_v49 = vld.sshfl [vmem:[#allocation1] sm:$0xff pattern:$0x75316420]  ;;  %v2324_v39 = vld.sshfl [vmem:[#allocation1 + $0x8] sm:$0xff pattern:$0x75316420] }
 0x1bc   : > { %v2325_v53 = vld.sshfl [vmem:[#allocation1 + $0x10] sm:$0xff pattern:$0x75316420]  ;;  %v2326_v40 = vld.sshfl [vmem:[#allocation1 + $0x18] sm:$0xff pattern:$0x75316420]  ;;  %v2331_v41 = vpack.c.bf16 %v2324_v39, %v2323_v49 }
 0x1bd   : > { %v2332_v42 = vpack.c.bf16 %v2326_v40, %v2325_v53 }
 0x1be   : > { %v2335_v43 = vrot.slane %v2331_v41, 2 }
 0x1bf   : > { %v2336_v44 = vrot.slane %v2332_v42, 4  ;;  %v2337_v45 = vrot.slane %v2332_v42, 6 }
 0x1c0   : > { %v2341_v46 = vsel %vm2338_vm1, %v2331_v41, %v2335_v43 }
 0x1c1   : > { %v2345_v48 = vsel %vm2342_vm7, %v2336_v44, %v2337_v45 }
 0x1c2   : > { %v2346_v50 = vsel %vm735_vm0, %v2341_v46, %v2345_v48 }
 0x1c3   : > { %v2364_v11 = vsel %vm2362_vm15, %v2346_v50, %v2363_v47 }
 0x1c4   : > { %2365 = vst [vmem:[%s4173_s8] sm:$0xff] %v2364_v11 }
 0x1c5 PF: > { %s13_s18 = sadd.s32 1, %s4092_s18   ;;  %s4818_s12 = smov %s4080_s15 }
 0x1c6   : > { %p10_p11 = scmp.ge.s32.totalorder %s13_s18, 26   ;;  %s4819_s13 = smov %s4084_s16 }
 0x1c7   : > { %s4820_s14 = smov %s4088_s17  ;;  %s4821_s15 = smov %s4825_s19 }
 0x1c8   : > { %s4822_s16 = smov %s4829_s20  ;;  %s4823_s17 = smov %s4833_s21 }
 0x1c9   :  { %12 = sbr.rel (!%p10_p11) target bundleno = 4 (0x4), region = 75 }

// kernel: _lambda_.15
= control target key start
LH: loop header
LB: loop body
LE: loop exit
PB: predicated region body
PF: predicated region fallthrough
CT: control target
= control target key end

     0   :  { %s1569_s9 = smov 0   ;;  %s2069_s0 = inlined_call_operand.vmem [shape: bf16[2,5,5,512], index: 0, kind: input, shape index: {}]   ;;  %s2070_s1 = inlined_call_operand.vmem [shape: f32[16,512], index: 1, kind: input, shape index: {}]   ;;  %s2071_s2 = inlined_call_operand.vmem [shape: f32[2,128], index: 2, kind: output, shape index: {}]  }
   0x1 LB: > { %s1575_s10 = sadd.s32 4294967295, %s1552_s9   ;;  %p1468_p0 = scmp.ge.s32.totalorder %s1552_s9, 1  ;;  %s1552_s9 = sphi %s1569_s9, %s12_s9  }
   0x2   : > { %p107_p1 = scmp.lt.s32.totalorder %s1552_s9, 3 }
   0x4   : > { %p108_p2 = pnand %p1468_p0, %p107_p1 }
   0x5   : > { %p124_p3 = scmp.lt.s32.totalorder (!%p108_p2), %s1575_s10, 1  ;;  %s1434_s26 = scalar_lea.vmem (!%p108_p2), %s2071_s2, %s1575_s10 }
   0x6   : > { %111 = sbr.rel (%p108_p2) target bundleno = 459 (0x1cb), region = 28 }
   0xb   : > { %s125_s11 = scalar_select %p124_p3, %s1575_s10, 1  ;;  %vm141_vm0 = vcmask 1041408   ;;  %vm212_vm1 = vcmask 1042433   ;;  %v1613_v48 = vld [vmem:[%s2070_s1] ss:$8 sm:$0xf] }
   0xc   : > { %v184_v61 = vperm.slane %v1613_v48, 0  ;;  %v185_v62 = vperm.slane %v1613_v48, 1  ;;  %vm296_vm2 = vcmask 1043458   ;;  %vm380_vm3 = vcmask 1044483  }
   0xd   : > { %s1535_s12 = smul.u32 80, %s125_s11  ;;  %vm1415_vm4 = vcmask 1040384  }
   0xf   : > { %s1584_s15 = scalar_lea.vmem %s2069_s0, %s1535_s12 }
  0x10   : > { %v129_v0 = vld [vmem:[%s1584_s15] sm:$0x11]  ;;  %v130_v1 = vld [vmem:[%s1584_s15 + $0x8] sm:$0x11]  ;;  %v131_v2 = vld [vmem:[%s1584_s15 + $0x10] sm:$0x11] }
  0x11   : > { %v132_v3 = vld [vmem:[%s1584_s15 + $0x18] sm:$0x11]  ;;  %v133_v4 = vunpack.c.l.bf16 %v129_v0  ;;  %v134_v5 = vunpack.c.h.bf16 %v129_v0  ;;  %v135_v6 = vunpack.c.l.bf16 %v130_v1  ;;  %v136_v7 = vunpack.c.h.bf16 %v130_v1  ;;  %v200_v20 = vld [vmem:[%s1584_s15] sm:$0x33]  ;;  %v201_v25 = vld [vmem:[%s1584_s15 + $0x8] sm:$0x33] }
  0x12   : > { %v137_v8 = vunpack.c.l.bf16 %v131_v2  ;;  %v138_v9 = vunpack.c.h.bf16 %v131_v2  ;;  %v139_v10 = vunpack.c.l.bf16 %v132_v3  ;;  %v140_v11 = vunpack.c.h.bf16 %v132_v3  ;;  %v202_v26 = vld [vmem:[%s1584_s15 + $0x10] sm:$0x33]  ;;  %v203_v27 = vld [vmem:[%s1584_s15 + $0x18] sm:$0x33] }
  0x13   : > { %v142_v12 = vsel %vm141_vm0, %v133_v4, 0.0  ;;  %v145_v13 = vsel %vm141_vm0, %v134_v5, 0.0  ;;  %v148_v14 = vsel %vm141_vm0, %v135_v6, 0.0  ;;  %v151_v15 = vsel %vm141_vm0, %v136_v7, 0.0 }
  0x14   : > { %v143_v16 = vsel %vm141_vm0, %v137_v8, 0.0  ;;  %v146_v17 = vsel %vm141_vm0, %v138_v9, 0.0  ;;  %v149_v18 = vsel %vm141_vm0, %v139_v10, 0.0  ;;  %v152_v19 = vsel %vm141_vm0, %v140_v11, 0.0 }
  0x15   : > { %v144_v21 = vadd.f32 %v143_v16, %v142_v12  ;;  %v147_v22 = vadd.f32 %v146_v17, %v145_v13  ;;  %v150_v23 = vadd.f32 %v149_v18, %v148_v14  ;;  %v153_v24 = vadd.f32 %v152_v19, %v151_v15  ;;  %v1625_v3 = vld [vmem:[%s2070_s1 + $0x1] ss:$8 sm:$0xf] }
  0x16   : > { %v204_v30 = vunpack.c.l.bf16 %v200_v20  ;;  %v205_v31 = vunpack.c.h.bf16 %v200_v20  ;;  %v206_v33 = vunpack.c.l.bf16 %v201_v25  ;;  %v208_v35 = vunpack.c.l.bf16 %v202_v26  ;;  %v284_v12 = vld [vmem:[%s1584_s15] sm:$0x22]  ;;  %v286_v20 = vld [vmem:[%s1584_s15 + $0x10] sm:$0x22] }
  0x17   : > { %v154_v28 = vsel %vm141_vm0, %v144_v21, 0.0  ;;  %v161_v29 = vsel %vm141_vm0, %v147_v22, 0.0  ;;  %v168_v32 = vsel %vm141_vm0, %v150_v23, 0.0  ;;  %v175_v34 = vsel %vm141_vm0, %v153_v24, 0.0  ;;  %v285_v24 = vld [vmem:[%s1584_s15 + $0x8] sm:$0x22] }
  0x18   : > { %v209_v36 = vunpack.c.h.bf16 %v202_v26  ;;  %v210_v37 = vunpack.c.l.bf16 %v203_v27  ;;  %v155_v38 = vrot.slane %v154_v28, 4  ;;  %v162_v39 = vrot.slane %v161_v29, 4 }
  0x19   : > { %v207_v40 = vunpack.c.h.bf16 %v201_v25  ;;  %v211_v41 = vunpack.c.h.bf16 %v203_v27  ;;  %v213_v42 = vsel %vm212_vm1, %v204_v30, 0.0  ;;  %v214_v43 = vsel %vm212_vm1, %v208_v35, 0.0  ;;  %v287_v30 = vld [vmem:[%s1584_s15 + $0x18] sm:$0x22] }
  0x1a   : > { %v216_v44 = vsel %vm212_vm1, %v205_v31, 0.0  ;;  %v217_v45 = vsel %vm212_vm1, %v209_v36, 0.0  ;;  %v169_v46 = vrot.slane %v168_v32, 4  ;;  %v176_v47 = vrot.slane %v175_v34, 4 }
  0x1b   : > { %v215_v49 = vadd.f32 %v214_v43, %v213_v42  ;;  %v218_v50 = vadd.f32 %v217_v45, %v216_v44  ;;  %v219_v51 = vsel %vm212_vm1, %v206_v33, 0.0  ;;  %v220_v52 = vsel %vm212_vm1, %v210_v37, 0.0 }
  0x1c   : > { %v156_v53 = vadd.f32 %v155_v38, %v154_v28  ;;  %v163_v54 = vadd.f32 %v162_v39, %v161_v29  ;;  %v221_v55 = vadd.f32 %v220_v52, %v219_v51  ;;  %v222_v56 = vsel %vm212_vm1, %v207_v40, 0.0 }
  0x1d   : > { %v223_v57 = vsel %vm212_vm1, %v211_v41, 0.0  ;;  %v229_v58 = vrot.slane %v215_v49, 1  ;;  %v170_v59 = vadd.f32 %v169_v46, %v168_v32  ;;  %v177_v60 = vadd.f32 %v176_v47, %v175_v34 }
  0x1e   : > { %v224_v63 = vadd.f32 %v223_v57, %v222_v56  ;;  %v230_v0 = vrot.slane %v218_v50, 1  ;;  %v231_v1 = vrot.slane %v221_v55, 1  ;;  %v157_v4 = vrot.slane %v156_v53, 2 }
  0x1f   : > { %v237_v2 = vsel %vm141_vm0, %v229_v58, 0.0  ;;  %v164_v5 = vrot.slane %v163_v54, 2  ;;  %v186_v6 = vperm.slane %v1613_v48, 2  ;;  %v187_v7 = vperm.slane %v1613_v48, 3 }
  0x20   : > { %v232_v8 = vrot.slane %v224_v63, 1  ;;  %v238_v9 = vrot.slane %v237_v2, 4  ;;  %v244_v10 = vsel %vm141_vm0, %v230_v0, 0.0  ;;  %v251_v11 = vsel %vm141_vm0, %v231_v1, 0.0 }
  0x21   : > { %v171_v13 = vrot.slane %v170_v59, 2  ;;  %v178_v14 = vrot.slane %v177_v60, 2  ;;  %v268_v15 = vperm.slane %v1625_v3, 0  ;;  %v245_v17 = vrot.slane %v244_v10, 4 }
  0x22   : > { %v239_v16 = vadd.f32 %v238_v9, %v237_v2  ;;  %v252_v18 = vrot.slane %v251_v11, 4  ;;  %v258_v19 = vsel %vm141_vm0, %v232_v8, 0.0  ;;  %v158_v21 = vadd.f32 %v157_v4, %v156_v53 }
  0x23   : > { %v259_v22 = vrot.slane %v258_v19, 4  ;;  %v269_v23 = vperm.slane %v1625_v3, 1  ;;  %v288_v25 = vunpack.c.l.bf16 %v284_v12  ;;  %v165_v26 = vadd.f32 %v164_v5, %v163_v54 }
  0x24   : > { %v240_v27 = vrot.slane %v239_v16, 2  ;;  %v246_v28 = vadd.f32 %v245_v17, %v244_v10  ;;  %v253_v29 = vadd.f32 %v252_v18, %v251_v11  ;;  %v172_v31 = vadd.f32 %v171_v13, %v170_v59 }
  0x25   : > { %v179_v32 = vadd.f32 %v178_v14, %v177_v60  ;;  %v289_v33 = vunpack.c.h.bf16 %v284_v12  ;;  %v292_v34 = vunpack.c.l.bf16 %v286_v20  ;;  %v260_v36 = vadd.f32 %v259_v22, %v258_v19 }
  0x26   : > { %v247_v35 = vrot.slane %v246_v28, 2  ;;  %v290_v37 = vunpack.c.l.bf16 %v285_v24  ;;  %v293_v38 = vunpack.c.h.bf16 %v286_v20  ;;  %v254_v39 = vrot.slane %v253_v29, 2 }
  0x27   : > { %v291_v40 = vunpack.c.h.bf16 %v285_v24  ;;  %v294_v41 = vunpack.c.l.bf16 %v287_v30  ;;  %v297_v42 = vsel %vm296_vm2, %v288_v25, 0.0  ;;  %v159_v43 = vrot.slane %v158_v21, 1 }
  0x28   : > { %v166_v44 = vrot.slane %v165_v26, 1  ;;  %v241_v45 = vadd.f32 %v240_v27, %v239_v16  ;;  %v298_v46 = vsel %vm296_vm2, %v292_v34, 0.0  ;;  %v295_v47 = vunpack.c.h.bf16 %v287_v30 }
  0x29   : > { %v299_v49 = vadd.f32 %v298_v46, %v297_v42  ;;  %v300_v50 = vsel %vm296_vm2, %v289_v33, 0.0  ;;  %v301_v51 = vsel %vm296_vm2, %v293_v38, 0.0  ;;  %v173_v52 = vrot.slane %v172_v31, 1 }
  0x2a   : > { %v248_v53 = vadd.f32 %v247_v35, %v246_v28  ;;  %v261_v54 = vrot.slane %v260_v36, 2  ;;  %v302_v55 = vadd.f32 %v301_v51, %v300_v50  ;;  %v255_v56 = vadd.f32 %v254_v39, %v253_v29  ;;  %v370_v35 = vld [vmem:[%s1584_s15 + $0x10] sm:$0x66]  ;;  %v369_v39 = vld [vmem:[%s1584_s15 + $0x8] sm:$0x66] }
  0x2b   : > { %v303_v57 = vsel %vm296_vm2, %v290_v37, 0.0  ;;  %v304_v58 = vsel %vm296_vm2, %v294_v41, 0.0  ;;  %v306_v59 = vsel %vm296_vm2, %v291_v40, 0.0  ;;  %v160_v60 = vadd.f32 %v159_v43, %v158_v21  ;;  %v371_v43 = vld [vmem:[%s1584_s15 + $0x18] sm:$0x66] }
  0x2c   : > { %v167_v63 = vadd.f32 %v166_v44, %v165_v26  ;;  %v180_v0 = vrot.slane %v179_v32, 1  ;;  %v305_v1 = vadd.f32 %v304_v58, %v303_v57  ;;  %v242_v2 = vrot.slane %v241_v45, 1 }
  0x2d   : > { %v307_v4 = vsel %vm296_vm2, %v295_v47, 0.0  ;;  %v313_v5 = vrot.slane %v299_v49, 2  ;;  %v314_v8 = vrot.slane %v302_v55, 2  ;;  %v174_v9 = vadd.f32 %v173_v52, %v172_v31  ;;  %v368_v31 = vld [vmem:[%s1584_s15] sm:$0x66] }
  0x2e   : > { %v249_v10 = vrot.slane %v248_v53, 1  ;;  %v262_v11 = vadd.f32 %v261_v54, %v260_v36  ;;  %v308_v12 = vadd.f32 %v307_v4, %v306_v59  ;;  %v256_v13 = vrot.slane %v255_v56, 1  ;;  %v1684_v4 = vld [vmem:[%s2070_s1 + $0x2] ss:$8 sm:$0xf] }
  0x2f   : > { %v315_v14 = vrot.slane %v305_v1, 2  ;;  %v321_v16 = vsel %vm141_vm0, %v313_v5, 0.0  ;;  %v328_v17 = vsel %vm141_vm0, %v314_v8, 0.0  ;;  %v181_v18 = vadd.f32 %v180_v0, %v179_v32 }
  0x30   : > { %v192_v19 = vmul.f32 %v184_v61, %v160_v60  ;;  %v316_v20 = vrot.slane %v308_v12, 2  ;;  %v322_v21 = vrot.slane %v321_v16, 4  ;;  %v193_v22 = vmul.f32 %v185_v62, %v167_v63 }
  0x31   : > { %v243_v24 = vadd.f32 %v242_v2, %v241_v45  ;;  %v329_v25 = vrot.slane %v328_v17, 4  ;;  %v335_v26 = vsel %vm141_vm0, %v315_v14, 0.0  ;;  %v263_v27 = vrot.slane %v262_v11, 1 }
  0x32   : > { %v323_v28 = vadd.f32 %v322_v21, %v321_v16  ;;  %v336_v29 = vrot.slane %v335_v26, 4  ;;  %v342_v30 = vsel %vm141_vm0, %v316_v20, 0.0  ;;  %v250_v32 = vadd.f32 %v249_v10, %v248_v53 }
  0x33   : > { %v257_v61 = vadd.f32 %v256_v13, %v255_v56  ;;  %v270_v33 = vperm.slane %v1625_v3, 2  ;;  %v343_v34 = vrot.slane %v342_v30, 4  ;;  %v194_v62 = vmul.f32 %v186_v6, %v174_v9 }
  0x34   : > { %v1661_v36 = vmul.f32 %v187_v7, %v181_v18  ;;  %v271_v37 = vperm.slane %v1625_v3, 3  ;;  %v330_v38 = vadd.f32 %v329_v25, %v328_v17  ;;  %v276_v40 = vmul.f32 %v268_v15, %v243_v24 }
  0x35   : > { %v324_v41 = vrot.slane %v323_v28, 2  ;;  %v337_v42 = vadd.f32 %v336_v29, %v335_v26  ;;  %v372_v44 = vunpack.c.l.bf16 %v368_v31  ;;  %v264_v45 = vadd.f32 %v263_v27, %v262_v11  ;;  %v1473_v27 = vld [vmem:[%s1584_s15 + $0x10] sm:$0x11] }
  0x36   : > { %v344_v46 = vadd.f32 %v343_v34, %v342_v30  ;;  %v373_v47 = vunpack.c.h.bf16 %v368_v31  ;;  %v376_v49 = vunpack.c.l.bf16 %v370_v35  ;;  %v277_v48 = vmul.f32 %v269_v23, %v250_v32  ;;  %v1474_v32 = vld [vmem:[%s1584_s15 + $0x18] sm:$0x11] }
  0x37   : > { %v278_v6 = vmul.f32 %v270_v33, %v257_v61  ;;  %v374_v7 = vunpack.c.l.bf16 %v369_v39  ;;  %v377_v50 = vunpack.c.h.bf16 %v370_v35  ;;  %v331_v51 = vrot.slane %v330_v38, 2 }
  0x38   : > { %v375_v52 = vunpack.c.h.bf16 %v369_v39  ;;  %v378_v53 = vunpack.c.l.bf16 %v371_v43  ;;  %v325_v54 = vadd.f32 %v324_v41, %v323_v28  ;;  %v338_v15 = vrot.slane %v337_v42, 2 }
  0x39   : > { %v381_v55 = vsel %vm380_vm3, %v372_v44, 0.0  ;;  %v382_v56 = vsel %vm380_vm3, %v376_v49, 0.0  ;;  %v345_v57 = vrot.slane %v344_v46, 2  ;;  %v379_v58 = vunpack.c.h.bf16 %v371_v43 }
  0x3a   : > { %v383_v59 = vadd.f32 %v382_v56, %v381_v55  ;;  %v384_v60 = vsel %vm380_vm3, %v373_v47, 0.0  ;;  %v1673_v3 = vmul.f32 %v271_v37, %v264_v45  ;;  %v1675_v23 = vadd.f32 %v276_v40, %v192_v19  ;;  %v1476_v40 = vld [vmem:[%s1584_s15 + $0x28] sm:$0x11] }
  0x3b   : > { %v385_v63 = vsel %vm380_vm3, %v377_v50, 0.0  ;;  %v387_v0 = vsel %vm380_vm3, %v374_v7, 0.0  ;;  %v1679_v1 = vadd.f32 %v277_v48, %v193_v22  ;;  %v332_v2 = vadd.f32 %v331_v51, %v330_v38 }
  0x3c   : > { %v386_v5 = vadd.f32 %v385_v63, %v384_v60  ;;  %v388_v8 = vsel %vm380_vm3, %v378_v53, 0.0  ;;  %v1687_v9 = vadd.f32 %v278_v6, %v194_v62  ;;  %v326_v10 = vrot.slane %v325_v54, 1  ;;  %v1475_v62 = vld [vmem:[%s1584_s15 + $0x20] sm:$0x11] }
  0x3d   : > { %v389_v11 = vadd.f32 %v388_v8, %v387_v0  ;;  %v390_v12 = vsel %vm380_vm3, %v375_v52, 0.0  ;;  %v339_v13 = vadd.f32 %v338_v15, %v337_v42  ;;  %v346_v14 = vadd.f32 %v345_v57, %v344_v46 }
  0x3e   : > { %v391_v16 = vsel %vm380_vm3, %v379_v58, 0.0  ;;  %v397_v17 = vrot.slane %v383_v59, 3  ;;  %v352_v18 = vperm.slane %v1684_v4, 0  ;;  %v353_v19 = vperm.slane %v1684_v4, 1 }
  0x3f   : > { %v392_v20 = vadd.f32 %v391_v16, %v390_v12  ;;  %v398_v21 = vrot.slane %v386_v5, 3  ;;  %v333_v22 = vrot.slane %v332_v2, 1  ;;  %v354_v24 = vperm.slane %v1684_v4, 2  ;;  %v1472_v16 = vld [vmem:[%s2070_s1 + $0x3] ss:$8 sm:$0xf] }
  0x40   : > { %v399_v25 = vrot.slane %v389_v11, 3  ;;  %v405_v26 = vsel %vm141_vm0, %v397_v17, 0.0  ;;  %v327_v28 = vadd.f32 %v326_v10, %v325_v54  ;;  %v340_v61 = vrot.slane %v339_v13, 1 }
  0x41   : > { %v400_v29 = vrot.slane %v392_v20, 3  ;;  %v406_v30 = vrot.slane %v405_v26, 4  ;;  %v412_v31 = vsel %vm141_vm0, %v398_v21, 0.0  ;;  %v347_v33 = vrot.slane %v346_v14, 1 }
  0x42   : > { %v413_v34 = vrot.slane %v412_v31, 4  ;;  %v419_v35 = vsel %vm141_vm0, %v399_v25, 0.0  ;;  %v457_v41 = vunpack.c.l.bf16 %v1473_v27  ;;  %v458_v44 = vunpack.c.h.bf16 %v1473_v27 }
  0x43   : > { %v407_v37 = vadd.f32 %v406_v30, %v405_v26  ;;  %v420_v38 = vrot.slane %v419_v35, 4  ;;  %v426_v39 = vsel %vm141_vm0, %v400_v29, 0.0  ;;  %v459_v45 = vunpack.c.l.bf16 %v1474_v32 }
  0x44   : > { %v414_v42 = vadd.f32 %v413_v34, %v412_v31  ;;  %v427_v43 = vrot.slane %v426_v39, 4  ;;  %v460_v49 = vunpack.c.h.bf16 %v1474_v32  ;;  %v461_v48 = vunpack.c.l.bf16 %v1475_v62 }
  0x45   : > { %v408_v46 = vrot.slane %v407_v37, 2  ;;  %v421_v47 = vadd.f32 %v420_v38, %v419_v35  ;;  %v462_v50 = vunpack.c.h.bf16 %v1475_v62  ;;  %v463_v51 = vunpack.c.l.bf16 %v1476_v40 }
  0x46   : > { %v415_v6 = vrot.slane %v414_v42, 2  ;;  %v428_v7 = vadd.f32 %v427_v43, %v426_v39  ;;  %v464_v54 = vunpack.c.h.bf16 %v1476_v40  ;;  %v465_v15 = vsel %vm141_vm0, %v457_v41, 0.0  ;;  %v1478_v40 = vld [vmem:[%s1584_s15 + $0x10] sm:$0x33] }
  0x47   : > { %v409_v52 = vadd.f32 %v408_v46, %v407_v37  ;;  %v422_v53 = vrot.slane %v421_v47, 2  ;;  %v466_v57 = vsel %vm141_vm0, %v461_v48, 0.0  ;;  %v468_v58 = vsel %vm141_vm0, %v458_v44, 0.0  ;;  %v1481_v48 = vld [vmem:[%s1584_s15 + $0x28] sm:$0x33] }
  0x48   : > { %v416_v55 = vadd.f32 %v415_v6, %v414_v42  ;;  %v429_v56 = vrot.slane %v428_v7, 2  ;;  %v355_v59 = vperm.slane %v1684_v4, 3  ;;  %v467_v63 = vadd.f32 %v466_v57, %v465_v15 }
  0x49   : > { %v423_v60 = vadd.f32 %v422_v53, %v421_v47  ;;  %v469_v0 = vsel %vm141_vm0, %v462_v50, 0.0  ;;  %v334_v5 = vadd.f32 %v333_v22, %v332_v2  ;;  %v410_v8 = vrot.slane %v409_v52, 1 }
  0x4a   : > { %v430_v10 = vadd.f32 %v429_v56, %v428_v7  ;;  %v471_v11 = vsel %vm141_vm0, %v459_v45, 0.0  ;;  %v341_v12 = vadd.f32 %v340_v61, %v339_v13  ;;  %v470_v17 = vadd.f32 %v469_v0, %v468_v58  ;;  %v1480_v45 = vld [vmem:[%s1584_s15 + $0x20] sm:$0x33] }
  0x4b   : > { %v472_v20 = vsel %vm141_vm0, %v463_v51, 0.0  ;;  %v474_v21 = vsel %vm141_vm0, %v460_v49, 0.0  ;;  %v348_v25 = vadd.f32 %v347_v33, %v346_v14  ;;  %v360_v26 = vmul.f32 %v352_v18, %v327_v28  ;;  %v1479_v49 = vld [vmem:[%s1584_s15 + $0x18] sm:$0x33] }
  0x4c   : > { %v417_v27 = vrot.slane %v416_v55, 1  ;;  %v475_v29 = vsel %vm141_vm0, %v464_v54, 0.0  ;;  %v424_v2 = vrot.slane %v423_v60, 1  ;;  %v473_v22 = vadd.f32 %v472_v20, %v471_v11  ;;  %v1737_v0 = vld [vmem:[%s2070_s1 + $0x4] ss:$8 sm:$0xf] }
  0x4d   : > { %v476_v30 = vadd.f32 %v475_v29, %v474_v21  ;;  %v477_v31 = vsel %vm141_vm0, %v467_v63, 0.0  ;;  %v283_v13 = vadd.f32 %v1673_v3, %v1661_v36  ;;  %v411_v32 = vadd.f32 %v410_v8, %v409_v52 }
  0x4e   : > { %v431_v61 = vrot.slane %v430_v10, 1  ;;  %v436_v34 = vperm.slane %v1472_v16, 0  ;;  %v361_v35 = vmul.f32 %v353_v19, %v334_v5  ;;  %v362_v14 = vmul.f32 %v354_v24, %v341_v12 }
  0x4f   : > { %v478_v18 = vrot.slane %v477_v31, 4  ;;  %v484_v28 = vsel %vm141_vm0, %v470_v17, 0.0  ;;  %v363_v33 = vmul.f32 %v355_v59, %v348_v25  ;;  %v364_v62 = vadd.f32 %v360_v26, %v1675_v23 }
  0x50   : > { %v437_v37 = vperm.slane %v1472_v16, 1  ;;  %v438_v38 = vperm.slane %v1472_v16, 2  ;;  %v418_v36 = vadd.f32 %v417_v27, %v416_v55  ;;  %v425_v3 = vadd.f32 %v424_v2, %v423_v60 }
  0x51   : > { %v491_v39 = vsel %vm141_vm0, %v473_v22, 0.0  ;;  %v498_v19 = vsel %vm141_vm0, %v476_v30, 0.0  ;;  %v432_v4 = vadd.f32 %v431_v61, %v430_v10  ;;  %v439_v24 = vperm.slane %v1472_v16, 3 }
  0x52   : > { %v444_v41 = vmul.f32 %v436_v34, %v411_v32  ;;  %v485_v42 = vrot.slane %v484_v28, 4  ;;  %v365_v43 = vadd.f32 %v361_v35, %v1679_v1  ;;  %v479_v44 = vadd.f32 %v478_v18, %v477_v31 }
  0x53   : > { %v366_v23 = vadd.f32 %v362_v14, %v1687_v9  ;;  %v492_v46 = vrot.slane %v491_v39, 4  ;;  %v499_v47 = vrot.slane %v498_v19, 4  ;;  %v528_v6 = vunpack.c.l.bf16 %v1478_v40 }
  0x54   : > { %v367_v7 = vadd.f32 %v363_v33, %v283_v13  ;;  %v445_v50 = vmul.f32 %v437_v37, %v418_v36  ;;  %v446_v51 = vmul.f32 %v438_v38, %v425_v3  ;;  %v529_v52 = vunpack.c.h.bf16 %v1478_v40  ;;  %v1483_v38 = vld [vmem:[%s1584_s15 + $0x10] sm:$0x22] }
  0x55   : > { %v447_v53 = vmul.f32 %v439_v24, %v432_v4  ;;  %v1731_v54 = vadd.f32 %v444_v41, %v364_v62  ;;  %v486_v15 = vadd.f32 %v485_v42, %v484_v28  ;;  %v532_v55 = vunpack.c.l.bf16 %v1480_v45  ;;  %v1485_v42 = vld [vmem:[%s1584_s15 + $0x20] sm:$0x22] }
  0x56   : > { %v480_v56 = vrot.slane %v479_v44, 2  ;;  %v530_v1 = vunpack.c.l.bf16 %v1479_v49  ;;  %v533_v57 = vunpack.c.h.bf16 %v1480_v45  ;;  %v534_v58 = vunpack.c.l.bf16 %v1481_v48 }
  0x57   : > { %v493_v59 = vadd.f32 %v492_v46, %v491_v39  ;;  %v500_v9 = vadd.f32 %v499_v47, %v498_v19  ;;  %v531_v60 = vunpack.c.h.bf16 %v1479_v49  ;;  %v536_v63 = vsel %vm212_vm1, %v528_v6, 0.0  ;;  %v1486_v6 = vld [vmem:[%s1584_s15 + $0x28] sm:$0x22] }
  0x58   : > { %v535_v5 = vunpack.c.h.bf16 %v1481_v48  ;;  %v537_v8 = vsel %vm212_vm1, %v532_v55, 0.0  ;;  %v539_v10 = vsel %vm212_vm1, %v529_v52, 0.0  ;;  %v540_v11 = vsel %vm212_vm1, %v533_v57, 0.0 }
  0x59   : > { %v1742_v12 = vadd.f32 %v445_v50, %v365_v43  ;;  %v1744_v16 = vadd.f32 %v446_v51, %v366_v23  ;;  %v487_v17 = vrot.slane %v486_v15, 2  ;;  %v538_v20 = vadd.f32 %v537_v8, %v536_v63  ;;  %v1484_v23 = vld [vmem:[%s1584_s15 + $0x18] sm:$0x22] }
  0x5a   : > { %v481_v21 = vadd.f32 %v480_v56, %v479_v44  ;;  %v541_v25 = vadd.f32 %v540_v11, %v539_v10  ;;  %v542_v26 = vsel %vm212_vm1, %v530_v1, 0.0  ;;  %v543_v27 = vsel %vm212_vm1, %v534_v58, 0.0 }
  0x5b   : > { %v1748_v29 = vadd.f32 %v447_v53, %v367_v7  ;;  %v494_v2 = vrot.slane %v493_v59, 2  ;;  %v508_v22 = vperm.slane %v1737_v0, 0  ;;  %v544_v30 = vadd.f32 %v543_v27, %v542_v26 }
  0x5c   : > { %v501_v31 = vrot.slane %v500_v9, 2  ;;  %v545_v13 = vsel %vm212_vm1, %v531_v60, 0.0  ;;  %v546_v32 = vsel %vm212_vm1, %v535_v5, 0.0  ;;  %v552_v61 = vrot.slane %v538_v20, 1 }
  0x5d   : > { %v509_v34 = vperm.slane %v1737_v0, 1  ;;  %v510_v35 = vperm.slane %v1737_v0, 2  ;;  %v547_v14 = vadd.f32 %v546_v32, %v545_v13  ;;  %v553_v18 = vrot.slane %v541_v25, 1 }
  0x5e   : > { %v482_v28 = vrot.slane %v481_v21, 1  ;;  %v488_v33 = vadd.f32 %v487_v17, %v486_v15  ;;  %v554_v62 = vrot.slane %v544_v30, 1  ;;  %v560_v37 = vsel %vm141_vm0, %v552_v61, 0.0 }
  0x5f   : > { %v495_v36 = vadd.f32 %v494_v2, %v493_v59  ;;  %v555_v3 = vrot.slane %v547_v14, 1  ;;  %v561_v39 = vrot.slane %v560_v37, 4  ;;  %v567_v19 = vsel %vm141_vm0, %v553_v18, 0.0 }
  0x60   : > { %v502_v40 = vadd.f32 %v501_v31, %v500_v9  ;;  %v511_v4 = vperm.slane %v1737_v0, 3  ;;  %v568_v24 = vrot.slane %v567_v19, 4  ;;  %v574_v41 = vsel %vm141_vm0, %v554_v62, 0.0 }
  0x61   : > { %v562_v43 = vadd.f32 %v561_v39, %v560_v37  ;;  %v575_v44 = vrot.slane %v574_v41, 4  ;;  %v581_v45 = vsel %vm141_vm0, %v555_v3, 0.0  ;;  %v611_v46 = vunpack.c.l.bf16 %v1483_v38 }
  0x62   : > { %v489_v47 = vrot.slane %v488_v33, 1  ;;  %v569_v49 = vadd.f32 %v568_v24, %v567_v19  ;;  %v582_v48 = vrot.slane %v581_v45, 4  ;;  %v612_v7 = vunpack.c.h.bf16 %v1483_v38 }
  0x63   : > { %v483_v50 = vadd.f32 %v482_v28, %v481_v21  ;;  %v496_v51 = vrot.slane %v495_v36, 1  ;;  %v576_v52 = vadd.f32 %v575_v44, %v574_v41  ;;  %v615_v53 = vunpack.c.l.bf16 %v1485_v42 }
  0x64   : > { %v563_v15 = vrot.slane %v562_v43, 2  ;;  %v583_v55 = vadd.f32 %v582_v48, %v581_v45  ;;  %v613_v56 = vunpack.c.l.bf16 %v1484_v23  ;;  %v616_v1 = vunpack.c.h.bf16 %v1485_v42  ;;  %v1488_v48 = vld [vmem:[%s1584_s15 + $0x10] sm:$0x66] }
  0x65   : > { %v503_v57 = vrot.slane %v502_v40, 1  ;;  %v614_v58 = vunpack.c.h.bf16 %v1484_v23  ;;  %v617_v59 = vunpack.c.l.bf16 %v1486_v6  ;;  %v619_v9 = vsel %vm296_vm2, %v611_v46, 0.0 }
  0x66   : > { %v570_v60 = vrot.slane %v569_v49, 2  ;;  %v618_v63 = vunpack.c.h.bf16 %v1486_v6  ;;  %v620_v5 = vsel %vm296_vm2, %v615_v53, 0.0  ;;  %v622_v8 = vsel %vm296_vm2, %v612_v7, 0.0 }
  0x67   : > { %v490_v10 = vadd.f32 %v489_v47, %v488_v33  ;;  %v577_v11 = vrot.slane %v576_v52, 2  ;;  %v621_v17 = vadd.f32 %v620_v5, %v619_v9  ;;  %v623_v20 = vsel %vm296_vm2, %v616_v1, 0.0  ;;  %v1491_v1 = vld [vmem:[%s1584_s15 + $0x28] sm:$0x66] }
  0x68   : > { %v564_v21 = vadd.f32 %v563_v15, %v562_v43  ;;  %v584_v25 = vrot.slane %v583_v55, 2  ;;  %v624_v26 = vadd.f32 %v623_v20, %v622_v8  ;;  %v625_v27 = vsel %vm296_vm2, %v613_v56, 0.0  ;;  %v1489_v56 = vld [vmem:[%s1584_s15 + $0x18] sm:$0x66] }
  0x69   : > { %v497_v2 = vadd.f32 %v496_v51, %v495_v36  ;;  %v504_v30 = vadd.f32 %v503_v57, %v502_v40  ;;  %v626_v31 = vsel %vm296_vm2, %v617_v59, 0.0  ;;  %v628_v13 = vsel %vm296_vm2, %v614_v58, 0.0  ;;  %v1482_v36 = vld [vmem:[%s2070_s1 + $0x5] ss:$8 sm:$0xf] }
  0x6a   : > { %v516_v32 = vmul.f32 %v508_v22, %v483_v50  ;;  %v571_v61 = vadd.f32 %v570_v60, %v569_v49  ;;  %v627_v14 = vadd.f32 %v626_v31, %v625_v27  ;;  %v629_v18 = vsel %vm296_vm2, %v618_v63, 0.0  ;;  %v1490_v51 = vld [vmem:[%s1584_s15 + $0x20] sm:$0x66] }
  0x6b   : > { %v517_v28 = vmul.f32 %v509_v34, %v490_v10  ;;  %v578_v33 = vadd.f32 %v577_v11, %v576_v52  ;;  %v630_v62 = vadd.f32 %v629_v18, %v628_v13  ;;  %v635_v37 = vrot.slane %v621_v17, 2 }
  0x6c   : > { %v565_v38 = vrot.slane %v564_v21, 1  ;;  %v585_v3 = vadd.f32 %v584_v25, %v583_v55  ;;  %v636_v39 = vrot.slane %v624_v26, 2  ;;  %v637_v19 = vrot.slane %v627_v14, 2 }
  0x6d   : > { %v518_v40 = vmul.f32 %v510_v35, %v497_v2  ;;  %v519_v22 = vmul.f32 %v511_v4, %v504_v30  ;;  %v638_v24 = vrot.slane %v630_v62, 2  ;;  %v643_v41 = vsel %vm141_vm0, %v635_v37, 0.0 }
  0x6e   : > { %v520_v34 = vadd.f32 %v516_v32, %v1731_v54  ;;  %v572_v42 = vrot.slane %v571_v61, 1  ;;  %v644_v43 = vrot.slane %v643_v41, 4  ;;  %v650_v44 = vsel %vm141_vm0, %v636_v39, 0.0 }
  0x6f   : > { %v579_v45 = vrot.slane %v578_v33, 1  ;;  %v591_v23 = vperm.slane %v1482_v36, 0  ;;  %v657_v46 = vsel %vm141_vm0, %v637_v19, 0.0  ;;  %v664_v0 = vsel %vm141_vm0, %v638_v24, 0.0 }
  0x70   : > { %v566_v35 = vadd.f32 %v565_v38, %v564_v21  ;;  %v586_v4 = vrot.slane %v585_v3, 1  ;;  %v651_v47 = vrot.slane %v650_v44, 4  ;;  %v658_v49 = vrot.slane %v657_v46, 4 }
  0x71   : > { %v521_v54 = vadd.f32 %v517_v28, %v1742_v12  ;;  %v522_v6 = vadd.f32 %v518_v40, %v1744_v16  ;;  %v1786_v7 = vadd.f32 %v519_v22, %v1748_v29  ;;  %v592_v50 = vperm.slane %v1482_v36, 1 }
  0x72   : > { %v573_v52 = vadd.f32 %v572_v42, %v571_v61  ;;  %v593_v53 = vperm.slane %v1482_v36, 2  ;;  %v645_v15 = vadd.f32 %v644_v43, %v643_v41  ;;  %v665_v55 = vrot.slane %v664_v0, 4  ;;  %v1799_v61 = vld [vmem:[%s2070_s1 + $0x6] ss:$8 sm:$0xf] }
  0x73   : > { %v580_v57 = vadd.f32 %v579_v45, %v578_v33  ;;  %v594_v58 = vperm.slane %v1482_v36, 3  ;;  %v694_v59 = vunpack.c.l.bf16 %v1488_v48  ;;  %v695_v9 = vunpack.c.h.bf16 %v1488_v48 }
  0x74   : > { %v587_v60 = vadd.f32 %v586_v4, %v585_v3  ;;  %v599_v63 = vmul.f32 %v591_v23, %v566_v35  ;;  %v652_v12 = vadd.f32 %v651_v47, %v650_v44  ;;  %v659_v5 = vadd.f32 %v658_v49, %v657_v46  ;;  %v1493_v4 = vld [vmem:[%s1584_s15 + $0x20] sm:$0x11] }
  0x75   : > { %v696_v16 = vunpack.c.l.bf16 %v1489_v56  ;;  %v698_v8 = vunpack.c.l.bf16 %v1490_v51  ;;  %v699_v29 = vunpack.c.h.bf16 %v1490_v51  ;;  %v700_v10 = vunpack.c.l.bf16 %v1491_v1 }
  0x76   : > { %v600_v11 = vmul.f32 %v592_v50, %v573_v52  ;;  %v646_v17 = vrot.slane %v645_v15, 2  ;;  %v666_v20 = vadd.f32 %v665_v55, %v664_v0  ;;  %v697_v21 = vunpack.c.h.bf16 %v1489_v56 }
  0x77   : > { %v701_v25 = vunpack.c.h.bf16 %v1491_v1  ;;  %v702_v26 = vsel %vm380_vm3, %v694_v59, 0.0  ;;  %v703_v27 = vsel %vm380_vm3, %v698_v8, 0.0  ;;  %v705_v2 = vsel %vm380_vm3, %v695_v9, 0.0 }
  0x78   : > { %v601_v30 = vmul.f32 %v593_v53, %v580_v57  ;;  %v1794_v31 = vadd.f32 %v599_v63, %v520_v34  ;;  %v653_v13 = vrot.slane %v652_v12, 2  ;;  %v660_v32 = vrot.slane %v659_v5, 2  ;;  %v1496_v63 = vld [vmem:[%s1584_s15 + $0x38] sm:$0x11] }
  0x79   : > { %v704_v14 = vadd.f32 %v703_v27, %v702_v26  ;;  %v706_v18 = vsel %vm380_vm3, %v699_v29, 0.0  ;;  %v708_v28 = vsel %vm380_vm3, %v696_v16, 0.0  ;;  %v709_v33 = vsel %vm380_vm3, %v700_v10, 0.0 }
  0x7a   : > { %v1804_v62 = vmul.f32 %v594_v58, %v587_v60  ;;  %v1806_v37 = vadd.f32 %v600_v11, %v521_v54  ;;  %v667_v38 = vrot.slane %v666_v20, 2  ;;  %v707_v3 = vadd.f32 %v706_v18, %v705_v2 }
  0x7b   : > { %v647_v36 = vadd.f32 %v646_v17, %v645_v15  ;;  %v710_v39 = vadd.f32 %v709_v33, %v708_v28  ;;  %v711_v19 = vsel %vm380_vm3, %v697_v21, 0.0  ;;  %v712_v40 = vsel %vm380_vm3, %v701_v25, 0.0  ;;  %v1494_v15 = vld [vmem:[%s1584_s15 + $0x28] sm:$0x11] }
  0x7c   : > { %v1810_v22 = vadd.f32 %v601_v30, %v522_v6  ;;  %v654_v24 = vadd.f32 %v653_v13, %v652_v12  ;;  %v674_v41 = vperm.slane %v1799_v61, 0  ;;  %v713_v34 = vadd.f32 %v712_v40, %v711_v19  ;;  %v1495_v6 = vld [vmem:[%s1584_s15 + $0x30] sm:$0x11] }
  0x7d   : > { %v661_v42 = vadd.f32 %v660_v32, %v659_v5  ;;  %v718_v43 = vrot.slane %v704_v14, 3  ;;  %v719_v44 = vrot.slane %v707_v3, 3  ;;  %v720_v45 = vrot.slane %v710_v39, 3 }
  0x7e   : > { %v668_v23 = vadd.f32 %v667_v38, %v666_v20  ;;  %v675_v46 = vperm.slane %v1799_v61, 1  ;;  %v676_v0 = vperm.slane %v1799_v61, 2  ;;  %v721_v35 = vrot.slane %v713_v34, 3 }
  0x7f   : > { %v648_v47 = vrot.slane %v647_v36, 1  ;;  %v726_v49 = vsel %vm141_vm0, %v718_v43, 0.0  ;;  %v733_v48 = vsel %vm141_vm0, %v719_v44, 0.0  ;;  %v740_v54 = vsel %vm141_vm0, %v720_v45, 0.0 }
  0x80   : > { %v727_v50 = vrot.slane %v726_v49, 4  ;;  %v734_v51 = vrot.slane %v733_v48, 4  ;;  %v741_v52 = vrot.slane %v740_v54, 4  ;;  %v747_v53 = vsel %vm141_vm0, %v721_v35, 0.0 }
  0x81   : > { %v655_v55 = vrot.slane %v654_v24, 1  ;;  %v662_v56 = vrot.slane %v661_v42, 1  ;;  %v748_v1 = vrot.slane %v747_v53, 4  ;;  %v778_v57 = vunpack.c.l.bf16 %v1493_v4  ;;  %v1492_v35 = vld [vmem:[%s2070_s1 + $0x7] ss:$8 sm:$0xf] }
  0x82   : > { %v669_v58 = vrot.slane %v668_v23, 1  ;;  %v728_v59 = vadd.f32 %v727_v50, %v726_v49  ;;  %v735_v9 = vadd.f32 %v734_v51, %v733_v48  ;;  %v742_v60 = vadd.f32 %v741_v52, %v740_v54 }
  0x83   : > { %v749_v12 = vadd.f32 %v748_v1, %v747_v53  ;;  %v779_v5 = vunpack.c.h.bf16 %v1493_v4  ;;  %v780_v16 = vunpack.c.l.bf16 %v1494_v15  ;;  %v782_v8 = vunpack.c.l.bf16 %v1495_v6 }
  0x84   : > { %v729_v29 = vrot.slane %v728_v59, 2  ;;  %v736_v10 = vrot.slane %v735_v9, 2  ;;  %v743_v11 = vrot.slane %v742_v60, 2  ;;  %v783_v17 = vunpack.c.h.bf16 %v1495_v6 }
  0x85   : > { %v750_v20 = vrot.slane %v749_v12, 2  ;;  %v781_v21 = vunpack.c.h.bf16 %v1494_v15  ;;  %v784_v25 = vunpack.c.l.bf16 %v1496_v63  ;;  %v786_v26 = vsel %vm141_vm0, %v778_v57, 0.0 }
  0x86   : > { %v730_v27 = vadd.f32 %v729_v29, %v728_v59  ;;  %v737_v2 = vadd.f32 %v736_v10, %v735_v9  ;;  %v785_v30 = vunpack.c.h.bf16 %v1496_v63  ;;  %v787_v13 = vsel %vm141_vm0, %v782_v8, 0.0 }
  0x87   : > { %v744_v32 = vadd.f32 %v743_v11, %v742_v60  ;;  %v788_v14 = vadd.f32 %v787_v13, %v786_v26  ;;  %v789_v18 = vsel %vm141_vm0, %v779_v5, 0.0  ;;  %v790_v28 = vsel %vm141_vm0, %v783_v17, 0.0  ;;  %v1499_v5 = vld [vmem:[%s1584_s15 + $0x28] sm:$0x33]  ;;  %v1501_v11 = vld [vmem:[%s1584_s15 + $0x38] sm:$0x33] }
  0x88   : > { %v649_v33 = vadd.f32 %v648_v47, %v647_v36  ;;  %v656_v38 = vadd.f32 %v655_v55, %v654_v24  ;;  %v663_v3 = vadd.f32 %v662_v56, %v661_v42  ;;  %v751_v39 = vadd.f32 %v750_v20, %v749_v12 }
  0x89   : > { %v731_v19 = vrot.slane %v730_v27, 1  ;;  %v792_v40 = vsel %vm141_vm0, %v780_v16, 0.0  ;;  %v793_v34 = vsel %vm141_vm0, %v784_v25, 0.0  ;;  %v795_v43 = vsel %vm141_vm0, %v781_v21, 0.0  ;;  %v1500_v16 = vld [vmem:[%s1584_s15 + $0x30] sm:$0x33] }
  0x8a   : > { %v670_v44 = vadd.f32 %v669_v58, %v668_v23  ;;  %v677_v45 = vperm.slane %v1799_v61, 3  ;;  %v791_v4 = vadd.f32 %v790_v28, %v789_v18  ;;  %v794_v49 = vadd.f32 %v793_v34, %v792_v40  ;;  %v1498_v58 = vld [vmem:[%s1584_s15 + $0x20] sm:$0x33] }
  0x8b   : > { %v738_v36 = vrot.slane %v737_v2, 1  ;;  %v745_v24 = vrot.slane %v744_v32, 1  ;;  %v796_v42 = vsel %vm141_vm0, %v785_v30, 0.0  ;;  %v798_v47 = vsel %vm141_vm0, %v788_v14, 0.0 }
  0x8c   : > { %v606_v48 = vadd.f32 %v1804_v62, %v1786_v7  ;;  %v682_v23 = vmul.f32 %v674_v41, %v649_v33  ;;  %v752_v54 = vrot.slane %v751_v39, 1  ;;  %v797_v6 = vadd.f32 %v796_v42, %v795_v43  ;;  %v1866_v43 = vld [vmem:[%s2070_s1 + $0x20] ss:$8 sm:$0xf] }
  0x8d   : > { %v683_v50 = vmul.f32 %v675_v46, %v656_v38  ;;  %v684_v51 = vmul.f32 %v676_v0, %v663_v3  ;;  %v732_v52 = vadd.f32 %v731_v19, %v730_v27  ;;  %v757_v53 = vperm.slane %v1492_v35, 0 }
  0x8e   : > { %v685_v15 = vmul.f32 %v677_v45, %v670_v44  ;;  %v799_v55 = vrot.slane %v798_v47, 4  ;;  %v805_v56 = vsel %vm141_vm0, %v791_v4, 0.0  ;;  %v812_v7 = vsel %vm141_vm0, %v794_v49, 0.0 }
  0x8f   : > { %v739_v62 = vadd.f32 %v738_v36, %v737_v2  ;;  %v746_v41 = vadd.f32 %v745_v24, %v744_v32  ;;  %v758_v1 = vperm.slane %v1492_v35, 1  ;;  %v759_v57 = vperm.slane %v1492_v35, 2 }
  0x90   : > { %v686_v46 = vadd.f32 %v682_v23, %v1794_v31  ;;  %v753_v61 = vadd.f32 %v752_v54, %v751_v39  ;;  %v760_v0 = vperm.slane %v1492_v35, 3  ;;  %v819_v59 = vsel %vm141_vm0, %v797_v6, 0.0 }
  0x91   : > { %v687_v9 = vadd.f32 %v683_v50, %v1806_v37  ;;  %v765_v60 = vmul.f32 %v757_v53, %v732_v52  ;;  %v806_v63 = vrot.slane %v805_v56, 4  ;;  %v813_v12 = vrot.slane %v812_v7, 4 }
  0x92   : > { %v688_v8 = vadd.f32 %v684_v51, %v1810_v22  ;;  %v689_v29 = vadd.f32 %v685_v15, %v606_v48  ;;  %v800_v10 = vadd.f32 %v799_v55, %v798_v47  ;;  %v849_v17 = vunpack.c.l.bf16 %v1498_v58 }
  0x93   : > { %v766_v20 = vmul.f32 %v758_v1, %v739_v62  ;;  %v767_v21 = vmul.f32 %v759_v57, %v746_v41  ;;  %v820_v31 = vrot.slane %v819_v59, 4  ;;  %v850_v25 = vunpack.c.h.bf16 %v1498_v58  ;;  %v1503_v41 = vld [vmem:[%s1584_s15 + $0x20] sm:$0x22] }
  0x94   : > { %v768_v26 = vmul.f32 %v760_v0, %v753_v61  ;;  %v851_v27 = vunpack.c.l.bf16 %v1499_v5  ;;  %v853_v2 = vunpack.c.l.bf16 %v1500_v16  ;;  %v854_v30 = vunpack.c.h.bf16 %v1500_v16  ;;  %v1504_v16 = vld [vmem:[%s1584_s15 + $0x28] sm:$0x22] }
  0x95   : > { %v1854_v37 = vadd.f32 %v765_v60, %v686_v46  ;;  %v807_v13 = vadd.f32 %v806_v63, %v805_v56  ;;  %v814_v32 = vadd.f32 %v813_v12, %v812_v7  ;;  %v855_v14 = vunpack.c.l.bf16 %v1501_v11  ;;  %v1505_v60 = vld [vmem:[%s1584_s15 + $0x30] sm:$0x22] }
  0x96   : > { %v801_v18 = vrot.slane %v800_v10, 2  ;;  %v852_v28 = vunpack.c.h.bf16 %v1499_v5  ;;  %v857_v22 = vsel %vm212_vm1, %v849_v17, 0.0  ;;  %v858_v33 = vsel %vm212_vm1, %v853_v2, 0.0  ;;  %v1506_v17 = vld [vmem:[%s1584_s15 + $0x38] sm:$0x22] }
  0x97   : > { %v821_v38 = vadd.f32 %v820_v31, %v819_v59  ;;  %v856_v3 = vunpack.c.h.bf16 %v1501_v11  ;;  %v859_v39 = vadd.f32 %v858_v33, %v857_v22  ;;  %v860_v19 = vsel %vm212_vm1, %v850_v25, 0.0 }
  0x98   : > { %v1859_v40 = vadd.f32 %v766_v20, %v687_v9  ;;  %v1861_v34 = vadd.f32 %v767_v21, %v688_v8  ;;  %v861_v44 = vsel %vm212_vm1, %v854_v30, 0.0  ;;  %v863_v45 = vsel %vm212_vm1, %v851_v27, 0.0 }
  0x99   : > { %v808_v35 = vrot.slane %v807_v13, 2  ;;  %v815_v4 = vrot.slane %v814_v32, 2  ;;  %v862_v49 = vadd.f32 %v861_v44, %v860_v19  ;;  %v864_v36 = vsel %vm212_vm1, %v855_v14, 0.0 }
  0x9a   : > { %v1871_v24 = vadd.f32 %v768_v26, %v689_v29  ;;  %v802_v42 = vadd.f32 %v801_v18, %v800_v10  ;;  %v865_v47 = vadd.f32 %v864_v36, %v863_v45  ;;  %v866_v48 = vsel %vm212_vm1, %v852_v28, 0.0 }
  0x9b   : > { %v822_v23 = vrot.slane %v821_v38, 2  ;;  %v829_v54 = vperm.slane %v1866_v43, 0  ;;  %v867_v6 = vsel %vm212_vm1, %v856_v3, 0.0  ;;  %v873_v50 = vrot.slane %v859_v39, 1 }
  0x9c   : > { %v830_v51 = vperm.slane %v1866_v43, 1  ;;  %v831_v52 = vperm.slane %v1866_v43, 2  ;;  %v868_v53 = vadd.f32 %v867_v6, %v866_v48  ;;  %v874_v15 = vrot.slane %v862_v49, 1 }
  0x9d   : > { %v809_v55 = vadd.f32 %v808_v35, %v807_v13  ;;  %v816_v56 = vadd.f32 %v815_v4, %v814_v32  ;;  %v875_v7 = vrot.slane %v865_v47, 1  ;;  %v881_v62 = vsel %vm141_vm0, %v873_v50, 0.0 }
  0x9e   : > { %v803_v1 = vrot.slane %v802_v42, 1  ;;  %v876_v57 = vrot.slane %v868_v53, 1  ;;  %v882_v58 = vrot.slane %v881_v62, 4  ;;  %v888_v46 = vsel %vm141_vm0, %v874_v15, 0.0 }
  0x9f   : > { %v823_v61 = vadd.f32 %v822_v23, %v821_v38  ;;  %v832_v0 = vperm.slane %v1866_v43, 3  ;;  %v889_v59 = vrot.slane %v888_v46, 4  ;;  %v895_v9 = vsel %vm141_vm0, %v875_v7, 0.0 }
  0xa0   : > { %v883_v63 = vadd.f32 %v882_v58, %v881_v62  ;;  %v896_v12 = vrot.slane %v895_v9, 4  ;;  %v902_v5 = vsel %vm141_vm0, %v876_v57, 0.0  ;;  %v932_v8 = vunpack.c.l.bf16 %v1503_v41 }
  0xa1   : > { %v810_v29 = vrot.slane %v809_v55, 1  ;;  %v890_v10 = vadd.f32 %v889_v59, %v888_v46  ;;  %v903_v11 = vrot.slane %v902_v5, 4  ;;  %v933_v20 = vunpack.c.h.bf16 %v1503_v41 }
  0xa2   : > { %v804_v21 = vadd.f32 %v803_v1, %v802_v42  ;;  %v817_v31 = vrot.slane %v816_v56, 1  ;;  %v897_v25 = vadd.f32 %v896_v12, %v895_v9  ;;  %v936_v26 = vunpack.c.l.bf16 %v1505_v60 }
  0xa3   : > { %v884_v27 = vrot.slane %v883_v63, 2  ;;  %v904_v2 = vadd.f32 %v903_v11, %v902_v5  ;;  %v934_v30 = vunpack.c.l.bf16 %v1504_v16  ;;  %v937_v13 = vunpack.c.h.bf16 %v1505_v60  ;;  %v1508_v11 = vld [vmem:[%s1584_s15 + $0x20] sm:$0x66] }
  0xa4   : > { %v824_v32 = vrot.slane %v823_v61, 1  ;;  %v935_v14 = vunpack.c.h.bf16 %v1504_v16  ;;  %v938_v18 = vunpack.c.l.bf16 %v1506_v17  ;;  %v940_v28 = vsel %vm296_vm2, %v932_v8, 0.0 }
  0xa5   : > { %v891_v22 = vrot.slane %v890_v10, 2  ;;  %v939_v33 = vunpack.c.h.bf16 %v1506_v17  ;;  %v941_v38 = vsel %vm296_vm2, %v936_v26, 0.0  ;;  %v943_v3 = vsel %vm296_vm2, %v933_v20, 0.0 }
  0xa6   : > { %v811_v39 = vadd.f32 %v810_v29, %v809_v55  ;;  %v898_v19 = vrot.slane %v897_v25, 2  ;;  %v942_v44 = vadd.f32 %v941_v38, %v940_v28  ;;  %v944_v45 = vsel %vm296_vm2, %v937_v13, 0.0  ;;  %v1511_v13 = vld [vmem:[%s1584_s15 + $0x38] sm:$0x66] }
  0xa7   : > { %v885_v35 = vadd.f32 %v884_v27, %v883_v63  ;;  %v905_v4 = vrot.slane %v904_v2, 2  ;;  %v945_v49 = vadd.f32 %v944_v45, %v943_v3  ;;  %v946_v36 = vsel %vm296_vm2, %v934_v30, 0.0 }
  0xa8   : > { %v818_v42 = vadd.f32 %v817_v31, %v816_v56  ;;  %v825_v47 = vadd.f32 %v824_v32, %v823_v61  ;;  %v947_v48 = vsel %vm296_vm2, %v938_v18, 0.0  ;;  %v949_v23 = vsel %vm296_vm2, %v935_v14, 0.0  ;;  %v1502_v56 = vld [vmem:[%s2070_s1 + $0x21] ss:$8 sm:$0xf] }
  0xa9   : > { %v837_v6 = vmul.f32 %v829_v54, %v804_v21  ;;  %v892_v50 = vadd.f32 %v891_v22, %v890_v10  ;;  %v948_v53 = vadd.f32 %v947_v48, %v946_v36  ;;  %v950_v15 = vsel %vm296_vm2, %v939_v33, 0.0  ;;  %v1509_v31 = vld [vmem:[%s1584_s15 + $0x28] sm:$0x66] }
  0xaa   : > { %v838_v55 = vmul.f32 %v830_v51, %v811_v39  ;;  %v899_v7 = vadd.f32 %v898_v19, %v897_v25  ;;  %v951_v62 = vadd.f32 %v950_v15, %v949_v23  ;;  %v956_v41 = vrot.slane %v942_v44, 2  ;;  %v1510_v25 = vld [vmem:[%s1584_s15 + $0x30] sm:$0x66] }
  0xab   : > { %v886_v1 = vrot.slane %v885_v35, 1  ;;  %v906_v57 = vadd.f32 %v905_v4, %v904_v2  ;;  %v957_v58 = vrot.slane %v945_v49, 2  ;;  %v958_v46 = vrot.slane %v948_v53, 2 }
  0xac   : > { %v839_v61 = vmul.f32 %v831_v52, %v818_v42  ;;  %v840_v54 = vmul.f32 %v832_v0, %v825_v47  ;;  %v959_v59 = vrot.slane %v951_v62, 2  ;;  %v964_v9 = vsel %vm141_vm0, %v956_v41, 0.0 }
  0xad   : > { %v841_v51 = vadd.f32 %v837_v6, %v1854_v37  ;;  %v893_v60 = vrot.slane %v892_v50, 1  ;;  %v965_v63 = vrot.slane %v964_v9, 4  ;;  %v971_v12 = vsel %vm141_vm0, %v957_v58, 0.0 }
  0xae   : > { %v900_v5 = vrot.slane %v899_v7, 1  ;;  %v912_v16 = vperm.slane %v1502_v56, 0  ;;  %v978_v8 = vsel %vm141_vm0, %v958_v46, 0.0  ;;  %v985_v43 = vsel %vm141_vm0, %v959_v59, 0.0 }
  0xaf   : > { %v887_v52 = vadd.f32 %v886_v1, %v885_v35  ;;  %v907_v0 = vrot.slane %v906_v57, 1  ;;  %v966_v29 = vadd.f32 %v965_v63, %v964_v9  ;;  %v972_v10 = vrot.slane %v971_v12, 4 }
  0xb0   : > { %v842_v37 = vadd.f32 %v838_v55, %v1859_v40  ;;  %v1908_v17 = vadd.f32 %v839_v61, %v1861_v34  ;;  %v1911_v20 = vadd.f32 %v840_v54, %v1871_v24  ;;  %v913_v21 = vperm.slane %v1502_v56, 1 }
  0xb1   : > { %v894_v26 = vadd.f32 %v893_v60, %v892_v50  ;;  %v914_v27 = vperm.slane %v1502_v56, 2  ;;  %v979_v2 = vrot.slane %v978_v8, 4  ;;  %v986_v30 = vrot.slane %v985_v43, 4  ;;  %v1926_v50 = vld [vmem:[%s2070_s1 + $0x22] ss:$8 sm:$0xf] }
  0xb2   : > { %v901_v32 = vadd.f32 %v900_v5, %v899_v7  ;;  %v915_v14 = vperm.slane %v1502_v56, 3  ;;  %v1015_v18 = vunpack.c.l.bf16 %v1508_v11  ;;  %v1016_v28 = vunpack.c.h.bf16 %v1508_v11 }
  0xb3   : > { %v908_v22 = vadd.f32 %v907_v0, %v906_v57  ;;  %v920_v40 = vmul.f32 %v912_v16, %v887_v52  ;;  %v967_v33 = vrot.slane %v966_v29, 2  ;;  %v973_v34 = vadd.f32 %v972_v10, %v971_v12  ;;  %v1513_v0 = vld [vmem:[%s1584_s15 + $0x30] sm:$0x11] }
  0xb4   : > { %v1017_v38 = vunpack.c.l.bf16 %v1509_v31  ;;  %v1019_v3 = vunpack.c.l.bf16 %v1510_v25  ;;  %v1020_v24 = vunpack.c.h.bf16 %v1510_v25  ;;  %v1021_v39 = vunpack.c.l.bf16 %v1511_v13 }
  0xb5   : > { %v921_v19 = vmul.f32 %v913_v21, %v894_v26  ;;  %v980_v44 = vadd.f32 %v979_v2, %v978_v8  ;;  %v987_v45 = vadd.f32 %v986_v30, %v985_v43  ;;  %v1018_v35 = vunpack.c.h.bf16 %v1509_v31 }
  0xb6   : > { %v1022_v4 = vunpack.c.h.bf16 %v1511_v13  ;;  %v1023_v49 = vsel %vm380_vm3, %v1015_v18, 0.0  ;;  %v1024_v36 = vsel %vm380_vm3, %v1019_v3, 0.0  ;;  %v1026_v42 = vsel %vm380_vm3, %v1016_v28, 0.0 }
  0xb7   : > { %v1919_v47 = vmul.f32 %v914_v27, %v901_v32  ;;  %v1921_v48 = vadd.f32 %v920_v40, %v841_v51  ;;  %v968_v23 = vadd.f32 %v967_v33, %v966_v29  ;;  %v974_v6 = vrot.slane %v973_v34, 2  ;;  %v1515_v27 = vld [vmem:[%s1584_s15 + $0x40] sm:$0x11]  ;;  %v1514_v32 = vld [vmem:[%s1584_s15 + $0x38] sm:$0x11] }
  0xb8   : > { %v1025_v53 = vadd.f32 %v1024_v36, %v1023_v49  ;;  %v1027_v15 = vsel %vm380_vm3, %v1020_v24, 0.0  ;;  %v1029_v55 = vsel %vm380_vm3, %v1017_v38, 0.0  ;;  %v1030_v7 = vsel %vm380_vm3, %v1021_v39, 0.0  ;;  %v1516_v33 = vld [vmem:[%s1584_s15 + $0x48] sm:$0x11] }
  0xb9   : > { %v1931_v62 = vmul.f32 %v915_v14, %v908_v22  ;;  %v1933_v41 = vadd.f32 %v921_v19, %v842_v37  ;;  %v981_v1 = vrot.slane %v980_v44, 2  ;;  %v1028_v57 = vadd.f32 %v1027_v15, %v1026_v42 }
  0xba   : > { %v988_v56 = vrot.slane %v987_v45, 2  ;;  %v1031_v58 = vadd.f32 %v1030_v7, %v1029_v55  ;;  %v1032_v46 = vsel %vm380_vm3, %v1018_v35, 0.0  ;;  %v1033_v61 = vsel %vm380_vm3, %v1022_v4, 0.0 }
  0xbb   : > { %v975_v54 = vadd.f32 %v974_v6, %v973_v34  ;;  %v995_v59 = vperm.slane %v1926_v50, 0  ;;  %v996_v9 = vperm.slane %v1926_v50, 1  ;;  %v1034_v51 = vadd.f32 %v1033_v61, %v1032_v46 }
  0xbc   : > { %v969_v60 = vrot.slane %v968_v23, 1  ;;  %v1039_v63 = vrot.slane %v1025_v53, 3  ;;  %v1040_v12 = vrot.slane %v1028_v57, 3  ;;  %v1041_v5 = vrot.slane %v1031_v58, 3 }
  0xbd   : > { %v982_v16 = vadd.f32 %v981_v1, %v980_v44  ;;  %v997_v8 = vperm.slane %v1926_v50, 2  ;;  %v998_v43 = vperm.slane %v1926_v50, 3  ;;  %v1042_v52 = vrot.slane %v1034_v51, 3 }
  0xbe   : > { %v989_v29 = vadd.f32 %v988_v56, %v987_v45  ;;  %v1047_v10 = vsel %vm141_vm0, %v1039_v63, 0.0  ;;  %v1054_v11 = vsel %vm141_vm0, %v1040_v12, 0.0  ;;  %v1061_v37 = vsel %vm141_vm0, %v1041_v5, 0.0 }
  0xbf   : > { %v1048_v21 = vrot.slane %v1047_v10, 4  ;;  %v1055_v31 = vrot.slane %v1054_v11, 4  ;;  %v1062_v25 = vrot.slane %v1061_v37, 4  ;;  %v1068_v26 = vsel %vm141_vm0, %v1042_v52, 0.0 }
  0xc0   : > { %v970_v2 = vadd.f32 %v969_v60, %v968_v23  ;;  %v976_v30 = vrot.slane %v975_v54, 1  ;;  %v1069_v13 = vrot.slane %v1068_v26, 4  ;;  %v1099_v14 = vunpack.c.l.bf16 %v1513_v0 }
  0xc1   : > { %v983_v18 = vrot.slane %v982_v16, 1  ;;  %v1049_v28 = vadd.f32 %v1048_v21, %v1047_v10  ;;  %v1056_v22 = vadd.f32 %v1055_v31, %v1054_v11  ;;  %v1063_v40 = vadd.f32 %v1062_v25, %v1061_v37 }
  0xc2   : > { %v990_v34 = vrot.slane %v989_v29, 1  ;;  %v1070_v38 = vadd.f32 %v1069_v13, %v1068_v26  ;;  %v1100_v3 = vunpack.c.h.bf16 %v1513_v0  ;;  %v1103_v24 = vunpack.c.l.bf16 %v1515_v27 }
  0xc3   : > { %v1050_v39 = vrot.slane %v1049_v28, 2  ;;  %v1057_v19 = vrot.slane %v1056_v22, 2  ;;  %v1101_v44 = vunpack.c.l.bf16 %v1514_v32  ;;  %v1104_v45 = vunpack.c.h.bf16 %v1515_v27 }
  0xc4   : > { %v1064_v35 = vrot.slane %v1063_v40, 2  ;;  %v1102_v4 = vunpack.c.h.bf16 %v1514_v32  ;;  %v1105_v49 = vunpack.c.l.bf16 %v1516_v33  ;;  %v1107_v36 = vsel %vm141_vm0, %v1099_v14, 0.0 }
  0xc5   : > { %v977_v42 = vadd.f32 %v976_v30, %v975_v54  ;;  %v1071_v23 = vrot.slane %v1070_v38, 2  ;;  %v1106_v6 = vunpack.c.h.bf16 %v1516_v33  ;;  %v1108_v53 = vsel %vm141_vm0, %v1103_v24, 0.0 }
  0xc6   : > { %v1051_v15 = vadd.f32 %v1050_v39, %v1049_v28  ;;  %v1109_v55 = vadd.f32 %v1108_v53, %v1107_v36  ;;  %v1110_v7 = vsel %vm141_vm0, %v1100_v3, 0.0  ;;  %v1111_v1 = vsel %vm141_vm0, %v1104_v45, 0.0 }
  0xc7   : > { %v984_v57 = vadd.f32 %v983_v18, %v982_v16  ;;  %v991_v56 = vadd.f32 %v990_v34, %v989_v29  ;;  %v1058_v58 = vadd.f32 %v1057_v19, %v1056_v22  ;;  %v1112_v46 = vadd.f32 %v1111_v1, %v1110_v7  ;;  %v1518_v18 = vld [vmem:[%s1584_s15 + $0x30] sm:$0x33]  ;;  %v1519_v34 = vld [vmem:[%s1584_s15 + $0x38] sm:$0x33] }
  0xc8   : > { %v1065_v61 = vadd.f32 %v1064_v35, %v1063_v40  ;;  %v1113_v51 = vsel %vm141_vm0, %v1101_v44, 0.0  ;;  %v1114_v60 = vsel %vm141_vm0, %v1105_v49, 0.0  ;;  %v1116_v54 = vsel %vm141_vm0, %v1102_v4, 0.0 }
  0xc9   : > { %v1003_v63 = vmul.f32 %v995_v59, %v970_v2  ;;  %v1004_v12 = vmul.f32 %v996_v9, %v977_v42  ;;  %v1072_v5 = vadd.f32 %v1071_v23, %v1070_v38  ;;  %v1115_v52 = vadd.f32 %v1114_v60, %v1113_v51  ;;  %v1512_v59 = vld [vmem:[%s2070_s1 + $0x23] ss:$8 sm:$0xf] }
  0xca   : > { %v1052_v0 = vrot.slane %v1051_v15, 1  ;;  %v1117_v10 = vsel %vm141_vm0, %v1106_v6, 0.0  ;;  %v1119_v11 = vsel %vm141_vm0, %v1109_v55, 0.0  ;;  %v1126_v16 = vsel %vm141_vm0, %v1112_v46, 0.0 }
  0xcb   : > { %v926_v29 = vadd.f32 %v1919_v47, %v1908_v17  ;;  %v1005_v37 = vmul.f32 %v997_v8, %v984_v57  ;;  %v1059_v21 = vrot.slane %v1058_v58, 1  ;;  %v1118_v9 = vadd.f32 %v1117_v10, %v1116_v54 }
  0xcc   : > { %v1066_v31 = vrot.slane %v1065_v61, 1  ;;  %v1120_v25 = vrot.slane %v1119_v11, 4  ;;  %v1127_v26 = vrot.slane %v1126_v16, 4  ;;  %v1133_v27 = vsel %vm141_vm0, %v1115_v52, 0.0 }
  0xcd   : > { %v927_v2 = vadd.f32 %v1931_v62, %v1911_v20  ;;  %v1006_v30 = vmul.f32 %v998_v43, %v991_v56  ;;  %v1007_v17 = vadd.f32 %v1003_v63, %v1921_v48  ;;  %v1134_v47 = vrot.slane %v1133_v27, 4  ;;  %v1520_v48 = vld [vmem:[%s1584_s15 + $0x40] sm:$0x33] }
  0xce   : > { %v1008_v8 = vadd.f32 %v1004_v12, %v1933_v41  ;;  %v1053_v13 = vadd.f32 %v1052_v0, %v1051_v15  ;;  %v1073_v32 = vrot.slane %v1072_v5, 1  ;;  %v1078_v14 = vperm.slane %v1512_v59, 0  ;;  %v1521_v41 = vld [vmem:[%s1584_s15 + $0x48] sm:$0x33] }
  0xcf   : > { %v1009_v28 = vadd.f32 %v1005_v37, %v926_v29  ;;  %v1060_v22 = vadd.f32 %v1059_v21, %v1058_v58  ;;  %v1079_v40 = vperm.slane %v1512_v59, 1  ;;  %v1140_v20 = vsel %vm141_vm0, %v1118_v9, 0.0  ;;  %v1986_v52 = vld [vmem:[%s2070_s1 + $0x24] ss:$8 sm:$0xf] }
  0xd0   : > { %v1067_v62 = vadd.f32 %v1066_v31, %v1065_v61  ;;  %v1080_v50 = vperm.slane %v1512_v59, 2  ;;  %v1121_v43 = vadd.f32 %v1120_v25, %v1119_v11  ;;  %v1128_v33 = vadd.f32 %v1127_v26, %v1126_v16 }
  0xd1   : > { %v1010_v38 = vadd.f32 %v1006_v30, %v927_v2  ;;  %v1081_v3 = vperm.slane %v1512_v59, 3  ;;  %v1135_v24 = vadd.f32 %v1134_v47, %v1133_v27  ;;  %v1170_v39 = vunpack.c.l.bf16 %v1518_v18 }
  0xd2   : > { %v1074_v19 = vadd.f32 %v1073_v32, %v1072_v5  ;;  %v1086_v44 = vmul.f32 %v1078_v14, %v1053_v13  ;;  %v1141_v45 = vrot.slane %v1140_v20, 4  ;;  %v1171_v35 = vunpack.c.h.bf16 %v1518_v18  ;;  %v1523_v13 = vld [vmem:[%s1584_s15 + $0x30] sm:$0x22] }
  0xd3   : > { %v1087_v4 = vmul.f32 %v1079_v40, %v1060_v22  ;;  %v1172_v49 = vunpack.c.l.bf16 %v1519_v34  ;;  %v1174_v36 = vunpack.c.l.bf16 %v1520_v48  ;;  %v1175_v42 = vunpack.c.h.bf16 %v1520_v48  ;;  %v1524_v48 = vld [vmem:[%s1584_s15 + $0x38] sm:$0x22] }
  0xd4   : > { %v1088_v23 = vmul.f32 %v1080_v50, %v1067_v62  ;;  %v1122_v6 = vrot.slane %v1121_v43, 2  ;;  %v1129_v53 = vrot.slane %v1128_v33, 2  ;;  %v1176_v15 = vunpack.c.l.bf16 %v1521_v41  ;;  %v1525_v50 = vld [vmem:[%s1584_s15 + $0x40] sm:$0x22] }
  0xd5   : > { %v1136_v55 = vrot.slane %v1135_v24, 2  ;;  %v1173_v7 = vunpack.c.h.bf16 %v1519_v34  ;;  %v1178_v1 = vsel %vm212_vm1, %v1170_v39, 0.0  ;;  %v1179_v57 = vsel %vm212_vm1, %v1174_v36, 0.0  ;;  %v1526_v39 = vld [vmem:[%s1584_s15 + $0x48] sm:$0x22] }
  0xd6   : > { %v1142_v56 = vadd.f32 %v1141_v45, %v1140_v20  ;;  %v1177_v58 = vunpack.c.h.bf16 %v1521_v41  ;;  %v1180_v46 = vadd.f32 %v1179_v57, %v1178_v1  ;;  %v1181_v61 = vsel %vm212_vm1, %v1171_v35, 0.0 }
  0xd7   : > { %v1089_v51 = vmul.f32 %v1081_v3, %v1074_v19  ;;  %v1979_v60 = vadd.f32 %v1086_v44, %v1007_v17  ;;  %v1182_v54 = vsel %vm212_vm1, %v1175_v42, 0.0  ;;  %v1184_v63 = vsel %vm212_vm1, %v1172_v49, 0.0 }
  0xd8   : > { %v1123_v12 = vadd.f32 %v1122_v6, %v1121_v43  ;;  %v1130_v5 = vadd.f32 %v1129_v53, %v1128_v33  ;;  %v1183_v0 = vadd.f32 %v1182_v54, %v1181_v61  ;;  %v1185_v10 = vsel %vm212_vm1, %v1176_v15, 0.0 }
  0xd9   : > { %v1989_v11 = vadd.f32 %v1087_v4, %v1008_v8  ;;  %v1137_v16 = vadd.f32 %v1136_v55, %v1135_v24  ;;  %v1186_v29 = vadd.f32 %v1185_v10, %v1184_v63  ;;  %v1187_v37 = vsel %vm212_vm1, %v1173_v7, 0.0 }
  0xda   : > { %v1992_v21 = vadd.f32 %v1088_v23, %v1009_v28  ;;  %v1143_v59 = vrot.slane %v1142_v56, 2  ;;  %v1188_v9 = vsel %vm212_vm1, %v1177_v58, 0.0  ;;  %v1194_v31 = vrot.slane %v1180_v46, 1 }
  0xdb   : > { %v1995_v25 = vadd.f32 %v1089_v51, %v1010_v38  ;;  %v1150_v26 = vperm.slane %v1986_v52, 0  ;;  %v1189_v27 = vadd.f32 %v1188_v9, %v1187_v37  ;;  %v1195_v2 = vrot.slane %v1183_v0, 1 }
  0xdc   : > { %v1124_v30 = vrot.slane %v1123_v12, 1  ;;  %v1131_v17 = vrot.slane %v1130_v5, 1  ;;  %v1196_v47 = vrot.slane %v1186_v29, 1  ;;  %v1202_v8 = vsel %vm141_vm0, %v1194_v31, 0.0 }
  0xdd   : > { %v1138_v32 = vrot.slane %v1137_v16, 1  ;;  %v1197_v14 = vrot.slane %v1189_v27, 1  ;;  %v1203_v18 = vrot.slane %v1202_v8, 4  ;;  %v1209_v28 = vsel %vm141_vm0, %v1195_v2, 0.0 }
  0xde   : > { %v1144_v22 = vadd.f32 %v1143_v59, %v1142_v56  ;;  %v1151_v40 = vperm.slane %v1986_v52, 1  ;;  %v1210_v20 = vrot.slane %v1209_v28, 4  ;;  %v1216_v62 = vsel %vm141_vm0, %v1196_v47, 0.0 }
  0xdf   : > { %v1152_v43 = vperm.slane %v1986_v52, 2  ;;  %v1204_v33 = vadd.f32 %v1203_v18, %v1202_v8  ;;  %v1223_v34 = vsel %vm141_vm0, %v1197_v14, 0.0  ;;  %v1253_v38 = vunpack.c.l.bf16 %v1523_v13 }
  0xe0   : > { %v1125_v3 = vadd.f32 %v1124_v30, %v1123_v12  ;;  %v1153_v24 = vperm.slane %v1986_v52, 3  ;;  %v1217_v41 = vrot.slane %v1216_v62, 4  ;;  %v1254_v19 = vunpack.c.h.bf16 %v1523_v13 }
  0xe1   : > { %v1132_v44 = vadd.f32 %v1131_v17, %v1130_v5  ;;  %v1139_v45 = vadd.f32 %v1138_v32, %v1137_v16  ;;  %v1211_v35 = vadd.f32 %v1210_v20, %v1209_v28  ;;  %v1257_v4 = vunpack.c.l.bf16 %v1525_v50 }
  0xe2   : > { %v1145_v49 = vrot.slane %v1144_v22, 1  ;;  %v1224_v36 = vrot.slane %v1223_v34, 4  ;;  %v1255_v42 = vunpack.c.l.bf16 %v1524_v48  ;;  %v1258_v23 = vunpack.c.h.bf16 %v1525_v50 }
  0xe3   : > { %v1205_v6 = vrot.slane %v1204_v33, 2  ;;  %v1256_v53 = vunpack.c.h.bf16 %v1524_v48  ;;  %v1259_v15 = vunpack.c.l.bf16 %v1526_v39  ;;  %v1261_v55 = vsel %vm296_vm2, %v1253_v38, 0.0  ;;  %v1528_v38 = vld [vmem:[%s1584_s15 + $0x30] sm:$0x66] }
  0xe4   : > { %v1218_v7 = vadd.f32 %v1217_v41, %v1216_v62  ;;  %v1260_v1 = vunpack.c.h.bf16 %v1526_v39  ;;  %v1262_v57 = vsel %vm296_vm2, %v1257_v4, 0.0  ;;  %v1264_v56 = vsel %vm296_vm2, %v1254_v19, 0.0  ;;  %v1530_v19 = vld [vmem:[%s1584_s15 + $0x40] sm:$0x66] }
  0xe5   : > { %v1158_v58 = vmul.f32 %v1150_v26, %v1125_v3  ;;  %v1212_v46 = vrot.slane %v1211_v35, 2  ;;  %v1263_v61 = vadd.f32 %v1262_v57, %v1261_v55  ;;  %v1265_v51 = vsel %vm296_vm2, %v1258_v23, 0.0 }
  0xe6   : > { %v1159_v54 = vmul.f32 %v1151_v40, %v1132_v44  ;;  %v1225_v63 = vadd.f32 %v1224_v36, %v1223_v34  ;;  %v1266_v12 = vadd.f32 %v1265_v51, %v1264_v56  ;;  %v1267_v5 = vsel %vm296_vm2, %v1255_v42, 0.0  ;;  %v1531_v36 = vld [vmem:[%s1584_s15 + $0x48] sm:$0x66] }
  0xe7   : > { %v1146_v52 = vadd.f32 %v1145_v49, %v1144_v22  ;;  %v1160_v0 = vmul.f32 %v1152_v43, %v1139_v45  ;;  %v1268_v10 = vsel %vm296_vm2, %v1259_v15, 0.0  ;;  %v1270_v16 = vsel %vm296_vm2, %v1256_v53, 0.0  ;;  %v1522_v22 = vld [vmem:[%s2070_s1 + $0x25] ss:$8 sm:$0xf] }
  0xe8   : > { %v1206_v29 = vadd.f32 %v1205_v6, %v1204_v33  ;;  %v1219_v37 = vrot.slane %v1218_v7, 2  ;;  %v1269_v59 = vadd.f32 %v1268_v10, %v1267_v5  ;;  %v1271_v9 = vsel %vm296_vm2, %v1260_v1, 0.0  ;;  %v1529_v49 = vld [vmem:[%s1584_s15 + $0x38] sm:$0x66] }
  0xe9   : > { %v2018_v31 = vadd.f32 %v1158_v58, %v1979_v60  ;;  %v1213_v26 = vadd.f32 %v1212_v46, %v1211_v35  ;;  %v1272_v27 = vadd.f32 %v1271_v9, %v1270_v16  ;;  %v1277_v2 = vrot.slane %v1263_v61, 2 }
  0xea   : > { %v2021_v30 = vadd.f32 %v1159_v54, %v1989_v11  ;;  %v1226_v17 = vrot.slane %v1225_v63, 2  ;;  %v1278_v47 = vrot.slane %v1266_v12, 2  ;;  %v1279_v8 = vrot.slane %v1269_v59, 2 }
  0xeb   : > { %v1161_v13 = vmul.f32 %v1153_v24, %v1146_v52  ;;  %v2024_v32 = vadd.f32 %v1160_v0, %v1992_v21  ;;  %v1280_v14 = vrot.slane %v1272_v27, 2  ;;  %v1285_v18 = vsel %vm141_vm0, %v1277_v2, 0.0 }
  0xec   : > { %v1207_v28 = vrot.slane %v1206_v29, 1  ;;  %v1220_v60 = vadd.f32 %v1219_v37, %v1218_v7  ;;  %v1286_v11 = vrot.slane %v1285_v18, 4  ;;  %v1292_v40 = vsel %vm141_vm0, %v1278_v47, 0.0 }
  0xed   : > { %v1214_v20 = vrot.slane %v1213_v26, 1  ;;  %v1293_v62 = vrot.slane %v1292_v40, 4  ;;  %v1299_v50 = vsel %vm141_vm0, %v1279_v8, 0.0  ;;  %v1306_v21 = vsel %vm141_vm0, %v1280_v14, 0.0 }
  0xee   : > { %v1227_v43 = vadd.f32 %v1226_v17, %v1225_v63  ;;  %v1287_v33 = vadd.f32 %v1286_v11, %v1285_v18  ;;  %v1300_v34 = vrot.slane %v1299_v50, 4  ;;  %v1307_v48 = vrot.slane %v1306_v21, 4 }
  0xef   : > { %v2035_v3 = vadd.f32 %v1161_v13, %v1995_v25  ;;  %v1233_v24 = vperm.slane %v1522_v22, 0  ;;  %v1234_v41 = vperm.slane %v1522_v22, 1  ;;  %v1294_v39 = vadd.f32 %v1293_v62, %v1292_v40  ;;  %v1527_v13 = vld [vmem:[%s2070_s1 + $0x26] ss:$8 sm:$0xf] }
  0xf0   : > { %v1221_v44 = vrot.slane %v1220_v60, 1  ;;  %v1235_v45 = vperm.slane %v1522_v22, 2  ;;  %v1301_v35 = vadd.f32 %v1300_v34, %v1299_v50  ;;  %v1308_v4 = vadd.f32 %v1307_v48, %v1306_v21 }
  0xf1   : > { %v1208_v42 = vadd.f32 %v1207_v28, %v1206_v29  ;;  %v1236_v23 = vperm.slane %v1522_v22, 3  ;;  %v1336_v6 = vunpack.c.l.bf16 %v1528_v38  ;;  %v1337_v53 = vunpack.c.h.bf16 %v1528_v38 }
  0xf2   : > { %v1215_v15 = vadd.f32 %v1214_v20, %v1213_v26  ;;  %v1228_v55 = vrot.slane %v1227_v43, 1  ;;  %v1288_v7 = vrot.slane %v1287_v33, 2  ;;  %v1295_v1 = vrot.slane %v1294_v39, 2 }
  0xf3   : > { %v1338_v25 = vunpack.c.l.bf16 %v1529_v49  ;;  %v1340_v57 = vunpack.c.l.bf16 %v1530_v19  ;;  %v1341_v56 = vunpack.c.h.bf16 %v1530_v19  ;;  %v1342_v58 = vunpack.c.l.bf16 %v1531_v36 }
  0xf4   : > { %v1222_v46 = vadd.f32 %v1221_v44, %v1220_v60  ;;  %v1302_v61 = vrot.slane %v1301_v35, 2  ;;  %v1309_v51 = vrot.slane %v1308_v4, 2  ;;  %v1339_v54 = vunpack.c.h.bf16 %v1529_v49 }
  0xf5   : > { %v1343_v63 = vunpack.c.h.bf16 %v1531_v36  ;;  %v1344_v12 = vsel %vm380_vm3, %v1336_v6, 0.0  ;;  %v1345_v5 = vsel %vm380_vm3, %v1340_v57, 0.0  ;;  %v1347_v52 = vsel %vm380_vm3, %v1337_v53, 0.0 }
  0xf6   : > { %v1229_v0 = vadd.f32 %v1228_v55, %v1227_v43  ;;  %v1241_v10 = vmul.f32 %v1233_v24, %v1208_v42  ;;  %v1289_v16 = vadd.f32 %v1288_v7, %v1287_v33  ;;  %v1296_v29 = vadd.f32 %v1295_v1, %v1294_v39 }
  0xf7   : > { %v1346_v37 = vadd.f32 %v1345_v5, %v1344_v12  ;;  %v1348_v59 = vsel %vm380_vm3, %v1341_v56, 0.0  ;;  %v1350_v9 = vsel %vm380_vm3, %v1338_v25, 0.0  ;;  %v1351_v26 = vsel %vm380_vm3, %v1342_v58, 0.0 }
  0xf8   : > { %v1242_v27 = vmul.f32 %v1234_v41, %v1215_v15  ;;  %v1243_v2 = vmul.f32 %v1235_v45, %v1222_v46  ;;  %v1303_v17 = vadd.f32 %v1302_v61, %v1301_v35  ;;  %v1349_v47 = vadd.f32 %v1348_v59, %v1347_v52  ;;  %v1532_v46 = vld [vmem:[%s2070_s1 + $0x27] ss:$8 sm:$0xf] }
  0xf9   : > { %v1310_v8 = vadd.f32 %v1309_v51, %v1308_v4  ;;  %v1352_v14 = vadd.f32 %v1351_v26, %v1350_v9  ;;  %v1353_v18 = vsel %vm380_vm3, %v1339_v54, 0.0  ;;  %v1354_v28 = vsel %vm380_vm3, %v1343_v63, 0.0 }
  0xfa   : > { %v1244_v60 = vmul.f32 %v1236_v23, %v1229_v0  ;;  %v1245_v22 = vadd.f32 %v1241_v10, %v2018_v31  ;;  %v1290_v11 = vrot.slane %v1289_v16, 1  ;;  %v1355_v40 = vadd.f32 %v1354_v28, %v1353_v18 }
  0xfb   : > { %v1297_v20 = vrot.slane %v1296_v29, 1  ;;  %v1360_v62 = vrot.slane %v1346_v37, 3  ;;  %v1361_v50 = vrot.slane %v1349_v47, 3  ;;  %v1362_v21 = vrot.slane %v1352_v14, 3 }
  0xfc   : > { %v1304_v43 = vrot.slane %v1303_v17, 1  ;;  %v1316_v33 = vperm.slane %v1527_v13, 0  ;;  %v1317_v34 = vperm.slane %v1527_v13, 1  ;;  %v1363_v48 = vrot.slane %v1355_v40, 3 }
  0xfd   : > { %v1311_v38 = vrot.slane %v1310_v8, 1  ;;  %v1368_v24 = vsel %vm141_vm0, %v1360_v62, 0.0  ;;  %v1375_v41 = vsel %vm141_vm0, %v1361_v50, 0.0  ;;  %v1382_v39 = vsel %vm141_vm0, %v1362_v21, 0.0 }
  0xfe   : > { %v1369_v19 = vrot.slane %v1368_v24, 4  ;;  %v1376_v44 = vrot.slane %v1375_v41, 4  ;;  %v1383_v31 = vrot.slane %v1382_v39, 4  ;;  %v1389_v45 = vsel %vm141_vm0, %v1363_v48, 0.0 }
  0xff   : > { %v1291_v35 = vadd.f32 %v1290_v11, %v1289_v16  ;;  %v1298_v4 = vadd.f32 %v1297_v20, %v1296_v29  ;;  %v1318_v49 = vperm.slane %v1527_v13, 2  ;;  %v1390_v36 = vrot.slane %v1389_v45, 4 }
 0x100   : > { %v1305_v42 = vadd.f32 %v1304_v43, %v1303_v17  ;;  %v1370_v23 = vadd.f32 %v1369_v19, %v1368_v24  ;;  %v1377_v6 = vadd.f32 %v1376_v44, %v1375_v41  ;;  %v1384_v53 = vadd.f32 %v1383_v31, %v1382_v39 }
 0x101   : > { %v1246_v15 = vadd.f32 %v1242_v27, %v2021_v30  ;;  %v1312_v55 = vadd.f32 %v1311_v38, %v1310_v8  ;;  %v1319_v7 = vperm.slane %v1527_v13, 3  ;;  %v1391_v1 = vadd.f32 %v1390_v36, %v1389_v45 }
 0x102   : > { %v1247_v25 = vadd.f32 %v1243_v2, %v2024_v32  ;;  %v1371_v57 = vrot.slane %v1370_v23, 2  ;;  %v1378_v56 = vrot.slane %v1377_v6, 2  ;;  %v1385_v58 = vrot.slane %v1384_v53, 2 }
 0x103   : > { %v1248_v61 = vadd.f32 %v1244_v60, %v2035_v3  ;;  %v1324_v51 = vmul.f32 %v1316_v33, %v1291_v35  ;;  %v1325_v54 = vmul.f32 %v1317_v34, %v1298_v4  ;;  %v1392_v63 = vrot.slane %v1391_v1, 2 }
 0x104   : > { %v1326_v12 = vmul.f32 %v1318_v49, %v1305_v42  ;;  %v1372_v5 = vadd.f32 %v1371_v57, %v1370_v23  ;;  %v1379_v30 = vadd.f32 %v1378_v56, %v1377_v6  ;;  %v1386_v52 = vadd.f32 %v1385_v58, %v1384_v53 }
 0x105   : > { %v1327_v0 = vmul.f32 %v1319_v7, %v1312_v55  ;;  %v1393_v10 = vadd.f32 %v1392_v63, %v1391_v1  ;;  %v1399_v16 = vperm.slane %v1532_v46, 0  ;;  %v1400_v32 = vperm.slane %v1532_v46, 1 }
 0x106   : > { %v1373_v29 = vrot.slane %v1372_v5, 1  ;;  %v1380_v37 = vrot.slane %v1379_v30, 1  ;;  %v1387_v59 = vrot.slane %v1386_v52, 1  ;;  %v1401_v9 = vperm.slane %v1532_v46, 2 }
 0x107   : > { %v1328_v26 = vadd.f32 %v1324_v51, %v1245_v22  ;;  %v1329_v27 = vadd.f32 %v1325_v54, %v1246_v15  ;;  %v1394_v2 = vrot.slane %v1393_v10, 1  ;;  %v1402_v17 = vperm.slane %v1532_v46, 3 }
 0x108   : > { %v1330_v3 = vadd.f32 %v1326_v12, %v1247_v25  ;;  %v1374_v47 = vadd.f32 %v1373_v29, %v1372_v5  ;;  %v1381_v8 = vadd.f32 %v1380_v37, %v1379_v30  ;;  %v1388_v13 = vadd.f32 %v1387_v59, %v1386_v52 }
 0x109   : > { %v1331_v14 = vadd.f32 %v1327_v0, %v1248_v61  ;;  %v1395_v18 = vadd.f32 %v1394_v2, %v1393_v10 }
 0x10a   : > { %v1407_v28 = vmul.f32 %v1399_v16, %v1374_v47  ;;  %v1408_v60 = vmul.f32 %v1400_v32, %v1381_v8  ;;  %v1409_v11 = vmul.f32 %v1401_v9, %v1388_v13 }
 0x10b   : > { %v1410_v40 = vmul.f32 %v1402_v17, %v1395_v18 }
 0x10c   : > { %v1411_v20 = vadd.f32 %v1407_v28, %v1328_v26  ;;  %v1412_v62 = vadd.f32 %v1408_v60, %v1329_v27  ;;  %v1413_v50 = vadd.f32 %v1409_v11, %v1330_v3 }
 0x10d   : > { %v1414_v21 = vadd.f32 %v1410_v40, %v1331_v14 }
 0x10e   : > { %v1416_v43 = vsel %vm1415_vm4, %v1411_v20, 0.0  ;;  %v1417_v22 = vsel %vm1415_vm4, %v1412_v62, 0.0  ;;  %v1419_v33 = vsel %vm1415_vm4, %v1413_v50, 0.0 }
 0x10f   : > { %v1418_v34 = vadd.f32 %v1417_v22, %v1416_v43  ;;  %v1421_v48 = vsel %vm1415_vm4, %v1414_v21, 0.0 }
 0x111   : > { %v1420_v38 = vadd.f32 %v1419_v33, %v1418_v34 }
 0x113   : > { %v1422_v24 = vadd.f32 %v1421_v48, %v1420_v38 }
 0x115   : > { %1423 = vadd.xlane.f32.xlu0 %v1422_v24 }
 0x188   : > { %v1424_v41 = vpop.xlane.xlu0 %1423 }
 0x189   : > { %v1425_v39 = vrot.slane %v1424_v41, 4 }
 0x18b   : > { %v1426_v19 = vadd.f32 %v1425_v39, %v1424_v41 }
 0x18d   : > { %v1427_v44 = vrot.slane %v1426_v19, 2 }
 0x18f   : > { %v1428_v31 = vadd.f32 %v1427_v44, %v1426_v19 }
 0x191   : > { %v1429_v45 = vrot.slane %v1428_v31, 1 }
 0x193   : > { %v1430_v35 = vadd.f32 %v1429_v45, %v1428_v31 }
 0x195   : > { %1536 = vpush %v1430_v35 }
 0x1c6   : > { %s1537_s22 = spop %1536 }
 0x1c7   : > { %s1432_s23 = smul.f32 0.25, %s1537_s22 }
 0x1c9   : > { %v1433_v4 = vstv %s1432_s23 }
 0x1ca   : > { %1435 = vst [vmem:[%s1434_s26] sm:$0x1] %v1433_v4 }
 0x1cb PF: > { %s12_s9 = sadd.s32 1, %s1552_s9  }
 0x1cc   : > { %p9_p4 = scmp.ge.s32.totalorder %s12_s9, 4  }
 0x1ce   :  { %11 = sbr.rel (!%p9_p4) target bundleno = 1 (0x1), region = 73 }

</bundles_post_ra>
